<compile_context>
chip_gen: v5e
topology: v5e:2x2
jax: 0.10.0
libtpu: 0.0.40
codegen_flags: <defaults>
</compile_context>

<pallas_src>
import functools

import jax
import jax.numpy as jnp
from jax import lax
from jax.experimental import pallas as pl
from jax.experimental.pallas import tpu as pltpu

_LANES = 128
_FP = 8            # scratch end-pad rows (sublane aligned; only >=1 is required)


def _round_up(x: int, m: int) -> int:
    return ((x + m - 1) // m) * m


def _bottleneck_kernel(x_ref, w1_ref, s1_ref, b1_ref, w2_ref, s2_ref, b2_ref,
                       o_ref, y1buf, *, H: int, W: int, TH: int, add: bool):
    """One (batch n, row-tile h) grid step.

    x_ref : (1, H, W, Cin)   f32   full image of this batch element (resident)
    w1_ref: (Cin, Cmp)       bf16  1x1 conv weight (Cmid zero-padded -> Cmp)
    s1/b1 : (1, Cmp)         f32   folded BN of cv1
    w2_ref: (9, Cmp, Cout)   bf16  3x3 conv weight, rows ordered (ky, kx)
    s2/b2 : (1, Cout)        f32   folded BN of cv2
    o_ref : (1, TH, W, Cout) f32   output row tile
    y1buf : VMEM (2*_FP + (TH+2)*W, Cmp) bf16  flat y1 strip with 1-row halos
    """
    h = pl.program_id(1)
    n_h = pl.num_programs(1)
    Cin = x_ref.shape[-1]
    Cmp = w1_ref.shape[-1]
    Cout = w2_ref.shape[-1]
    HWt = TH * W
    TOT = y1buf.shape[0]
    row0 = h * TH                       # first output row of this tile

    def cv1(x3d):                       # (R, W, Cin) f32 -> (R*W, Cmp) bf16
        r = x3d.shape[0]
        xm = x3d.reshape(r * W, Cin).astype(jnp.bfloat16)
        y = jnp.dot(xm, w1_ref[...], preferred_element_type=jnp.float32)
        y = y * s1_ref[...] + b1_ref[...]           # folded BN (f32)
        y = y * jax.nn.sigmoid(y)                   # SiLU      (f32)
        return y.astype(jnp.bfloat16)

    # ---- stage y1 (cv1 of this tile + its 1-row halos) into the scratch ----
    zpad = jnp.zeros((_FP, Cmp), jnp.bfloat16)
    y1buf[0:_FP, :] = zpad                          # end pads: never read un-zeroed
    y1buf[TOT - _FP:TOT, :] = zpad

    # body rows (one (TH*W, Cin) @ (Cin, Cmp) MXU matmul)
    y1buf[_FP + W:_FP + W + HWt, :] = cv1(x_ref[0, pl.ds(row0, TH), :, :])

    # halo rows: recompute cv1 on the neighbouring image rows (clamped loads);
    # at the image border the halo is the conv's zero padding in y1-space.
    top_keep = (h > 0).astype(jnp.bfloat16)
    top = cv1(x_ref[0, pl.ds(jnp.maximum(row0 - 1, 0), 1), :, :])
    y1buf[_FP:_FP + W, :] = top * top_keep

    bot_keep = (h < n_h - 1).astype(jnp.bfloat16)
    bot = cv1(x_ref[0, pl.ds(jnp.minimum(row0 + TH, H - 1), 1), :, :])
    y1buf[_FP + W + HWt:_FP + 2 * W + HWt, :] = bot * bot_keep

    # ---- cv2: nine accumulating matmuls over static windows of the scratch --
    # Only the raster wrap along W (dx = +-1) needs masking; masks are hoisted
    # and computed once (2 masks, 6 selects total).
    col = lax.broadcasted_iota(jnp.int32, (HWt, 1), 0) % W
    wm_neg = col >= 1                   # reading column c-1 stays in-row
    wm_pos = col < (W - 1)              # reading column c+1 stays in-row

    acc = jnp.zeros((HWt, Cout), jnp.float32)
    k = 0
    for dy in (-1, 0, 1):
        base = _FP + (1 + dy) * W
        for dx in (-1, 0, 1):
            tap = y1buf[base + dx:base + dx + HWt, :]        # (HWt, Cmp) bf16
            if dx != 0:
                tap = jnp.where(wm_neg if dx < 0 else wm_pos, tap, 0)
            acc = acc + jnp.dot(tap, w2_ref[k],
                                preferred_element_type=jnp.float32)
            k += 1

    y2 = acc * s2_ref[...] + b2_ref[...]            # folded BN (f32)
    y2 = y2 * jax.nn.sigmoid(y2)                    # SiLU      (f32)

    if add:
        # Residual rows are re-read here (cheap VMEM vld) so x is not kept
        # live across both matmuls.
        y2 = y2 + x_ref[0, pl.ds(row0, TH), :, :].reshape(HWt, Cin)

    o_ref[0] = y2.reshape(TH, W, Cout)


def _pick_tile_h(H: int, W: int, Cmp: int, Cout: int,
                 budget_bytes: int = 4 << 20) -> int:
    """Largest divisor of H whose per-tile accumulator/tap footprint is modest."""
    per_row = W * (2 * Cout * 4 + 4 * Cmp * 2) + 1
    cap = max(1, budget_bytes // per_row)
    th = 1
    for cand in range(1, H + 1):
        if H % cand == 0 and cand <= cap:
            th = cand
    return th


def bottleneck_pallas_nhwc(x_nhwc, params, *, shortcut: bool = True,
                           tile_h=None):
    """Bottleneck forward. x_nhwc: (N, H, W, Cin) f32 -> (N, H, W, Cout) f32."""
    w1, s1, b1, w2, s2, b2 = params
    N, H, W, Cin = x_nhwc.shape
    Cmid = w1.shape[1]
    Cout = w2.shape[3]
    add = bool(shortcut) and (Cin == Cout)

    # Only weight dims are padded; activations stay unpadded in HBM.
    # TODO(synk): for Cmid = 32/64 layers, leaving the contraction dim unpadded
    # trades masked VMEM staging stores for fewer wasted MXU K-cycles.
    Cmp = _round_up(Cmid, _LANES)

    x = x_nhwc.astype(jnp.float32)
    w1p = jnp.pad(w1, ((0, 0), (0, Cmp - Cmid))).astype(jnp.bfloat16)
    w2p = jnp.pad(w2, ((0, 0), (0, 0), (0, Cmp - Cmid), (0, 0)))
    w2p = w2p.reshape(9, Cmp, Cout).astype(jnp.bfloat16)   # rows = (ky, kx)
    s1p = jnp.pad(s1.astype(jnp.float32), ((0, 0), (0, Cmp - Cmid)))
    b1p = jnp.pad(b1.astype(jnp.float32), ((0, 0), (0, Cmp - Cmid)))
    s2p = s2.astype(jnp.float32).reshape(1, Cout)
    b2p = b2.astype(jnp.float32).reshape(1, Cout)

    TH = tile_h if tile_h is not None else _pick_tile_h(H, W, Cmp, Cout)
    assert H % TH == 0, "tile_h must divide H"
    nH = H // TH
    scratch_rows = 2 * _FP + (TH + 2) * W

    kernel = functools.partial(_bottleneck_kernel, H=H, W=W, TH=TH, add=add)

    # Per-block VMEM footprint (double-buffered image + output tile + scratch
    # + weights + allowance for in-kernel temporaries) -> per-chip VMEM limit.
    footprint = (2 * H * W * Cin * 4 + 2 * TH * W * Cout * 4 +
                 scratch_rows * Cmp * 2 +
                 (Cin * Cmp + 9 * Cmp * Cout) * 2 +
                 TH * W * (2 * Cout * 4 + 4 * Cmp * 2))
    try:
        phys = int(getattr(pltpu.get_tpu_info(), "vmem_capacity_bytes", 64 << 20))
    except Exception:
        phys = 64 << 20                    # conservative: v7x per-TC VMEM
    vmem_limit = int(min(max(32 << 20, (3 * footprint) // 2 + (8 << 20)),
                         (9 * phys) // 10))

    try:
        cost = pl.CostEstimate(
            flops=2 * N * H * W * (Cin * Cmid + 9 * Cmid * Cout),
            transcendentals=N * H * W * (Cmid + Cout),
            bytes_accessed=(N * H * W * (Cin + Cout) * 4 +
                            (Cin * Cmp + 9 * Cmp * Cout) * 2 +
                            (2 * Cmp + 2 * Cout) * 4),
        )
    except Exception:
        cost = None

    def run(single_buffer_weights: bool):
        def wspec(shape):
            kw = ({"pipeline_mode": pl.Buffered(1)}
                  if single_buffer_weights else {})
            return pl.BlockSpec(shape, lambda *_: (0,) * len(shape), **kw)

        return pl.pallas_call(
            kernel,
            out_shape=jax.ShapeDtypeStruct((N, H, W, Cout), jnp.float32),
            grid_spec=pltpu.PrefetchScalarGridSpec(
                num_scalar_prefetch=0,
                grid=(N, nH),
                in_specs=[
                    pl.BlockSpec((1, H, W, Cin), lambda n, h: (n, 0, 0, 0)),
                    wspec((Cin, Cmp)),
                    wspec((1, Cmp)),
                    wspec((1, Cmp)),
                    wspec((9, Cmp, Cout)),
                    wspec((1, Cout)),
                    wspec((1, Cout)),
                ],
                out_specs=pl.BlockSpec((1, TH, W, Cout),
                                       lambda n, h: (n, h, 0, 0)),
                scratch_shapes=[pltpu.VMEM((scratch_rows, Cmp), jnp.bfloat16)],
            ),
            compiler_params=pltpu.CompilerParams(
                dimension_semantics=("parallel", "parallel"),
                vmem_limit_bytes=vmem_limit,
            ),
            cost_estimate=cost,
        )(x, w1p, s1p, b1p, w2p, s2p, b2p)

    try:
        return run(True)
    except Exception:
        # pipeline_mode / pl.Buffered(1) unsupported on this jax version:
        # fall back to default double-buffered weight blocks.
        return run(False)


def bottleneck_pallas(x_nchw, params, *, shortcut: bool = True, tile_h=None):
    """NCHW adapter matching the PyTorch module layout.

    TODO(synk): the NCHW<->NHWC transposes are full extra HBM passes; when this
    block lives inside an NHWC pipeline call bottleneck_pallas_nhwc directly
    (and consider bf16 HBM activations to halve the dominant DMA).
    """
    x = jnp.transpose(x_nchw, (0, 2, 3, 1))
    out = bottleneck_pallas_nhwc(x, params, shortcut=shortcut, tile_h=tile_h)
    return jnp.transpose(out, (0, 3, 1, 2))


def make_params(key, in_channels, out_channels, e=0.5, eps=1e-3):
    """Deterministic synthetic weights; BN folded to per-channel scale/bias."""
    c_ = int(in_channels * e)
    k1, k2, k3, k4, k5, k6 = jax.random.split(key, 6)
    w1 = jax.random.normal(k1, (in_channels, c_), jnp.float32) * 0.1         # 1x1
    w2 = jax.random.normal(k2, (3, 3, c_, out_channels), jnp.float32) * 0.1  # HWIO
    g1 = 1.0 + 0.1 * jax.random.normal(k3, (c_,), jnp.float32)
    beta1 = 0.1 * jax.random.normal(k4, (c_,), jnp.float32)
    mean1 = jnp.zeros((c_,), jnp.float32)
    var1 = jnp.ones((c_,), jnp.float32)
    s1 = (g1 / jnp.sqrt(var1 + eps)).reshape(1, c_)
    b1 = (beta1 - mean1 * s1[0]).reshape(1, c_)

    g2 = 1.0 + 0.1 * jax.random.normal(k5, (out_channels,), jnp.float32)
    beta2 = 0.1 * jax.random.normal(k6, (out_channels,), jnp.float32)
    mean2 = jnp.zeros((out_channels,), jnp.float32)
    var2 = jnp.ones((out_channels,), jnp.float32)
    s2 = (g2 / jnp.sqrt(var2 + eps)).reshape(1, out_channels)
    b2 = (beta2 - mean2 * s2[0]).reshape(1, out_channels)
    return (w1, s1, b1, w2, s2, b2)


def bottleneck_ref(x_nchw, params, *, shortcut=True):
    """Pure-JAX reference (lax.conv, f32) of the same forward pass."""
    w1, s1, b1, w2, s2, b2 = params
    N, Cin, H, W = x_nchw.shape
    Cout = w2.shape[3]
    add = bool(shortcut) and (Cin == Cout)
    x = jnp.transpose(x_nchw, (0, 2, 3, 1)).astype(jnp.float32)
    dn = ('NHWC', 'HWIO', 'NHWC')
    y1 = lax.conv_general_dilated(x, w1.reshape(1, 1, *w1.shape), (1, 1),
                                  'VALID', dimension_numbers=dn)
    y1 = y1 * s1.reshape(1, 1, 1, -1) + b1.reshape(1, 1, 1, -1)
    y1 = y1 * jax.nn.sigmoid(y1)
    y2 = lax.conv_general_dilated(y1, w2, (1, 1), 'SAME', dimension_numbers=dn)
    y2 = y2 * s2.reshape(1, 1, 1, -1) + b2.reshape(1, 1, 1, -1)
    y2 = y2 * jax.nn.sigmoid(y2)
    out = x + y2 if add else y2
    return jnp.transpose(out, (0, 3, 1, 2))


if __name__ == "__main__":
    key = jax.random.PRNGKey(0)
    kx1, kp1, kx2, kp2 = jax.random.split(key, 4)

    # Case 1: shortcut add, H tiled into two halo'd row tiles (exercises halos).
    N, C, H, W = 2, 4, 16, 16
    x1 = jax.random.normal(kx1, (N, C, H, W), jnp.float32)
    p1 = make_params(kp1, in_channels=C, out_channels=C, e=0.5)
    out1 = jax.block_until_ready(
        bottleneck_pallas(x1, p1, shortcut=True, tile_h=8))
    ref1 = bottleneck_ref(x1, p1, shortcut=True)
    assert out1.shape == (N, C, H, W)
    assert jnp.allclose(out1, ref1, atol=2e-2, rtol=2e-2), "case 1 mismatch"

    # Case 2: Cin != Cout (residual disabled), auto-picked tile_h.
    x2 = jax.random.normal(kx2, (1, 4, 16, 16), jnp.float32)
    p2 = make_params(kp2, in_channels=4, out_channels=8, e=0.5)
    out2 = jax.block_until_ready(bottleneck_pallas(x2, p2, shortcut=True))
    ref2 = bottleneck_ref(x2, p2, shortcut=True)
    assert out2.shape == (1, 8, 16, 16)
    assert jnp.allclose(out2, ref2, atol=2e-2, rtol=2e-2), "case 2 mismatch"

    print("KERNEL_OK")
</pallas_src>

<mosaic_0001>
module attributes {stable_mosaic.version = 11 : i64} {
  func.func @_bottleneck_kernel(%arg0: i32, %arg1: i32, %arg2: memref<1x16x16x4xf32, #tpu.memory_space<vmem>>, %arg3: memref<4x128xbf16, #tpu.memory_space<vmem>>, %arg4: memref<1x128xf32, #tpu.memory_space<vmem>>, %arg5: memref<1x128xf32, #tpu.memory_space<vmem>>, %arg6: memref<9x128x4xbf16, #tpu.memory_space<vmem>>, %arg7: memref<1x4xf32, #tpu.memory_space<vmem>>, %arg8: memref<1x4xf32, #tpu.memory_space<vmem>>, %arg9: memref<1x8x16x4xf32, #tpu.memory_space<vmem>>, %arg10: memref<176x128xbf16, #tpu.memory_space<vmem>>) attributes {dimension_semantics = [#tpu.dimension_semantics<parallel>, #tpu.dimension_semantics<parallel>], iteration_bounds = array<i64: 2, 2>, scalar_prefetch = 0 : i64, scratch_operands = 1 : i64, tpu.core_type = #tpu.core_type<tc>, window_params = [{transform_indices = @transform_0, window_bounds = array<i64: 1, 16, 16, 4>}, {pipeline_mode = #tpu.pipeline_mode<synchronous>, transform_indices = @transform_1, window_bounds = array<i64: 4, 128>}, {pipeline_mode = #tpu.pipeline_mode<synchronous>, transform_indices = @transform_2, window_bounds = array<i64: 1, 128>}, {pipeline_mode = #tpu.pipeline_mode<synchronous>, transform_indices = @transform_3, window_bounds = array<i64: 1, 128>}, {pipeline_mode = #tpu.pipeline_mode<synchronous>, transform_indices = @transform_4, window_bounds = array<i64: 9, 128, 4>}, {pipeline_mode = #tpu.pipeline_mode<synchronous>, transform_indices = @transform_5, window_bounds = array<i64: 1, 4>}, {pipeline_mode = #tpu.pipeline_mode<synchronous>, transform_indices = @transform_6, window_bounds = array<i64: 1, 4>}, {transform_indices = @transform_7, window_bounds = array<i64: 1, 8, 16, 4>}]} {
    %c8_i32 = arith.constant 8 : i32
    %0 = arith.muli %arg1, %c8_i32 : i32
    %cst = arith.constant 0.000000e+00 : bf16
    %1 = vector.broadcast %cst : bf16 to vector<8x128xbf16>
    %c0 = arith.constant 0 : index
    %c0_0 = arith.constant 0 : index
    %2 = vector.load %arg10[%c0, %c0_0] : memref<176x128xbf16, #tpu.memory_space<vmem>>, vector<8x128xbf16>
    tpu.vector_store %arg10[%c0, %c0_0], %1 {strides = array<i32>} : memref<176x128xbf16, #tpu.memory_space<vmem>>, vector<8x128xbf16>,
    %c168 = arith.constant 168 : index
    %c0_1 = arith.constant 0 : index
    %3 = vector.load %arg10[%c168, %c0_1] : memref<176x128xbf16, #tpu.memory_space<vmem>>, vector<8x128xbf16>
    tpu.vector_store %arg10[%c168, %c0_1], %1 {strides = array<i32>} : memref<176x128xbf16, #tpu.memory_space<vmem>>, vector<8x128xbf16>,
    %c0_2 = arith.constant 0 : index
    %4 = arith.index_cast %0 : i32 to index
    %c0_3 = arith.constant 0 : index
    %c0_4 = arith.constant 0 : index
    %5 = vector.load %arg2[%c0_2, %4, %c0_3, %c0_4] : memref<1x16x16x4xf32, #tpu.memory_space<vmem>>, vector<1x8x16x4xf32>
    %6 = vector.shape_cast %5 : vector<1x8x16x4xf32> to vector<8x16x4xf32>
    %7 = vector.shape_cast %6 : vector<8x16x4xf32> to vector<128x4xf32>
    %8 = arith.truncf %7 : vector<128x4xf32> to vector<128x4xbf16>
    %c0_5 = arith.constant 0 : index
    %c0_6 = arith.constant 0 : index
    %9 = vector.load %arg3[%c0_5, %c0_6] : memref<4x128xbf16, #tpu.memory_space<vmem>>, vector<4x128xbf16>
    %cst_7 = arith.constant dense<0.000000e+00> : vector<128x128xf32>
    %10 = tpu.matmul %8, %9, %cst_7 {dimension_numbers = #tpu.dot_dimension_numbers<[1], [0], [0], [1], [0, 0, 1, 1], [], []>} : vector<128x4xbf16>, vector<4x128xbf16>, vector<128x128xf32> -> vector<128x128xf32>
    %c0_8 = arith.constant 0 : index
    %c0_9 = arith.constant 0 : index
    %11 = vector.load %arg4[%c0_8, %c0_9] : memref<1x128xf32, #tpu.memory_space<vmem>>, vector<1x128xf32>
    %12 = vector.broadcast %11 : vector<1x128xf32> to vector<128x128xf32>
    %13 = arith.mulf %10, %12 : vector<128x128xf32>
    %c0_10 = arith.constant 0 : index
    %c0_11 = arith.constant 0 : index
    %14 = vector.load %arg5[%c0_10, %c0_11] : memref<1x128xf32, #tpu.memory_space<vmem>>, vector<1x128xf32>
    %15 = vector.broadcast %14 : vector<1x128xf32> to vector<128x128xf32>
    %16 = arith.addf %13, %15 : vector<128x128xf32>
    %17 = arith.negf %16 : vector<128x128xf32>
    %18 = math.exp %17 : vector<128x128xf32>
    %cst_12 = arith.constant 1.000000e+00 : f32
    %19 = vector.broadcast %cst_12 : f32 to vector<128x128xf32>
    %20 = arith.addf %19, %18 : vector<128x128xf32>
    %21 = arith.divf %19, %20 : vector<128x128xf32>
    %22 = arith.mulf %16, %21 : vector<128x128xf32>
    %23 = arith.truncf %22 : vector<128x128xf32> to vector<128x128xbf16>
    %c24 = arith.constant 24 : index
    %c0_13 = arith.constant 0 : index
    %24 = vector.load %arg10[%c24, %c0_13] : memref<176x128xbf16, #tpu.memory_space<vmem>>, vector<128x128xbf16>
    tpu.vector_store %arg10[%c24, %c0_13], %23 {strides = array<i32>} : memref<176x128xbf16, #tpu.memory_space<vmem>>, vector<128x128xbf16>,
    %c0_i32 = arith.constant 0 : i32
    %25 = arith.cmpi sgt, %arg1, %c0_i32 : i32
    %26 = arith.extui %25 : i1 to i32
    %27 = arith.sitofp %26 : i32 to f32
    %28 = arith.truncf %27 : f32 to bf16
    %c1_i32 = arith.constant 1 : i32
    %29 = arith.subi %0, %c1_i32 : i32
    %c0_i32_14 = arith.constant 0 : i32
    %30 = arith.maxsi %29, %c0_i32_14 : i32
    %c0_15 = arith.constant 0 : index
    %31 = arith.index_cast %30 : i32 to index
    %c0_16 = arith.constant 0 : index
    %c0_17 = arith.constant 0 : index
    %32 = vector.load %arg2[%c0_15, %31, %c0_16, %c0_17] : memref<1x16x16x4xf32, #tpu.memory_space<vmem>>, vector<1x1x16x4xf32>
    %33 = vector.shape_cast %32 : vector<1x1x16x4xf32> to vector<1x16x4xf32>
    %34 = vector.shape_cast %33 : vector<1x16x4xf32> to vector<16x4xf32>
    %35 = arith.truncf %34 : vector<16x4xf32> to vector<16x4xbf16>
    %c0_18 = arith.constant 0 : index
    %c0_19 = arith.constant 0 : index
    %36 = vector.load %arg3[%c0_18, %c0_19] : memref<4x128xbf16, #tpu.memory_space<vmem>>, vector<4x128xbf16>
    %cst_20 = arith.constant dense<0.000000e+00> : vector<16x128xf32>
    %37 = tpu.matmul %35, %36, %cst_20 {dimension_numbers = #tpu.dot_dimension_numbers<[1], [0], [0], [1], [0, 0, 1, 1], [], []>} : vector<16x4xbf16>, vector<4x128xbf16>, vector<16x128xf32> -> vector<16x128xf32>
    %c0_21 = arith.constant 0 : index
    %c0_22 = arith.constant 0 : index
    %38 = vector.load %arg4[%c0_21, %c0_22] : memref<1x128xf32, #tpu.memory_space<vmem>>, vector<1x128xf32>
    %39 = vector.broadcast %38 : vector<1x128xf32> to vector<16x128xf32>
    %40 = arith.mulf %37, %39 : vector<16x128xf32>
    %c0_23 = arith.constant 0 : index
    %c0_24 = arith.constant 0 : index
    %41 = vector.load %arg5[%c0_23, %c0_24] : memref<1x128xf32, #tpu.memory_space<vmem>>, vector<1x128xf32>
    %42 = vector.broadcast %41 : vector<1x128xf32> to vector<16x128xf32>
    %43 = arith.addf %40, %42 : vector<16x128xf32>
    %44 = arith.negf %43 : vector<16x128xf32>
    %45 = math.exp %44 : vector<16x128xf32>
    %cst_25 = arith.constant 1.000000e+00 : f32
    %46 = vector.broadcast %cst_25 : f32 to vector<16x128xf32>
    %47 = arith.addf %46, %45 : vector<16x128xf32>
    %48 = arith.divf %46, %47 : vector<16x128xf32>
    %49 = arith.mulf %43, %48 : vector<16x128xf32>
    %50 = arith.truncf %49 : vector<16x128xf32> to vector<16x128xbf16>
    %51 = vector.broadcast %28 : bf16 to vector<16x128xbf16>
    %52 = arith.mulf %50, %51 : vector<16x128xbf16>
    %c8 = arith.constant 8 : index
    %c0_26 = arith.constant 0 : index
    %53 = vector.load %arg10[%c8, %c0_26] : memref<176x128xbf16, #tpu.memory_space<vmem>>, vector<16x128xbf16>
    tpu.vector_store %arg10[%c8, %c0_26], %52 {strides = array<i32>} : memref<176x128xbf16, #tpu.memory_space<vmem>>, vector<16x128xbf16>,
    %c1_i32_27 = arith.constant 1 : i32
    %54 = arith.cmpi slt, %arg1, %c1_i32_27 : i32
    %55 = arith.extui %54 : i1 to i32
    %56 = arith.sitofp %55 : i32 to f32
    %57 = arith.truncf %56 : f32 to bf16
    %c8_i32_28 = arith.constant 8 : i32
    %58 = arith.addi %0, %c8_i32_28 : i32
    %c15_i32 = arith.constant 15 : i32
    %59 = arith.minsi %58, %c15_i32 : i32
    %c0_29 = arith.constant 0 : index
    %60 = arith.index_cast %59 : i32 to index
    %c0_30 = arith.constant 0 : index
    %c0_31 = arith.constant 0 : index
    %61 = vector.load %arg2[%c0_29, %60, %c0_30, %c0_31] : memref<1x16x16x4xf32, #tpu.memory_space<vmem>>, vector<1x1x16x4xf32>
    %62 = vector.shape_cast %61 : vector<1x1x16x4xf32> to vector<1x16x4xf32>
    %63 = vector.shape_cast %62 : vector<1x16x4xf32> to vector<16x4xf32>
    %64 = arith.truncf %63 : vector<16x4xf32> to vector<16x4xbf16>
    %c0_32 = arith.constant 0 : index
    %c0_33 = arith.constant 0 : index
    %65 = vector.load %arg3[%c0_32, %c0_33] : memref<4x128xbf16, #tpu.memory_space<vmem>>, vector<4x128xbf16>
    %cst_34 = arith.constant dense<0.000000e+00> : vector<16x128xf32>
    %66 = tpu.matmul %64, %65, %cst_34 {dimension_numbers = #tpu.dot_dimension_numbers<[1], [0], [0], [1], [0, 0, 1, 1], [], []>} : vector<16x4xbf16>, vector<4x128xbf16>, vector<16x128xf32> -> vector<16x128xf32>
    %c0_35 = arith.constant 0 : index
    %c0_36 = arith.constant 0 : index
    %67 = vector.load %arg4[%c0_35, %c0_36] : memref<1x128xf32, #tpu.memory_space<vmem>>, vector<1x128xf32>
    %68 = vector.broadcast %67 : vector<1x128xf32> to vector<16x128xf32>
    %69 = arith.mulf %66, %68 : vector<16x128xf32>
    %c0_37 = arith.constant 0 : index
    %c0_38 = arith.constant 0 : index
    %70 = vector.load %arg5[%c0_37, %c0_38] : memref<1x128xf32, #tpu.memory_space<vmem>>, vector<1x128xf32>
    %71 = vector.broadcast %70 : vector<1x128xf32> to vector<16x128xf32>
    %72 = arith.addf %69, %71 : vector<16x128xf32>
    %73 = arith.negf %72 : vector<16x128xf32>
    %74 = math.exp %73 : vector<16x128xf32>
    %cst_39 = arith.constant 1.000000e+00 : f32
    %75 = vector.broadcast %cst_39 : f32 to vector<16x128xf32>
    %76 = arith.addf %75, %74 : vector<16x128xf32>
    %77 = arith.divf %75, %76 : vector<16x128xf32>
    %78 = arith.mulf %72, %77 : vector<16x128xf32>
    %79 = arith.truncf %78 : vector<16x128xf32> to vector<16x128xbf16>
    %80 = vector.broadcast %57 : bf16 to vector<16x128xbf16>
    %81 = arith.mulf %79, %80 : vector<16x128xbf16>
    %c152 = arith.constant 152 : index
    %c0_40 = arith.constant 0 : index
    %82 = vector.load %arg10[%c152, %c0_40] : memref<176x128xbf16, #tpu.memory_space<vmem>>, vector<16x128xbf16>
    tpu.vector_store %arg10[%c152, %c0_40], %81 {strides = array<i32>} : memref<176x128xbf16, #tpu.memory_space<vmem>>, vector<16x128xbf16>,
    %83 = tpu.iota {dimensions = array<i32: 0>} : vector<128x1xi32>
    %c16_i32 = arith.constant 16 : i32
    %c0_i32_41 = arith.constant 0 : i32
    %84 = arith.cmpi eq, %c16_i32, %c0_i32_41 : i32
    %c1_i32_42 = arith.constant 1 : i32
    %85 = arith.select %84, %c1_i32_42, %c16_i32 : i32
    %86 = vector.broadcast %85 : i32 to vector<128x1xi32>
    %87 = arith.remsi %83, %86 : vector<128x1xi32>
    %c0_i32_43 = arith.constant 0 : i32
    %88 = vector.broadcast %c0_i32_43 : i32 to vector<128x1xi32>
    %89 = arith.cmpi ne, %87, %88 : vector<128x1xi32>
    %c0_i32_44 = arith.constant 0 : i32
    %90 = vector.broadcast %c0_i32_44 : i32 to vector<128x1xi32>
    %91 = arith.cmpi slt, %87, %90 : vector<128x1xi32>
    %c0_i32_45 = arith.constant 0 : i32
    %92 = arith.cmpi slt, %85, %c0_i32_45 : i32
    %93 = vector.broadcast %92 : i1 to vector<128x1xi1>
    %94 = vector.broadcast %93 : vector<128x1xi1> to vector<128x1xi1>
    %95 = arith.xori %91, %94 : vector<128x1xi1>
    %96 = arith.andi %95, %89 : vector<128x1xi1>
    %97 = vector.broadcast %85 : i32 to vector<128x1xi32>
    %98 = arith.addi %87, %97 : vector<128x1xi32>
    %99 = arith.select %96, %98, %87 : vector<128x1xi1>, vector<128x1xi32>
    %c1_i32_46 = arith.constant 1 : i32
    %100 = vector.broadcast %c1_i32_46 : i32 to vector<128x1xi32>
    %101 = arith.cmpi sge, %99, %100 : vector<128x1xi32>
    %c15_i32_47 = arith.constant 15 : i32
    %102 = vector.broadcast %c15_i32_47 : i32 to vector<128x1xi32>
    %103 = arith.cmpi slt, %99, %102 : vector<128x1xi32>
    %cst_48 = arith.constant 0.000000e+00 : f32
    %104 = vector.broadcast %cst_48 : f32 to vector<128x4xf32>
    %c7 = arith.constant 7 : index
    %c0_49 = arith.constant 0 : index
    %105 = vector.load %arg10[%c7, %c0_49] : memref<176x128xbf16, #tpu.memory_space<vmem>>, vector<128x128xbf16>
    %c0_i32_50 = arith.constant 0 : i32
    %106 = arith.sitofp %c0_i32_50 : i32 to bf16
    %107 = vector.shape_cast %101 : vector<128x1xi1> to vector<128x1xi1>
    %108 = vector.broadcast %107 : vector<128x1xi1> to vector<128x128xi1>
    %109 = vector.broadcast %106 : bf16 to vector<128x128xbf16>
    %110 = arith.select %108, %105, %109 : vector<128x128xi1>, vector<128x128xbf16>
    %c0_51 = arith.constant 0 : index
    %c0_52 = arith.constant 0 : index
    %c0_53 = arith.constant 0 : index
    %111 = vector.load %arg6[%c0_51, %c0_52, %c0_53] : memref<9x128x4xbf16, #tpu.memory_space<vmem>>, vector<1x128x4xbf16>
    %112 = vector.shape_cast %111 : vector<1x128x4xbf16> to vector<128x4xbf16>
    %cst_54 = arith.constant dense<0.000000e+00> : vector<128x4xf32>
    %113 = tpu.matmul %110, %112, %cst_54 {dimension_numbers = #tpu.dot_dimension_numbers<[1], [0], [0], [1], [0, 0, 1, 1], [], []>} : vector<128x128xbf16>, vector<128x4xbf16>, vector<128x4xf32> -> vector<128x4xf32>
    %114 = arith.addf %104, %113 : vector<128x4xf32>
    %c8_55 = arith.constant 8 : index
    %c0_56 = arith.constant 0 : index
    %115 = vector.load %arg10[%c8_55, %c0_56] : memref<176x128xbf16, #tpu.memory_space<vmem>>, vector<128x128xbf16>
    %c1 = arith.constant 1 : index
    %c0_57 = arith.constant 0 : index
    %c0_58 = arith.constant 0 : index
    %116 = vector.load %arg6[%c1, %c0_57, %c0_58] : memref<9x128x4xbf16, #tpu.memory_space<vmem>>, vector<1x128x4xbf16>
    %117 = vector.shape_cast %116 : vector<1x128x4xbf16> to vector<128x4xbf16>
    %cst_59 = arith.constant dense<0.000000e+00> : vector<128x4xf32>
    %118 = tpu.matmul %115, %117, %cst_59 {dimension_numbers = #tpu.dot_dimension_numbers<[1], [0], [0], [1], [0, 0, 1, 1], [], []>} : vector<128x128xbf16>, vector<128x4xbf16>, vector<128x4xf32> -> vector<128x4xf32>
    %119 = arith.addf %114, %118 : vector<128x4xf32>
    %c9 = arith.constant 9 : index
    %c0_60 = arith.constant 0 : index
    %120 = vector.load %arg10[%c9, %c0_60] : memref<176x128xbf16, #tpu.memory_space<vmem>>, vector<128x128xbf16>
    %c0_i32_61 = arith.constant 0 : i32
    %121 = arith.sitofp %c0_i32_61 : i32 to bf16
    %122 = vector.shape_cast %103 : vector<128x1xi1> to vector<128x1xi1>
    %123 = vector.broadcast %122 : vector<128x1xi1> to vector<128x128xi1>
    %124 = vector.broadcast %121 : bf16 to vector<128x128xbf16>
    %125 = arith.select %123, %120, %124 : vector<128x128xi1>, vector<128x128xbf16>
    %c2 = arith.constant 2 : index
    %c0_62 = arith.constant 0 : index
    %c0_63 = arith.constant 0 : index
    %126 = vector.load %arg6[%c2, %c0_62, %c0_63] : memref<9x128x4xbf16, #tpu.memory_space<vmem>>, vector<1x128x4xbf16>
    %127 = vector.shape_cast %126 : vector<1x128x4xbf16> to vector<128x4xbf16>
    %cst_64 = arith.constant dense<0.000000e+00> : vector<128x4xf32>
    %128 = tpu.matmul %125, %127, %cst_64 {dimension_numbers = #tpu.dot_dimension_numbers<[1], [0], [0], [1], [0, 0, 1, 1], [], []>} : vector<128x128xbf16>, vector<128x4xbf16>, vector<128x4xf32> -> vector<128x4xf32>
    %129 = arith.addf %119, %128 : vector<128x4xf32>
    %c23 = arith.constant 23 : index
    %c0_65 = arith.constant 0 : index
    %130 = vector.load %arg10[%c23, %c0_65] : memref<176x128xbf16, #tpu.memory_space<vmem>>, vector<128x128xbf16>
    %c0_i32_66 = arith.constant 0 : i32
    %131 = arith.sitofp %c0_i32_66 : i32 to bf16
    %132 = vector.shape_cast %101 : vector<128x1xi1> to vector<128x1xi1>
    %133 = vector.broadcast %132 : vector<128x1xi1> to vector<128x128xi1>
    %134 = vector.broadcast %131 : bf16 to vector<128x128xbf16>
    %135 = arith.select %133, %130, %134 : vector<128x128xi1>, vector<128x128xbf16>
    %c3 = arith.constant 3 : index
    %c0_67 = arith.constant 0 : index
    %c0_68 = arith.constant 0 : index
    %136 = vector.load %arg6[%c3, %c0_67, %c0_68] : memref<9x128x4xbf16, #tpu.memory_space<vmem>>, vector<1x128x4xbf16>
    %137 = vector.shape_cast %136 : vector<1x128x4xbf16> to vector<128x4xbf16>
    %cst_69 = arith.constant dense<0.000000e+00> : vector<128x4xf32>
    %138 = tpu.matmul %135, %137, %cst_69 {dimension_numbers = #tpu.dot_dimension_numbers<[1], [0], [0], [1], [0, 0, 1, 1], [], []>} : vector<128x128xbf16>, vector<128x4xbf16>, vector<128x4xf32> -> vector<128x4xf32>
    %139 = arith.addf %129, %138 : vector<128x4xf32>
    %c24_70 = arith.constant 24 : index
    %c0_71 = arith.constant 0 : index
    %140 = vector.load %arg10[%c24_70, %c0_71] : memref<176x128xbf16, #tpu.memory_space<vmem>>, vector<128x128xbf16>
    %c4 = arith.constant 4 : index
    %c0_72 = arith.constant 0 : index
    %c0_73 = arith.constant 0 : index
    %141 = vector.load %arg6[%c4, %c0_72, %c0_73] : memref<9x128x4xbf16, #tpu.memory_space<vmem>>, vector<1x128x4xbf16>
    %142 = vector.shape_cast %141 : vector<1x128x4xbf16> to vector<128x4xbf16>
    %cst_74 = arith.constant dense<0.000000e+00> : vector<128x4xf32>
    %143 = tpu.matmul %140, %142, %cst_74 {dimension_numbers = #tpu.dot_dimension_numbers<[1], [0], [0], [1], [0, 0, 1, 1], [], []>} : vector<128x128xbf16>, vector<128x4xbf16>, vector<128x4xf32> -> vector<128x4xf32>
    %144 = arith.addf %139, %143 : vector<128x4xf32>
    %c25 = arith.constant 25 : index
    %c0_75 = arith.constant 0 : index
    %145 = vector.load %arg10[%c25, %c0_75] : memref<176x128xbf16, #tpu.memory_space<vmem>>, vector<128x128xbf16>
    %c0_i32_76 = arith.constant 0 : i32
    %146 = arith.sitofp %c0_i32_76 : i32 to bf16
    %147 = vector.shape_cast %103 : vector<128x1xi1> to vector<128x1xi1>
    %148 = vector.broadcast %147 : vector<128x1xi1> to vector<128x128xi1>
    %149 = vector.broadcast %146 : bf16 to vector<128x128xbf16>
    %150 = arith.select %148, %145, %149 : vector<128x128xi1>, vector<128x128xbf16>
    %c5 = arith.constant 5 : index
    %c0_77 = arith.constant 0 : index
    %c0_78 = arith.constant 0 : index
    %151 = vector.load %arg6[%c5, %c0_77, %c0_78] : memref<9x128x4xbf16, #tpu.memory_space<vmem>>, vector<1x128x4xbf16>
    %152 = vector.shape_cast %151 : vector<1x128x4xbf16> to vector<128x4xbf16>
    %cst_79 = arith.constant dense<0.000000e+00> : vector<128x4xf32>
    %153 = tpu.matmul %150, %152, %cst_79 {dimension_numbers = #tpu.dot_dimension_numbers<[1], [0], [0], [1], [0, 0, 1, 1], [], []>} : vector<128x128xbf16>, vector<128x4xbf16>, vector<128x4xf32> -> vector<128x4xf32>
    %154 = arith.addf %144, %153 : vector<128x4xf32>
    %c39 = arith.constant 39 : index
    %c0_80 = arith.constant 0 : index
    %155 = vector.load %arg10[%c39, %c0_80] : memref<176x128xbf16, #tpu.memory_space<vmem>>, vector<128x128xbf16>
    %c0_i32_81 = arith.constant 0 : i32
    %156 = arith.sitofp %c0_i32_81 : i32 to bf16
    %157 = vector.shape_cast %101 : vector<128x1xi1> to vector<128x1xi1>
    %158 = vector.broadcast %157 : vector<128x1xi1> to vector<128x128xi1>
    %159 = vector.broadcast %156 : bf16 to vector<128x128xbf16>
    %160 = arith.select %158, %155, %159 : vector<128x128xi1>, vector<128x128xbf16>
    %c6 = arith.constant 6 : index
    %c0_82 = arith.constant 0 : index
    %c0_83 = arith.constant 0 : index
    %161 = vector.load %arg6[%c6, %c0_82, %c0_83] : memref<9x128x4xbf16, #tpu.memory_space<vmem>>, vector<1x128x4xbf16>
    %162 = vector.shape_cast %161 : vector<1x128x4xbf16> to vector<128x4xbf16>
    %cst_84 = arith.constant dense<0.000000e+00> : vector<128x4xf32>
    %163 = tpu.matmul %160, %162, %cst_84 {dimension_numbers = #tpu.dot_dimension_numbers<[1], [0], [0], [1], [0, 0, 1, 1], [], []>} : vector<128x128xbf16>, vector<128x4xbf16>, vector<128x4xf32> -> vector<128x4xf32>
    %164 = arith.addf %154, %163 : vector<128x4xf32>
    %c40 = arith.constant 40 : index
    %c0_85 = arith.constant 0 : index
    %165 = vector.load %arg10[%c40, %c0_85] : memref<176x128xbf16, #tpu.memory_space<vmem>>, vector<128x128xbf16>
    %c7_86 = arith.constant 7 : index
    %c0_87 = arith.constant 0 : index
    %c0_88 = arith.constant 0 : index
    %166 = vector.load %arg6[%c7_86, %c0_87, %c0_88] : memref<9x128x4xbf16, #tpu.memory_space<vmem>>, vector<1x128x4xbf16>
    %167 = vector.shape_cast %166 : vector<1x128x4xbf16> to vector<128x4xbf16>
    %cst_89 = arith.constant dense<0.000000e+00> : vector<128x4xf32>
    %168 = tpu.matmul %165, %167, %cst_89 {dimension_numbers = #tpu.dot_dimension_numbers<[1], [0], [0], [1], [0, 0, 1, 1], [], []>} : vector<128x128xbf16>, vector<128x4xbf16>, vector<128x4xf32> -> vector<128x4xf32>
    %169 = arith.addf %164, %168 : vector<128x4xf32>
    %c41 = arith.constant 41 : index
    %c0_90 = arith.constant 0 : index
    %170 = vector.load %arg10[%c41, %c0_90] : memref<176x128xbf16, #tpu.memory_space<vmem>>, vector<128x128xbf16>
    %c0_i32_91 = arith.constant 0 : i32
    %171 = arith.sitofp %c0_i32_91 : i32 to bf16
    %172 = vector.shape_cast %103 : vector<128x1xi1> to vector<128x1xi1>
    %173 = vector.broadcast %172 : vector<128x1xi1> to vector<128x128xi1>
    %174 = vector.broadcast %171 : bf16 to vector<128x128xbf16>
    %175 = arith.select %173, %170, %174 : vector<128x128xi1>, vector<128x128xbf16>
    %c8_92 = arith.constant 8 : index
    %c0_93 = arith.constant 0 : index
    %c0_94 = arith.constant 0 : index
    %176 = vector.load %arg6[%c8_92, %c0_93, %c0_94] : memref<9x128x4xbf16, #tpu.memory_space<vmem>>, vector<1x128x4xbf16>
    %177 = vector.shape_cast %176 : vector<1x128x4xbf16> to vector<128x4xbf16>
    %cst_95 = arith.constant dense<0.000000e+00> : vector<128x4xf32>
    %178 = tpu.matmul %175, %177, %cst_95 {dimension_numbers = #tpu.dot_dimension_numbers<[1], [0], [0], [1], [0, 0, 1, 1], [], []>} : vector<128x128xbf16>, vector<128x4xbf16>, vector<128x4xf32> -> vector<128x4xf32>
    %179 = arith.addf %169, %178 : vector<128x4xf32>
    %c0_96 = arith.constant 0 : index
    %c0_97 = arith.constant 0 : index
    %180 = vector.load %arg7[%c0_96, %c0_97] : memref<1x4xf32, #tpu.memory_space<vmem>>, vector<1x4xf32>
    %181 = vector.broadcast %180 : vector<1x4xf32> to vector<128x4xf32>
    %182 = arith.mulf %179, %181 : vector<128x4xf32>
    %c0_98 = arith.constant 0 : index
    %c0_99 = arith.constant 0 : index
    %183 = vector.load %arg8[%c0_98, %c0_99] : memref<1x4xf32, #tpu.memory_space<vmem>>, vector<1x4xf32>
    %184 = vector.broadcast %183 : vector<1x4xf32> to vector<128x4xf32>
    %185 = arith.addf %182, %184 : vector<128x4xf32>
    %186 = arith.negf %185 : vector<128x4xf32>
    %187 = math.exp %186 : vector<128x4xf32>
    %cst_100 = arith.constant 1.000000e+00 : f32
    %188 = vector.broadcast %cst_100 : f32 to vector<128x4xf32>
    %189 = arith.addf %188, %187 : vector<128x4xf32>
    %190 = arith.divf %188, %189 : vector<128x4xf32>
    %191 = arith.mulf %185, %190 : vector<128x4xf32>
    %c0_101 = arith.constant 0 : index
    %192 = arith.index_cast %0 : i32 to index
    %c0_102 = arith.constant 0 : index
    %c0_103 = arith.constant 0 : index
    %193 = vector.load %arg2[%c0_101, %192, %c0_102, %c0_103] : memref<1x16x16x4xf32, #tpu.memory_space<vmem>>, vector<1x8x16x4xf32>
    %194 = vector.shape_cast %193 : vector<1x8x16x4xf32> to vector<8x16x4xf32>
    %195 = vector.shape_cast %194 : vector<8x16x4xf32> to vector<128x4xf32>
    %196 = arith.addf %191, %195 : vector<128x4xf32>
    %197 = vector.shape_cast %196 : vector<128x4xf32> to vector<8x16x4xf32>
    %c0_104 = arith.constant 0 : index
    %c0_105 = arith.constant 0 : index
    %c0_106 = arith.constant 0 : index
    %c0_107 = arith.constant 0 : index
    %198 = vector.load %arg9[%c0_104, %c0_105, %c0_106, %c0_107] : memref<1x8x16x4xf32, #tpu.memory_space<vmem>>, vector<1x8x16x4xf32>
    %199 = vector.shape_cast %198 : vector<1x8x16x4xf32> to vector<8x16x4xf32>
    %200 = vector.shape_cast %197 : vector<8x16x4xf32> to vector<1x8x16x4xf32>
    tpu.vector_store %arg9[%c0_104, %c0_105, %c0_106, %c0_107], %200 {strides = array<i32>} : memref<1x8x16x4xf32, #tpu.memory_space<vmem>>, vector<1x8x16x4xf32>,
    return
  }
  func.func @transform_0(%arg0: i32, %arg1: i32) -> (i32, i32, i32, i32) {
    %c0_i32 = arith.constant 0 : i32
    %c0_i32_0 = arith.constant 0 : i32
    %c0_i32_1 = arith.constant 0 : i32
    %c0_i32_2 = arith.constant 0 : i32
    return %arg0, %c0_i32, %c0_i32_0, %c0_i32_1 : i32, i32, i32, i32
  }
  func.func @transform_1(%arg0: i32, %arg1: i32) -> (i32, i32) {
    %c0_i32 = arith.constant 0 : i32
    %c0_i32_0 = arith.constant 0 : i32
    %c0_i32_1 = arith.constant 0 : i32
    return %c0_i32, %c0_i32_0 : i32, i32
  }
  func.func @transform_2(%arg0: i32, %arg1: i32) -> (i32, i32) {
    %c0_i32 = arith.constant 0 : i32
    %c0_i32_0 = arith.constant 0 : i32
    %c0_i32_1 = arith.constant 0 : i32
    return %c0_i32, %c0_i32_0 : i32, i32
  }
  func.func @transform_3(%arg0: i32, %arg1: i32) -> (i32, i32) {
    %c0_i32 = arith.constant 0 : i32
    %c0_i32_0 = arith.constant 0 : i32
    %c0_i32_1 = arith.constant 0 : i32
    return %c0_i32, %c0_i32_0 : i32, i32
  }
  func.func @transform_4(%arg0: i32, %arg1: i32) -> (i32, i32, i32) {
    %c0_i32 = arith.constant 0 : i32
    %c0_i32_0 = arith.constant 0 : i32
    %c0_i32_1 = arith.constant 0 : i32
    %c0_i32_2 = arith.constant 0 : i32
    return %c0_i32, %c0_i32_0, %c0_i32_1 : i32, i32, i32
  }
  func.func @transform_5(%arg0: i32, %arg1: i32) -> (i32, i32) {
    %c0_i32 = arith.constant 0 : i32
    %c0_i32_0 = arith.constant 0 : i32
    %c0_i32_1 = arith.constant 0 : i32
    return %c0_i32, %c0_i32_0 : i32, i32
  }
  func.func @transform_6(%arg0: i32, %arg1: i32) -> (i32, i32) {
    %c0_i32 = arith.constant 0 : i32
    %c0_i32_0 = arith.constant 0 : i32
    %c0_i32_1 = arith.constant 0 : i32
    return %c0_i32, %c0_i32_0 : i32, i32
  }
  func.func @transform_7(%arg0: i32, %arg1: i32) -> (i32, i32, i32, i32) {
    %c0_i32 = arith.constant 0 : i32
    %c0_i32_0 = arith.constant 0 : i32
    %c0_i32_1 = arith.constant 0 : i32
    return %arg0, %arg1, %c0_i32, %c0_i32_0 : i32, i32, i32, i32
  }
}

module attributes {stable_mosaic.version = 11 : i64} {
  func.func @_bottleneck_kernel(%arg0: i32, %arg1: i32, %arg2: memref<1x16x16x4xf32, #tpu.memory_space<vmem>>, %arg3: memref<4x128xbf16, #tpu.memory_space<vmem>>, %arg4: memref<1x128xf32, #tpu.memory_space<vmem>>, %arg5: memref<1x128xf32, #tpu.memory_space<vmem>>, %arg6: memref<9x128x4xbf16, #tpu.memory_space<vmem>>, %arg7: memref<1x4xf32, #tpu.memory_space<vmem>>, %arg8: memref<1x4xf32, #tpu.memory_space<vmem>>, %arg9: memref<1x8x16x4xf32, #tpu.memory_space<vmem>>, %arg10: memref<176x128xbf16, #tpu.memory_space<vmem>>) attributes {dimension_semantics = [#tpu.dimension_semantics<parallel>, #tpu.dimension_semantics<parallel>], iteration_bounds = array<i64: 2, 2>, scalar_prefetch = 0 : i64, scratch_operands = 1 : i64, tpu.core_type = #tpu.core_type<tc>, window_params = [{transform_indices = @transform_0, window_bounds = array<i64: 1, 16, 16, 4>}, {pipeline_mode = #tpu.pipeline_mode<synchronous>, transform_indices = @transform_1, window_bounds = array<i64: 4, 128>}, {pipeline_mode = #tpu.pipeline_mode<synchronous>, transform_indices = @transform_2, window_bounds = array<i64: 1, 128>}, {pipeline_mode = #tpu.pipeline_mode<synchronous>, transform_indices = @transform_3, window_bounds = array<i64: 1, 128>}, {pipeline_mode = #tpu.pipeline_mode<synchronous>, transform_indices = @transform_4, window_bounds = array<i64: 9, 128, 4>}, {pipeline_mode = #tpu.pipeline_mode<synchronous>, transform_indices = @transform_5, window_bounds = array<i64: 1, 4>}, {pipeline_mode = #tpu.pipeline_mode<synchronous>, transform_indices = @transform_6, window_bounds = array<i64: 1, 4>}, {transform_indices = @transform_7, window_bounds = array<i64: 1, 8, 16, 4>}]} {
    %c8_i32 = arith.constant 8 : i32
    %0 = arith.muli %arg1, %c8_i32 : i32
    %cst = arith.constant 0.000000e+00 : bf16
    %1 = vector.broadcast %cst : bf16 to vector<8x128xbf16>
    %c0 = arith.constant 0 : index
    %c0_0 = arith.constant 0 : index
    %2 = vector.load %arg10[%c0, %c0_0] : memref<176x128xbf16, #tpu.memory_space<vmem>>, vector<8x128xbf16>
    tpu.vector_store %arg10[%c0, %c0_0], %1 {strides = array<i32>} : memref<176x128xbf16, #tpu.memory_space<vmem>>, vector<8x128xbf16>,
    %c168 = arith.constant 168 : index
    %c0_1 = arith.constant 0 : index
    %3 = vector.load %arg10[%c168, %c0_1] : memref<176x128xbf16, #tpu.memory_space<vmem>>, vector<8x128xbf16>
    tpu.vector_store %arg10[%c168, %c0_1], %1 {strides = array<i32>} : memref<176x128xbf16, #tpu.memory_space<vmem>>, vector<8x128xbf16>,
    %c0_2 = arith.constant 0 : index
    %4 = arith.index_cast %0 : i32 to index
    %c0_3 = arith.constant 0 : index
    %c0_4 = arith.constant 0 : index
    %5 = vector.load %arg2[%c0_2, %4, %c0_3, %c0_4] : memref<1x16x16x4xf32, #tpu.memory_space<vmem>>, vector<1x8x16x4xf32>
    %6 = vector.shape_cast %5 : vector<1x8x16x4xf32> to vector<8x16x4xf32>
    %7 = vector.shape_cast %6 : vector<8x16x4xf32> to vector<128x4xf32>
    %8 = arith.truncf %7 : vector<128x4xf32> to vector<128x4xbf16>
    %c0_5 = arith.constant 0 : index
    %c0_6 = arith.constant 0 : index
    %9 = vector.load %arg3[%c0_5, %c0_6] : memref<4x128xbf16, #tpu.memory_space<vmem>>, vector<4x128xbf16>
    %cst_7 = arith.constant dense<0.000000e+00> : vector<128x128xf32>
    %10 = tpu.matmul %8, %9, %cst_7 {dimension_numbers = #tpu.dot_dimension_numbers<[1], [0], [0], [1], [0, 0, 1, 1], [], []>} : vector<128x4xbf16>, vector<4x128xbf16>, vector<128x128xf32> -> vector<128x128xf32>
    %c0_8 = arith.constant 0 : index
    %c0_9 = arith.constant 0 : index
    %11 = vector.load %arg4[%c0_8, %c0_9] : memref<1x128xf32, #tpu.memory_space<vmem>>, vector<1x128xf32>
    %12 = vector.broadcast %11 : vector<1x128xf32> to vector<128x128xf32>
    %13 = arith.mulf %10, %12 : vector<128x128xf32>
    %c0_10 = arith.constant 0 : index
    %c0_11 = arith.constant 0 : index
    %14 = vector.load %arg5[%c0_10, %c0_11] : memref<1x128xf32, #tpu.memory_space<vmem>>, vector<1x128xf32>
    %15 = vector.broadcast %14 : vector<1x128xf32> to vector<128x128xf32>
    %16 = arith.addf %13, %15 : vector<128x128xf32>
    %17 = arith.negf %16 : vector<128x128xf32>
    %18 = math.exp %17 : vector<128x128xf32>
    %cst_12 = arith.constant 1.000000e+00 : f32
    %19 = vector.broadcast %cst_12 : f32 to vector<128x128xf32>
    %20 = arith.addf %19, %18 : vector<128x128xf32>
    %21 = arith.divf %19, %20 : vector<128x128xf32>
    %22 = arith.mulf %16, %21 : vector<128x128xf32>
    %23 = arith.truncf %22 : vector<128x128xf32> to vector<128x128xbf16>
    %c24 = arith.constant 24 : index
    %c0_13 = arith.constant 0 : index
    %24 = vector.load %arg10[%c24, %c0_13] : memref<176x128xbf16, #tpu.memory_space<vmem>>, vector<128x128xbf16>
    tpu.vector_store %arg10[%c24, %c0_13], %23 {strides = array<i32>} : memref<176x128xbf16, #tpu.memory_space<vmem>>, vector<128x128xbf16>,
    %c0_i32 = arith.constant 0 : i32
    %25 = arith.cmpi sgt, %arg1, %c0_i32 : i32
    %26 = arith.extui %25 : i1 to i32
    %27 = arith.sitofp %26 : i32 to f32
    %28 = arith.truncf %27 : f32 to bf16
    %c1_i32 = arith.constant 1 : i32
    %29 = arith.subi %0, %c1_i32 : i32
    %c0_i32_14 = arith.constant 0 : i32
    %30 = arith.maxsi %29, %c0_i32_14 : i32
    %c0_15 = arith.constant 0 : index
    %31 = arith.index_cast %30 : i32 to index
    %c0_16 = arith.constant 0 : index
    %c0_17 = arith.constant 0 : index
    %32 = vector.load %arg2[%c0_15, %31, %c0_16, %c0_17] : memref<1x16x16x4xf32, #tpu.memory_space<vmem>>, vector<1x1x16x4xf32>
    %33 = vector.shape_cast %32 : vector<1x1x16x4xf32> to vector<1x16x4xf32>
    %34 = vector.shape_cast %33 : vector<1x16x4xf32> to vector<16x4xf32>
    %35 = arith.truncf %34 : vector<16x4xf32> to vector<16x4xbf16>
    %c0_18 = arith.constant 0 : index
    %c0_19 = arith.constant 0 : index
    %36 = vector.load %arg3[%c0_18, %c0_19] : memref<4x128xbf16, #tpu.memory_space<vmem>>, vector<4x128xbf16>
    %cst_20 = arith.constant dense<0.000000e+00> : vector<16x128xf32>
    %37 = tpu.matmul %35, %36, %cst_20 {dimension_numbers = #tpu.dot_dimension_numbers<[1], [0], [0], [1], [0, 0, 1, 1], [], []>} : vector<16x4xbf16>, vector<4x128xbf16>, vector<16x128xf32> -> vector<16x128xf32>
    %c0_21 = arith.constant 0 : index
    %c0_22 = arith.constant 0 : index
    %38 = vector.load %arg4[%c0_21, %c0_22] : memref<1x128xf32, #tpu.memory_space<vmem>>, vector<1x128xf32>
    %39 = vector.broadcast %38 : vector<1x128xf32> to vector<16x128xf32>
    %40 = arith.mulf %37, %39 : vector<16x128xf32>
    %c0_23 = arith.constant 0 : index
    %c0_24 = arith.constant 0 : index
    %41 = vector.load %arg5[%c0_23, %c0_24] : memref<1x128xf32, #tpu.memory_space<vmem>>, vector<1x128xf32>
    %42 = vector.broadcast %41 : vector<1x128xf32> to vector<16x128xf32>
    %43 = arith.addf %40, %42 : vector<16x128xf32>
    %44 = arith.negf %43 : vector<16x128xf32>
    %45 = math.exp %44 : vector<16x128xf32>
    %cst_25 = arith.constant 1.000000e+00 : f32
    %46 = vector.broadcast %cst_25 : f32 to vector<16x128xf32>
    %47 = arith.addf %46, %45 : vector<16x128xf32>
    %48 = arith.divf %46, %47 : vector<16x128xf32>
    %49 = arith.mulf %43, %48 : vector<16x128xf32>
    %50 = arith.truncf %49 : vector<16x128xf32> to vector<16x128xbf16>
    %51 = vector.broadcast %28 : bf16 to vector<16x128xbf16>
    %52 = arith.mulf %50, %51 : vector<16x128xbf16>
    %c8 = arith.constant 8 : index
    %c0_26 = arith.constant 0 : index
    %53 = vector.load %arg10[%c8, %c0_26] : memref<176x128xbf16, #tpu.memory_space<vmem>>, vector<16x128xbf16>
    tpu.vector_store %arg10[%c8, %c0_26], %52 {strides = array<i32>} : memref<176x128xbf16, #tpu.memory_space<vmem>>, vector<16x128xbf16>,
    %c1_i32_27 = arith.constant 1 : i32
    %54 = arith.cmpi slt, %arg1, %c1_i32_27 : i32
    %55 = arith.extui %54 : i1 to i32
    %56 = arith.sitofp %55 : i32 to f32
    %57 = arith.truncf %56 : f32 to bf16
    %c8_i32_28 = arith.constant 8 : i32
    %58 = arith.addi %0, %c8_i32_28 : i32
    %c15_i32 = arith.constant 15 : i32
    %59 = arith.minsi %58, %c15_i32 : i32
    %c0_29 = arith.constant 0 : index
    %60 = arith.index_cast %59 : i32 to index
    %c0_30 = arith.constant 0 : index
    %c0_31 = arith.constant 0 : index
    %61 = vector.load %arg2[%c0_29, %60, %c0_30, %c0_31] : memref<1x16x16x4xf32, #tpu.memory_space<vmem>>, vector<1x1x16x4xf32>
    %62 = vector.shape_cast %61 : vector<1x1x16x4xf32> to vector<1x16x4xf32>
    %63 = vector.shape_cast %62 : vector<1x16x4xf32> to vector<16x4xf32>
    %64 = arith.truncf %63 : vector<16x4xf32> to vector<16x4xbf16>
    %c0_32 = arith.constant 0 : index
    %c0_33 = arith.constant 0 : index
    %65 = vector.load %arg3[%c0_32, %c0_33] : memref<4x128xbf16, #tpu.memory_space<vmem>>, vector<4x128xbf16>
    %cst_34 = arith.constant dense<0.000000e+00> : vector<16x128xf32>
    %66 = tpu.matmul %64, %65, %cst_34 {dimension_numbers = #tpu.dot_dimension_numbers<[1], [0], [0], [1], [0, 0, 1, 1], [], []>} : vector<16x4xbf16>, vector<4x128xbf16>, vector<16x128xf32> -> vector<16x128xf32>
    %c0_35 = arith.constant 0 : index
    %c0_36 = arith.constant 0 : index
    %67 = vector.load %arg4[%c0_35, %c0_36] : memref<1x128xf32, #tpu.memory_space<vmem>>, vector<1x128xf32>
    %68 = vector.broadcast %67 : vector<1x128xf32> to vector<16x128xf32>
    %69 = arith.mulf %66, %68 : vector<16x128xf32>
    %c0_37 = arith.constant 0 : index
    %c0_38 = arith.constant 0 : index
    %70 = vector.load %arg5[%c0_37, %c0_38] : memref<1x128xf32, #tpu.memory_space<vmem>>, vector<1x128xf32>
    %71 = vector.broadcast %70 : vector<1x128xf32> to vector<16x128xf32>
    %72 = arith.addf %69, %71 : vector<16x128xf32>
    %73 = arith.negf %72 : vector<16x128xf32>
    %74 = math.exp %73 : vector<16x128xf32>
    %cst_39 = arith.constant 1.000000e+00 : f32
    %75 = vector.broadcast %cst_39 : f32 to vector<16x128xf32>
    %76 = arith.addf %75, %74 : vector<16x128xf32>
    %77 = arith.divf %75, %76 : vector<16x128xf32>
    %78 = arith.mulf %72, %77 : vector<16x128xf32>
    %79 = arith.truncf %78 : vector<16x128xf32> to vector<16x128xbf16>
    %80 = vector.broadcast %57 : bf16 to vector<16x128xbf16>
    %81 = arith.mulf %79, %80 : vector<16x128xbf16>
    %c152 = arith.constant 152 : index
    %c0_40 = arith.constant 0 : index
    %82 = vector.load %arg10[%c152, %c0_40] : memref<176x128xbf16, #tpu.memory_space<vmem>>, vector<16x128xbf16>
    tpu.vector_store %arg10[%c152, %c0_40], %81 {strides = array<i32>} : memref<176x128xbf16, #tpu.memory_space<vmem>>, vector<16x128xbf16>,
    %83 = tpu.iota {dimensions = array<i32: 0>} : vector<128x1xi32>
    %c16_i32 = arith.constant 16 : i32
    %c0_i32_41 = arith.constant 0 : i32
    %84 = arith.cmpi eq, %c16_i32, %c0_i32_41 : i32
    %c1_i32_42 = arith.constant 1 : i32
    %85 = arith.select %84, %c1_i32_42, %c16_i32 : i32
    %86 = vector.broadcast %85 : i32 to vector<128x1xi32>
    %87 = arith.remsi %83, %86 : vector<128x1xi32>
    %c0_i32_43 = arith.constant 0 : i32
    %88 = vector.broadcast %c0_i32_43 : i32 to vector<128x1xi32>
    %89 = arith.cmpi ne, %87, %88 : vector<128x1xi32>
    %c0_i32_44 = arith.constant 0 : i32
    %90 = vector.broadcast %c0_i32_44 : i32 to vector<128x1xi32>
    %91 = arith.cmpi slt, %87, %90 : vector<128x1xi32>
    %c0_i32_45 = arith.constant 0 : i32
    %92 = arith.cmpi slt, %85, %c0_i32_45 : i32
    %93 = vector.broadcast %92 : i1 to vector<128x1xi1>
    %94 = vector.broadcast %93 : vector<128x1xi1> to vector<128x1xi1>
    %95 = arith.xori %91, %94 : vector<128x1xi1>
    %96 = arith.andi %95, %89 : vector<128x1xi1>
    %97 = vector.broadcast %85 : i32 to vector<128x1xi32>
    %98 = arith.addi %87, %97 : vector<128x1xi32>
    %99 = arith.select %96, %98, %87 : vector<128x1xi1>, vector<128x1xi32>
    %c1_i32_46 = arith.constant 1 : i32
    %100 = vector.broadcast %c1_i32_46 : i32 to vector<128x1xi32>
    %101 = arith.cmpi sge, %99, %100 : vector<128x1xi32>
    %c15_i32_47 = arith.constant 15 : i32
    %102 = vector.broadcast %c15_i32_47 : i32 to vector<128x1xi32>
    %103 = arith.cmpi slt, %99, %102 : vector<128x1xi32>
    %cst_48 = arith.constant 0.000000e+00 : f32
    %104 = vector.broadcast %cst_48 : f32 to vector<128x4xf32>
    %c7 = arith.constant 7 : index
    %c0_49 = arith.constant 0 : index
    %105 = vector.load %arg10[%c7, %c0_49] : memref<176x128xbf16, #tpu.memory_space<vmem>>, vector<128x128xbf16>
    %c0_i32_50 = arith.constant 0 : i32
    %106 = arith.sitofp %c0_i32_50 : i32 to bf16
    %107 = vector.shape_cast %101 : vector<128x1xi1> to vector<128x1xi1>
    %108 = vector.broadcast %107 : vector<128x1xi1> to vector<128x128xi1>
    %109 = vector.broadcast %106 : bf16 to vector<128x128xbf16>
    %110 = arith.select %108, %105, %109 : vector<128x128xi1>, vector<128x128xbf16>
    %c0_51 = arith.constant 0 : index
    %c0_52 = arith.constant 0 : index
    %c0_53 = arith.constant 0 : index
    %111 = vector.load %arg6[%c0_51, %c0_52, %c0_53] : memref<9x128x4xbf16, #tpu.memory_space<vmem>>, vector<1x128x4xbf16>
    %112 = vector.shape_cast %111 : vector<1x128x4xbf16> to vector<128x4xbf16>
    %cst_54 = arith.constant dense<0.000000e+00> : vector<128x4xf32>
    %113 = tpu.matmul %110, %112, %cst_54 {dimension_numbers = #tpu.dot_dimension_numbers<[1], [0], [0], [1], [0, 0, 1, 1], [], []>} : vector<128x128xbf16>, vector<128x4xbf16>, vector<128x4xf32> -> vector<128x4xf32>
    %114 = arith.addf %104, %113 : vector<128x4xf32>
    %c8_55 = arith.constant 8 : index
    %c0_56 = arith.constant 0 : index
    %115 = vector.load %arg10[%c8_55, %c0_56] : memref<176x128xbf16, #tpu.memory_space<vmem>>, vector<128x128xbf16>
    %c1 = arith.constant 1 : index
    %c0_57 = arith.constant 0 : index
    %c0_58 = arith.constant 0 : index
    %116 = vector.load %arg6[%c1, %c0_57, %c0_58] : memref<9x128x4xbf16, #tpu.memory_space<vmem>>, vector<1x128x4xbf16>
    %117 = vector.shape_cast %116 : vector<1x128x4xbf16> to vector<128x4xbf16>
    %cst_59 = arith.constant dense<0.000000e+00> : vector<128x4xf32>
    %118 = tpu.matmul %115, %117, %cst_59 {dimension_numbers = #tpu.dot_dimension_numbers<[1], [0], [0], [1], [0, 0, 1, 1], [], []>} : vector<128x128xbf16>, vector<128x4xbf16>, vector<128x4xf32> -> vector<128x4xf32>
    %119 = arith.addf %114, %118 : vector<128x4xf32>
    %c9 = arith.constant 9 : index
    %c0_60 = arith.constant 0 : index
    %120 = vector.load %arg10[%c9, %c0_60] : memref<176x128xbf16, #tpu.memory_space<vmem>>, vector<128x128xbf16>
    %c0_i32_61 = arith.constant 0 : i32
    %121 = arith.sitofp %c0_i32_61 : i32 to bf16
    %122 = vector.shape_cast %103 : vector<128x1xi1> to vector<128x1xi1>
    %123 = vector.broadcast %122 : vector<128x1xi1> to vector<128x128xi1>
    %124 = vector.broadcast %121 : bf16 to vector<128x128xbf16>
    %125 = arith.select %123, %120, %124 : vector<128x128xi1>, vector<128x128xbf16>
    %c2 = arith.constant 2 : index
    %c0_62 = arith.constant 0 : index
    %c0_63 = arith.constant 0 : index
    %126 = vector.load %arg6[%c2, %c0_62, %c0_63] : memref<9x128x4xbf16, #tpu.memory_space<vmem>>, vector<1x128x4xbf16>
    %127 = vector.shape_cast %126 : vector<1x128x4xbf16> to vector<128x4xbf16>
    %cst_64 = arith.constant dense<0.000000e+00> : vector<128x4xf32>
    %128 = tpu.matmul %125, %127, %cst_64 {dimension_numbers = #tpu.dot_dimension_numbers<[1], [0], [0], [1], [0, 0, 1, 1], [], []>} : vector<128x128xbf16>, vector<128x4xbf16>, vector<128x4xf32> -> vector<128x4xf32>
    %129 = arith.addf %119, %128 : vector<128x4xf32>
    %c23 = arith.constant 23 : index
    %c0_65 = arith.constant 0 : index
    %130 = vector.load %arg10[%c23, %c0_65] : memref<176x128xbf16, #tpu.memory_space<vmem>>, vector<128x128xbf16>
    %c0_i32_66 = arith.constant 0 : i32
    %131 = arith.sitofp %c0_i32_66 : i32 to bf16
    %132 = vector.shape_cast %101 : vector<128x1xi1> to vector<128x1xi1>
    %133 = vector.broadcast %132 : vector<128x1xi1> to vector<128x128xi1>
    %134 = vector.broadcast %131 : bf16 to vector<128x128xbf16>
    %135 = arith.select %133, %130, %134 : vector<128x128xi1>, vector<128x128xbf16>
    %c3 = arith.constant 3 : index
    %c0_67 = arith.constant 0 : index
    %c0_68 = arith.constant 0 : index
    %136 = vector.load %arg6[%c3, %c0_67, %c0_68] : memref<9x128x4xbf16, #tpu.memory_space<vmem>>, vector<1x128x4xbf16>
    %137 = vector.shape_cast %136 : vector<1x128x4xbf16> to vector<128x4xbf16>
    %cst_69 = arith.constant dense<0.000000e+00> : vector<128x4xf32>
    %138 = tpu.matmul %135, %137, %cst_69 {dimension_numbers = #tpu.dot_dimension_numbers<[1], [0], [0], [1], [0, 0, 1, 1], [], []>} : vector<128x128xbf16>, vector<128x4xbf16>, vector<128x4xf32> -> vector<128x4xf32>
    %139 = arith.addf %129, %138 : vector<128x4xf32>
    %c24_70 = arith.constant 24 : index
    %c0_71 = arith.constant 0 : index
    %140 = vector.load %arg10[%c24_70, %c0_71] : memref<176x128xbf16, #tpu.memory_space<vmem>>, vector<128x128xbf16>
    %c4 = arith.constant 4 : index
    %c0_72 = arith.constant 0 : index
    %c0_73 = arith.constant 0 : index
    %141 = vector.load %arg6[%c4, %c0_72, %c0_73] : memref<9x128x4xbf16, #tpu.memory_space<vmem>>, vector<1x128x4xbf16>
    %142 = vector.shape_cast %141 : vector<1x128x4xbf16> to vector<128x4xbf16>
    %cst_74 = arith.constant dense<0.000000e+00> : vector<128x4xf32>
    %143 = tpu.matmul %140, %142, %cst_74 {dimension_numbers = #tpu.dot_dimension_numbers<[1], [0], [0], [1], [0, 0, 1, 1], [], []>} : vector<128x128xbf16>, vector<128x4xbf16>, vector<128x4xf32> -> vector<128x4xf32>
    %144 = arith.addf %139, %143 : vector<128x4xf32>
    %c25 = arith.constant 25 : index
    %c0_75 = arith.constant 0 : index
    %145 = vector.load %arg10[%c25, %c0_75] : memref<176x128xbf16, #tpu.memory_space<vmem>>, vector<128x128xbf16>
    %c0_i32_76 = arith.constant 0 : i32
    %146 = arith.sitofp %c0_i32_76 : i32 to bf16
    %147 = vector.shape_cast %103 : vector<128x1xi1> to vector<128x1xi1>
    %148 = vector.broadcast %147 : vector<128x1xi1> to vector<128x128xi1>
    %149 = vector.broadcast %146 : bf16 to vector<128x128xbf16>
    %150 = arith.select %148, %145, %149 : vector<128x128xi1>, vector<128x128xbf16>
    %c5 = arith.constant 5 : index
    %c0_77 = arith.constant 0 : index
    %c0_78 = arith.constant 0 : index
    %151 = vector.load %arg6[%c5, %c0_77, %c0_78] : memref<9x128x4xbf16, #tpu.memory_space<vmem>>, vector<1x128x4xbf16>
    %152 = vector.shape_cast %151 : vector<1x128x4xbf16> to vector<128x4xbf16>
    %cst_79 = arith.constant dense<0.000000e+00> : vector<128x4xf32>
    %153 = tpu.matmul %150, %152, %cst_79 {dimension_numbers = #tpu.dot_dimension_numbers<[1], [0], [0], [1], [0, 0, 1, 1], [], []>} : vector<128x128xbf16>, vector<128x4xbf16>, vector<128x4xf32> -> vector<128x4xf32>
    %154 = arith.addf %144, %153 : vector<128x4xf32>
    %c39 = arith.constant 39 : index
    %c0_80 = arith.constant 0 : index
    %155 = vector.load %arg10[%c39, %c0_80] : memref<176x128xbf16, #tpu.memory_space<vmem>>, vector<128x128xbf16>
    %c0_i32_81 = arith.constant 0 : i32
    %156 = arith.sitofp %c0_i32_81 : i32 to bf16
    %157 = vector.shape_cast %101 : vector<128x1xi1> to vector<128x1xi1>
    %158 = vector.broadcast %157 : vector<128x1xi1> to vector<128x128xi1>
    %159 = vector.broadcast %156 : bf16 to vector<128x128xbf16>
    %160 = arith.select %158, %155, %159 : vector<128x128xi1>, vector<128x128xbf16>
    %c6 = arith.constant 6 : index
    %c0_82 = arith.constant 0 : index
    %c0_83 = arith.constant 0 : index
    %161 = vector.load %arg6[%c6, %c0_82, %c0_83] : memref<9x128x4xbf16, #tpu.memory_space<vmem>>, vector<1x128x4xbf16>
    %162 = vector.shape_cast %161 : vector<1x128x4xbf16> to vector<128x4xbf16>
    %cst_84 = arith.constant dense<0.000000e+00> : vector<128x4xf32>
    %163 = tpu.matmul %160, %162, %cst_84 {dimension_numbers = #tpu.dot_dimension_numbers<[1], [0], [0], [1], [0, 0, 1, 1], [], []>} : vector<128x128xbf16>, vector<128x4xbf16>, vector<128x4xf32> -> vector<128x4xf32>
    %164 = arith.addf %154, %163 : vector<128x4xf32>
    %c40 = arith.constant 40 : index
    %c0_85 = arith.constant 0 : index
    %165 = vector.load %arg10[%c40, %c0_85] : memref<176x128xbf16, #tpu.memory_space<vmem>>, vector<128x128xbf16>
    %c7_86 = arith.constant 7 : index
    %c0_87 = arith.constant 0 : index
    %c0_88 = arith.constant 0 : index
    %166 = vector.load %arg6[%c7_86, %c0_87, %c0_88] : memref<9x128x4xbf16, #tpu.memory_space<vmem>>, vector<1x128x4xbf16>
    %167 = vector.shape_cast %166 : vector<1x128x4xbf16> to vector<128x4xbf16>
    %cst_89 = arith.constant dense<0.000000e+00> : vector<128x4xf32>
    %168 = tpu.matmul %165, %167, %cst_89 {dimension_numbers = #tpu.dot_dimension_numbers<[1], [0], [0], [1], [0, 0, 1, 1], [], []>} : vector<128x128xbf16>, vector<128x4xbf16>, vector<128x4xf32> -> vector<128x4xf32>
    %169 = arith.addf %164, %168 : vector<128x4xf32>
    %c41 = arith.constant 41 : index
    %c0_90 = arith.constant 0 : index
    %170 = vector.load %arg10[%c41, %c0_90] : memref<176x128xbf16, #tpu.memory_space<vmem>>, vector<128x128xbf16>
    %c0_i32_91 = arith.constant 0 : i32
    %171 = arith.sitofp %c0_i32_91 : i32 to bf16
    %172 = vector.shape_cast %103 : vector<128x1xi1> to vector<128x1xi1>
    %173 = vector.broadcast %172 : vector<128x1xi1> to vector<128x128xi1>
    %174 = vector.broadcast %171 : bf16 to vector<128x128xbf16>
    %175 = arith.select %173, %170, %174 : vector<128x128xi1>, vector<128x128xbf16>
    %c8_92 = arith.constant 8 : index
    %c0_93 = arith.constant 0 : index
    %c0_94 = arith.constant 0 : index
    %176 = vector.load %arg6[%c8_92, %c0_93, %c0_94] : memref<9x128x4xbf16, #tpu.memory_space<vmem>>, vector<1x128x4xbf16>
    %177 = vector.shape_cast %176 : vector<1x128x4xbf16> to vector<128x4xbf16>
    %cst_95 = arith.constant dense<0.000000e+00> : vector<128x4xf32>
    %178 = tpu.matmul %175, %177, %cst_95 {dimension_numbers = #tpu.dot_dimension_numbers<[1], [0], [0], [1], [0, 0, 1, 1], [], []>} : vector<128x128xbf16>, vector<128x4xbf16>, vector<128x4xf32> -> vector<128x4xf32>
    %179 = arith.addf %169, %178 : vector<128x4xf32>
    %c0_96 = arith.constant 0 : index
    %c0_97 = arith.constant 0 : index
    %180 = vector.load %arg7[%c0_96, %c0_97] : memref<1x4xf32, #tpu.memory_space<vmem>>, vector<1x4xf32>
    %181 = vector.broadcast %180 : vector<1x4xf32> to vector<128x4xf32>
    %182 = arith.mulf %179, %181 : vector<128x4xf32>
    %c0_98 = arith.constant 0 : index
    %c0_99 = arith.constant 0 : index
    %183 = vector.load %arg8[%c0_98, %c0_99] : memref<1x4xf32, #tpu.memory_space<vmem>>, vector<1x4xf32>
    %184 = vector.broadcast %183 : vector<1x4xf32> to vector<128x4xf32>
    %185 = arith.addf %182, %184 : vector<128x4xf32>
    %186 = arith.negf %185 : vector<128x4xf32>
    %187 = math.exp %186 : vector<128x4xf32>
    %cst_100 = arith.constant 1.000000e+00 : f32
    %188 = vector.broadcast %cst_100 : f32 to vector<128x4xf32>
    %189 = arith.addf %188, %187 : vector<128x4xf32>
    %190 = arith.divf %188, %189 : vector<128x4xf32>
    %191 = arith.mulf %185, %190 : vector<128x4xf32>
    %c0_101 = arith.constant 0 : index
    %192 = arith.index_cast %0 : i32 to index
    %c0_102 = arith.constant 0 : index
    %c0_103 = arith.constant 0 : index
    %193 = vector.load %arg2[%c0_101, %192, %c0_102, %c0_103] : memref<1x16x16x4xf32, #tpu.memory_space<vmem>>, vector<1x8x16x4xf32>
    %194 = vector.shape_cast %193 : vector<1x8x16x4xf32> to vector<8x16x4xf32>
    %195 = vector.shape_cast %194 : vector<8x16x4xf32> to vector<128x4xf32>
    %196 = arith.addf %191, %195 : vector<128x4xf32>
    %197 = vector.shape_cast %196 : vector<128x4xf32> to vector<8x16x4xf32>
    %c0_104 = arith.constant 0 : index
    %c0_105 = arith.constant 0 : index
    %c0_106 = arith.constant 0 : index
    %c0_107 = arith.constant 0 : index
    %198 = vector.load %arg9[%c0_104, %c0_105, %c0_106, %c0_107] : memref<1x8x16x4xf32, #tpu.memory_space<vmem>>, vector<1x8x16x4xf32>
    %199 = vector.shape_cast %198 : vector<1x8x16x4xf32> to vector<8x16x4xf32>
    %200 = vector.shape_cast %197 : vector<8x16x4xf32> to vector<1x8x16x4xf32>
    tpu.vector_store %arg9[%c0_104, %c0_105, %c0_106, %c0_107], %200 {strides = array<i32>} : memref<1x8x16x4xf32, #tpu.memory_space<vmem>>, vector<1x8x16x4xf32>,
    return
  }
  func.func @transform_0(%arg0: i32, %arg1: i32) -> (i32, i32, i32, i32) {
    %c0_i32 = arith.constant 0 : i32
    %c0_i32_0 = arith.constant 0 : i32
    %c0_i32_1 = arith.constant 0 : i32
    %c0_i32_2 = arith.constant 0 : i32
    return %arg0, %c0_i32, %c0_i32_0, %c0_i32_1 : i32, i32, i32, i32
  }
  func.func @transform_1(%arg0: i32, %arg1: i32) -> (i32, i32) {
    %c0_i32 = arith.constant 0 : i32
    %c0_i32_0 = arith.constant 0 : i32
    %c0_i32_1 = arith.constant 0 : i32
    return %c0_i32, %c0_i32_0 : i32, i32
  }
  func.func @transform_2(%arg0: i32, %arg1: i32) -> (i32, i32) {
    %c0_i32 = arith.constant 0 : i32
    %c0_i32_0 = arith.constant 0 : i32
    %c0_i32_1 = arith.constant 0 : i32
    return %c0_i32, %c0_i32_0 : i32, i32
  }
  func.func @transform_3(%arg0: i32, %arg1: i32) -> (i32, i32) {
    %c0_i32 = arith.constant 0 : i32
    %c0_i32_0 = arith.constant 0 : i32
    %c0_i32_1 = arith.constant 0 : i32
    return %c0_i32, %c0_i32_0 : i32, i32
  }
  func.func @transform_4(%arg0: i32, %arg1: i32) -> (i32, i32, i32) {
    %c0_i32 = arith.constant 0 : i32
    %c0_i32_0 = arith.constant 0 : i32
    %c0_i32_1 = arith.constant 0 : i32
    %c0_i32_2 = arith.constant 0 : i32
    return %c0_i32, %c0_i32_0, %c0_i32_1 : i32, i32, i32
  }
  func.func @transform_5(%arg0: i32, %arg1: i32) -> (i32, i32) {
    %c0_i32 = arith.constant 0 : i32
    %c0_i32_0 = arith.constant 0 : i32
    %c0_i32_1 = arith.constant 0 : i32
    return %c0_i32, %c0_i32_0 : i32, i32
  }
  func.func @transform_6(%arg0: i32, %arg1: i32) -> (i32, i32) {
    %c0_i32 = arith.constant 0 : i32
    %c0_i32_0 = arith.constant 0 : i32
    %c0_i32_1 = arith.constant 0 : i32
    return %c0_i32, %c0_i32_0 : i32, i32
  }
  func.func @transform_7(%arg0: i32, %arg1: i32) -> (i32, i32, i32, i32) {
    %c0_i32 = arith.constant 0 : i32
    %c0_i32_0 = arith.constant 0 : i32
    %c0_i32_1 = arith.constant 0 : i32
    return %arg0, %arg1, %c0_i32, %c0_i32_0 : i32, i32, i32, i32
  }
}

</mosaic_0001>

<bundles_post_ra>
// kernel: tpu_custom_call.1
= control target key start
LH: loop header
LB: loop body
LE: loop exit
PB: predicated region body
PF: predicated region fallthrough
CT: control target
= control target key end

     0   :  { %s5684_s24 = smov 0   ;;  %s5686_s25 = smov 0   ;;  %s7934_s0 = inlined_call_operand.vmem [shape: f32[2,16,16,4], index: 0, kind: input, shape index: {}]   ;;  %s7935_s1 = inlined_call_operand.vmem [shape: bf16[4,128], index: 1, kind: input, shape index: {}]   ;;  %s7936_s2 = inlined_call_operand.vmem [shape: f32[1,128], index: 2, kind: input, shape index: {}]   ;;  %s7937_s3 = inlined_call_operand.vmem [shape: f32[1,128], index: 3, kind: input, shape index: {}]   ;;  %s7938_s4 = inlined_call_operand.vmem [shape: bf16[9,128,4], index: 4, kind: input, shape index: {}]   ;;  %s7939_s5 = inlined_call_operand.vmem [shape: f32[1,4], index: 5, kind: input, shape index: {}]   ;;  %s7940_s6 = inlined_call_operand.vmem [shape: f32[1,4], index: 6, kind: input, shape index: {}]   ;;  %s7941_s7 = inlined_call_operand.vmem [shape: f32[2,16,16,4], index: 7, kind: output, shape index: {}]  }
   0x1   :  { %s5688_s26 = smov 0   ;;  %s5690_s27 = smov 0  }
   0x2   :  { %s5692_s28 = smov 0  }
   0x3 LB: > { %s26_s29 = sadd.s32 1, %s5632_s26  ;;  %s29_s30 = sadd.s32 1, %s5636_s27  ;;  %s5640_s28 = sphi %s5692_s28, %s17_s28   ;;  %s5636_s27 = sphi %s5690_s27, %s8239_s27   ;;  %s5632_s26 = sphi %s5688_s26, %s8238_s26   ;;  %s5628_s25 = sphi %s5686_s25, %s8237_s25   ;;  %s5624_s24 = sphi %s5684_s24, %s8236_s24  }
   0x4   : > { %p27_p0 = scmp.ge.s32.totalorder %s26_s29, 2  ;;  %p4685_p1 = scmp.ge.s32.totalorder %s5640_s28, 1 }
   0x5   : > { %p251_p2 = scmp.lt.s32.totalorder %s5640_s28, 5 }
   0x6   : > { %s8241_s29 = smov (%p27_p0, %s26_s29), 0  ;;  %s8243_s30 = smov (!%p27_p0, %s29_s30), %s5636_s27 }
   0x7   : > { %p252_p3 = pnand %p4685_p1, %p251_p2  ;;  %p31_p4 = scmp.ge.s32.totalorder %s8243_s30, 2 }
   0x9   : > { %s8245_s30 = smov (%p31_p4, %s8243_s30), 0  ;;  %255 = sbr.rel (%p252_p3) target bundleno = 826 (0x33a), region = 48 }
   0xe   : > { %v336_v0 = vld [vmem:[%s7935_s1] sm:$0x3]  ;;  %vm362_vm0 = vcmask 1041408   ;;  %p288_p5 = scmp.lt.s32.totalorder %s5628_s25, 1  ;;  %s5258_s12 = sshll.u32 %s5624_s24, 7  ;;  %vm7942_vm1 = vcmask 31744  }
   0xf   : > { %v828_v1 = vld [vmem:[%s7935_s1] sm:$0x3]  ;;  %v364_v2 = vsel %vm362_vm0, %v336_v0, 0  ;;  %s5726_s13 = sshll.u32 %s5624_s24, 3  ;;  %p807_p9 = scmp.gt.s32.totalorder %s5624_s24, 0  ;;  %v5282_v42 = vld [vmem:[%s7938_s4 + $0x78] sm:$0xff] }
  0x10   : > { %v833_v3 = vsel %vm362_vm0, %v828_v1, 0  ;;  %373 = vmatpush.bf16.msra.mxu0 %v364_v2  ;;  %s8247_s25 = smov (!%p288_p5, %s5628_s25), 1  ;;  %p296_p6 = scmp.lt.s32.totalorder %s5726_s13, 15  ;;  %5397 = vmatpush.bf16.msra.mxu2 %v364_v2  ;;  %v937_v10 = vld [vmem:[%s7935_s1] sm:$0x3]  ;;  %v5281_v51 = vld [vmem:[%s7938_s4 + $0x70] sm:$0xff] }
  0x11   : > { %842 = vmatpush.bf16.msra.mxu1 %v833_v3  ;;  %s4718_s14 = sadd.s32 4294967295, %s5726_s13  ;;  %s5257_s15 = sshll.u32 %s8247_s25, 8  ;;  %v942_v11 = vsel %vm362_vm0, %v937_v10, 0  ;;  %v5780_v36 = vld [vmem:[%s7936_s2] ss:$0 sm:$0xff]  ;;  %5398 = vmatpush.bf16.msra.mxu3 %v5282_v42  ;;  %v5280_v58 = vld [vmem:[%s7938_s4 + $0x68] sm:$0xff] }
  0x12   : > { %s5733_s18 = scalar_lea.vmem %s7934_s0, %s5257_s15  ;;  %p821_p7 = scmp.gt.s32.totalorder %s4718_s14, 0  ;;  %v5786_v37 = vld [vmem:[%s7937_s3] ss:$0 sm:$0xff]  ;;  %v7979_v0 = vmov 0  }
  0x13   : > { %s5736_s19 = scalar_lea.vmem %s5733_s18, %s5258_s12  ;;  %s4690_s20 = sshll.u32 %s8247_s25, 5  ;;  %v5450_v40 = vld [vmem:[%s7936_s2] ss:$0 sm:$0xff]  ;;  %308 = vst [vmem:[#allocation2] sm:$0xf] %v7979_v0 }
  0x14   : > { %v312_v4 = vld [vmem:[%s5736_s19] sm:$0xff]  ;;  %v313_v5 = vld [vmem:[%s5736_s19 + $0x8] sm:$0xff]  ;;  %s297_s21 = scalar_select %p296_p6, %s5726_s13, 15  ;;  %951 = vmatpush.bf16.msrb.mxu2 %v942_v11  ;;  %v314_v15 = vld [vmem:[%s5736_s19 + $0x10] sm:$0xff]  ;;  %309 = vst [vmem:[#allocation2 + $0x54] sm:$0xf] %v7979_v0 }
  0x15   : > { %v328_v6 = vpack.c.bf16 %v313_v5, %v312_v4  ;;  %s8249_s14 = smov (!%p821_p7, %s4718_s14), 0  ;;  %v324_v7 = vld [vmem:[%s5736_s19 + $0x60] sm:$0xff]  ;;  %v325_v8 = vld [vmem:[%s5736_s19 + $0x68] sm:$0xff]  ;;  %v315_v16 = vld [vmem:[%s5736_s19 + $0x18] sm:$0xff]  ;;  %s929_s11 = sadd.s32 8, %s5726_s13  ;;  %1774 = vmatpush.bf16.msrb.mxu1 %v5282_v42  ;;  %5399 = vmatpush.bf16.msra.mxu3 %v5281_v51  ;;  %v1025_v4 = vlaneseq }
  0x16   : > { %s4689_s22 = sshll.u32 %s297_s21, 1  ;;  %v334_v9 = vpack.c.bf16 %v325_v8, %v324_v7  ;;  %s4719_s25 = sshll.u32 %s8249_s14, 4  ;;  %v326_v17 = vld [vmem:[%s5736_s19 + $0x70] sm:$0xff]  ;;  %v327_v18 = vld [vmem:[%s5736_s19 + $0x78] sm:$0xff]  ;;  %v329_v19 = vpack.c.bf16 %v315_v16, %v314_v15  ;;  %v316_v21 = vld [vmem:[%s5736_s19 + $0x20] sm:$0xff] }
  0x17   : > { %4694 = vmatmul.msk.bf16.vlgmr.msra.gmra.mxu0 %vm7942_vm1, %v328_v6  ;;  %s5744_s23 = sadd.s32 %s4690_s20, %s4689_s22  ;;  %s824_s10 = scalar_lea.vmem %s5733_s18, %s4719_s25  ;;  %v335_v20 = vpack.c.bf16 %v327_v18, %v326_v17  ;;  %v317_v22 = vld [vmem:[%s5736_s19 + $0x28] sm:$0xff]  ;;  %v318_v27 = vld [vmem:[%s5736_s19 + $0x30] sm:$0xff]  ;;  %v319_v28 = vld [vmem:[%s5736_s19 + $0x38] sm:$0xff]  ;;  %v5854_v15 = vshrl.u32 %v1025_v4, 7 }
  0x18   : > { %4700 = vmatmul.msk.bf16.vlgmr.msra.gmra.mxu2 %vm7942_vm1, %v334_v9  ;;  %v825_v12 = vld [vmem:[%s824_s10] sm:$0xff]  ;;  %v826_v13 = vld [vmem:[%s824_s10 + $0x8] sm:$0xff]  ;;  %p930_p8 = scmp.lt.s32.totalorder %s929_s11, 15  ;;  %v330_v25 = vpack.c.bf16 %v317_v22, %v316_v21  ;;  %v331_v29 = vpack.c.bf16 %v319_v28, %v318_v27  ;;  %v322_v33 = vld [vmem:[%s5736_s19 + $0x50] sm:$0xff]  ;;  %p916_p11 = scmp.lt.s32.totalorder %s5624_s24, 1 }
  0x19   : > { %v827_v14 = vpack.c.bf16 %v826_v13, %v825_v12  ;;  %v320_v30 = vld [vmem:[%s5736_s19 + $0x40] sm:$0xff]  ;;  %v321_v31 = vld [vmem:[%s5736_s19 + $0x48] sm:$0xff]  ;;  %v323_v34 = vld [vmem:[%s5736_s19 + $0x58] sm:$0xff]  ;;  %s808_s13 = scalar_select %p807_p9, 1, 0  ;;  %1775 = vmatpush.bf16.msrb.mxu1 %v5281_v51  ;;  %5400 = vmatpush.bf16.msra.mxu3 %v5280_v58  ;;  %v5864_v22 = vadd.s32 8, %v5854_v15 }
  0x1a   : > { %s8251_s11 = smov (!%p930_p8, %s929_s11), 15  ;;  %v332_v32 = vpack.c.bf16 %v321_v31, %v320_v30  ;;  %v333_v35 = vpack.c.bf16 %v323_v34, %v322_v33  ;;  %v5451_v43 = vld [vmem:[%s7937_s3] ss:$0 sm:$0xff]  ;;  %v5290_v9 = vld [vmem:[%s7938_s4 + $0xb8] sm:$0xff]  ;;  %v5289_v21 = vld [vmem:[%s7938_s4 + $0xb0] sm:$0xff] }
  0x1b   : > { %4720 = vmatmul.msk.bf16.vlgmr.msra.gmra.mxu1 %vm7942_vm1, %v827_v14  ;;  %s4723_s12 = sshll.u32 %s8251_s11, 4  ;;  %s5775_s15 = scvt.s32.f32 %s808_s13  ;;  %v5306_v11 = vld [vmem:[%s7938_s4 + $0xf8] sm:$0xff]  ;;  %v5279_v12 = vld [vmem:[%s7938_s4 + $0x60] sm:$0xff]  ;;  %2600 = vmatpush.bf16.msra.mxu2 %v5290_v9  ;;  %v5277_v51 = vld [vmem:[%s7938_s4 + $0x50] sm:$0xff] }
  0x1c   : > { %s933_s14 = scalar_lea.vmem %s5733_s18, %s4723_s12  ;;  %2895 = vmatpush.bf16.msrb.mxu0 %v5306_v11  ;;  %v5278_v27 = vld [vmem:[%s7938_s4 + $0x58] sm:$0xff]  ;;  %v5287_v4 = vld [vmem:[%s7938_s4 + $0xa0] sm:$0xff]  ;;  %v5276_v9 = vld [vmem:[%s7938_s4 + $0x48] sm:$0xff] }
  0x1d   : > { %v934_v23 = vld [vmem:[%s933_s14] sm:$0xff]  ;;  %v935_v24 = vld [vmem:[%s933_s14 + $0x8] sm:$0xff]  ;;  %s812_s18 = sshrl.u32 %s5775_s15, 16  ;;  %p811_p10 = scmp.ne.f32.partialorder %s5775_s15, %s5775_s15  ;;  %1776 = vmatpush.bf16.msrb.mxu1 %v5280_v58  ;;  %5401 = vmatpush.bf16.msra.mxu3 %v5279_v12 }
  0x1e   : > { %v936_v26 = vpack.c.bf16 %v935_v24, %v934_v23  ;;  %s813_s22 = sand.u32 1, %s812_s18 }
  0x1f   : > { %s814_s11 = sadd.s32 32767, %s813_s22  ;;  %2601 = vmatpush.bf16.msra.mxu2 %v5289_v21 }
  0x20   : > { %s815_s13 = sadd.s32 %s814_s11, %s5775_s15 }
  0x21   : > { %s816_s16 = sand.u32 4294901760, %s815_s13  ;;  %1777 = vmatpush.bf16.msrb.mxu1 %v5279_v12  ;;  %5402 = vmatpush.bf16.msra.mxu3 %v5278_v27  ;;  %v1053_v12 = vand.u32 15, %v5864_v22 }
  0x22   : > { %s8253_s16 = smov (%p811_p10, %s816_s16), 2143289344 }
  0x23   : > { %s819_s21 = sshrl.u32 %s8253_s16, 16 }
  0x24   : > { %s903_s22 = sshll.u32 %s819_s21, 16 }
  0x25   : > { %s5844_s9 = sor.u32 %s903_s22, %s819_s21  ;;  %1778 = vmatpush.bf16.msrb.mxu1 %v5278_v27  ;;  %5403 = vmatpush.bf16.msra.mxu3 %v5277_v51 }
  0x26   : > { %s917_s15 = scalar_select %p916_p11, 1, 0 }
  0x27   : > { %4695 = vmatmul.msk.bf16.gmra.mxu0 %vm7942_vm1, %v329_v19  ;;  %v905_v19 = vstv %s5844_s9 }
  0x28   : > { %4701 = vmatmul.msk.bf16.gmra.mxu2 %vm7942_vm1, %v335_v20  ;;  %v5951_v11 = vunpack.c.l.bf16 %v905_v19  ;;  %s5981_s24 = scvt.s32.f32 %s917_s15 }
  0x29   : > { %1779 = vmatpush.bf16.msrb.mxu1 %v5277_v51  ;;  %5404 = vmatpush.bf16.msra.mxu3 %v5276_v9 }
  0x2a   : > { %s921_s10 = sshrl.u32 %s5981_s24, 16  ;;  %p920_p12 = scmp.ne.f32.partialorder %s5981_s24, %s5981_s24 }
  0x2b   : > { %s6062_s16 = sand.u32 1, %s921_s10 }
  0x2c   : > { %s923_s15 = sadd.s32 32767, %s6062_s16 }
  0x2d   : > { %1780 = vmatpush.bf16.msrb.mxu1 %v5276_v9  ;;  %s6105_s21 = sadd.s32 %s923_s15, %s5981_s24 }
  0x2e   : > { %s925_s11 = sand.u32 4294901760, %s6105_s21 }
  0x2f   : > { %s8255_s11 = smov (%p920_p12, %s925_s11), 2143289344 }
  0x30   : > { %s928_s24 = sshrl.u32 %s8255_s11, 16  ;;  %s4691_s11 = sshll.u32 %s5744_s23, 3 }
  0x31   : > { %s1012_s17 = sshll.u32 %s928_s24, 16  ;;  %s7763_s13 = scalar_lea.vmem %s7941_s7, %s4691_s11 }
  0x32   : > { %s6247_s18 = sor.u32 %s1012_s17, %s928_s24 }
  0x37   : > { %4696 = vmatmul.msk.bf16.gmra.mxu0 %vm7942_vm1, %v330_v25 }
  0x38   : > { %4724 = vmatmul.msk.bf16.vlgmr.msrb.gmra.mxu2 %vm7942_vm1, %v936_v26  ;;  %v5305_v26 = vld [vmem:[%s7938_s4 + $0xf0] sm:$0xff] }
  0x39   : > { %2896 = vmatpush.bf16.msrb.mxu0 %v5305_v26 }
  0x47   : > { %4697 = vmatmul.msk.bf16.gmra.mxu0 %vm7942_vm1, %v331_v29 }
  0x57   : > { %4698 = vmatmul.msk.bf16.gmra.mxu0 %vm7942_vm1, %v332_v32 }
  0x67   : > { %4699 = vmatmul.msk.bf16.gmra.mxu0 %vm7942_vm1, %v333_v35 }
  0x94   : > { %v375_v38 = vpop.f32.mrf.mxu0 }
  0x95   : > { %v419_v39 = vmul.f32 %v5780_v36, %v375_v38 }
  0x97   : > { %v5793_v41 = vadd.f32 %v5786_v37, %v419_v39 }
  0x98   : > { %v844_v45 = vpop.f32.mrf.mxu1 }
  0x99   : > { %v4702_v44 = vmul.f32 -1.442695, %v5793_v41  ;;  %v853_v46 = vmul.f32 %v5450_v40, %v844_v45 }
  0x9b   : > { %5456 = vpow2.f32 %v4702_v44  ;;  %v5803_v47 = vadd.f32 %v5451_v43, %v853_v46  ;;  %v405_v63 = vpop.f32.mrf.mxu2  ;;  %v5288_v44 = vld [vmem:[%s7938_s4 + $0xa8] sm:$0xff] }
  0x9c   : > { %v377_v48 = vpop.f32.mrf.mxu0  ;;  %v431_v20 = vmul.f32 %v5780_v36, %v405_v63  ;;  %2602 = vmatpush.bf16.msra.mxu2 %v5288_v44  ;;  %v6002_v44 = vadd.s32 24, %v5854_v15 }
  0x9d   : > { %v420_v49 = vmul.f32 %v5780_v36, %v377_v48  ;;  %v4721_v50 = vmul.f32 -1.442695, %v5803_v47 }
  0x9e   : > { %v5884_v32 = vadd.f32 %v5786_v37, %v431_v20 }
  0x9f   : > { %v5813_v52 = vadd.f32 %v5786_v37, %v420_v49  ;;  %5458 = vpow2.f32 %v4721_v50  ;;  %v5304_v50 = vld [vmem:[%s7938_s4 + $0xe8] sm:$0xff] }
  0xa0   : > { %v846_v55 = vpop.f32.mrf.mxu1  ;;  %2897 = vmatpush.bf16.msrb.mxu0 %v5304_v50  ;;  %2603 = vmatpush.bf16.msra.mxu2 %v5287_v4 }
  0xa1   : > { %v5457_v53 = vpop.eup %5456  ;;  %v4703_v54 = vmul.f32 -1.442695, %v5813_v52  ;;  %v854_v57 = vmul.f32 %v5450_v40, %v846_v55 }
  0xa2   : > { %v5818_v56 = vadd.f32 1.0, %v5457_v53 }
  0xa3   : > { %5460 = vpow2.f32 %v4703_v54  ;;  %v5825_v60 = vadd.f32 %v5451_v43, %v854_v57  ;;  %v407_v33 = vpop.f32.mrf.mxu2  ;;  %v4714_v43 = vmul.f32 -1.442695, %v5884_v32 }
  0xa4   : > { %5462 = vrcp.f32 %v5818_v56  ;;  %v380_v59 = vpop.f32.mrf.mxu0  ;;  %v528_v13 = vand.u32 2147483647, %v5818_v56  ;;  %v530_v17 = vand.u32 2147483648, %v5818_v56  ;;  %vm524_vm2 = vweird.f32 %v5818_v56 }
  0xa5   : > { %v421_v61 = vmul.f32 %v5780_v36, %v380_v59  ;;  %v5459_v62 = vpop.eup %5458  ;;  %v4722_v2 = vmul.f32 -1.442695, %v5825_v60 }
  0xa6   : > { %v5829_v1 = vadd.f32 1.0, %v5459_v62  ;;  %vm5876_vm4 = vcmp.eq.f32.partialorder %v528_v13, 8.507059e+37  ;;  %v531_v35 = vor.u32 1.1754944e-38, %v530_v17 }
  0xa7   : > { %v5833_v3 = vadd.f32 %v5786_v37, %v421_v61 }
  0xa8   : > { %5464 = vrcp.f32 %v5829_v1  ;;  %v878_v25 = vand.u32 2147483647, %v5829_v1  ;;  %v880_v31 = vand.u32 2147483648, %v5829_v1  ;;  %vm874_vm6 = vweird.f32 %v5829_v1 }
  0xa9   : > { %v5461_v5 = vpop.eup %5460  ;;  %5466 = vpow2.f32 %v4722_v2  ;;  %v4704_v8 = vmul.f32 -1.442695, %v5833_v3 }
  0xaa   : > { %v5463_v6 = vpop.eup %5462  ;;  %v5837_v7 = vadd.f32 1.0, %v5461_v5  ;;  %vm5902_vm8 = vcmp.eq.f32.partialorder %v878_v25, 8.507059e+37  ;;  %v881_v55 = vor.u32 1.1754944e-38, %v880_v31 }
  0xab   : > { %v520_v10 = vmul.f32 %v5463_v6, %v5818_v56  ;;  %vm525_vm3 = vweird.f32 %v5463_v6 }
  0xac   : > { %5468 = vrcp.f32 %v5837_v7  ;;  %v382_v14 = vpop.f32.mrf.mxu0  ;;  %vm526_vm5 = vmor %vm524_vm2, %vm525_vm3  ;;  %v545_v56 = vand.u32 2147483648, %v5837_v7  ;;  %vm539_vm10 = vweird.f32 %v5837_v7 }
  0xad   : > { %v521_v16 = vsub.f32 1.0, %v520_v10  ;;  %5470 = vpow2.f32 %v4704_v8  ;;  %v422_v18 = vmul.f32 %v5780_v36, %v382_v14  ;;  %v5303_v8 = vld [vmem:[%s7938_s4 + $0xe0] sm:$0xff] }
  0xae   : > { %v5866_v23 = vpop.eup %5464  ;;  %2898 = vmatpush.bf16.msrb.mxu0 %v5303_v8 }
  0xaf   : > { %v522_v24 = vmul.f32 %v5463_v6, %v521_v16  ;;  %v5467_v28 = vpop.eup %5466  ;;  %v870_v30 = vmul.f32 %v5866_v23, %v5829_v1  ;;  %v5889_v39 = vadd.f32 %v5786_v37, %v422_v18  ;;  %vm875_vm7 = vweird.f32 %v5866_v23 }
  0xb0   : > { %v5886_v38 = vadd.f32 1.0, %v5467_v28  ;;  %vm5925_vm9 = vmor %vm874_vm6, %vm875_vm7  ;;  %v432_v1 = vmul.f32 %v5780_v36, %v407_v33  ;;  %v5961_v16 = vor.u32 1.1754944e-38, %v545_v56 }
  0xb1   : > { %v523_v34 = vadd.f32 %v5463_v6, %v522_v24  ;;  %v871_v42 = vsub.f32 1.0, %v870_v30  ;;  %v4705_v63 = vmul.f32 -1.442695, %v5889_v39  ;;  %v5286_v30 = vld [vmem:[%s7938_s4 + $0x98] sm:$0xff] }
  0xb2   : > { %v5891_v40 = vpop.eup %5468  ;;  %5472 = vrcp.f32 %v5886_v38  ;;  %v5964_v17 = vadd.f32 %v5786_v37, %v432_v1  ;;  %v893_v21 = vand.u32 2147483647, %v5886_v38  ;;  %v895_v25 = vand.u32 2147483648, %v5886_v38  ;;  %2604 = vmatpush.bf16.msra.mxu2 %v5286_v30 }
  0xb3   : > { %v5471_v45 = vpop.eup %5470  ;;  %v527_v46 = vsel %vm526_vm5, %v5463_v6, %v523_v34  ;;  %v535_v49 = vmul.f32 %v5891_v40, %v5837_v7  ;;  %v872_v54 = vmul.f32 %v5866_v23, %v871_v42  ;;  %5474 = vpow2.f32 %v4714_v43  ;;  %v5302_v42 = vld [vmem:[%s7938_s4 + $0xd8] sm:$0xff]  ;;  %v5275_v43 = vld [vmem:[%s7938_s4 + $0x40] sm:$0xff] }
  0xb4   : > { %v532_v53 = vsel %vm5876_vm4, %v531_v35, %v527_v46  ;;  %v385_v57 = vpop.f32.mrf.mxu0  ;;  %v5929_v62 = vadd.f32 1.0, %v5471_v45  ;;  %vm540_vm11 = vweird.f32 %v5891_v40  ;;  %vm889_vm13 = vweird.f32 %v5886_v38  ;;  %2899 = vmatpush.bf16.msrb.mxu0 %v5302_v42  ;;  %1781 = vmatpush.bf16.msrb.mxu1 %v5275_v43 }
  0xb5   : > { %v759_v58 = vmul.f32 %v532_v53, %v5793_v41  ;;  %v536_v61 = vsub.f32 1.0, %v535_v49  ;;  %v873_v2 = vadd.f32 %v5866_v23, %v872_v54  ;;  %v543_v41 = vand.u32 2147483647, %v5837_v7  ;;  %vm6008_vm15 = vmor %vm539_vm10, %vm540_vm11  ;;  %5405 = vmatpush.bf16.msra.mxu3 %v5275_v43  ;;  %v5299_v53 = vld [vmem:[%s7938_s4 + $0xc0] sm:$0xff] }
  0xb6   : > { %5476 = vrcp.f32 %v5929_v62  ;;  %v423_v26 = vmul.f32 %v5780_v36, %v385_v57  ;;  %vm6013_vm0 = vcmp.eq.f32.partialorder %v893_v21, 8.507059e+37  ;;  %v896_v54 = vor.u32 1.1754944e-38, %v895_v25 }
  0xb7   : > { %v775_v5 = vpack.c.bf16 %v759_v58, %v759_v58  ;;  %v537_v6 = vmul.f32 %v5891_v40, %v536_v61  ;;  %v877_v10 = vsel %vm5925_vm9, %v5866_v23, %v873_v2  ;;  %5478 = vpow2.f32 %v4705_v63  ;;  %v410_v23 = vpop.f32.mrf.mxu2  ;;  %v5301_v2 = vld [vmem:[%s7938_s4 + $0xd0] sm:$0xff] }
  0xb8   : > { %v5957_v13 = vpop.eup %5472  ;;  %v882_v14 = vsel %vm5902_vm8, %v881_v55, %v877_v10  ;;  %vm5968_vm12 = vcmp.eq.f32.partialorder %v543_v41, 8.507059e+37  ;;  %v5991_v34 = vadd.f32 %v5786_v37, %v423_v26  ;;  %v558_v55 = vand.u32 2147483647, %v5929_v62  ;;  %2900 = vmatpush.bf16.msrb.mxu0 %v5301_v2  ;;  %v5300_v26 = vld [vmem:[%s7938_s4 + $0xc8] sm:$0xff] }
  0xb9   : > { %791 = vst [vmem:[#allocation2 + $0xc] sm:$0xf] %v775_v5  ;;  %v899_v18 = vmul.f32 %v882_v14, %v5803_v47  ;;  %v885_v20 = vmul.f32 %v5957_v13, %v5886_v38  ;;  %v538_v24 = vadd.f32 %v5891_v40, %v537_v6  ;;  %v4715_v47 = vmul.f32 -1.442695, %v5964_v17  ;;  %v5475_v27 = vpop.eup %5474  ;;  %v5285_v38 = vld [vmem:[%s7938_s4 + $0x90] sm:$0xff] }
  0xba   : > { %vm890_vm14 = vweird.f32 %v5957_v13  ;;  %v5988_v33 = vadd.f32 1.0, %v5475_v27  ;;  %v560_v59 = vand.u32 2147483648, %v5929_v62  ;;  %v4706_v61 = vmul.f32 -1.442695, %v5991_v34  ;;  %2605 = vmatpush.bf16.msra.mxu2 %v5285_v38 }
  0xbb   : > { %v901_v28 = vpack.c.bf16 %v899_v18, %v899_v18  ;;  %v886_v29 = vsub.f32 1.0, %v885_v20  ;;  %5480 = vpow2.f32 %v4715_v47  ;;  %v542_v7 = vsel %vm6008_vm15, %v5891_v40, %v538_v24  ;;  %vm6026_vm2 = vmor %vm889_vm13, %vm890_vm14 }
  0xbc   : > { %v5986_v31 = vpop.eup %5476  ;;  %v5993_v35 = vpop.f32.mrf.mxu0  ;;  %5482 = vrcp.f32 %v5988_v33  ;;  %v433_v63 = vmul.f32 %v5780_v36, %v410_v23  ;;  %v547_v6 = vsel %vm5968_vm12, %v5961_v16, %v542_v7  ;;  %vm554_vm4 = vweird.f32 %v5929_v62  ;;  %2901 = vmatpush.bf16.msrb.mxu0 %v5300_v26 }
  0xbd   : > { %v907_v45 = vunpack.c.l.bf16 %v901_v28  ;;  %v887_v48 = vmul.f32 %v5957_v13, %v886_v29  ;;  %v550_v50 = vmul.f32 %v5986_v31, %v5929_v62  ;;  %v5479_v51 = vpop.eup %5478  ;;  %vm555_vm3 = vweird.f32 %v5986_v31 }
  0xbe   : > { %v6034_v58 = vadd.f32 1.0, %v5479_v51  ;;  %vm6058_vm5 = vcmp.eq.f32.partialorder %v558_v55, 8.507059e+37  ;;  %vm556_vm6 = vmor %vm554_vm4, %vm555_vm3  ;;  %v561_v62 = vor.u32 1.1754944e-38, %v560_v59  ;;  %v710_v19 = vand.u32 2147483648, %v5988_v33 }
  0xbf   : > { %v910_v56 = vmul.f32 %v5951_v11, %v907_v45  ;;  %v888_v57 = vadd.f32 %v5957_v13, %v887_v48  ;;  %v551_v40 = vsub.f32 1.0, %v550_v50  ;;  %v412_v16 = vpop.f32.mrf.mxu2  ;;  %v6074_v20 = vadd.f32 %v5786_v37, %v433_v63 }
  0xc0   : > { %5484 = vrcp.f32 %v6034_v58  ;;  %v1067_v21 = vand.u32 15, %v6002_v44  ;;  %v760_v23 = vmul.f32 %v547_v6, %v5813_v52  ;;  %vm704_vm7 = vweird.f32 %v5988_v33  ;;  %2902 = vmatpush.bf16.msrb.mxu0 %v5299_v53 }
  0xc1   : > { %v912_v41 = vpack.c.bf16 %v910_v56, %v910_v56  ;;  %v892_v1 = vsel %vm6026_vm2, %v5957_v13, %v888_v57  ;;  %v552_v4 = vmul.f32 %v5986_v31, %v551_v40  ;;  %v5481_v5 = vpop.eup %5480  ;;  %5486 = vpow2.f32 %v4706_v61 }
  0xc2   : > { %v897_v8 = vsel %vm6013_vm0, %v896_v54, %v892_v1  ;;  %v6066_v14 = vadd.f32 1.0, %v5481_v5  ;;  %v6068_v18 = vpop.eup %5482  ;;  %v424_v52 = vmul.f32 %v5780_v36, %v5993_v35  ;;  %v708_v43 = vand.u32 2147483647, %v5988_v33 }
  0xc3   : > { %914 = vst [vmem:[#allocation2 + $0x4] sm:$0xf] %v912_v41  ;;  %v900_v10 = vmul.f32 %v897_v8, %v5825_v60  ;;  %v553_v13 = vadd.f32 %v5986_v31, %v552_v4  ;;  %v5284_v60 = vld [vmem:[%s7938_s4 + $0x88] sm:$0xff]  ;;  %v700_v47 = vmul.f32 %v6068_v18, %v5988_v33  ;;  %v6098_v45 = vor.u32 1.1754944e-38, %v710_v19  ;;  %v6140_v41 = vld [vmem:[%s7936_s2] ss:$0 sm:$0xff] }
  0xc4   : > { %5488 = vrcp.f32 %v6066_v14  ;;  %v390_v28 = vpop.f32.mrf.mxu0  ;;  %2606 = vmatpush.bf16.msra.mxu2 %v5284_v60  ;;  %vm569_vm8 = vweird.f32 %v6034_v58  ;;  %v4716_v35 = vmul.f32 -1.442695, %v6074_v20  ;;  %v573_v51 = vand.u32 2147483647, %v6034_v58 }
  0xc5   : > { %v902_v24 = vpack.c.bf16 %v900_v10, %v900_v10  ;;  %v557_v25 = vsel %vm556_vm6, %v5986_v31, %v553_v13  ;;  %v701_v42 = vsub.f32 1.0, %v700_v47  ;;  %v575_v7 = vand.u32 2147483648, %v6034_v58  ;;  %v6161_v13 = vld [vmem:[%s7937_s3] ss:$0 sm:$0xff] }
  0xc6   : > { %v562_v27 = vsel %vm6058_vm5, %v561_v62, %v557_v25  ;;  %v6094_v29 = vpop.eup %5484  ;;  %5490 = vpow2.f32 %v4716_v35  ;;  %v6119_v56 = vadd.f32 %v5786_v37, %v424_v52  ;;  %vm6124_vm9 = vcmp.eq.f32.partialorder %v708_v43, 8.507059e+37 }
  0xc7   : > { %v908_v30 = vunpack.c.l.bf16 %v902_v24  ;;  %v761_v31 = vmul.f32 %v562_v27, %v5833_v3  ;;  %v565_v46 = vmul.f32 %v6094_v29, %v6034_v58  ;;  %v5283_v3 = vld [vmem:[%s7938_s4 + $0x80] sm:$0xff]  ;;  %v5487_v48 = vpop.eup %5486  ;;  %v702_v57 = vmul.f32 %v6068_v18, %v701_v42  ;;  %v953_v6 = vpop.f32.mrf.mxu2 }
  0xc8   : > { %v6116_v55 = vadd.f32 1.0, %v5487_v48  ;;  %2607 = vmatpush.bf16.msra.mxu2 %v5283_v3  ;;  %v723_v38 = vand.u32 2147483647, %v6066_v14  ;;  %v434_v59 = vmul.f32 %v5780_v36, %v412_v16  ;;  %vm705_vm10 = vweird.f32 %v6068_v18 }
  0xc9   : > { %v911_v49 = vmul.f32 %v5951_v11, %v908_v30  ;;  %v5358_v50 = vpack.c.bf16 %v761_v31, %v760_v23  ;;  %v566_v54 = vsub.f32 1.0, %v565_v46  ;;  %v425_v2 = vmul.f32 %v5780_v36, %v390_v28  ;;  %vm6168_vm14 = vmor %vm704_vm7, %vm705_vm10 }
  0xca   : > { %v6131_v61 = vpop.eup %5488  ;;  %5492 = vrcp.f32 %v6116_v55  ;;  %vm570_vm11 = vweird.f32 %v6094_v29  ;;  %vm6143_vm12 = vcmp.eq.f32.partialorder %v573_v51, 8.507059e+37  ;;  %v576_v4 = vor.u32 1.1754944e-38, %v575_v7 }
  0xcb   : > { %v913_v11 = vpack.c.bf16 %v911_v49, %v911_v49  ;;  %5390 = vst [vmem:[#allocation2 + $0x10] sm:$0xff] %v5358_v50   ;;  %v567_v63 = vmul.f32 %v6094_v29, %v566_v54  ;;  %v715_v5 = vmul.f32 %v6131_v61, %v6066_v14  ;;  %vm719_vm13 = vweird.f32 %v6066_v14  ;;  %vm6183_vm0 = vmor %vm569_vm8, %vm570_vm11 }
  0xcc   : > { %v725_v9 = vand.u32 2147483648, %v6066_v14  ;;  %v4707_v10 = vmul.f32 -1.442695, %v6119_v56  ;;  %v703_v16 = vadd.f32 %v6068_v18, %v702_v57  ;;  %vm6172_vm15 = vcmp.eq.f32.partialorder %v723_v38, 8.507059e+37  ;;  %v5491_v24 = vpop.eup %5490  ;;  %v392_v26 = vpop.f32.mrf.mxu0 }
  0xcd   : > { %915 = vst [vmem:[#allocation2 + $0x8] sm:$0xf] %v913_v11  ;;  %v568_v8 = vadd.f32 %v6094_v29, %v567_v63  ;;  %v716_v19 = vsub.f32 1.0, %v715_v5  ;;  %v6177_v23 = vadd.f32 %v5786_v37, %v434_v59  ;;  %vm720_vm2 = vweird.f32 %v6131_v61 }
  0xce   : > { %5494 = vpow2.f32 %v4707_v10  ;;  %v6189_v25 = vadd.f32 %v5786_v37, %v425_v2  ;;  %v962_v47 = vmul.f32 %v6140_v41, %v953_v6  ;;  %v6196_v58 = vadd.f32 1.0, %v5491_v24  ;;  %vm6213_vm3 = vmor %vm719_vm13, %vm720_vm2 }
  0xcf   : > { %v572_v27 = vsel %vm6183_vm0, %v6094_v29, %v568_v8  ;;  %v717_v52 = vmul.f32 %v6131_v61, %v716_v19  ;;  %v4717_v28 = vmul.f32 -1.442695, %v6177_v23  ;;  %v726_v31 = vor.u32 1.1754944e-38, %v725_v9  ;;  %v955_v40 = vpop.f32.mrf.mxu2 }
  0xd0   : > { %v5493_v30 = vpop.eup %5492  ;;  %v588_v42 = vand.u32 2147483647, %v6116_v55  ;;  %v4708_v43 = vmul.f32 -1.442695, %v6189_v25  ;;  %v6203_v46 = vadd.f32 %v6161_v13, %v962_v47  ;;  %v707_v29 = vsel %vm6168_vm14, %v6068_v18, %v703_v16 }
  0xd1   : > { %v718_v35 = vadd.f32 %v6131_v61, %v717_v52  ;;  %v580_v48 = vmul.f32 %v5493_v30, %v6116_v55  ;;  %5496 = vrcp.f32 %v6196_v58  ;;  %v577_v49 = vsel %vm6143_vm12, %v576_v4, %v572_v27 }
  0xd2   : > { %vm584_vm4 = vweird.f32 %v6116_v55  ;;  %v590_v18 = vand.u32 2147483648, %v6116_v55  ;;  %5498 = vpow2.f32 %v4717_v28  ;;  %v4725_v14 = vmul.f32 -1.442695, %v6203_v46 }
  0xd3   : > { %v581_v51 = vsub.f32 1.0, %v580_v48  ;;  %5500 = vpow2.f32 %v4708_v43  ;;  %v426_v7 = vmul.f32 %v5780_v36, %v392_v26  ;;  %v6230_v54 = vsel %vm6124_vm9, %v6098_v45, %v707_v29 }
  0xd4   : > { %v5259_v50 = vld [vmem:[#allocation2 + $0x4] sm:$0xff]  ;;  %v5495_v53 = vpop.eup %5494  ;;  %v722_v11 = vsel %vm6213_vm3, %v6131_v61, %v718_v35  ;;  %v738_v57 = vand.u32 2147483647, %v6196_v58  ;;  %v740_v38 = vand.u32 2147483648, %v6196_v58  ;;  %vm585_vm5 = vweird.f32 %v5493_v30  ;;  %v395_v62 = vpop.f32.mrf.mxu0 }
  0xd5   : > { %1782 = vmatmul.bf16.vlgmr.msrb.gmra.mxu1 %v5259_v50  ;;  %v582_v59 = vmul.f32 %v5493_v30, %v581_v51  ;;  %vm6237_vm6 = vcmp.eq.f32.partialorder %v588_v42, 8.507059e+37  ;;  %v6241_v2 = vadd.f32 1.0, %v5495_v53  ;;  %v762_v45 = vmul.f32 %v577_v49, %v5889_v39  ;;  %vm586_vm8 = vmor %vm584_vm4, %vm585_vm5 }
  0xd6   : > { %v591_v1 = vor.u32 1.1754944e-38, %v590_v18  ;;  %vm734_vm7 = vweird.f32 %v6196_v58  ;;  %5502 = vpow2.f32 %v4725_v14  ;;  %v727_v4 = vsel %vm6172_vm15, %v726_v31, %v722_v11 }
  0xd7   : > { %v5497_v61 = vpop.eup %5496  ;;  %v583_v5 = vadd.f32 %v5493_v30, %v582_v59  ;;  %5504 = vrcp.f32 %v6241_v2  ;;  %v6253_v6 = vadd.f32 %v5786_v37, %v426_v7  ;;  %vm6259_vm9 = vcmp.eq.f32.partialorder %v738_v57, 8.507059e+37 }
  0xd8   : > { %v5499_v8 = vpop.eup %5498  ;;  %v730_v39 = vmul.f32 %v5497_v61, %v6196_v58  ;;  %v741_v10 = vor.u32 1.1754944e-38, %v740_v38  ;;  %v963_v16 = vmul.f32 %v6140_v41, %v955_v40  ;;  %vm735_vm10 = vweird.f32 %v5497_v61 }
  0xd9   : > { %v5501_v19 = vpop.eup %5500  ;;  %v587_v60 = vsel %vm586_vm8, %v5493_v30, %v583_v5  ;;  %v6264_v24 = vadd.f32 1.0, %v5499_v8  ;;  %v1014_v33 = vstv %s6247_s18  ;;  %v605_v26 = vand.u32 2147483648, %v6241_v2  ;;  %vm6287_vm11 = vmor %vm734_vm7, %vm735_vm10 }
  0xda   : > { %v592_v55 = vsel %vm6237_vm6, %v591_v1, %v587_v60  ;;  %v731_v47 = vsub.f32 1.0, %v730_v39  ;;  %v6270_v27 = vadd.f32 1.0, %v5501_v19  ;;  %v603_v28 = vand.u32 2147483647, %v6241_v2 }
  0xdb   : > { %v763_v52 = vmul.f32 %v592_v55, %v5991_v34  ;;  %5506 = vrcp.f32 %v6264_v24  ;;  %v4709_v41 = vmul.f32 -1.442695, %v6253_v6  ;;  %v753_v42 = vand.u32 2147483647, %v6264_v24 }
  0xdc   : > { %v5503_v30 = vpop.eup %5502  ;;  %v732_v31 = vmul.f32 %v5497_v61, %v731_v47  ;;  %5508 = vrcp.f32 %v6270_v27  ;;  %v6279_v43 = vadd.f32 %v6161_v13, %v963_v16  ;;  %v772_v35 = vmul.f32 %v727_v4, %v5964_v17  ;;  %v397_v5 = vpop.f32.mrf.mxu0 }
  0xdd   : > { %v6281_v29 = vpop.eup %5504  ;;  %v5363_v34 = vpack.c.bf16 %v763_v52, %v762_v45  ;;  %v6291_v48 = vunpack.c.l.bf16 %v1014_v33  ;;  %v427_v49 = vmul.f32 %v5780_v36, %v395_v62  ;;  %vm599_vm12 = vweird.f32 %v6241_v2 }
  0xde   : > { %v733_v18 = vadd.f32 %v5497_v61, %v732_v31  ;;  %v595_v13 = vmul.f32 %v6281_v29, %v6241_v2  ;;  %v606_v50 = vor.u32 1.1754944e-38, %v605_v26  ;;  %vm749_vm13 = vweird.f32 %v6264_v24 }
  0xdf   : > { %5391 = vst [vmem:[#allocation2 + $0x18] sm:$0xff] %v5363_v34   ;;  %v755_v17 = vand.u32 2147483648, %v6264_v24  ;;  %v6299_v58 = vadd.f32 1.0, %v5503_v30  ;;  %5510 = vpow2.f32 %v4709_v41  ;;  %vm6303_vm14 = vcmp.eq.f32.partialorder %v603_v28, 8.507059e+37 }
  0xe0   : > { %v737_v51 = vsel %vm6287_vm11, %v5497_v61, %v733_v18  ;;  %v596_v14 = vsub.f32 1.0, %v595_v13  ;;  %vm6307_vm15 = vcmp.eq.f32.partialorder %v753_v42, 8.507059e+37  ;;  %v618_v11 = vand.u32 2147483647, %v6270_v27 }
  0xe1   : > { %v4726_v57 = vmul.f32 -1.442695, %v6279_v43  ;;  %v5507_v38 = vpop.eup %5506  ;;  %v742_v59 = vsel %vm6259_vm9, %v741_v10, %v737_v51  ;;  %vm614_vm0 = vweird.f32 %v6270_v27  ;;  %v620_v63 = vand.u32 2147483648, %v6270_v27 }
  0xe2   : > { %5512 = vrcp.f32 %v6299_v58  ;;  %v6319_v40 = vadd.f32 %v5786_v37, %v427_v49  ;;  %v5509_v45 = vpop.eup %5508  ;;  %v773_v1 = vmul.f32 %v742_v59, %v6074_v20  ;;  %v597_v61 = vmul.f32 %v6281_v29, %v596_v14 }
  0xe3   : > { %vm600_vm2 = vweird.f32 %v6281_v29  ;;  %v745_v4 = vmul.f32 %v5507_v38, %v6264_v24  ;;  %vm750_vm3 = vweird.f32 %v5507_v38  ;;  %v756_v8 = vor.u32 1.1754944e-38, %v755_v17 }
  0xe4   : > { %v610_v39 = vmul.f32 %v5509_v45, %v6270_v27  ;;  %v987_v9 = vand.u32 2147483647, %v6299_v58  ;;  %v5388_v10 = vpack.c.bf16 %v773_v1, %v772_v35  ;;  %v598_v16 = vadd.f32 %v6281_v29, %v597_v61  ;;  %vm6330_vm4 = vmor %vm599_vm12, %vm600_vm2 }
  0xe5   : > { %v746_v62 = vsub.f32 1.0, %v745_v4  ;;  %5514 = vpow2.f32 %v4726_v57  ;;  %v5511_v19 = vpop.eup %5510  ;;  %vm6334_vm5 = vcmp.eq.f32.partialorder %v618_v11, 8.507059e+37  ;;  %v4710_v55 = vmul.f32 -1.442695, %v6319_v40  ;;  %vm6348_vm6 = vmor %vm749_vm13, %vm750_vm3 }
  0xe6   : > { %v611_v60 = vsub.f32 1.0, %v610_v39  ;;  %v428_v47 = vmul.f32 %v5780_v36, %v397_v5  ;;  %5396 = vst [vmem:[#allocation2 + $0x40] sm:$0xff] %v5388_v10   ;;  %v602_v26 = vsel %vm6330_vm4, %v6281_v29, %v598_v16  ;;  %v621_v2 = vor.u32 1.1754944e-38, %v620_v63 }
  0xe7   : > { %v747_v52 = vmul.f32 %v5507_v38, %v746_v62  ;;  %v6343_v28 = vadd.f32 1.0, %v5511_v19  ;;  %vm615_vm7 = vweird.f32 %v5509_v45  ;;  %5516 = vpow2.f32 %v4710_v55 }
  0xe8   : > { %v5513_v41 = vpop.eup %5512  ;;  %v612_v31 = vmul.f32 %v5509_v45, %v611_v60  ;;  %v6353_v36 = vadd.f32 %v5786_v37, %v428_v47  ;;  %vm983_vm8 = vweird.f32 %v6299_v58  ;;  %vm6357_vm9 = vcmp.eq.f32.partialorder %v987_v9, 8.507059e+37  ;;  %vm616_vm10 = vmor %vm614_vm0, %vm615_vm7 }
  0xe9   : > { %v748_v42 = vadd.f32 %v5507_v38, %v747_v52  ;;  %v979_v29 = vmul.f32 %v5513_v41, %v6299_v58  ;;  %v607_v24 = vsel %vm6303_vm14, %v606_v50, %v602_v26  ;;  %v989_v3 = vand.u32 2147483648, %v6299_v58 }
  0xea   : > { %v613_v34 = vadd.f32 %v5509_v45, %v612_v31  ;;  %5518 = vrcp.f32 %v6343_v28  ;;  %vm984_vm11 = vweird.f32 %v5513_v41  ;;  %v633_v13 = vand.u32 2147483647, %v6343_v28 }
  0xeb   : > { %v5515_v49 = vpop.eup %5514  ;;  %v752_v37 = vsel %vm6348_vm6, %v5507_v38, %v748_v42  ;;  %v980_v18 = vsub.f32 1.0, %v979_v29  ;;  %vm6372_vm12 = vcmp.lt.s32.totalorder %v1053_v12, 15  ;;  %v4711_v7 = vmul.f32 -1.442695, %v6353_v36  ;;  %vm6389_vm13 = vmor %vm983_vm8, %vm984_vm11 }
  0xec   : > { %v757_v17 = vsel %vm6307_vm15, %v756_v8, %v752_v37  ;;  %v617_v51 = vsel %vm616_vm10, %v5509_v45, %v613_v34  ;;  %v6378_v14 = vadd.f32 1.0, %v5515_v49  ;;  %v635_v22 = vand.u32 2147483648, %v6343_v28  ;;  %vm2102_vm8 = vmpackc.low %vm6372_vm12, %vm6372_vm12 }
  0xed   : > { %v774_v27 = vmul.f32 %v757_v17, %v6177_v23  ;;  %v622_v11 = vsel %vm6334_vm5, %v621_v2, %v617_v51  ;;  %v981_v57 = vmul.f32 %v5513_v41, %v980_v18  ;;  %v5517_v12 = vpop.eup %5516  ;;  %v764_v38 = vmul.f32 %v607_v24, %v6119_v56 }
  0xee   : > { %v765_v59 = vmul.f32 %v622_v11, %v6189_v25  ;;  %v990_v63 = vor.u32 1.1754944e-38, %v989_v3  ;;  %5520 = vrcp.f32 %v6378_v14  ;;  %v6394_v1 = vadd.f32 1.0, %v5517_v12 }
  0xef   : > { %v790_v23 = vpack.c.bf16 %v774_v27, %v774_v27  ;;  %v982_v45 = vadd.f32 %v5513_v41, %v981_v57  ;;  %vm6398_vm14 = vcmp.lt.s32.totalorder %v1067_v21, 15  ;;  %vm629_vm15 = vweird.f32 %v6343_v28 }
  0xf0   : > { %v5519_v56 = vpop.eup %5518  ;;  %v5368_v25 = vpack.c.bf16 %v765_v59, %v764_v38  ;;  %5522 = vpow2.f32 %v4711_v7  ;;  %vm6406_vm0 = vcmp.eq.f32.partialorder %v633_v13, 8.507059e+37  ;;  %v636_v44 = vor.u32 1.1754944e-38, %v635_v22  ;;  %vm2104_vm10 = vmpackc.low %vm6398_vm14, %vm6398_vm14  ;;  %v2054_v7 = vld [vmem:[#allocation2 + $0xc] sm:$0xf] }
  0xf1   : > { %806 = vst [vmem:[#allocation2 + $0x48] sm:$0xf] %v790_v23  ;;  %v986_v58 = vsel %vm6389_vm13, %v5513_v41, %v982_v45  ;;  %v625_v4 = vmul.f32 %v5519_v56, %v6343_v28  ;;  %vm5643_vm2 = vmmov 1   ;;  %v1002_v8 = vand.u32 2147483647, %v6378_v14 }
  0xf2   : > { %vm1316_vm3 = vmpackc.low %vm5643_vm2, %vm5643_vm2  ;;  %5392 = vst [vmem:[#allocation2 + $0x20] sm:$0xff] %v5368_v25   ;;  %v991_v21 = vsel %vm6357_vm9, %v990_v63, %v986_v58  ;;  %v1004_v39 = vand.u32 2147483648, %v6378_v14  ;;  %5524 = vrcp.f32 %v6394_v1  ;;  %vm998_vm4 = vweird.f32 %v6378_v14 }
  0xf3   : > { %v1008_v9 = vmul.f32 %v991_v21, %v6203_v46  ;;  %v626_v10 = vsub.f32 1.0, %v625_v4  ;;  %v1332_v16 = vsel %vm1316_vm3, 65537, %v7979_v0  ;;  %vm630_vm5 = vweird.f32 %v5519_v56 }
  0xf4   : > { %v5521_v62 = vpop.eup %5520  ;;  %v650_v19 = vand.u32 2147483648, %v6394_v1  ;;  %v1360_v20 = vshll.u32 %v1332_v16, 16  ;;  %v1364_v60 = vshrl.u32 %v1332_v16, 16  ;;  %v648_v26 = vand.u32 2147483647, %v6394_v1  ;;  %vm631_vm11 = vmor %vm629_vm15, %vm630_vm5 }
  0xf5   : > { %v1010_v33 = vpack.c.bf16 %v1008_v9, %v1008_v9  ;;  %v627_v55 = vmul.f32 %v5519_v56, %v626_v10  ;;  %v994_v47 = vmul.f32 %v5521_v62, %v6378_v14  ;;  %vm999_vm6 = vweird.f32 %v5521_v62 }
  0xf6   : > { %v5523_v52 = vpop.eup %5522  ;;  %vm6421_vm7 = vcmp.eq.f32.partialorder %v1002_v8, 8.507059e+37  ;;  %v1005_v2 = vor.u32 1.1754944e-38, %v1004_v39  ;;  %v1366_v41 = vrot.slane %v1364_v60, 4  ;;  %vm644_vm9 = vweird.f32 %v6394_v1  ;;  %vm6456_vm15 = vmor %vm998_vm4, %vm999_vm6 }
  0xf7   : > { %v1016_v30 = vunpack.c.l.bf16 %v1010_v33  ;;  %v628_v31 = vadd.f32 %v5519_v56, %v627_v55  ;;  %v995_v42 = vsub.f32 1.0, %v994_v47  ;;  %v6429_v29 = vadd.f32 1.0, %v5523_v52  ;;  %v5601_v47 = vld [vmem:[%s7937_s3] ss:$0 sm:$0xff] }
  0xf8   : > { %v5525_v35 = vpop.eup %5524  ;;  %v651_v24 = vor.u32 1.1754944e-38, %v650_v19  ;;  %v6437_v34 = vrot.slane %v1360_v20, 5  ;;  %v6440_v3 = vunpack.c.l.b16 %v7979_v0  ;;  %v6443_v49 = vunpack.c.h.b16 %v7979_v0 }
  0xf9   : > { %v1019_v37 = vmul.f32 %v6291_v48, %v1016_v30  ;;  %v632_v18 = vsel %vm631_vm11, %v5519_v56, %v628_v31  ;;  %v996_v13 = vmul.f32 %v5521_v62, %v995_v42  ;;  %v640_v17 = vmul.f32 %v5525_v35, %v6394_v1  ;;  %v2052_v42 = vld [vmem:[#allocation2 + $0x4] sm:$0xf] }
  0xfa   : > { %vm6447_vm13 = vcmp.eq.f32.partialorder %v648_v26, 8.507059e+37  ;;  %v637_v28 = vsel %vm6406_vm0, %v636_v44, %v632_v18  ;;  %5526 = vrcp.f32 %v6429_v29  ;;  %v1367_v27 = vor.u32 %v1366_v41, %v6437_v34 }
  0xfb   : > { %v2118_v11 = vsel %vm2102_vm8, 65537, %v7979_v0  ;;  %v1021_v57 = vpack.c.bf16 %v1019_v37, %v1019_v37  ;;  %v997_v22 = vadd.f32 %v5521_v62, %v996_v13  ;;  %v641_v12 = vsub.f32 1.0, %v640_v17  ;;  %v2053_v17 = vld [vmem:[#allocation2 + $0x8] sm:$0xf] }
  0xfc   : > { %v2120_v14 = vsel %vm2104_vm10, 65537, %v7979_v0  ;;  %v766_v38 = vmul.f32 %v637_v28, %v6253_v6  ;;  %vm645_vm0 = vweird.f32 %v5525_v35  ;;  %v663_v59 = vand.u32 2147483647, %v6429_v29 }
  0xfd   : > { %vm2133_vm2 = vsmask.f32 256  ;;  %1023 = vst [vmem:[#allocation2 + $0x4c] sm:$0xf] %v1021_v57  ;;  %v1001_v50 = vsel %vm6456_vm15, %v5521_v62, %v997_v22  ;;  %v642_v53 = vmul.f32 %v5525_v35, %v641_v12  ;;  %v2139_v63 = vrot.slane %v1364_v60, 7  ;;  %vm646_vm3 = vmor %vm644_vm9, %vm645_vm0 }
  0xfe   : > { %v2145_v23 = vshrl.u32 %v2118_v11, 16  ;;  %v1006_v45 = vsel %vm6421_vm7, %v1005_v2, %v1001_v50  ;;  %vm659_vm12 = vweird.f32 %v6429_v29  ;;  %v665_v61 = vand.u32 2147483648, %v6429_v29  ;;  %v2055_v22 = vld [vmem:[#allocation2 + $0x10] sm:$0xf] }
  0xff   : > { %vm2134_vm14 = vsmask.f32 4368  ;;  %v2148_v6 = vshll.u32 %v2118_v11, 16  ;;  %v1009_v56 = vmul.f32 %v1006_v45, %v6279_v43  ;;  %v643_v25 = vadd.f32 %v5525_v35, %v642_v53 }
 0x100   : > { %v6483_v58 = vrot.slane %v1367_v27, 4  ;;  %v6485_v4 = vor.u32 %v2139_v63, %v1360_v20  ;;  %v6487_v5 = vpop.eup %5526  ;;  %v6492_v44 = vrot.slane %v2139_v63, 4  ;;  %v2147_v21 = vrot.slane %v2145_v23, 7  ;;  %vm6499_vm5 = vmor %vm2133_vm2, %vm2134_vm14 }
 0x101   : > { %v2163_v8 = vshrl.u32 %v2120_v14, 16  ;;  %v2166_v39 = vshll.u32 %v2120_v14, 16  ;;  %v1011_v9 = vpack.c.bf16 %v1009_v56, %v1009_v56  ;;  %v647_v10 = vsel %vm646_vm3, %v5525_v35, %v643_v25 }
 0x102   : > { %v655_v43 = vmul.f32 %v6487_v5, %v6429_v29  ;;  %vm660_vm4 = vweird.f32 %v6487_v5  ;;  %v652_v1 = vsel %vm6447_vm13, %v651_v24, %v647_v10  ;;  %v2150_v62 = vor.u32 %v2148_v6, %v2147_v21 }
 0x103   : > { %v2152_v19 = vrot.slane %v2147_v21, 4  ;;  %v6505_v20 = vrot.slane %v2163_v8, 7  ;;  %v1017_v60 = vunpack.c.l.bf16 %v1011_v9  ;;  %v767_v33 = vmul.f32 %v652_v1, %v6319_v40  ;;  %vm6533_vm9 = vmor %vm659_vm12, %vm660_vm4  ;;  %v400_v9 = vpop.f32.mrf.mxu0 }
 0x104   : > { %v656_v55 = vsub.f32 1.0, %v655_v43  ;;  %vm6508_vm6 = vcmp.eq.f32.partialorder %v663_v59, 8.507059e+37  ;;  %v2279_v26 = vunpack.c.l.b16 %v6485_v4  ;;  %v2151_v52 = vsel %vm6499_vm5, %v6492_v44, %v2150_v62  ;;  %v5600_v43 = vld [vmem:[%s7936_s2] ss:$0 sm:$0xff] }
 0x105   : > { %v2160_v46 = vsel %vm6499_vm5, %v2152_v19, %v6485_v4  ;;  %v2168_v2 = vor.u32 %v2166_v39, %v6505_v20  ;;  %v2280_v41 = vunpack.c.h.b16 %v6485_v4  ;;  %v1020_v40 = vmul.f32 %v6291_v48, %v1017_v60  ;;  %v5260_v39 = vld [vmem:[#allocation2 + $0xc] sm:$0xff] }
 0x106   : > { %v5373_v30 = vpack.c.bf16 %v767_v33, %v766_v38  ;;  %v657_v31 = vmul.f32 %v6487_v5, %v656_v55  ;;  %vm2283_vm7 = vcmp.ne.s32.totalorder %v2279_v26, %v6440_v3  ;;  %v2286_v24 = vunpack.c.l.b16 %v2151_v52  ;;  %1787 = vmatmul.bf16.gmra.mxu1 %v5260_v39 }
 0x107   : > { %v2169_v35 = vsel %vm6499_vm5, %v6492_v44, %v2168_v2  ;;  %vm2284_vm8 = vcmp.ne.s32.totalorder %v2280_v41, %v6443_v49  ;;  %v2287_v37 = vunpack.c.h.b16 %v2151_v52  ;;  %v1022_v18 = vpack.c.bf16 %v1020_v40, %v1020_v40 }
 0x108   : > { %5393 = vst [vmem:[#allocation2 + $0x28] sm:$0xff] %v5373_v30   ;;  %v658_v13 = vadd.f32 %v6487_v5, %v657_v31  ;;  %v2293_v51 = vunpack.c.l.b16 %v2160_v46  ;;  %v2294_v28 = vunpack.c.h.b16 %v2160_v46  ;;  %vm6537_vm10 = vmpackc.low %vm2284_vm8, %vm2283_vm7  ;;  %v8054_v27 = vmov 0 }
 0x109   : > { %v8055_v27 = vsel %vm6537_vm10, 4294967295, %v8054_v27  ;;  %vm2290_vm11 = vcmp.ne.s32.totalorder %v2286_v24, %v6440_v3  ;;  %vm2291_vm13 = vcmp.ne.s32.totalorder %v2287_v37, %v6443_v49  ;;  %v2300_v11 = vunpack.c.l.b16 %v2169_v35  ;;  %1024 = vst [vmem:[#allocation2 + $0x50] sm:$0xf] %v1022_v18 }
 0x10a   : > { %v2301_v57 = vunpack.c.h.b16 %v2169_v35  ;;  %v662_v29 = vsel %vm6533_vm9, %v6487_v5, %v658_v13  ;;  %vm6546_vm15 = vmpackc.low %vm2291_vm13, %vm2290_vm11  ;;  %v8056_v12 = vmov 0  ;;  %vm2297_vm0 = vcmp.ne.s32.totalorder %v2293_v51, %v6440_v3 }
 0x10b   : > { %v8057_v12 = vsel %vm6546_vm15, 4294967295, %v8056_v12  ;;  %vm2298_vm2 = vcmp.ne.s32.totalorder %v2294_v28, %v6443_v49  ;;  %v2398_v14 = vsel %vm6537_vm10, %v2052_v42, 0  ;;  %v666_v38 = vor.u32 1.1754944e-38, %v665_v61 }
 0x10c   : > { %vm6554_vm12 = vmpackc.low %vm2298_vm2, %vm2297_vm0  ;;  %v8058_v59 = vmov 0  ;;  %vm2304_vm14 = vcmp.ne.s32.totalorder %v2300_v11, %v6440_v3  ;;  %vm2305_vm3 = vcmp.ne.s32.totalorder %v2301_v57, %v6443_v49  ;;  %v2399_v50 = vsel %vm6546_vm15, %v2053_v17, 0  ;;  %v402_v11 = vpop.f32.mrf.mxu0  ;;  %v5342_v57 = vld [vmem:[%s7938_s4 + $0x1d8] sm:$0xff] }
 0x10d   : > { %v8059_v59 = vsel %vm6554_vm12, 4294967295, %v8058_v59  ;;  %vm6562_vm4 = vmpackc.low %vm2305_vm3, %vm2304_vm14  ;;  %v8060_v53 = vmov 0  ;;  %v2400_v63 = vsel %vm6554_vm12, %v2054_v7, 0  ;;  %v2449_v23 = vunpack.c.l.b16 %v2398_v14  ;;  %v2665_v14 = vld [vmem:[#allocation2 + $0x8] sm:$0x8] }
 0x10e   : > { %v8061_v53 = vsel %vm6562_vm4, 4294967295, %v8060_v53  ;;  %v2450_v45 = vunpack.c.l.b16 %v2399_v50  ;;  %vm7943_vm7 = vsmask.f32 7424  ;;  %v6570_v61 = vsel %vm6508_vm6, %v666_v38, %v662_v29 }
 0x10f   : > { %v2401_v6 = vsel %vm6562_vm4, %v2055_v22, 0  ;;  %v1028_v56 = vadd.s32 16, %v5854_v15  ;;  %v1046_v25 = vand.u32 15, %v5854_v15  ;;  %v2451_v5 = vunpack.c.l.b16 %v2400_v63 }
 0x110   : > { %v2452_v21 = vunpack.c.l.b16 %v2401_v6  ;;  %v2466_v8 = vpack.c.b16 %v2450_v45, %v2449_v23  ;;  %vm1347_vm8 = vsmask.f32 3328  ;;  %vm1348_vm11 = vsmask.f32 7440 }
 0x111   : > { %v1060_v10 = vand.u32 15, %v1028_v56  ;;  %vm1234_vm9 = vcmp.ge.s32.totalorder %v1046_v25, 1  ;;  %v429_v1 = vmul.f32 %v5600_v43, %v400_v9  ;;  %v1031_v33 = vadd.s32 40, %v5854_v15  ;;  %vm6603_vm3 = vmor %vm1347_vm8, %vm1348_vm11 }
 0x112   : > { %v6579_v62 = vpack.c.b16 %v2452_v21, %v2451_v5  ;;  %v2477_v19 = vshrl.u32 %v2466_v8, 16  ;;  %v2479_v60 = vshll.u32 %v2466_v8, 16  ;;  %vm1315_vm6 = vmpackc.low %vm1234_vm9, %vm1234_vm9  ;;  %v2170_v52 = vrot.slane %v6505_v20, 4 }
 0x113   : > { %vm1236_vm13 = vcmp.ge.s32.totalorder %v1060_v10, 1  ;;  %v1331_v55 = vsel %vm1315_vm6, 65537, %v7979_v0  ;;  %v6586_v26 = vadd.f32 %v5601_v47, %v429_v1  ;;  %v1081_v42 = vand.u32 15, %v1031_v33 }
 0x114   : > { %v2481_v46 = vrot.slane %v2479_v60, 1  ;;  %v2484_v2 = vshll.u32 %v6579_v62, 16  ;;  %vm1317_vm0 = vmpackc.low %vm1236_vm13, %vm1236_vm13  ;;  %v1351_v41 = vshll.u32 %v1331_v55, 16  ;;  %v1354_v40 = vshrl.u32 %v1331_v55, 16  ;;  %v2667_v60 = vld [vmem:[#allocation2 + $0x10] sm:$0xf] }
 0x115   : > { %v1333_v30 = vsel %vm1317_vm0, 65537, %v7979_v0  ;;  %v4712_v31 = vmul.f32 -1.442695, %v6586_v26  ;;  %v6595_v35 = vsel %vm6499_vm5, %v2170_v52, %v6485_v4  ;;  %vm1255_vm2 = vcmp.lt.s32.totalorder %v1081_v42, 15  ;;  %v2666_v55 = vld [vmem:[#allocation2 + $0xc] sm:$0xf] }
 0x116   : > { %v2482_v24 = vor.u32 %v2481_v46, %v2477_v19  ;;  %v6597_v37 = vrot.slane %v2484_v2, 1  ;;  %v1353_v20 = vrot.slane %v1351_v41, 5  ;;  %v1356_v18 = vrot.slane %v1354_v40, 4  ;;  %vm2106_vm14 = vmpackc.low %vm1255_vm2, %vm1255_vm2 }
 0x117   : > { %v1370_v13 = vshll.u32 %v1333_v30, 16  ;;  %v1374_v48 = vshrl.u32 %v1333_v30, 16  ;;  %5528 = vpow2.f32 %v4712_v31  ;;  %v430_v38 = vmul.f32 %v5600_v43, %v402_v11 }
 0x118   : > { %v2487_v17 = vsel %vm7943_vm7, %v2482_v24, %v6597_v37  ;;  %v1357_v51 = vor.u32 %v1356_v18, %v1353_v20  ;;  %v1509_v28 = vunpack.c.l.b16 %v1353_v20  ;;  %v1510_v7 = vunpack.c.h.b16 %v1353_v20  ;;  %v2668_v18 = vld [vmem:[#allocation2 + $0x14] sm:$0xf] }
 0x119   : > { %2608 = vmatmul.bf16.vlgmr.msra.gmra.mxu2 %v2487_v17  ;;  %v1372_v29 = vrot.slane %v1370_v13, 5  ;;  %v1376_v22 = vrot.slane %v1374_v48, 4  ;;  %v2122_v50 = vsel %vm2106_vm14, 65537, %v7979_v0  ;;  %v6617_v25 = vadd.f32 %v5601_v47, %v430_v38 }
 0x11a   : > { %v1358_v63 = vrot.slane %v1357_v51, 4  ;;  %vm1513_vm9 = vcmp.ne.s32.totalorder %v1509_v28, %v6440_v3  ;;  %vm1514_vm6 = vcmp.ne.s32.totalorder %v1510_v7, %v6443_v49  ;;  %v2181_v23 = vshrl.u32 %v2122_v50, 16  ;;  %v5293_v51 = vld [vmem:[#allocation2 + $0x1c] sm:$0xff] }
 0x11b   : > { %v1373_v45 = vsel %vm6603_vm3, %v6483_v58, %v1372_v29  ;;  %v1377_v6 = vor.u32 %v1376_v22, %v1372_v29  ;;  %vm6613_vm8 = vmpackc.low %vm1514_vm6, %vm1513_vm9  ;;  %v2184_v5 = vshll.u32 %v2122_v50, 16  ;;  %v4713_v52 = vmul.f32 -1.442695, %v6617_v25  ;;  %v2056_v22 = vld [vmem:[#allocation2 + $0x14] sm:$0xf] }
 0x11c   : > { %v1363_v21 = vsel %vm6603_vm3, %v1358_v63, %v6437_v34  ;;  %v1523_v8 = vunpack.c.l.b16 %v1373_v45  ;;  %v1524_v39 = vunpack.c.h.b16 %v1373_v45  ;;  %v2682_v9 = vsel %vm6613_vm8, %v2665_v14, 0 }
 0x11d   : > { %v5529_v10 = vpop.eup %5528  ;;  %v1378_v43 = vrot.slane %v1377_v6, 4  ;;  %v1516_v1 = vunpack.c.l.b16 %v1363_v21  ;;  %v1517_v19 = vunpack.c.h.b16 %v1363_v21  ;;  %v2733_v33 = vunpack.c.l.b16 %v2682_v9  ;;  %v2057_v9 = vld [vmem:[#allocation2 + $0x18] sm:$0xf] }
 0x11e   : > { %vm1527_vm11 = vcmp.ne.s32.totalorder %v1523_v8, %v6440_v3  ;;  %vm1528_vm13 = vcmp.ne.s32.totalorder %v1524_v39, %v6443_v49  ;;  %v6626_v47 = vadd.f32 1.0, %v5529_v10  ;;  %v6638_v41 = vrot.slane %v2181_v23, 7 }
 0x11f   : > { %v1383_v46 = vsel %vm6603_vm3, %v1378_v43, %v6437_v34  ;;  %vm1520_vm0 = vcmp.ne.s32.totalorder %v1516_v1, %v6440_v3  ;;  %vm1521_vm2 = vcmp.ne.s32.totalorder %v1517_v19, %v6443_v49  ;;  %vm6634_vm14 = vmpackc.low %vm1528_vm13, %vm1527_vm11  ;;  %v8068_v40 = vmov 0 }
 0x120   : > { %vm6640_vm9 = vmpackc.low %vm1521_vm2, %vm1520_vm0  ;;  %v1530_v30 = vunpack.c.l.b16 %v1383_v46  ;;  %v1531_v31 = vunpack.c.h.b16 %v1383_v46  ;;  %v2684_v42 = vsel %vm6634_vm14, %v2667_v60, 0  ;;  %5530 = vrcp.f32 %v6626_v47 }
 0x121   : > { %v8069_v40 = vsel %vm6640_vm9, 4294967295, %v8068_v40  ;;  %v6649_v24 = vmul.f32 %v6230_v54, %v5884_v32  ;;  %v6653_v20 = vmul.f32 %v6570_v61, %v6353_v36  ;;  %v2683_v13 = vsel %vm6640_vm9, %v2666_v55, 0 }
 0x122   : > { %vm1534_vm6 = vcmp.ne.s32.totalorder %v1530_v30, %v6440_v3  ;;  %vm1535_vm11 = vcmp.ne.s32.totalorder %v1531_v31, %v6443_v49  ;;  %v2734_v48 = vunpack.c.l.b16 %v2683_v13  ;;  %v2735_v17 = vunpack.c.l.b16 %v2684_v42 }
 0x123   : > { %vm6659_vm13 = vmpackc.low %vm1535_vm11, %vm1534_vm6  ;;  %v678_v32 = vand.u32 2147483647, %v6626_v47  ;;  %5532 = vpow2.f32 %v4713_v52  ;;  %v2186_v54 = vor.u32 %v2184_v5, %v6638_v41  ;;  %v2307_v36 = vunpack.c.l.b16 %v6595_v35 }
 0x124   : > { %v2685_v61 = vsel %vm6659_vm13, %v2668_v18, 0  ;;  %v2750_v28 = vpack.c.b16 %v2734_v48, %v2733_v33  ;;  %v2308_v7 = vunpack.c.h.b16 %v6595_v35  ;;  %v680_v29 = vand.u32 2147483648, %v6626_v47 }
 0x125   : > { %v2736_v11 = vunpack.c.l.b16 %v2685_v61  ;;  %v2187_v14 = vsel %vm6499_vm5, %v6492_v44, %v2186_v54  ;;  %vm2311_vm6 = vcmp.ne.s32.totalorder %v2307_v36, %v6440_v3  ;;  %vm6677_vm1 = vcmp.eq.f32.partialorder %v678_v32, 8.507059e+37 }
 0x126   : > { %v5531_v38 = vpop.eup %5530  ;;  %v2760_v50 = vshrl.u32 %v2750_v28, 16  ;;  %v2763_v63 = vshll.u32 %v2750_v28, 16  ;;  %vm2312_vm11 = vcmp.ne.s32.totalorder %v2308_v7, %v6443_v49  ;;  %v2314_v23 = vunpack.c.l.b16 %v2187_v14 }
 0x127   : > { %v2751_v45 = vpack.c.b16 %v2736_v11, %v2735_v17  ;;  %v670_v35 = vmul.f32 %v5531_v38, %v6626_v47  ;;  %vm6681_vm7 = vmpackc.low %vm2312_vm11, %vm2311_vm6  ;;  %v8074_v5 = vmov 0  ;;  %v2315_v21 = vunpack.c.h.b16 %v2187_v14 }
 0x128   : > { %v8075_v5 = vsel %vm6681_vm7, 4294967295, %v8074_v5  ;;  %v2762_v8 = vrot.slane %v2760_v50, 3  ;;  %v2765_v39 = vrot.slane %v2763_v63, 4  ;;  %vm2318_vm0 = vcmp.ne.s32.totalorder %v2314_v23, %v6440_v3 }
 0x129   : > { %v2402_v10 = vsel %vm6681_vm7, %v2056_v22, 0  ;;  %v5533_v43 = vpop.eup %5532  ;;  %v2768_v1 = vshrl.u32 %v2751_v45, 16  ;;  %v2771_v19 = vshll.u32 %v2751_v45, 16  ;;  %v671_v60 = vsub.f32 1.0, %v670_v35 }
 0x12a   : > { %vm2319_vm2 = vcmp.ne.s32.totalorder %v2315_v21, %v6443_v49  ;;  %v2766_v33 = vor.u32 %v2765_v39, %v2762_v8  ;;  %vm675_vm6 = vweird.f32 %v5531_v38  ;;  %v681_v55 = vor.u32 1.1754944e-38, %v680_v29  ;;  %v5261_v29 = vld [vmem:[#allocation2 + $0x14] sm:$0xff] }
 0x12b   : > { %v6689_v52 = vadd.f32 1.0, %v5533_v43  ;;  %vm6691_vm11 = vmpackc.low %vm2319_vm2, %vm2318_vm0  ;;  %v8076_v46 = vmov 0  ;;  %v2770_v30 = vrot.slane %v2768_v1, 3  ;;  %v2773_v31 = vrot.slane %v2771_v19, 4  ;;  %1792 = vmatmul.bf16.gmra.mxu1 %v5261_v29 }
 0x12c   : > { %v8077_v46 = vsel %vm6691_vm11, 4294967295, %v8076_v46  ;;  %v672_v42 = vmul.f32 %v5531_v38, %v671_v60  ;;  %v2403_v18 = vsel %vm6691_vm11, %v2057_v9, 0  ;;  %v2453_v48 = vunpack.c.l.b16 %v2402_v10 }
 0x12d   : > { %5534 = vrcp.f32 %v6689_v52  ;;  %v695_v13 = vand.u32 2147483648, %v6689_v52  ;;  %v2488_v17 = vshrl.u32 %v6579_v62, 16  ;;  %v6700_v32 = vor.u32 %v2773_v31, %v2770_v30  ;;  %v5274_v62 = vld [vmem:[%s7938_s4 + $0x38] sm:$0xff] }
 0x12e   : > { %v673_v54 = vadd.f32 %v5531_v38, %v672_v42  ;;  %v2454_v36 = vunpack.c.l.b16 %v2403_v18  ;;  %v1030_v61 = vadd.s32 32, %v5854_v15  ;;  %vm8078_vm0 = vweird.f32 %v6626_v47  ;;  %2003 = vmatpush.bf16.msra.mxu1 %v5274_v62 }
 0x12f   : > { %vm676_vm2 = vmor %vm8078_vm0, %vm675_vm6  ;;  %v693_v28 = vand.u32 2147483647, %v6689_v52  ;;  %v6707_v7 = vor.u32 1.1754944e-38, %v695_v13  ;;  %v2490_v11 = vor.u32 %v2488_v17, %v6597_v37  ;;  %v1033_v22 = vadd.s32 56, %v5854_v15  ;;  %v2058_v17 = vld [vmem:[#allocation2 + $0x1c] sm:$0xf] }
 0x130   : > { %vm8079_vm7 = vsmask.f32 4352  ;;  %v677_v50 = vsel %vm676_vm2, %v5531_v38, %v673_v54  ;;  %v2468_v63 = vpack.c.b16 %v2454_v36, %v2453_v48  ;;  %v1074_v47 = vand.u32 15, %v1030_v61  ;;  %v5273_v38 = vld [vmem:[%s7938_s4 + $0x30] sm:$0xff] }
 0x131   : > { %v2775_v14 = vsel %vm8079_vm7, %v2766_v33, %v6700_v32  ;;  %v682_v23 = vsel %vm6677_vm1, %v681_v55, %v677_v50  ;;  %v1095_v45 = vand.u32 15, %v1033_v22  ;;  %v2188_v37 = vrot.slane %v6638_v41, 4  ;;  %v5272_v55 = vld [vmem:[%s7938_s4 + $0x28] sm:$0xff] }
 0x132   : > { %2903 = vmatmul.bf16.vlgmr.msrb.gmra.mxu0 %v2775_v14  ;;  %v1032_v35 = vadd.s32 48, %v5854_v15  ;;  %v769_v21 = vmul.f32 %v682_v23, %v6586_v26  ;;  %v2492_v8 = vshll.u32 %v2468_v63, 16  ;;  %vm6722_vm0 = vcmp.ge.s32.totalorder %v1074_v47, 1  ;;  %2004 = vmatpush.bf16.msra.mxu1 %v5273_v38 }
 0x133   : > { %v2496_v6 = vshrl.u32 %v2468_v63, 16  ;;  %v5535_v9 = vpop.eup %5534  ;;  %vm1319_vm1 = vmpackc.low %vm6722_vm0, %vm6722_vm0  ;;  %vm1257_vm7 = vcmp.lt.s32.totalorder %v1095_v45, 15  ;;  %v2196_v26 = vsel %vm6499_vm5, %v2188_v37, %v6485_v4  ;;  %v6736_v10 = vadd.s32 64, %v5854_v15 }
 0x134   : > { %v1088_v41 = vand.u32 15, %v1032_v35  ;;  %v5378_v43 = vpack.c.bf16 %v769_v21, %v6653_v20  ;;  %v685_v1 = vmul.f32 %v5535_v9, %v6689_v52  ;;  %vm690_vm2 = vweird.f32 %v5535_v9  ;;  %vm2108_vm0 = vmpackc.low %vm1257_vm7, %vm1257_vm7 }
 0x135   : > { %vm6740_vm6 = vcmp.eq.f32.partialorder %v693_v28, 8.507059e+37  ;;  %v2494_v60 = vrot.slane %v2492_v8, 1  ;;  %v1335_v33 = vsel %vm1319_vm1, 65537, %v7979_v0  ;;  %v2124_v30 = vsel %vm2108_vm0, 65537, %v7979_v0 }
 0x136   : > { %v2321_v31 = vunpack.c.l.b16 %v2196_v26  ;;  %v2322_v42 = vunpack.c.h.b16 %v2196_v26  ;;  %5394 = vst [vmem:[#allocation2 + $0x30] sm:$0xff] %v5378_v43   ;;  %v686_v20 = vsub.f32 1.0, %v685_v1  ;;  %vm8084_vm11 = vsmask.f32 7424  ;;  %2005 = vmatpush.bf16.msra.mxu1 %v5272_v55 }
 0x137   : > { %v2495_v18 = vsel %vm8084_vm11, %v2490_v11, %v2494_v60  ;;  %v1390_v13 = vshll.u32 %v1335_v33, 16  ;;  %v1394_v48 = vshrl.u32 %v1335_v33, 16  ;;  %v2199_v54 = vshrl.u32 %v2124_v30, 16 }
 0x138   : > { %2613 = vmatmul.bf16.gmra.mxu2 %v2495_v18  ;;  %v2202_v36 = vshll.u32 %v2124_v30, 16  ;;  %vm2325_vm1 = vcmp.ne.s32.totalorder %v2321_v31, %v6440_v3  ;;  %vm2326_vm7 = vcmp.ne.s32.totalorder %v2322_v42, %v6443_v49  ;;  %v687_v61 = vmul.f32 %v5535_v9, %v686_v20  ;;  %v2059_v31 = vld [vmem:[#allocation2 + $0x20] sm:$0xf]  ;;  %v5263_v20 = vld [vmem:[#allocation2 + $0x24] sm:$0xff] }
 0x139   : > { %v1392_v28 = vrot.slane %v1390_v13, 5  ;;  %v1396_v29 = vrot.slane %v1394_v48, 4  ;;  %vm6752_vm0 = vmpackc.low %vm2326_vm7, %vm2325_vm1  ;;  %v8085_v62 = vmov 0  ;;  %v6756_v22 = vor.u32 %v2496_v6, %v2494_v60  ;;  %v2669_v6 = vld [vmem:[#allocation2 + $0x18] sm:$0xf]  ;;  %1802 = vmatmul.bf16.vlgmr.msra.gmra.mxu3 %v5263_v20 }
 0x13a   : > { %v8086_v62 = vsel %vm6752_vm0, 4294967295, %v8085_v62  ;;  %v6758_v11 = vrot.slane %v2199_v54, 7  ;;  %v2404_v14 = vsel %vm6752_vm0, %v2058_v17, 0  ;;  %vm1240_vm11 = vcmp.ge.s32.totalorder %v1088_v41, 1  ;;  %v2670_v13 = vld [vmem:[#allocation2 + $0x1c] sm:$0xf] }
 0x13b   : > { %v1102_v50 = vand.u32 15, %v6736_v10  ;;  %v688_v63 = vadd.f32 %v5535_v9, %v687_v61  ;;  %v1393_v47 = vsel %vm6603_vm3, %v6483_v58, %v1392_v28  ;;  %v1397_v23 = vor.u32 %v1396_v29, %v1392_v28  ;;  %vm1321_vm1 = vmpackc.low %vm1240_vm11, %vm1240_vm11  ;;  %v5262_v17 = vld [vmem:[#allocation2 + $0x1c] sm:$0xff] }
 0x13c   : > { %v2455_v45 = vunpack.c.l.b16 %v2404_v14  ;;  %vm8087_vm7 = vweird.f32 %v6689_v52  ;;  %v1537_v37 = vunpack.c.l.b16 %v1393_v47  ;;  %v1538_v35 = vunpack.c.h.b16 %v1393_v47  ;;  %v5314_v54 = vld [vmem:[%s7938_s4 + $0x138] sm:$0xff]  ;;  %1797 = vmatmul.bf16.gmra.mxu1 %v5262_v17  ;;  %v5268_v17 = vld [vmem:[%s7938_s4 + $0x8] sm:$0xff] }
 0x13d   : > { %vm691_vm12 = vmor %vm8087_vm7, %vm690_vm2  ;;  %v2204_v21 = vor.u32 %v2202_v36, %v6758_v11  ;;  %v1337_v8 = vsel %vm1321_vm1, 65537, %v7979_v0  ;;  %v1398_v38 = vrot.slane %v1397_v23, 4  ;;  %v8088_v60 = vmov 0  ;;  %v5270_v28 = vld [vmem:[%s7938_s4 + $0x18] sm:$0xff]  ;;  %3073 = vmatpush.bf16.msrb.mxu3 %v5314_v54  ;;  %v5313_v23 = vld [vmem:[%s7938_s4 + $0x130] sm:$0xff] }
 0x13e   : > { %v692_v39 = vsel %vm691_vm12, %v5535_v9, %v688_v63  ;;  %v1410_v26 = vshll.u32 %v1337_v8, 16  ;;  %v1414_v41 = vshrl.u32 %v1337_v8, 16  ;;  %vm1541_vm11 = vcmp.ne.s32.totalorder %v1537_v37, %v6440_v3 }
 0x13f   : > { %v697_v43 = vsel %vm6740_vm6, %v6707_v7, %v692_v39  ;;  %vm1542_vm0 = vcmp.ne.s32.totalorder %v1538_v35, %v6443_v49  ;;  %v2205_v52 = vsel %vm6499_vm5, %v6492_v44, %v2204_v21  ;;  %v1403_v9 = vsel %vm6603_vm3, %v1398_v38, %v6437_v34  ;;  %v2671_v39 = vld [vmem:[#allocation2 + $0x20] sm:$0xf] }
 0x140   : > { %v770_v1 = vmul.f32 %v697_v43, %v6617_v25  ;;  %vm6783_vm12 = vmpackc.low %vm1542_vm0, %vm1541_vm11  ;;  %v2328_v19 = vunpack.c.l.b16 %v2205_v52  ;;  %v2329_v7 = vunpack.c.h.b16 %v2205_v52  ;;  %v1544_v33 = vunpack.c.l.b16 %v1403_v9  ;;  %v5271_v25 = vld [vmem:[%s7938_s4 + $0x20] sm:$0xff] }
 0x141   : > { %v8089_v60 = vsel %vm6783_vm12, 4294967295, %v8088_v60  ;;  %v1545_v55 = vunpack.c.h.b16 %v1403_v9  ;;  %v2686_v30 = vsel %vm6783_vm12, %v2669_v6, 0  ;;  %v1412_v42 = vrot.slane %v1410_v26, 5  ;;  %2006 = vmatpush.bf16.msra.mxu1 %v5271_v25  ;;  %3074 = vmatpush.bf16.msrb.mxu3 %v5313_v23  ;;  %v5267_v9 = vld [vmem:[%s7938_s4] sm:$0xff] }
 0x142   : > { %v5383_v18 = vpack.c.bf16 %v6649_v24, %v770_v1  ;;  %v2737_v48 = vunpack.c.l.b16 %v2686_v30  ;;  %vm2332_vm6 = vcmp.ne.s32.totalorder %v2328_v19, %v6440_v3  ;;  %vm2333_vm2 = vcmp.ne.s32.totalorder %v2329_v7, %v6443_v49  ;;  %v5269_v1 = vld [vmem:[%s7938_s4 + $0x10] sm:$0xff] }
 0x143   : > { %vm1548_vm0 = vcmp.ne.s32.totalorder %v1544_v33, %v6440_v3  ;;  %vm1549_vm1 = vcmp.ne.s32.totalorder %v1545_v55, %v6443_v49  ;;  %vm6800_vm7 = vmpackc.low %vm2333_vm2, %vm2332_vm6  ;;  %v8090_v36 = vmov 0  ;;  %v1413_v24 = vsel %vm6603_vm3, %v6483_v58, %v1412_v42 }
 0x144   : > { %v8091_v36 = vsel %vm6800_vm7, 4294967295, %v8090_v36  ;;  %v1416_v61 = vrot.slane %v1414_v41, 4  ;;  %5395 = vst [vmem:[#allocation2 + $0x38] sm:$0xff] %v5383_v18   ;;  %vm6810_vm11 = vmpackc.low %vm1549_vm1, %vm1548_vm0  ;;  %v8092_v29 = vmov 0  ;;  %v2405_v14 = vsel %vm6800_vm7, %v2059_v31, 0 }
 0x145   : > { %v8093_v29 = vsel %vm6810_vm11, 4294967295, %v8092_v29  ;;  %v1551_v63 = vunpack.c.l.b16 %v1413_v24  ;;  %v1552_v47 = vunpack.c.h.b16 %v1413_v24  ;;  %v1035_v37 = vadd.s32 72, %v5854_v15  ;;  %2007 = vmatpush.bf16.msra.mxu1 %v5270_v28  ;;  %v2060_v18 = vld [vmem:[#allocation2 + $0x24] sm:$0xf] }
 0x146   : > { %v2687_v35 = vsel %vm6810_vm11, %v2670_v13, 0  ;;  %v2456_v21 = vunpack.c.l.b16 %v2405_v14  ;;  %v1417_v8 = vor.u32 %v1416_v61, %v1412_v42  ;;  %v2206_v38 = vrot.slane %v6758_v11, 4  ;;  %v1266_v14 = vld [vmem:[#allocation2] sm:$0x8] }
 0x147   : > { %v2738_v6 = vunpack.c.l.b16 %v2687_v35  ;;  %vm1555_vm6 = vcmp.ne.s32.totalorder %v1551_v63, %v6440_v3  ;;  %vm1556_vm2 = vcmp.ne.s32.totalorder %v1552_v47, %v6443_v49  ;;  %v1109_v26 = vand.u32 15, %v1035_v37 }
 0x148   : > { %v2469_v41 = vpack.c.b16 %v2456_v21, %v2455_v45  ;;  %v1418_v43 = vrot.slane %v1417_v8, 4  ;;  %vm6825_vm0 = vmpackc.low %vm1556_vm2, %vm1555_vm6  ;;  %v8094_v52 = vmov 0  ;;  %v2214_v11 = vsel %vm6499_vm5, %v2206_v38, %v6485_v4 }
 0x149   : > { %v8095_v52 = vsel %vm6825_vm0, 4294967295, %v8094_v52  ;;  %vm6837_vm1 = vcmp.ge.s32.totalorder %v1102_v50, 1  ;;  %v2752_v45 = vpack.c.b16 %v2738_v6, %v2737_v48  ;;  %v2688_v19 = vsel %vm6825_vm0, %v2671_v39, 0  ;;  %v2672_v48 = vld [vmem:[#allocation2 + $0x24] sm:$0xf]  ;;  %2008 = vmatpush.bf16.msra.mxu1 %v5269_v1 }
 0x14a   : > { %vm6843_vm6 = vcmp.lt.s32.totalorder %v1109_v26, 15  ;;  %v2335_v33 = vunpack.c.l.b16 %v2214_v11  ;;  %v2500_v55 = vshll.u32 %v2469_v41, 16  ;;  %v1423_v30 = vsel %vm6603_vm3, %v1418_v43, %v6437_v34  ;;  %v1267_v6 = vld [vmem:[#allocation2 + $0x4] sm:$0xf]  ;;  %v1268_v26 = vld [vmem:[#allocation2 + $0x8] sm:$0xf] }
 0x14b   : > { %v2739_v10 = vunpack.c.l.b16 %v2688_v19  ;;  %vm2110_vm2 = vmpackc.low %vm6843_vm6, %vm6843_vm6  ;;  %v2336_v50 = vunpack.c.h.b16 %v2214_v11  ;;  %v2777_v31 = vshrl.u32 %v2752_v45, 16  ;;  %v2780_v42 = vshll.u32 %v2752_v45, 16  ;;  %v1269_v11 = vld [vmem:[#allocation2 + $0xc] sm:$0xf] }
 0x14c   : > { %v1558_v25 = vunpack.c.l.b16 %v1423_v30  ;;  %v1559_v20 = vunpack.c.h.b16 %v1423_v30  ;;  %v2502_v13 = vrot.slane %v2500_v55, 1  ;;  %v2126_v54 = vsel %vm2110_vm2, 65537, %v7979_v0  ;;  %vm1323_vm6 = vmpackc.low %vm6837_vm1, %vm6837_vm1 }
 0x14d   : > { %vm2339_vm7 = vcmp.ne.s32.totalorder %v2335_v33, %v6440_v3  ;;  %vm2340_vm4 = vcmp.ne.s32.totalorder %v2336_v50, %v6443_v49  ;;  %v2779_v24 = vrot.slane %v2777_v31, 3  ;;  %v2782_v61 = vrot.slane %v2780_v42, 4  ;;  %2009 = vmatpush.bf16.msra.mxu1 %v5268_v17  ;;  %v5264_v42 = vld [vmem:[#allocation2 + $0x2c] sm:$0xff] }
 0x14e   : > { %vm1562_vm10 = vcmp.ne.s32.totalorder %v1558_v25, %v6440_v3  ;;  %vm1563_vm15 = vcmp.ne.s32.totalorder %v1559_v20, %v6443_v49  ;;  %vm6864_vm0 = vmpackc.low %vm2340_vm4, %vm2339_vm7  ;;  %v8100_v28 = vmov 0  ;;  %vm8102_vm2 = vsmask.f32 7424  ;;  %1807 = vmatmul.bf16.gmra.mxu3 %v5264_v42 }
 0x14f   : > { %v8101_v28 = vsel %vm6864_vm0, 4294967295, %v8100_v28  ;;  %v2503_v63 = vsel %vm8102_vm2, %v6756_v22, %v2502_v13  ;;  %vm6870_vm11 = vmpackc.low %vm1563_vm15, %vm1562_vm10  ;;  %v8103_v47 = vmov 0  ;;  %v2217_v23 = vshrl.u32 %v2126_v54, 16 }
 0x150   : > { %v8104_v47 = vsel %vm6870_vm11, 4294967295, %v8103_v47  ;;  %v2220_v37 = vshll.u32 %v2126_v54, 16  ;;  %v2406_v35 = vsel %vm6864_vm0, %v2060_v18, 0  ;;  %v2783_v21 = vor.u32 %v2782_v61, %v2779_v24  ;;  %2618 = vmatmul.bf16.gmra.mxu2 %v2503_v63 }
 0x151   : > { %v2689_v8 = vsel %vm6870_vm11, %v2672_v48, 0  ;;  %v6878_v39 = vunpack.c.l.b16 %v2406_v35  ;;  %v2504_v38 = vshrl.u32 %v2469_v41, 16  ;;  %v6880_v43 = vrot.slane %v2217_v23, 7  ;;  %2010 = vmatpush.bf16.msra.mxu1 %v5267_v9  ;;  %v5311_v23 = vld [vmem:[%s7938_s4 + $0x120] sm:$0xff] }
 0x152   : > { %v2740_v22 = vunpack.c.l.b16 %v2689_v8  ;;  %v1339_v1 = vsel %vm1323_vm6, 65537, %v7979_v0  ;;  %v1628_v45 = vsel %vm6613_vm8, %v1266_v14, 0  ;;  %vm8105_vm10 = vsmask.f32 4352  ;;  %v2061_v8 = vld [vmem:[#allocation2 + $0x28] sm:$0xf] }
 0x153   : > { %v2784_v41 = vsel %vm8105_vm10, %v6700_v32, %v2783_v21  ;;  %v6892_v19 = vor.u32 %v2504_v38, %v2502_v13  ;;  %v1430_v7 = vshll.u32 %v1339_v1, 16  ;;  %v1434_v33 = vshrl.u32 %v1339_v1, 16  ;;  %v5312_v32 = vld [vmem:[%s7938_s4 + $0x128] sm:$0xff]  ;;  %vm8108_vm2 = vmmov %vm8105_vm10 }
 0x154   : > { %2908 = vmatmul.bf16.gmra.mxu0 %v2784_v41  ;;  %v2753_v55 = vpack.c.b16 %v2740_v22, %v2739_v10  ;;  %v2222_v30 = vor.u32 %v2220_v37, %v6880_v43  ;;  %v1629_v50 = vsel %vm6640_vm9, %v1267_v6, 0  ;;  %v1630_v31 = vsel %vm6634_vm14, %v1268_v26, 0  ;;  %3075 = vmatpush.bf16.msrb.mxu3 %v5312_v32 }
 0x155   : > { %v1432_v25 = vrot.slane %v1430_v7, 5  ;;  %v1436_v20 = vrot.slane %v1434_v33, 4  ;;  %v1631_v10 = vsel %vm6659_vm13, %v1269_v11, 0  ;;  %v1840_v18 = vunpack.c.l.b16 %v1628_v45  ;;  %v2673_v45 = vld [vmem:[#allocation2 + $0x28] sm:$0xf] }
 0x156   : > { %v2786_v13 = vshrl.u32 %v2753_v55, 16  ;;  %v2789_v48 = vshll.u32 %v2753_v55, 16  ;;  %v2223_v17 = vsel %vm6499_vm5, %v6492_v44, %v2222_v30  ;;  %v1841_v54 = vunpack.c.l.b16 %v1629_v50 }
 0x157   : > { %v2342_v24 = vunpack.c.l.b16 %v2223_v17  ;;  %v2343_v61 = vunpack.c.h.b16 %v2223_v17  ;;  %v1433_v14 = vsel %vm6603_vm3, %v6483_v58, %v1432_v25  ;;  %v1437_v63 = vor.u32 %v1436_v20, %v1432_v25  ;;  %v2674_v25 = vld [vmem:[#allocation2 + $0x2c] sm:$0xf] }
 0x158   : > { %v2788_v37 = vrot.slane %v2786_v13, 3  ;;  %v2791_v35 = vrot.slane %v2789_v48, 4  ;;  %v1565_v38 = vunpack.c.l.b16 %v1433_v14  ;;  %v1566_v6 = vunpack.c.h.b16 %v1433_v14  ;;  %3076 = vmatpush.bf16.msrb.mxu3 %v5311_v23 }
 0x159   : > { %vm2346_vm15 = vcmp.ne.s32.totalorder %v2342_v24, %v6440_v3  ;;  %vm2347_vm4 = vcmp.ne.s32.totalorder %v2343_v61, %v6443_v49  ;;  %v1438_v26 = vrot.slane %v1437_v63, 4  ;;  %v1842_v22 = vunpack.c.l.b16 %v1630_v31 }
 0x15a   : > { %v6918_v1 = vor.u32 %v2791_v35, %v2788_v37  ;;  %vm6920_vm7 = vmpackc.low %vm2347_vm4, %vm2346_vm15  ;;  %v8106_v11 = vmov 0  ;;  %vm1569_vm1 = vcmp.ne.s32.totalorder %v1565_v38, %v6440_v3  ;;  %vm1570_vm6 = vcmp.ne.s32.totalorder %v1566_v6, %v6443_v49 }
 0x15b   : > { %v8107_v11 = vsel %vm6920_vm7, 4294967295, %v8106_v11  ;;  %v1843_v41 = vunpack.c.l.b16 %v1631_v10  ;;  %v2407_v7 = vsel %vm6920_vm7, %v2061_v8, 0  ;;  %v1443_v33 = vsel %vm6603_vm3, %v1438_v26, %v6437_v34  ;;  %vm6934_vm10 = vmpackc.low %vm1570_vm6, %vm1569_vm1 }
 0x15c   : > { %v1857_v55 = vpack.c.b16 %v1841_v54, %v1840_v18  ;;  %v1037_v30 = vadd.s32 88, %v5854_v15  ;;  %v2793_v9 = vsel %vm8108_vm2, %v2783_v21, %v6918_v1  ;;  %v2458_v50 = vunpack.c.l.b16 %v2407_v7 }
 0x15d   : > { %v8109_v31 = vmov 0  ;;  %v1572_v42 = vunpack.c.l.b16 %v1443_v33  ;;  %v1573_v32 = vunpack.c.h.b16 %v1443_v33  ;;  %v2690_v20 = vsel %vm6934_vm10, %v2673_v45, 0 }
 0x15e   : > { %v8110_v31 = vsel %vm6934_vm10, 4294967295, %v8109_v31  ;;  %v1858_v10 = vpack.c.b16 %v1843_v41, %v1842_v22  ;;  %v1868_v13 = vshrl.u32 %v1857_v55, 16  ;;  %v1871_v18 = vshll.u32 %v1857_v55, 16 }
 0x15f   : > { %v2470_v48 = vpack.c.b16 %v2458_v50, %v6878_v39  ;;  %vm1576_vm15 = vcmp.ne.s32.totalorder %v1572_v42, %v6440_v3  ;;  %vm1577_vm4 = vcmp.ne.s32.totalorder %v1573_v32, %v6443_v49  ;;  %v2741_v21 = vunpack.c.l.b16 %v2690_v20  ;;  %v5265_v20 = vld [vmem:[#allocation2 + $0x34] sm:$0xff] }
 0x160   : > { %vm6943_vm1 = vmpackc.low %vm1577_vm4, %vm1576_vm15  ;;  %v8111_v17 = vmov 0  ;;  %v1870_v54 = vrot.slane %v1868_v13, 3  ;;  %v1873_v24 = vrot.slane %v1871_v18, 4  ;;  %v1876_v61 = vshrl.u32 %v1858_v10, 16  ;;  %1812 = vmatmul.bf16.gmra.mxu3 %v5265_v20 }
 0x161   : > { %v8112_v17 = vsel %vm6943_vm1, 4294967295, %v8111_v17  ;;  %v1879_v14 = vshll.u32 %v1858_v10, 16  ;;  %v2508_v63 = vshll.u32 %v2470_v48, 16  ;;  %v2691_v23 = vsel %vm6943_vm1, %v2674_v25, 0  ;;  %v1271_v25 = vld [vmem:[#allocation2 + $0x14] sm:$0xf] }
 0x162   : > { %v1123_v37 = vand.u32 15, %v1037_v30  ;;  %v2224_v39 = vrot.slane %v6880_v43, 4  ;;  %v2742_v35 = vunpack.c.l.b16 %v2691_v23  ;;  %v1874_v8 = vor.u32 %v1873_v24, %v1870_v54  ;;  %v1270_v30 = vld [vmem:[#allocation2 + $0x10] sm:$0xf]  ;;  %v5310_v10 = vld [vmem:[%s7938_s4 + $0x118] sm:$0xff] }
 0x163   : > { %v1878_v38 = vrot.slane %v1876_v61, 3  ;;  %v1881_v6 = vrot.slane %v1879_v14, 4  ;;  %v2510_v26 = vrot.slane %v2508_v63, 1  ;;  %v2512_v45 = vshrl.u32 %v2470_v48, 16  ;;  %v2062_v48 = vld [vmem:[#allocation2 + $0x2c] sm:$0xf]  ;;  %3077 = vmatpush.bf16.msrb.mxu3 %v5310_v10 }
 0x164   : > { %vm1261_vm6 = vcmp.lt.s32.totalorder %v1123_v37, 15  ;;  %v2232_v22 = vsel %vm6499_vm5, %v2224_v39, %v6485_v4  ;;  %v2754_v41 = vpack.c.b16 %v2742_v35, %v2741_v21  ;;  %2913 = vmatmul.bf16.gmra.mxu0 %v2793_v9  ;;  %vm8113_vm15 = vsmask.f32 7424  ;;  %v5309_v37 = vld [vmem:[%s7938_s4 + $0x110] sm:$0xff] }
 0x165   : > { %v6953_v7 = vor.u32 %v1881_v6, %v1878_v38  ;;  %vm2112_vm2 = vmpackc.low %vm1261_vm6, %vm1261_vm6  ;;  %v2349_v33 = vunpack.c.l.b16 %v2232_v22  ;;  %v2350_v55 = vunpack.c.h.b16 %v2232_v22  ;;  %v2511_v43 = vsel %vm8113_vm15, %v6892_v19, %v2510_v26 }
 0x166   : > { %v2128_v50 = vsel %vm2112_vm2, 65537, %v7979_v0  ;;  %v6958_v42 = vor.u32 %v2512_v45, %v2510_v26  ;;  %v1036_v32 = vadd.s32 80, %v5854_v15  ;;  %2623 = vmatmul.bf16.gmra.mxu2 %v2511_v43  ;;  %v2795_v13 = vshrl.u32 %v2754_v41, 16 }
 0x167   : > { %v2798_v18 = vshll.u32 %v2754_v41, 16  ;;  %vm8114_vm4 = vsmask.f32 4352  ;;  %v2235_v19 = vshrl.u32 %v2128_v50, 16  ;;  %v2238_v21 = vshll.u32 %v2128_v50, 16  ;;  %3078 = vmatpush.bf16.msrb.mxu3 %v5309_v37 }
 0x168   : > { %v1883_v9 = vsel %vm8114_vm4, %v1874_v8, %v6953_v7  ;;  %vm2353_vm6 = vcmp.ne.s32.totalorder %v2349_v33, %v6440_v3  ;;  %vm2354_vm2 = vcmp.ne.s32.totalorder %v2350_v55, %v6443_v49  ;;  %v1116_v54 = vand.u32 15, %v1036_v32 }
 0x169   : > { %2011 = vmatmul.bf16.vlgmr.msra.gmra.mxu1 %v1883_v9  ;;  %v2797_v24 = vrot.slane %v2795_v13, 3  ;;  %v2800_v61 = vrot.slane %v2798_v18, 4  ;;  %v2237_v14 = vrot.slane %v2235_v19, 7  ;;  %vm6968_vm15 = vmpackc.low %vm2354_vm2, %vm2353_vm6  ;;  %v8115_v63 = vmov 0  ;;  %v2063_v18 = vld [vmem:[#allocation2 + $0x30] sm:$0xf] }
 0x16a   : > { %v8116_v63 = vsel %vm6968_vm15, 4294967295, %v8115_v63  ;;  %v1632_v23 = vsel %vm6783_vm12, %v1270_v30, 0  ;;  %v2408_v39 = vsel %vm6968_vm15, %v2062_v48, 0  ;;  %vm1244_vm4 = vcmp.ge.s32.totalorder %v1116_v54, 1 }
 0x16b   : > { %vm8117_vm0 = vnez %v8093_v29  ;;  %v1844_v8 = vunpack.c.l.b16 %v1632_v23  ;;  %v6981_v38 = vor.u32 %v2800_v61, %v2797_v24  ;;  %v2240_v6 = vor.u32 %v2238_v21, %v2237_v14  ;;  %vm1325_vm6 = vmpackc.low %vm1244_vm4, %vm1244_vm4 }
 0x16c   : > { %v1633_v35 = vsel %vm8117_vm0, %v1271_v25, 0  ;;  %v2459_v26 = vunpack.c.l.b16 %v2408_v39  ;;  %v1341_v45 = vsel %vm1325_vm6, 65537, %v7979_v0  ;;  %v1039_v41 = vadd.s32 104, %v5854_v15 }
 0x16d   : > { %v1845_v22 = vunpack.c.l.b16 %v1633_v35  ;;  %v2242_v33 = vrot.slane %v2237_v14, 4  ;;  %v6986_v55 = vadd.s32 96, %v5854_v15  ;;  %vm8118_vm2 = vsmask.f32 4352 }
 0x16e   : > { %v2802_v30 = vsel %vm8118_vm2, %v6918_v1, %v6981_v38  ;;  %v2241_v43 = vsel %vm6499_vm5, %v6492_v44, %v2240_v6  ;;  %v1450_v50 = vshll.u32 %v1341_v45, 16  ;;  %v1454_v32 = vshrl.u32 %v1341_v45, 16  ;;  %v2675_v45 = vld [vmem:[#allocation2 + $0x30] sm:$0xf] }
 0x16f   : > { %v2356_v25 = vunpack.c.l.b16 %v2241_v43  ;;  %v2357_v20 = vunpack.c.h.b16 %v2241_v43  ;;  %v1859_v10 = vpack.c.b16 %v1845_v22, %v1844_v8  ;;  %v1137_v13 = vand.u32 15, %v1039_v41 }
 0x170   : > { %v1452_v9 = vrot.slane %v1450_v50, 5  ;;  %v1456_v48 = vrot.slane %v1454_v32, 4  ;;  %v2250_v19 = vsel %vm6499_vm5, %v2242_v33, %v6485_v4  ;;  %v1130_v1 = vand.u32 15, %v6986_v55 }
 0x171   : > { %vm2360_vm4 = vcmp.ne.s32.totalorder %v2356_v25, %v6440_v3  ;;  %vm2361_vm6 = vcmp.ne.s32.totalorder %v2357_v20, %v6443_v49  ;;  %v1885_v21 = vshrl.u32 %v1859_v10, 16  ;;  %v1888_v54 = vshll.u32 %v1859_v10, 16 }
 0x172   : > { %vm7000_vm2 = vmpackc.low %vm2361_vm6, %vm2360_vm4  ;;  %v8119_v24 = vmov 0  ;;  %v1453_v61 = vsel %vm6603_vm3, %v6483_v58, %v1452_v9  ;;  %v1457_v14 = vor.u32 %v1456_v48, %v1452_v9  ;;  %vm1263_vm15 = vcmp.lt.s32.totalorder %v1137_v13, 15 }
 0x173   : > { %v8120_v24 = vsel %vm7000_vm2, 4294967295, %v8119_v24  ;;  %v2363_v23 = vunpack.c.l.b16 %v2250_v19  ;;  %v2409_v37 = vsel %vm7000_vm2, %v2063_v18, 0  ;;  %v1579_v39 = vunpack.c.l.b16 %v1453_v61  ;;  %vm2114_vm7 = vmpackc.low %vm1263_vm15, %vm1263_vm15 }
 0x174   : > { %v1580_v35 = vunpack.c.h.b16 %v1453_v61  ;;  %v1887_v8 = vrot.slane %v1885_v21, 3  ;;  %v2460_v6 = vunpack.c.l.b16 %v2409_v37  ;;  %v1458_v22 = vrot.slane %v1457_v14, 4  ;;  %2918 = vmatmul.bf16.gmra.mxu0 %v2802_v30  ;;  %v1273_v21 = vld [vmem:[#allocation2 + $0x1c] sm:$0xf]  ;;  %v2676_v61 = vld [vmem:[#allocation2 + $0x34] sm:$0xf] }
 0x175   : > { %v1890_v41 = vrot.slane %v1888_v54, 4  ;;  %v2130_v33 = vsel %vm2114_vm7, 65537, %v7979_v0  ;;  %vm1583_vm4 = vcmp.ne.s32.totalorder %v1579_v39, %v6440_v3  ;;  %v2364_v10 = vunpack.c.h.b16 %v2250_v19  ;;  %v5266_v30 = vld [vmem:[#allocation2 + $0x3c] sm:$0xff]  ;;  %v5308_v39 = vld [vmem:[%s7938_s4 + $0x108] sm:$0xff] }
 0x176   : > { %vm1584_vm6 = vcmp.ne.s32.totalorder %v1580_v35, %v6443_v49  ;;  %v2253_v55 = vshrl.u32 %v2130_v33, 16  ;;  %v2256_v43 = vshll.u32 %v2130_v33, 16  ;;  %v2471_v50 = vpack.c.b16 %v2460_v6, %v2459_v26  ;;  %v1272_v26 = vld [vmem:[#allocation2 + $0x18] sm:$0xf]  ;;  %1817 = vmatmul.bf16.gmra.mxu3 %v5266_v30 }
 0x177   : > { %v1463_v32 = vsel %vm6603_vm3, %v1458_v22, %v6437_v34  ;;  %vm7015_vm2 = vmpackc.low %vm1584_vm6, %vm1583_vm4  ;;  %v7019_v20 = vor.u32 %v1890_v41, %v1887_v8  ;;  %vm8123_vm7 = vsmask.f32 4352  ;;  %vm7029_vm15 = vcmp.ne.s32.totalorder %v2363_v23, %v6440_v3  ;;  %v2064_v8 = vld [vmem:[#allocation2 + $0x34] sm:$0xf]  ;;  %3079 = vmatpush.bf16.msrb.mxu3 %v5308_v39 }
 0x178   : > { %v1586_v13 = vunpack.c.l.b16 %v1463_v32  ;;  %v1587_v18 = vunpack.c.h.b16 %v1463_v32  ;;  %v2692_v9 = vsel %vm7015_vm2, %v2675_v45, 0  ;;  %v7023_v48 = vrot.slane %v2253_v55, 7 }
 0x179   : > { %v2516_v54 = vshll.u32 %v2471_v50, 16  ;;  %v2743_v14 = vunpack.c.l.b16 %v2692_v9  ;;  %v1892_v37 = vsel %vm8123_vm7, %v6953_v7, %v7019_v20  ;;  %vm2368_vm0 = vcmp.ne.s32.totalorder %v2364_v10, %v6443_v49  ;;  %v2065_v9 = vld [vmem:[#allocation2 + $0x38] sm:$0xf] }
 0x17a   : > { %vm1590_vm4 = vcmp.ne.s32.totalorder %v1586_v13, %v6440_v3  ;;  %vm1591_vm6 = vcmp.ne.s32.totalorder %v1587_v18, %v6443_v49  ;;  %2016 = vmatmul.bf16.gmra.mxu1 %v1892_v37  ;;  %v2258_v35 = vor.u32 %v2256_v43, %v7023_v48  ;;  %v2520_v6 = vshrl.u32 %v2471_v50, 16  ;;  %v5307_v50 = vld [vmem:[%s7938_s4 + $0x100] sm:$0xff] }
 0x17b   : > { %v2518_v7 = vrot.slane %v2516_v54, 1  ;;  %vm7040_vm7 = vmpackc.low %vm1591_vm6, %vm1590_vm4  ;;  %vm7044_vm12 = vcmp.ge.s32.totalorder %v1130_v1, 1  ;;  %vm8130_vm9 = vnez %v8095_v52  ;;  %v8131_v55 = vmov 0  ;;  %3080 = vmatpush.bf16.msrb.mxu3 %v5307_v50 }
 0x17c   : > { %v1634_v45 = vsel %vm8130_vm9, %v1272_v26, 0  ;;  %v2693_v41 = vsel %vm7040_vm7, %v2676_v61, 0  ;;  %v2259_v33 = vsel %vm6499_vm5, %v6492_v44, %v2258_v35  ;;  %vm7057_vm4 = vmpackc.low %vm2368_vm0, %vm7029_vm15  ;;  %v1635_v1 = vsel %vm6870_vm11, %v1273_v21, 0 }
 0x17d   : > { %v8132_v55 = vsel %vm7057_vm4, 4294967295, %v8131_v55  ;;  %v1846_v43 = vunpack.c.l.b16 %v1634_v45  ;;  %vm8133_vm6 = vsmask.f32 7424  ;;  %v2744_v10 = vunpack.c.l.b16 %v2693_v41  ;;  %vm1327_vm0 = vmpackc.low %vm7044_vm12, %vm7044_vm12 }
 0x17e   : > { %v2519_v32 = vsel %vm8133_vm6, %v6958_v42, %v2518_v7  ;;  %v2370_v13 = vunpack.c.l.b16 %v2259_v33  ;;  %v2371_v18 = vunpack.c.h.b16 %v2259_v33  ;;  %v2410_v26 = vsel %vm7057_vm4, %v2064_v8, 0 }
 0x17f   : > { %2628 = vmatmul.bf16.gmra.mxu2 %v2519_v32  ;;  %v2522_v21 = vor.u32 %v2520_v6, %v2518_v7  ;;  %v1343_v54 = vsel %vm1327_vm0, 65537, %v7979_v0  ;;  %v1847_v61 = vunpack.c.l.b16 %v1635_v1  ;;  %v2755_v37 = vpack.c.b16 %v2744_v10, %v2743_v14 }
 0x180   : > { %vm2374_vm15 = vcmp.ne.s32.totalorder %v2370_v13, %v6440_v3  ;;  %vm2375_vm6 = vcmp.ne.s32.totalorder %v2371_v18, %v6443_v49  ;;  %v2461_v42 = vunpack.c.l.b16 %v2410_v26  ;;  %v8134_v19 = vmov 0 }
 0x181   : > { %vm7076_vm11 = vmpackc.low %vm2375_vm6, %vm2374_vm15  ;;  %v1470_v30 = vshll.u32 %v1343_v54, 16  ;;  %v1474_v39 = vshrl.u32 %v1343_v54, 16  ;;  %v1860_v35 = vpack.c.b16 %v1847_v61, %v1846_v43  ;;  %v1041_v8 = vadd.s32 120, %v5854_v15 }
 0x182   : > { %v8135_v19 = vsel %vm7076_vm11, 4294967295, %v8134_v19  ;;  %v2804_v7 = vshrl.u32 %v2755_v37, 16  ;;  %v2807_v6 = vshll.u32 %v2755_v37, 16  ;;  %v2411_v14 = vsel %vm7076_vm11, %v2065_v9, 0 }
 0x183   : > { %v2260_v22 = vrot.slane %v7023_v48, 4  ;;  %v2462_v45 = vunpack.c.l.b16 %v2411_v14  ;;  %v1472_v41 = vrot.slane %v1470_v30, 5  ;;  %v1476_v33 = vrot.slane %v1474_v39, 4 }
 0x184   : > { %v1894_v1 = vshrl.u32 %v1860_v35, 16  ;;  %v2806_v32 = vrot.slane %v2804_v7, 3  ;;  %v2809_v10 = vrot.slane %v2807_v6, 4  ;;  %v1897_v13 = vshll.u32 %v1860_v35, 16  ;;  %v2677_v7 = vld [vmem:[#allocation2 + $0x38] sm:$0xf] }
 0x185   : > { %v1151_v18 = vand.u32 15, %v1041_v8  ;;  %v7084_v26 = vpack.c.b16 %v2462_v45, %v2461_v42  ;;  %v1473_v43 = vsel %vm6603_vm3, %v6483_v58, %v1472_v41  ;;  %v1477_v50 = vor.u32 %v1476_v33, %v1472_v41 }
 0x186   : > { %v1896_v54 = vrot.slane %v1894_v1, 3  ;;  %v7089_v61 = vor.u32 %v2809_v10, %v2806_v32  ;;  %v1593_v9 = vunpack.c.l.b16 %v1473_v43  ;;  %v1594_v48 = vunpack.c.h.b16 %v1473_v43  ;;  %v1274_v32 = vld [vmem:[#allocation2 + $0x20] sm:$0xf]  ;;  %v5291_v10 = vld [vmem:[#allocation2 + $0xc] sm:$0xff] }
 0x187   : > { %v1899_v37 = vrot.slane %v1897_v13, 4  ;;  %v2524_v30 = vshll.u32 %v7084_v26, 16  ;;  %v1478_v39 = vrot.slane %v1477_v50, 4  ;;  %vm1265_vm12 = vcmp.lt.s32.totalorder %v1151_v18, 15  ;;  %v2678_v18 = vld [vmem:[#allocation2 + $0x3c] sm:$0xf]  ;;  %3081 = vmatmul.bf16.vlgmr.msrb.gmra.mxu3 %v5291_v10 }
 0x188   : > { %v2268_v42 = vsel %vm6499_vm5, %v2260_v22, %v6485_v4  ;;  %vm8136_vm0 = vsmask.f32 4352  ;;  %vm1597_vm15 = vcmp.ne.s32.totalorder %v1593_v9, %v6440_v3  ;;  %vm1598_vm6 = vcmp.ne.s32.totalorder %v1594_v48, %v6443_v49  ;;  %vm2116_vm11 = vmpackc.low %vm1265_vm12, %vm1265_vm12  ;;  %v2066_v9 = vld [vmem:[#allocation2 + $0x3c] sm:$0xf] }
 0x189   : > { %v2811_v35 = vsel %vm8136_vm0, %v6981_v38, %v7089_v61  ;;  %v7100_v8 = vor.u32 %v1899_v37, %v1896_v54  ;;  %v7102_v6 = vrot.slane %v2524_v30, 1  ;;  %v1483_v14 = vsel %vm6603_vm3, %v1478_v39, %v6437_v34  ;;  %vm7107_vm4 = vmpackc.low %vm1598_vm6, %vm1597_vm15  ;;  %v1275_v54 = vld [vmem:[#allocation2 + $0x24] sm:$0xf]  ;;  %v5354_v10 = vld [vmem:[%s7938_s4 + $0x238] sm:$0xff] }
 0x18a   : > { %2923 = vmatmul.bf16.gmra.mxu0 %v2811_v35  ;;  %v2132_v38 = vsel %vm2116_vm11, 65537, %v7979_v0  ;;  %v2377_v22 = vunpack.c.l.b16 %v2268_v42  ;;  %v1600_v45 = vunpack.c.l.b16 %v1483_v14  ;;  %v1601_v41 = vunpack.c.h.b16 %v1483_v14  ;;  %vm8139_vm12 = vmmov %vm8136_vm0  ;;  %4112 = vmatpush.bf16.msra.mxu3 %v5354_v10  ;;  %v2067_v0 = vld [vmem:[#allocation2 + $0x40] sm:$0xf] }
 0x18b   : > { %v2694_v33 = vsel %vm7107_vm4, %v2677_v7, 0  ;;  %v1901_v1 = vsel %vm8139_vm12, %v7019_v20, %v7100_v8  ;;  %vm8140_vm0 = vsmask.f32 7424  ;;  %v2271_v43 = vshrl.u32 %v2132_v38, 16  ;;  %v5338_v7 = vld [vmem:[%s7938_s4 + $0x1b8] sm:$0xff] }
 0x18c   : > { %v2527_v13 = vsel %vm8140_vm0, %v2522_v21, %v7102_v6  ;;  %2021 = vmatmul.bf16.gmra.mxu1 %v1901_v1  ;;  %v2274_v50 = vshll.u32 %v2132_v38, 16  ;;  %vm1604_vm11 = vcmp.ne.s32.totalorder %v1600_v45, %v6440_v3  ;;  %vm1605_vm15 = vcmp.ne.s32.totalorder %v1601_v41, %v6443_v49  ;;  %3651 = vmatpush.bf16.msrb.mxu2 %v5338_v7 }
 0x18d   : > { %v2378_v48 = vunpack.c.h.b16 %v2268_v42  ;;  %vm7122_vm6 = vcmp.ne.s32.totalorder %v2377_v22, %v6440_v3  ;;  %vm7126_vm12 = vmpackc.low %vm1605_vm15, %vm1604_vm11  ;;  %v2745_v21 = vunpack.c.l.b16 %v2694_v33  ;;  %v2273_v30 = vrot.slane %v2271_v43, 7  ;;  %v5346_v42 = vld [vmem:[%s7938_s4 + $0x1f8] sm:$0xff] }
 0x18e   : > { %v1040_v39 = vadd.s32 112, %v5854_v15  ;;  %v1636_v35 = vsel %vm6934_vm10, %v1274_v32, 0  ;;  %v2695_v14 = vsel %vm7126_vm12, %v2678_v18, 0  ;;  %v1637_v38 = vsel %vm6943_vm1, %v1275_v54, 0  ;;  %v5322_v22 = vld [vmem:[%s7938_s4 + $0x178] sm:$0xff]  ;;  %3829 = vmatpush.bf16.msra.mxu0 %v5346_v42  ;;  %v5345_v32 = vld [vmem:[%s7938_s4 + $0x1f0] sm:$0xff] }
 0x18f   : > { %vm2382_vm0 = vcmp.ne.s32.totalorder %v2378_v48, %v6443_v49  ;;  %v1848_v15 = vunpack.c.l.b16 %v1636_v35  ;;  %2633 = vmatmul.bf16.gmra.mxu2 %v2527_v13  ;;  %v2746_v45 = vunpack.c.l.b16 %v2695_v14  ;;  %v2276_v41 = vor.u32 %v2274_v50, %v2273_v30  ;;  %v5337_v18 = vld [vmem:[%s7938_s4 + $0x1b0] sm:$0xff]  ;;  %3356 = vmatpush.bf16.msrb.mxu1 %v5322_v22 }
 0x190   : > { %vm7149_vm11 = vmpackc.low %vm2382_vm0, %vm7122_vm6  ;;  %v8145_v33 = vmov 0  ;;  %v1144_v1 = vand.u32 15, %v1040_v39  ;;  %v1849_v43 = vunpack.c.l.b16 %v1637_v38  ;;  %v2278_v50 = vrot.slane %v2273_v30, 4  ;;  %3652 = vmatpush.bf16.msrb.mxu2 %v5337_v18 }
 0x191   : > { %v8146_v33 = vsel %vm7149_vm11, 4294967295, %v8145_v33  ;;  %v2412_v13 = vsel %vm7149_vm11, %v2066_v9, 0  ;;  %v2756_v54 = vpack.c.b16 %v2746_v45, %v2745_v21  ;;  %v2277_v48 = vsel %vm6499_vm5, %v6492_v44, %v2276_v41  ;;  %v5344_v21 = vld [vmem:[%s7938_s4 + $0x1e8] sm:$0xff] }
 0x192   : > { %8147 = vst [vmem:[#allocation3_spill] sm:$0xff] %v8146_v33  ;;  %v2463_v37 = vunpack.c.l.b16 %v2412_v13  ;;  %vm1248_vm15 = vcmp.ge.s32.totalorder %v1144_v1, 1  ;;  %v2384_v39 = vunpack.c.l.b16 %v2277_v48  ;;  %v2385_v42 = vunpack.c.h.b16 %v2277_v48  ;;  %3830 = vmatpush.bf16.msra.mxu0 %v5345_v32 }
 0x193   : > { %vm1329_vm6 = vmpackc.low %vm1248_vm15, %vm1248_vm15  ;;  %v1861_v9 = vpack.c.b16 %v1849_v43, %v1848_v15  ;;  %v2391_v7 = vunpack.c.l.b16 %v2278_v50  ;;  %v2813_v35 = vshrl.u32 %v2756_v54, 16  ;;  %v2816_v14 = vshll.u32 %v2756_v54, 16  ;;  %v5336_v15 = vld [vmem:[%s7938_s4 + $0x1a8] sm:$0xff] }
 0x194   : > { %v8148_v33 = vmov 0   ;;  %v2392_v16 = vunpack.c.h.b16 %v2278_v50  ;;  %vm2388_vm5 = vcmp.ne.s32.totalorder %v2384_v39, %v6440_v3  ;;  %vm2389_vm0 = vcmp.ne.s32.totalorder %v2385_v42, %v6443_v49  ;;  %v5343_v39 = vld [vmem:[%s7938_s4 + $0x1e0] sm:$0xff]  ;;  %3653 = vmatpush.bf16.msrb.mxu2 %v5336_v15 }
 0x195   : > { %v1345_v38 = vsel %vm1329_vm6, 65537, %v8148_v33  ;;  %v2815_v22 = vrot.slane %v2813_v35, 3  ;;  %v2818_v45 = vrot.slane %v2816_v14, 4  ;;  %vm7176_vm15 = vmpackc.low %vm2389_vm0, %vm2388_vm5  ;;  %v8149_v41 = vmov 0 }
 0x196   : > { %v1490_v44 = vshll.u32 %v1345_v38, 16  ;;  %v1494_v30 = vshrl.u32 %v1345_v38, 16  ;;  %v8150_v41 = vsel %vm7176_vm15, 4294967295, %v8149_v41  ;;  %v1903_v33 = vshrl.u32 %v1861_v9, 16  ;;  %3831 = vmatpush.bf16.msra.mxu0 %v5344_v21 }
 0x197   : > { %v1906_v1 = vshll.u32 %v1861_v9, 16  ;;  %v2413_v32 = vsel %vm7176_vm15, %v2067_v0, 0  ;;  %v2528_v10 = vshrl.u32 %v7084_v26, 16  ;;  %v7183_v18 = vor.u32 %v2818_v45, %v2815_v22  ;;  %v5335_v0 = vld [vmem:[%s7938_s4 + $0x1a0] sm:$0xff]  ;;  %v5292_v45 = vld [vmem:[#allocation2 + $0x14] sm:$0xff] }
 0x198   : > { %v1492_v13 = vrot.slane %v1490_v44, 5  ;;  %v1496_v43 = vrot.slane %v1494_v30, 4  ;;  %v2464_v50 = vunpack.c.l.b16 %v2413_v32  ;;  %v1905_v54 = vrot.slane %v1903_v33, 3  ;;  %v2679_v44 = vld [vmem:[#allocation2 + $0x40] sm:$0xf]  ;;  %3654 = vmatpush.bf16.msrb.mxu2 %v5335_v0  ;;  %3086 = vmatmul.bf16.gmra.mxu3 %v5292_v45  ;;  %v5321_v0 = vld [vmem:[%s7938_s4 + $0x170] sm:$0xff] }
 0x199   : > { %v1908_v48 = vrot.slane %v1906_v1, 4  ;;  %vm2395_vm6 = vcmp.ne.s32.totalorder %v2391_v7, %v6440_v3  ;;  %vm8151_vm0 = vsmask.f32 4352  ;;  %v1621_v15 = vunpack.c.l.b16 %v6483_v58  ;;  %3357 = vmatpush.bf16.msrb.mxu1 %v5321_v0  ;;  %v3421_v0 = vld [vmem:[#allocation2 + $0x10] sm:$0x8] }
 0x19a   : > { %v1493_v42 = vsel %vm6603_vm3, %v6483_v58, %v1492_v13  ;;  %v1497_v9 = vor.u32 %v1496_v43, %v1492_v13  ;;  %v2820_v26 = vsel %vm8151_vm0, %v7089_v61, %v7183_v18  ;;  %v7199_v35 = vpack.c.b16 %v2464_v50, %v2463_v37  ;;  %3832 = vmatpush.bf16.msra.mxu0 %v5343_v39  ;;  %v2068_v61 = vld [vmem:[#allocation2 + $0x44] sm:$0x1]  ;;  %v7237_v50 = vpop.f32.mrf.mxu1  ;;  %v3424_v39 = vld [vmem:[#allocation2 + $0x1c] sm:$0xf] }
 0x19b   : > { %v1607_v14 = vunpack.c.l.b16 %v1493_v42  ;;  %v1608_v38 = vunpack.c.h.b16 %v1493_v42  ;;  %2928 = vmatmul.bf16.gmra.mxu0 %v2820_v26  ;;  %v7201_v30 = vor.u32 %v1908_v48, %v1905_v54  ;;  %v1622_v22 = vunpack.c.h.b16 %v6483_v58  ;;  %v1276_v58 = vld [vmem:[#allocation2 + $0x28] sm:$0xf]  ;;  %v2680_v54 = vld [vmem:[#allocation2 + $0x44] sm:$0xf] }
 0x19c   : > { %v1498_v21 = vrot.slane %v1497_v9, 4  ;;  %v2530_v33 = vor.u32 %v2528_v10, %v7102_v6  ;;  %v2532_v1 = vshll.u32 %v7199_v35, 16  ;;  %vm8152_vm15 = vcmp.ne.s32.totalorder %v2392_v16, %v6443_v49  ;;  %v7371_v52 = vpop.f32.mrf.mxu2 }
 0x19d   : > { %vm1611_vm0 = vcmp.ne.s32.totalorder %v1607_v14, %v6440_v3  ;;  %vm1612_vm5 = vcmp.ne.s32.totalorder %v1608_v38, %v6443_v49  ;;  %vm7213_vm11 = vmpackc.low %vm8152_vm15, %vm2395_vm6  ;;  %vm8157_vm10 = vsmask.f32 4352  ;;  %v1638_v9 = vsel %vm7015_vm2, %v1276_v58, 0  ;;  %v5341_v14 = vld [vmem:[%s7938_s4 + $0x1d0] sm:$0xff] }
 0x19e   : > { %v1503_v6 = vsel %vm6603_vm3, %v1498_v21, %v6437_v34  ;;  %vm7220_vm1 = vmpackc.low %vm1612_vm5, %vm1611_vm0  ;;  %v1910_v10 = vsel %vm8157_vm10, %v7100_v8, %v7201_v30  ;;  %v7227_v7 = vrot.slane %v2532_v1, 1  ;;  %v5334_v34 = vld [vmem:[%s7938_s4 + $0x198] sm:$0xff]  ;;  %v1277_v8 = vld [vmem:[#allocation2 + $0x2c] sm:$0xf]  ;;  %v2414_v48 = vsel %vm7213_vm11, %v2068_v61, 0  ;;  %3833 = vmatpush.bf16.msra.mxu0 %v5342_v57 }
 0x19f   : > { %v1614_v16 = vunpack.c.l.b16 %v1503_v6  ;;  %v1615_v13 = vunpack.c.h.b16 %v1503_v6  ;;  %v2696_v43 = vsel %vm7220_vm1, %v2679_v44, 0  ;;  %2026 = vmatmul.bf16.gmra.mxu1 %v1910_v10  ;;  %vm7242_vm3 = vcmp.ne.s32.totalorder %v1621_v15, %v6440_v3  ;;  %v5353_v38 = vld [vmem:[%s7938_s4 + $0x230] sm:$0xff]  ;;  %3655 = vmatpush.bf16.msrb.mxu2 %v5334_v34  ;;  %v5340_v10 = vld [vmem:[%s7938_s4 + $0x1c8] sm:$0xff] }
 0x1a0   : > { %vm7247_vm10 = vcmp.ne.s32.totalorder %v1622_v22, %v6443_v49  ;;  %vm8162_vm15 = vsmask.f32 7424  ;;  %v2747_v44 = vunpack.c.l.b16 %v2696_v43  ;;  %v1850_v15 = vunpack.c.l.b16 %v1638_v9  ;;  %v5333_v1 = vld [vmem:[%s7938_s4 + $0x190] sm:$0xff]  ;;  %4113 = vmatpush.bf16.msra.mxu3 %v5353_v38  ;;  %v3423_v43 = vld [vmem:[#allocation2 + $0x18] sm:$0xf] }
 0x1a1   : > { %v2535_v26 = vsel %vm8162_vm15, %v2530_v33, %v7227_v7  ;;  %vm1618_vm6 = vcmp.ne.s32.totalorder %v1614_v16, %v6440_v3  ;;  %vm1619_vm5 = vcmp.ne.s32.totalorder %v1615_v13, %v6443_v49  ;;  %v1639_v3 = vsel %vm7040_vm7, %v1277_v8, 0  ;;  %vm7278_vm15 = vmpackc.low %vm7247_vm10, %vm7242_vm3  ;;  %v2681_v33 = vld [vmem:[#allocation2 + $0x48] sm:$0xf] }
 0x1a2   : > { %2638 = vmatmul.bf16.gmra.mxu2 %v2535_v26  ;;  %vm7266_vm0 = vmpackc.low %vm1619_vm5, %vm1618_vm6  ;;  %v2465_v22 = vunpack.c.l.b16 %v2414_v48  ;;  %v1851_v61 = vunpack.c.l.b16 %v1639_v3  ;;  %3834 = vmatpush.bf16.msra.mxu0 %v5341_v14  ;;  %v2698_v13 = vsel %vm7278_vm15, %v2681_v33, 0  ;;  %v7293_v48 = vpop.f32.mrf.mxu1  ;;  %v3422_v3 = vld [vmem:[#allocation2 + $0x14] sm:$0xf]  ;;  %v3441_v33 = vsel %vm6659_vm13, %v3424_v39, 0 }
 0x1a3   : > { %v2697_v49 = vsel %vm7266_vm0, %v2680_v54, 0  ;;  %3656 = vmatpush.bf16.msrb.mxu2 %v5333_v1  ;;  %v5332_v54 = vld [vmem:[%s7938_s4 + $0x188] sm:$0xff]  ;;  %v2749_v26 = vunpack.c.l.b16 %v2698_v13  ;;  %v2536_v1 = vshrl.u32 %v7199_v35, 16  ;;  %vm8168_vm13 = vsmask.f32 4352 }
 0x1a4   : > { %v2748_v58 = vunpack.c.l.b16 %v2697_v49  ;;  %v1862_v6 = vpack.c.b16 %v1851_v61, %v1850_v15  ;;  %v2474_v57 = vpack.c.b16 %v2465_v22, %v2465_v22  ;;  %v3440_v22 = vsel %vm6634_vm14, %v3423_v43, 0  ;;  %vm8169_vm3 = vmmov %vm8168_vm13 }
 0x1a5   : > { %vm8167_vm14 = vnez %v8069_v40  ;;  %v2538_v13 = vor.u32 %v2536_v1, %v7227_v7  ;;  %v3491_v35 = vunpack.c.l.b16 %v3440_v22  ;;  %v3492_v43 = vunpack.c.l.b16 %v3441_v33  ;;  %v1278_v7 = vld [vmem:[#allocation2 + $0x30] sm:$0xf]  ;;  %vm8173_vm5 = vmmov %vm8169_vm3 }
 0x1a6   : > { %v2757_v16 = vpack.c.b16 %v2748_v58, %v2747_v44  ;;  %v1912_v34 = vshrl.u32 %v1862_v6, 16  ;;  %v1915_v8 = vshll.u32 %v1862_v6, 16  ;;  %3835 = vmatpush.bf16.msra.mxu0 %v5340_v10  ;;  %v5339_v44 = vld [vmem:[%s7938_s4 + $0x1c0] sm:$0xff]  ;;  %v2540_v61 = vshll.u32 %v2474_v57, 16 }
 0x1a7   : > { %3657 = vmatpush.bf16.msrb.mxu2 %v5332_v54  ;;  %v5331_v10 = vld [vmem:[%s7938_s4 + $0x180] sm:$0xff]  ;;  %v3439_v2 = vsel %vm8167_vm14, %v3422_v3, 0  ;;  %vm8171_vm10 = vnez %v8089_v60  ;;  %vm8172_vm6 = vnez %v8093_v29  ;;  %vm8174_vm14 = vmmov %vm8169_vm3  ;;  %v1280_v60 = vld [vmem:[#allocation2 + $0x38] sm:$0xf] }
 0x1a8   : > { %v2822_v42 = vshrl.u32 %v2757_v16, 16  ;;  %v2825_v9 = vshll.u32 %v2757_v16, 16  ;;  %v1914_v14 = vrot.slane %v1912_v34, 3  ;;  %v1917_v38 = vrot.slane %v1915_v8, 4  ;;  %3091 = vmatmul.bf16.gmra.mxu3 %v5293_v51  ;;  %v3425_v51 = vld [vmem:[#allocation2 + $0x20] sm:$0xf] }
 0x1a9   : > { %v3438_v16 = vsel %vm6613_vm8, %v3421_v0, 0  ;;  %v2758_v34 = vpack.c.b16 %v2749_v26, %v2749_v26  ;;  %v2542_v56 = vrot.slane %v2540_v61, 1  ;;  %v3490_v54 = vunpack.c.l.b16 %v3439_v2  ;;  %v5352_v0 = vld [vmem:[%s7938_s4 + $0x228] sm:$0xff] }
 0x1aa   : > { %v2824_v15 = vrot.slane %v2822_v42, 3  ;;  %v2827_v49 = vrot.slane %v2825_v9, 4  ;;  %v7303_v58 = vor.u32 %v1917_v38, %v1914_v14  ;;  %3836 = vmatpush.bf16.msra.mxu0 %v5339_v44  ;;  %v3489_v40 = vunpack.c.l.b16 %v3438_v16  ;;  %v7321_v39 = vpop.f32.mrf.mxu1  ;;  %v1279_v42 = vld [vmem:[#allocation2 + $0x34] sm:$0xf]  ;;  %v5320_v9 = vld [vmem:[%s7938_s4 + $0x168] sm:$0xff]  ;;  %4114 = vmatpush.bf16.msra.mxu3 %v5352_v0 }
 0x1ab   : > { %3658 = vmatpush.bf16.msrb.mxu2 %v5331_v10  ;;  %vm8170_vm8 = vsmask.f32 7424  ;;  %v3507_v14 = vpack.c.b16 %v3492_v43, %v3491_v35  ;;  %3358 = vmatpush.bf16.msrb.mxu1 %v5320_v9  ;;  %v2831_v3 = vshrl.u32 %v2758_v34, 16  ;;  %v3426_v43 = vld [vmem:[#allocation2 + $0x24] sm:$0xf]  ;;  %v1642_v29 = vsel %vm7220_vm1, %v1280_v60, 0 }
 0x1ac   : > { %v7305_v6 = vor.u32 %v2827_v49, %v2824_v15  ;;  %v1919_v8 = vsel %vm8169_vm3, %v7201_v30, %v7303_v58  ;;  %v1641_v30 = vsel %vm7126_vm12, %v1279_v42, 0  ;;  %v2543_v26 = vsel %vm8170_vm8, %v2538_v13, %v2542_v56  ;;  %v5294_v0 = vld [vmem:[#allocation2 + $0x24] sm:$0xff]  ;;  %vm8177_vm8 = vmmov %vm8173_vm5 }
 0x1ad   : > { %v1853_v44 = vunpack.c.l.b16 %v1641_v30  ;;  %v2834_v15 = vshll.u32 %v2758_v34, 16  ;;  %v3506_v49 = vpack.c.b16 %v3490_v54, %v3489_v40  ;;  %v3524_v33 = vshrl.u32 %v3507_v14, 16 }
 0x1ae   : > { %v2829_v57 = vsel %vm8168_vm13, %v7183_v18, %v7305_v6  ;;  %v1640_v18 = vsel %vm7107_vm4, %v1278_v7, 0  ;;  %v3527_v1 = vshll.u32 %v3507_v14, 16  ;;  %v2833_v16 = vrot.slane %v2831_v3, 3  ;;  %vm8175_vm13 = vmmov %vm8169_vm3 }
 0x1af   : > { %2933 = vmatmul.bf16.gmra.mxu0 %v2829_v57  ;;  %2031 = vmatmul.bf16.gmra.mxu1 %v1919_v8  ;;  %v1852_v38 = vunpack.c.l.b16 %v1640_v18  ;;  %v2836_v2 = vrot.slane %v2834_v15, 4  ;;  %v3516_v57 = vshrl.u32 %v3506_v49, 16  ;;  %v3519_v8 = vshll.u32 %v3506_v49, 16  ;;  %v1281_v49 = vld [vmem:[#allocation2 + $0x3c] sm:$0xf] }
 0x1b0   : > { %v3526_v7 = vrot.slane %v3524_v33, 3  ;;  %v3529_v42 = vrot.slane %v3527_v1, 4  ;;  %v3442_v40 = vsel %vm8171_vm10, %v3425_v51, 0  ;;  %v3443_v54 = vsel %vm8172_vm6, %v3426_v43, 0  ;;  %v5319_v33 = vld [vmem:[%s7938_s4 + $0x160] sm:$0xff] }
 0x1b1   : > { %v1863_v22 = vpack.c.b16 %v1853_v44, %v1852_v38  ;;  %v2837_v34 = vor.u32 %v2836_v2, %v2833_v16  ;;  %v3518_v18 = vrot.slane %v3516_v57, 3  ;;  %v3521_v30 = vrot.slane %v3519_v8, 4  ;;  %3359 = vmatpush.bf16.msrb.mxu1 %v5319_v33 }
 0x1b2   : > { %2643 = vmatmul.bf16.gmra.mxu2 %v2543_v26  ;;  %v7334_v56 = vpop.f32.mrf.mxu1  ;;  %v3530_v26 = vor.u32 %v3529_v42, %v3526_v7  ;;  %v3493_v14 = vunpack.c.l.b16 %v3442_v40  ;;  %v3494_v38 = vunpack.c.l.b16 %v3443_v54  ;;  %v3427_v42 = vld [vmem:[#allocation2 + $0x28] sm:$0xf]  ;;  %vm8176_vm3 = vnez %v8104_v47  ;;  %v5318_v47 = vld [vmem:[%s7938_s4 + $0x158] sm:$0xff] }
 0x1b3   : > { %v1921_v61 = vshrl.u32 %v1863_v22, 16  ;;  %v1924_v10 = vshll.u32 %v1863_v22, 16  ;;  %v2838_v44 = vsel %vm8173_vm5, %v7305_v6, %v2837_v34  ;;  %v3522_v15 = vor.u32 %v3521_v30, %v3518_v18  ;;  %v3428_v34 = vld [vmem:[#allocation2 + $0x2c] sm:$0xf] }
 0x1b4   : > { %v1643_v22 = vsel %vm7266_vm0, %v1281_v49, 0  ;;  %v3508_v1 = vpack.c.b16 %v3494_v38, %v3493_v14  ;;  %v3445_v14 = vsel %vm8176_vm3, %v3428_v34, 0  ;;  %vm8179_vm10 = vnez %v8057_v12  ;;  %vm8186_vm3 = vmmov %vm8177_vm8  ;;  %v5326_v12 = vld [vmem:[#allocation2 + $0x2c] sm:$0xff] }
 0x1b5   : > { %v1923_v13 = vrot.slane %v1921_v61, 3  ;;  %v1926_v35 = vrot.slane %v1924_v10, 4  ;;  %v3531_v6 = vsel %vm8175_vm13, %v3522_v15, %v3530_v26  ;;  %v1854_v61 = vunpack.c.l.b16 %v1642_v29  ;;  %v5323_v15 = vld [vmem:[#allocation2 + $0x14] sm:$0xff]  ;;  %3360 = vmatpush.bf16.msrb.mxu1 %v5318_v47  ;;  %vm8185_vm13 = vmmov %vm8177_vm8 }
 0x1b6   : > { %v1855_v10 = vunpack.c.l.b16 %v1643_v22  ;;  %v3533_v51 = vshrl.u32 %v3508_v1, 16  ;;  %v3536_v57 = vshll.u32 %v3508_v1, 16  ;;  %v3496_v29 = vunpack.c.l.b16 %v3445_v14  ;;  %v3141_v14 = vld [vmem:[#allocation2 + $0x18] sm:$0xf] }
 0x1b7   : > { %v1927_v9 = vor.u32 %v1926_v35, %v1923_v13  ;;  %v1282_v35 = vld [vmem:[#allocation2 + $0x40] sm:$0xf]  ;;  %vm8181_vm6 = vnez %v8112_v17 }
 0x1b8   : > { %3096 = vmatmul.bf16.gmra.mxu3 %v5294_v0  ;;  %v1864_v2 = vpack.c.b16 %v1855_v10, %v1854_v61  ;;  %v3535_v40 = vrot.slane %v3533_v51, 3  ;;  %v3538_v54 = vrot.slane %v3536_v57, 4  ;;  %v1644_v18 = vsel %vm7278_vm15, %v1282_v35, 0  ;;  %v3138_v35 = vld [vmem:[#allocation2 + $0xc] sm:$0xf] }
 0x1b9   : > { %v1928_v3 = vsel %vm8174_vm14, %v7303_v58, %v1927_v9  ;;  %v5351_v58 = vld [vmem:[%s7938_s4 + $0x220] sm:$0xff]  ;;  %v3444_v0 = vsel %vm8130_vm9, %v3427_v42, 0  ;;  %vm8178_vm9 = vmmov %vm8173_vm5  ;;  %v3430_v42 = vld [vmem:[#allocation2 + $0x34] sm:$0xf]  ;;  %vm8182_vm5 = vnez %v8055_v27  ;;  %vm8183_vm14 = vnez %v8061_v53 }
 0x1ba   : > { %v7355_v16 = vpop.f32.mrf.mxu1  ;;  %4115 = vmatpush.bf16.msra.mxu3 %v5351_v58  ;;  %v1930_v8 = vshrl.u32 %v1864_v2, 16  ;;  %v1933_v13 = vshll.u32 %v1864_v2, 16  ;;  %v7367_v60 = vor.u32 %v3538_v54, %v3535_v40  ;;  %v3495_v49 = vunpack.c.l.b16 %v3444_v0  ;;  %v5350_v58 = vld [vmem:[%s7938_s4 + $0x218] sm:$0xff]  ;;  %v3139_v2 = vld [vmem:[#allocation2 + $0x10] sm:$0xf]  ;;  %v5316_v0 = vld [vmem:[%s7938_s4 + $0x148] sm:$0xff] }
 0x1bb   : > { %v3156_v34 = vsel %vm8179_vm10, %v3139_v2, 0  ;;  %v3447_v47 = vsel %vm8181_vm6, %v3430_v42, 0  ;;  %v3158_v21 = vsel %vm8183_vm14, %v3141_v14, 0  ;;  %v5347_v53 = vld [vmem:[%s7938_s4 + $0x200] sm:$0xff]  ;;  %vm8195_vm6 = vnez %v8107_v11 }
 0x1bc   : > { %v1932_v43 = vrot.slane %v1930_v8, 3  ;;  %v1935_v7 = vrot.slane %v1933_v13, 4  ;;  %v3509_v1 = vpack.c.b16 %v3496_v29, %v3495_v49  ;;  %v7384_v8 = vpop.f32.mrf.mxu3  ;;  %v3140_v29 = vld [vmem:[#allocation2 + $0x14] sm:$0xf] }
 0x1be   : > { %v7359_v30 = vor.u32 %v1935_v7, %v1932_v43  ;;  %4116 = vmatpush.bf16.msra.mxu3 %v5350_v58  ;;  %v3542_v51 = vshrl.u32 %v3509_v1, 16  ;;  %v3545_v57 = vshll.u32 %v3509_v1, 16  ;;  %v3436_v43 = vld [vmem:[#allocation2 + $0x4c] sm:$0xf]  ;;  %v3429_v7 = vld [vmem:[#allocation2 + $0x30] sm:$0xf] }
 0x1bf   : > { %2938 = vmatmul.bf16.gmra.mxu0 %v2838_v44  ;;  %2036 = vmatmul.bf16.gmra.mxu1 %v1928_v3  ;;  %v1856_v44 = vunpack.c.l.b16 %v1644_v18  ;;  %v5295_v3 = vld [vmem:[#allocation2 + $0x2c] sm:$0xff]  ;;  %v3155_v58 = vsel %vm8182_vm5, %v3138_v35, 0 }
 0x1c0   : > { %v1937_v22 = vsel %vm8177_vm8, %v1927_v9, %v7359_v30  ;;  %v5317_v9 = vld [vmem:[%s7938_s4 + $0x150] sm:$0xff]  ;;  %v3547_v49 = vrot.slane %v3545_v57, 4  ;;  %v3206_v57 = vunpack.c.l.b16 %v3155_v58  ;;  %v7432_v58 = vpop.f32.mrf.mxu0  ;;  %vm8187_vm8 = vnez %v8077_v46 }
 0x1c1   : > { %v1865_v33 = vpack.c.b16 %v1856_v44, %v1856_v44  ;;  %3361 = vmatpush.bf16.msrb.mxu1 %v5317_v9  ;;  %v3453_v44 = vsel %vm7266_vm0, %v3436_v43, 0  ;;  %vm8184_vm0 = vnez %v8059_v59  ;;  %v5315_v43 = vld [vmem:[%s7938_s4 + $0x140] sm:$0xff] }
 0x1c2   : > { %3659 = vmatmul.bf16.vlgmr.msrb.gmra.mxu2 %v3531_v6  ;;  %v7365_v38 = vpop.f32.mrf.mxu1  ;;  %v3540_v6 = vsel %vm8178_vm9, %v3530_v26, %v7367_v60  ;;  %v3435_v26 = vld [vmem:[#allocation2 + $0x48] sm:$0xf]  ;;  %vm8188_vm9 = vnez %v8075_v5 }
 0x1c3   : > { %v1939_v61 = vshrl.u32 %v1865_v33, 16  ;;  %v1942_v10 = vshll.u32 %v1865_v33, 16  ;;  %v3452_v40 = vsel %vm7220_vm1, %v3435_v26, 0  ;;  %v7397_v33 = vpop.f32.mrf.mxu2  ;;  %vm8180_vm1 = vnez %v8110_v31 }
 0x1c4   : > { %v3446_v32 = vsel %vm8180_vm1, %v3429_v7, 0  ;;  %v3209_v26 = vunpack.c.l.b16 %v3158_v21  ;;  %v7413_v35 = vpop.f32.mrf.mxu3  ;;  %vm8191_vm1 = vnez %v8091_v36 }
 0x1c5   : > { %v1941_v54 = vrot.slane %v1939_v61, 3  ;;  %v1944_v18 = vrot.slane %v1942_v10, 4  ;;  %3362 = vmatpush.bf16.msrb.mxu1 %v5316_v0  ;;  %v3157_v61 = vsel %vm8184_vm0, %v3140_v29, 0  ;;  %v5324_v10 = vld [vmem:[#allocation2 + $0x1c] sm:$0xff]  ;;  %v3497_v31 = vunpack.c.l.b16 %v3446_v32  ;;  %v3431_v32 = vld [vmem:[#allocation2 + $0x38] sm:$0xf] }
 0x1c7   : > { %v1945_v9 = vor.u32 %v1944_v18, %v1941_v54  ;;  %v5349_v54 = vld [vmem:[%s7938_s4 + $0x210] sm:$0xff] }
 0x1c8   : > { %3101 = vmatmul.bf16.gmra.mxu3 %v5295_v3  ;;  %v3503_v3 = vunpack.c.l.b16 %v3452_v40  ;;  %v5296_v40 = vld [vmem:[#allocation2 + $0x34] sm:$0xff] }
 0x1c9   : > { %v1946_v17 = vsel %vm8185_vm13, %v7359_v30, %v1945_v9  ;;  %3363 = vmatpush.bf16.msrb.mxu1 %v5315_v43  ;;  %4117 = vmatpush.bf16.msra.mxu3 %v5349_v54  ;;  %v3142_v9 = vld [vmem:[#allocation2 + $0x1c] sm:$0xf] }
 0x1ca   : > { %v7386_v13 = vpop.f32.mrf.mxu1 }
 0x1cf   : > { %3837 = vmatmul.bf16.vlgmr.msra.gmra.mxu0 %v5323_v15  ;;  %2041 = vmatmul.bf16.gmra.mxu1 %v1937_v22  ;;  %v3544_v15 = vrot.slane %v3542_v51, 3  ;;  %v3504_v22 = vunpack.c.l.b16 %v3453_v44  ;;  %v3498_v51 = vunpack.c.l.b16 %v3447_v47  ;;  %v7427_v44 = vpop.f32.mrf.mxu2  ;;  %v3432_v47 = vld [vmem:[#allocation2 + $0x3c] sm:$0xf] }
 0x1d1   : > { %v7407_v1 = vpack.c.b16 %v3504_v22, %v3503_v3  ;;  %v3548_v2 = vor.u32 %v3547_v49, %v3544_v15  ;;  %v3510_v18 = vpack.c.b16 %v3498_v51, %v3497_v31  ;;  %v7430_v22 = vpop.f32.mrf.mxu3  ;;  %v3448_v51 = vsel %vm7015_vm2, %v3431_v32, 0 }
 0x1d2   : > { %3664 = vmatmul.bf16.gmra.mxu2 %v3540_v6  ;;  %v3207_v6 = vunpack.c.l.b16 %v3156_v34  ;;  %v7418_v42 = vpop.f32.mrf.mxu1  ;;  %v3208_v34 = vunpack.c.l.b16 %v3157_v61  ;;  %v3499_v25 = vunpack.c.l.b16 %v3448_v51  ;;  %vm8189_vm2 = vsmask.f32 7424 }
 0x1d3   : > { %v3549_v30 = vsel %vm8186_vm3, %v7367_v60, %v3548_v2  ;;  %v3551_v3 = vshrl.u32 %v3510_v18, 16  ;;  %v3554_v15 = vshll.u32 %v3510_v18, 16  ;;  %v3143_v60 = vld [vmem:[#allocation2 + $0x20] sm:$0xf]  ;;  %vm8199_vm13 = vmmov %vm8189_vm2 }
 0x1d4   : > { %v3223_v7 = vpack.c.b16 %v3207_v6, %v3206_v57  ;;  %v7425_v0 = vpack.c.b16 %v3209_v26, %v3208_v34  ;;  %v3449_v57 = vsel %vm7040_vm7, %v3432_v47, 0  ;;  %v3160_v26 = vsel %vm8187_vm8, %v3143_v60, 0  ;;  %vm8190_vm7 = vmmov %vm8186_vm3  ;;  %v7460_v60 = vpop.f32.mrf.mxu0 }
 0x1d5   : > { %v3553_v21 = vrot.slane %v3551_v3, 3  ;;  %v3556_v6 = vrot.slane %v3554_v15, 4  ;;  %v3159_v34 = vsel %vm8188_vm9, %v3142_v9, 0  ;;  %v5297_v15 = vld [vmem:[#allocation2 + $0x3c] sm:$0xff] }
 0x1d6   : > { %v3235_v14 = vshll.u32 %v3223_v7, 16  ;;  %v3240_v49 = vshll.u32 %v7425_v0, 16  ;;  %v3210_v3 = vunpack.c.l.b16 %v3159_v34 }
 0x1d7   : > { %v7443_v54 = vor.u32 %v3556_v6, %v3553_v21  ;;  %v7448_v18 = vpop.f32.mrf.mxu2 }
 0x1d8   : > { %3106 = vmatmul.bf16.gmra.mxu3 %v5296_v40  ;;  %v3237_v29 = vrot.slane %v3235_v14, 1  ;;  %v3242_v31 = vrot.slane %v3240_v49, 1  ;;  %v5325_v40 = vld [vmem:[#allocation2 + $0x24] sm:$0xff] }
 0x1d9   : > { %v7451_v14 = vpop.f32.mrf.mxu3  ;;  %v5348_v49 = vld [vmem:[%s7938_s4 + $0x208] sm:$0xff] }
 0x1da   : > { %4118 = vmatpush.bf16.msra.mxu3 %v5348_v49  ;;  %v3897_v49 = vld [vmem:[#allocation2 + $0x20] sm:$0xf] }
 0x1db   : > { %v3914_v27 = vsel %vm8183_vm14, %v3897_v49, 0  ;;  %vm8197_vm14 = vmmov %vm8189_vm2 }
 0x1de   : > { %4119 = vmatpush.bf16.msra.mxu3 %v5347_v53 }
 0x1df   : > { %3842 = vmatmul.bf16.gmra.mxu0 %v5324_v10  ;;  %2046 = vmatmul.bf16.gmra.mxu1 %v1946_v17  ;;  %v3233_v10 = vshrl.u32 %v3223_v7, 16 }
 0x1e1   : > { %v3238_v43 = vor.u32 %v3237_v29, %v3233_v10 }
 0x1e2   : > { %3669 = vmatmul.bf16.gmra.mxu2 %v3549_v30  ;;  %v3500_v30 = vunpack.c.l.b16 %v3449_v57  ;;  %v7469_v57 = vpop.f32.mrf.mxu2 }
 0x1e3   : > { %v3243_v23 = vsel %vm8189_vm2, %v3238_v43, %v3242_v31  ;;  %v7467_v51 = vpop.f32.mrf.mxu3 }
 0x1e4   : > { %v3511_v29 = vpack.c.b16 %v3500_v30, %v3499_v25  ;;  %v3434_v25 = vld [vmem:[#allocation2 + $0x44] sm:$0xf]  ;;  %v3244_v30 = vshrl.u32 %v7425_v0, 16 }
 0x1e6   : > { %v2012_v61 = vpop.f32.mrf.mxu1  ;;  %v3560_v9 = vshrl.u32 %v3511_v29, 16 }
 0x1e7   : > { %v2013_v17 = vadd.f32 %v2012_v61, %v7237_v50  ;;  %v3211_v50 = vunpack.c.l.b16 %v3160_v26  ;;  %v3563_v61 = vshll.u32 %v3511_v29, 16  ;;  %v3894_v26 = vld [vmem:[#allocation2 + $0x14] sm:$0xf] }
 0x1e8   : > { %3111 = vmatmul.bf16.gmra.mxu3 %v5297_v15  ;;  %v3562_v43 = vrot.slane %v3560_v9, 3  ;;  %v3911_v0 = vsel %vm8182_vm5, %v3894_v26, 0  ;;  %vm8196_vm5 = vnez %v8101_v28 }
 0x1e9   : > { %v7446_v7 = vadd.f32 %v7371_v52, %v2013_v17  ;;  %v3558_v52 = vsel %vm8190_vm7, %v3548_v2, %v7443_v54  ;;  %v7458_v47 = vpack.c.b16 %v3211_v50, %v3210_v3  ;;  %v3895_v2 = vld [vmem:[#allocation2 + $0x18] sm:$0xf]  ;;  %v3145_v17 = vld [vmem:[#allocation2 + $0x28] sm:$0xf]  ;;  %v3565_v34 = vrot.slane %v3563_v61, 4 }
 0x1ea   : > { %v3912_v50 = vsel %vm8179_vm10, %v3895_v2, 0  ;;  %v3162_v15 = vsel %vm8191_vm1, %v3145_v17, 0  ;;  %vm8192_vm10 = vnez %v8086_v62  ;;  %v3896_v61 = vld [vmem:[#allocation2 + $0x1c] sm:$0xf]  ;;  %vm8205_vm7 = vnez %v8132_v55 }
 0x1eb   : > { %v3248_v10 = vshll.u32 %v7458_v47, 16  ;;  %v7487_v9 = vor.u32 %v3565_v34, %v3562_v43  ;;  %v3963_v4 = vunpack.c.l.b16 %v3912_v50  ;;  %v7498_v26 = vpop.f32.mrf.mxu3  ;;  %v5298_v34 = vld [vmem:[#allocation2 + $0x44] sm:$0xff] }
 0x1ee   : > { %v2014_v32 = vpop.f32.mrf.mxu1 }
 0x1ef   : > { %3847 = vmatmul.bf16.gmra.mxu0 %v5325_v40  ;;  %3364 = vmatmul.bf16.vlgmr.msrb.gmra.mxu1 %v3243_v23  ;;  %v2015_v21 = vadd.f32 %v2014_v32, %v7293_v48  ;;  %v3433_v40 = vld [vmem:[#allocation2 + $0x40] sm:$0xf]  ;;  %v3144_v23 = vld [vmem:[#allocation2 + $0x24] sm:$0xf]  ;;  %v3451_v32 = vsel %vm7126_vm12, %v3434_v25, 0  ;;  %vm8194_vm12 = vmmov %vm8186_vm3 }
 0x1f0   : > { %v3450_v29 = vsel %vm7107_vm4, %v3433_v40, 0  ;;  %vm8193_vm4 = vmmov %vm8189_vm2  ;;  %v3502_v17 = vunpack.c.l.b16 %v3451_v32  ;;  %v3913_v40 = vsel %vm8184_vm0, %v3896_v61, 0  ;;  %v3567_v25 = vsel %vm8194_vm12, %v7443_v54, %v7487_v9 }
 0x1f1   : > { %v7464_v6 = vadd.f32 %v7397_v33, %v2015_v21  ;;  %v7472_v33 = vrot.slane %v3248_v10, 1  ;;  %v7485_v21 = vpop.f32.mrf.mxu0  ;;  %v3213_v10 = vunpack.c.l.b16 %v3162_v15  ;;  %v3501_v2 = vunpack.c.l.b16 %v3450_v29  ;;  %vm8198_vm0 = vmmov %vm8186_vm3 }
 0x1f2   : > { %3674 = vmatmul.bf16.gmra.mxu2 %v3558_v52  ;;  %v3246_v52 = vor.u32 %v3244_v30, %v3242_v31  ;;  %v3161_v31 = vsel %vm8192_vm10, %v3144_v23, 0  ;;  %v2621_v23 = vpop.f32.mrf.mxu2  ;;  %v3964_v49 = vunpack.c.l.b16 %v3913_v40  ;;  %vm8200_vm3 = vnez %v8120_v24 }
 0x1f3   : > { %v3212_v43 = vunpack.c.l.b16 %v3161_v31  ;;  %v3512_v59 = vpack.c.b16 %v3502_v17, %v3501_v2  ;;  %v3146_v2 = vld [vmem:[#allocation2 + $0x2c] sm:$0xf]  ;;  %v3899_v17 = vld [vmem:[#allocation2 + $0x28] sm:$0xf] }
 0x1f4   : > { %v3251_v20 = vsel %vm8193_vm4, %v3246_v52, %v7472_v33 }
 0x1f5   : > { %v3572_v31 = vshll.u32 %v3512_v59, 16 }
 0x1f7   : > { %v2017_v48 = vpop.f32.mrf.mxu1 }
 0x1f8   : > { %v2018_v3 = vadd.f32 %v2017_v48, %v7321_v39  ;;  %v3965_v48 = vunpack.c.l.b16 %v3914_v27  ;;  %3116 = vmatmul.bf16.gmra.mxu3 %v5298_v34  ;;  %v3252_v27 = vshrl.u32 %v7458_v47, 16  ;;  %v3163_v47 = vsel %vm8196_vm5, %v3146_v2, 0 }
 0x1f9   : > { %v7519_v61 = vpop.f32.mrf.mxu3 }
 0x1fa   : > { %v7490_v39 = vadd.f32 %v7427_v44, %v2018_v3  ;;  %v3962_v44 = vunpack.c.l.b16 %v3911_v0  ;;  %v7508_v3 = vpack.c.b16 %v3213_v10, %v3212_v43  ;;  %v7514_v54 = vpack.c.b16 %v3965_v48, %v3964_v49  ;;  %v7517_v0 = vpop.f32.mrf.mxu0 }
 0x1fb   : > { %v3574_v43 = vrot.slane %v3572_v31, 4  ;;  %v3254_v53 = vor.u32 %v3252_v27, %v7472_v33  ;;  %v3214_v31 = vunpack.c.l.b16 %v3163_v47  ;;  %v3149_v47 = vld [vmem:[#allocation2 + $0x38] sm:$0xf] }
 0x1fc   : > { %v3979_v30 = vpack.c.b16 %v3963_v4, %v3962_v44  ;;  %v3256_v32 = vshll.u32 %v7508_v3, 16  ;;  %v3147_v4 = vld [vmem:[#allocation2 + $0x30] sm:$0xf] }
 0x1fd   : > { %v3164_v40 = vsel %vm8195_vm6, %v3147_v4, 0 }
 0x1fe   : > { %v3991_v29 = vshll.u32 %v3979_v30, 16  ;;  %v3989_v48 = vshrl.u32 %v3979_v30, 16 }
 0x1ff   : > { %3852 = vmatmul.bf16.gmra.mxu0 %v5326_v12  ;;  %3369 = vmatmul.bf16.gmra.mxu1 %v3251_v20  ;;  %v2019_v50 = vpop.f32.mrf.mxu1  ;;  %v3569_v12 = vshrl.u32 %v3512_v59, 16 }
 0x200   : > { %v2020_v15 = vadd.f32 %v2019_v50, %v7334_v56  ;;  %v3993_v20 = vrot.slane %v3991_v29, 1  ;;  %v3996_v56 = vshll.u32 %v7514_v54, 16  ;;  %v3898_v50 = vld [vmem:[#allocation2 + $0x24] sm:$0xf] }
 0x201   : > { %v3571_v44 = vrot.slane %v3569_v12, 3  ;;  %v7537_v33 = vpop.f32.mrf.mxu3 }
 0x202   : > { %3679 = vmatmul.bf16.gmra.mxu2 %v3567_v25  ;;  %v7512_v52 = vadd.f32 %v7448_v18, %v2020_v15  ;;  %v3258_v18 = vrot.slane %v3256_v32, 1  ;;  %v7526_v25 = vpop.f32.mrf.mxu2  ;;  %v5327_v15 = vld [vmem:[#allocation2 + $0x34] sm:$0xff]  ;;  %v3998_v49 = vrot.slane %v3996_v56, 1  ;;  %v3215_v32 = vunpack.c.l.b16 %v3164_v40 }
 0x203   : > { %v3575_v12 = vor.u32 %v3574_v43, %v3571_v44  ;;  %v3994_v30 = vor.u32 %v3993_v20, %v3989_v48  ;;  %v3578_v43 = vshrl.u32 %v7407_v1, 16 }
 0x204   : > { %v3259_v29 = vsel %vm8197_vm14, %v3254_v53, %v3258_v18  ;;  %v7546_v2 = vpack.c.b16 %v3215_v32, %v3214_v31  ;;  %v2944_v53 = vadd.f32 %v7432_v58, %v7446_v7  ;;  %v3166_v58 = vsel %vm8200_vm3, %v3149_v47, 0  ;;  %v3901_v7 = vld [vmem:[#allocation2 + $0x30] sm:$0xf] }
 0x205   : > { %v3576_v46 = vsel %vm8198_vm0, %v7487_v9, %v3575_v12  ;;  %v3999_v56 = vsel %vm8199_vm13, %v3994_v30, %v3998_v49  ;;  %v3148_v30 = vld [vmem:[#allocation2 + $0x34] sm:$0xf] }
 0x206   : > { %v3264_v9 = vshll.u32 %v7546_v2, 16 }
 0x208   : > { %4120 = vmatmul.bf16.vlgmr.msra.gmra.mxu3 %v3999_v56  ;;  %v3266_v32 = vrot.slane %v3264_v9, 1  ;;  %v3217_v9 = vunpack.c.l.b16 %v3166_v58 }
 0x209   : > { %v2022_v10 = vpop.f32.mrf.mxu1 }
 0x20a   : > { %v2023_v34 = vadd.f32 %v2022_v10, %v7355_v16  ;;  %v3916_v16 = vsel %vm8187_vm8, %v3899_v17, 0  ;;  %v7541_v10 = vpop.f32.mrf.mxu0  ;;  %v2626_v40 = vpop.f32.mrf.mxu2  ;;  %vm8202_vm8 = vmmov %vm8189_vm2 }
 0x20b   : > { %v3967_v4 = vunpack.c.l.b16 %v3916_v16  ;;  %v3082_v48 = vpop.f32.mrf.mxu3  ;;  %v3580_v16 = vrot.slane %v3578_v43, 3  ;;  %v3900_v43 = vld [vmem:[#allocation2 + $0x2c] sm:$0xf] }
 0x20c   : > { %v7530_v59 = vadd.f32 %v7469_v57, %v2023_v34  ;;  %v3915_v57 = vsel %vm8188_vm9, %v3898_v50, 0  ;;  %v3581_v34 = vshll.u32 %v7407_v1, 16  ;;  %v3437_v50 = vld [vmem:[#allocation2 + $0x50] sm:$0xf]  ;;  %vm8203_vm9 = vmmov %vm8189_vm2 }
 0x20d   : > { %v3966_v17 = vunpack.c.l.b16 %v3915_v57  ;;  %v3454_v1 = vsel %vm7278_vm15, %v3437_v50, 0  ;;  %vm8201_vm15 = vnez %v8116_v63  ;;  %vm8204_vm2 = vmmov %vm8198_vm0 }
 0x20e   : > { %v3505_v45 = vunpack.c.l.b16 %v3454_v1  ;;  %v2948_v28 = vadd.f32 %v7541_v10, %v7530_v59  ;;  %v5330_v59 = vld [vmem:[#allocation2 + $0x4c] sm:$0xff] }
 0x20f   : > { %3857 = vmatmul.bf16.gmra.mxu0 %v5327_v15  ;;  %3374 = vmatmul.bf16.gmra.mxu1 %v3259_v29  ;;  %v7549_v44 = vpack.c.b16 %v3967_v4, %v3966_v17  ;;  %v7558_v15 = vadd.f32 %v3082_v48, %v2944_v53  ;;  %v3260_v29 = vshrl.u32 %v7508_v3, 16 }
 0x211   : > { %v2024_v27 = vpop.f32.mrf.mxu1  ;;  %v3262_v4 = vor.u32 %v3260_v29, %v3258_v18  ;;  %v3918_v18 = vsel %vm8191_vm1, %v3901_v7, 0  ;;  %vm8206_vm1 = vmmov %vm8193_vm4 }
 0x212   : > { %3684 = vmatmul.bf16.gmra.mxu2 %v3576_v46  ;;  %v2025_v20 = vadd.f32 %v2024_v27, %v7365_v38  ;;  %v4004_v38 = vshll.u32 %v7549_v44, 16  ;;  %v7564_v57 = vpop.f32.mrf.mxu0  ;;  %v4000_v46 = vshrl.u32 %v7514_v54, 16  ;;  %v5328_v27 = vld [vmem:[#allocation2 + $0x3c] sm:$0xff]  ;;  %v2629_v50 = vpop.f32.mrf.mxu2  ;;  %vm8208_vm4 = vmmov %vm8198_vm0 }
 0x213   : > { %v3084_v48 = vpop.f32.mrf.mxu3  ;;  %vm8209_vm12 = vmmov %vm8206_vm1 }
 0x214   : > { %v7551_v5 = vadd.f32 %v2621_v23, %v2025_v20  ;;  %v3583_v23 = vrot.slane %v3581_v34, 4  ;;  %v7569_v56 = vrot.slane %v4004_v38, 1  ;;  %v3165_v20 = vsel %vm8201_vm15, %v3148_v30, 0  ;;  %vm8213_vm14 = vmmov %vm8206_vm1 }
 0x215   : > { %v3267_v34 = vsel %vm8202_vm8, %v3262_v4, %v3266_v32  ;;  %v4002_v53 = vor.u32 %v4000_v46, %v3998_v49  ;;  %v3216_v47 = vunpack.c.l.b16 %v3165_v20  ;;  %v3917_v49 = vsel %vm8192_vm10, %v3900_v43, 0  ;;  %vm8214_vm0 = vmmov %vm8206_vm1 }
 0x216   : > { %v7571_v17 = vor.u32 %v3583_v23, %v3580_v16  ;;  %v3514_v16 = vpack.c.b16 %v3505_v45, %v3505_v45  ;;  %vm8207_vm10 = vnez %v8135_v19  ;;  %vm8215_vm13 = vmmov %vm8214_vm0 }
 0x217   : > { %v4007_v38 = vsel %vm8203_vm9, %v4002_v53, %v7569_v56  ;;  %v7592_v29 = vpack.c.b16 %v3217_v9, %v3216_v47  ;;  %v3150_v9 = vld [vmem:[#allocation2 + $0x3c] sm:$0xf]  ;;  %v3903_v53 = vld [vmem:[#allocation2 + $0x38] sm:$0xf]  ;;  %vm8218_vm8 = vmmov %vm8214_vm0 }
 0x218   : > { %v3585_v36 = vsel %vm8204_vm2, %v3575_v12, %v7571_v17  ;;  %4125 = vmatmul.bf16.gmra.mxu3 %v4007_v38  ;;  %v3587_v58 = vshrl.u32 %v3514_v16, 16  ;;  %v3590_v62 = vshll.u32 %v3514_v16, 16  ;;  %v3167_v38 = vsel %vm8205_vm7, %v3150_v9, 0  ;;  %vm8219_vm9 = vmmov %vm8214_vm0 }
 0x219   : > { %v3272_v12 = vshll.u32 %v7592_v29, 16  ;;  %vm8220_vm2 = vmmov %vm8214_vm0 }
 0x21a   : > { %v7594_v1 = vpop.f32.mrf.mxu0  ;;  %v3592_v45 = vrot.slane %v3590_v62, 4  ;;  %v2631_v43 = vpop.f32.mrf.mxu2 }
 0x21b   : > { %v3087_v46 = vpop.f32.mrf.mxu3 }
 0x21c   : > { %v2027_v31 = vpop.f32.mrf.mxu1 }
 0x21d   : > { %v2028_v3 = vadd.f32 %v2027_v31, %v7386_v13  ;;  %v2945_v13 = vadd.f32 %v7460_v60, %v7464_v6  ;;  %v3968_v60 = vunpack.c.l.b16 %v3917_v49  ;;  %v2946_v31 = vadd.f32 %v7485_v21, %v7490_v39  ;;  %v5329_v39 = vld [vmem:[#allocation2 + $0x44] sm:$0xff] }
 0x21e   : > { %v4008_v21 = vshrl.u32 %v7549_v44, 16 }
 0x21f   : > { %3862 = vmatmul.bf16.gmra.mxu0 %v5328_v27  ;;  %v7580_v54 = vadd.f32 %v7526_v25, %v2028_v3  ;;  %3379 = vmatmul.bf16.gmra.mxu1 %v3267_v34  ;;  %v7590_v23 = vadd.f32 %v3084_v48, %v2945_v13  ;;  %v3969_v25 = vunpack.c.l.b16 %v3918_v18  ;;  %v7604_v27 = vadd.f32 %v3087_v46, %v2946_v31  ;;  %v3151_v48 = vld [vmem:[#allocation2 + $0x40] sm:$0xf] }
 0x220   : > { %v3589_v3 = vrot.slane %v3587_v58, 3  ;;  %v3274_v34 = vrot.slane %v3272_v12, 1  ;;  %v3218_v58 = vunpack.c.l.b16 %v3167_v38 }
 0x221   : > { %v7597_v7 = vpack.c.b16 %v3969_v25, %v3968_v60  ;;  %v3168_v60 = vsel %vm8207_vm10, %v3151_v48, 0 }
 0x222   : > { %3689 = vmatmul.bf16.gmra.mxu2 %v3585_v36  ;;  %v3902_v36 = vld [vmem:[#allocation2 + $0x34] sm:$0xf]  ;;  %v7617_v25 = vpop.f32.mrf.mxu0  ;;  %v3219_v62 = vunpack.c.l.b16 %v3168_v60  ;;  %v2634_v31 = vpop.f32.mrf.mxu2 }
 0x223   : > { %v4012_v20 = vshll.u32 %v7597_v7, 16 }
 0x224   : > { %v2029_v6 = vpop.f32.mrf.mxu1 }
 0x225   : > { %v2030_v30 = vadd.f32 %v2029_v6, %v7418_v42  ;;  %v3268_v42 = vshrl.u32 %v7546_v2, 16  ;;  %v4014_v49 = vrot.slane %v4012_v20, 1  ;;  %v2947_v2 = vadd.f32 %v7517_v0, %v7512_v52 }
 0x226   : > { %v4010_v6 = vor.u32 %v4008_v21, %v7569_v56  ;;  %v3919_v52 = vsel %vm8196_vm5, %v3902_v36, 0  ;;  %vm8212_vm5 = vnez %v8150_v41 }
 0x227   : > { %v7602_v4 = vadd.f32 %v2626_v40, %v2030_v30  ;;  %v3270_v13 = vor.u32 %v3268_v42, %v3266_v32  ;;  %v3593_v40 = vor.u32 %v3592_v45, %v3589_v3  ;;  %v3920_v32 = vsel %vm8195_vm6, %v3903_v53, 0 }
 0x228   : > { %v4015_v0 = vsel %vm8209_vm12, %v4010_v6, %v4014_v49  ;;  %v3970_v12 = vunpack.c.l.b16 %v3919_v52  ;;  %v3229_v3 = vpack.c.b16 %v3219_v62, %v3218_v58  ;;  %vm8221_vm12 = vcmask 31744  }
 0x229   : > { %v3275_v16 = vsel %vm8206_vm1, %v3270_v13, %v3274_v34  ;;  %v3594_v11 = vsel %vm8208_vm4, %v7571_v17, %v3593_v40  ;;  %4130 = vmatmul.bf16.gmra.mxu3 %v4015_v0  ;;  %v3276_v17 = vshrl.u32 %v7592_v29, 16  ;;  %v3152_v13 = vld [vmem:[#allocation2 + $0x44] sm:$0xf] }
 0x22a   : > { %v3280_v9 = vshll.u32 %v3229_v3, 16 }
 0x22b   : > { %v3278_v21 = vor.u32 %v3276_v17, %v3274_v34  ;;  %v2949_v34 = vadd.f32 %v7564_v57, %v7551_v5  ;;  %v3284_v17 = vshrl.u32 %v3229_v3, 16 }
 0x22c   : > { %v2032_v18 = vpop.f32.mrf.mxu1 }
 0x22d   : > { %v2033_v47 = vadd.f32 %v2032_v18, %v7384_v8  ;;  %v3089_v8 = vpop.f32.mrf.mxu3  ;;  %v7639_v18 = vpop.f32.mrf.mxu0 }
 0x22e   : > { %v7624_v30 = vadd.f32 %v3089_v8, %v2947_v2  ;;  %v2636_v2 = vpop.f32.mrf.mxu2 }
 0x22f   : > { %3867 = vmatmul.bf16.gmra.mxu0 %v5329_v39  ;;  %v7619_v44 = vadd.f32 %v2629_v50, %v2033_v47  ;;  %3384 = vmatmul.bf16.gmra.mxu1 %v3275_v16  ;;  %v3971_v50 = vunpack.c.l.b16 %v3920_v32  ;;  %v3153_v39 = vld [vmem:[#allocation2 + $0x48] sm:$0xf]  ;;  %v8210_v47 = vld [vmem:[#allocation3_spill] sm:$0xff] }
 0x230   : > { %vm8211_vm6 = vnez %v8210_v47  ;;  %v3170_v29 = vsel %vm8212_vm5, %v3153_v39, 0  ;;  %v3904_v16 = vld [vmem:[#allocation2 + $0x3c] sm:$0xf] }
 0x231   : > { %v3983_v45 = vpack.c.b16 %v3971_v50, %v3970_v12  ;;  %v3169_v38 = vsel %vm8211_vm6, %v3152_v13, 0  ;;  %v3154_v13 = vld [vmem:[#allocation2 + $0x4c] sm:$0x1] }
 0x232   : > { %3694 = vmatmul.bf16.gmra.mxu2 %v3594_v11  ;;  %v3220_v52 = vunpack.c.l.b16 %v3169_v38  ;;  %v3221_v11 = vunpack.c.l.b16 %v3170_v29  ;;  %v3907_v29 = vld [vmem:[#allocation2 + $0x48] sm:$0xf] }
 0x233   : > { %v4020_v48 = vshll.u32 %v3983_v45, 16  ;;  %v4024_v39 = vshrl.u32 %v3983_v45, 16 }
 0x234   : > { %v2034_v46 = vpop.f32.mrf.mxu1  ;;  %v3230_v12 = vpack.c.b16 %v3221_v11, %v3220_v52 }
 0x235   : > { %v2035_v56 = vadd.f32 %v2034_v46, %v7413_v35  ;;  %v3092_v42 = vpop.f32.mrf.mxu3  ;;  %v3282_v35 = vrot.slane %v3280_v9, 1  ;;  %v4022_v36 = vrot.slane %v4020_v48, 1  ;;  %v7659_v57 = vpop.f32.mrf.mxu0  ;;  %v2950_v46 = vadd.f32 %v7594_v1, %v7580_v54 }
 0x236   : > { %v7637_v53 = vadd.f32 %v3092_v42, %v2948_v28  ;;  %v2639_v42 = vpop.f32.mrf.mxu2  ;;  %v3288_v9 = vshll.u32 %v3230_v12, 16  ;;  %v3292_v11 = vshrl.u32 %v3230_v12, 16 }
 0x237   : > { %v7634_v20 = vadd.f32 %v2631_v43, %v2035_v56  ;;  %v4016_v43 = vshrl.u32 %v7597_v7, 16  ;;  %v3283_v32 = vsel %vm8213_vm14, %v3278_v21, %v3282_v35  ;;  %v3921_v7 = vsel %vm8201_vm15, %v3904_v16, 0  ;;  %vm8217_vm15 = vmmov %vm8214_vm0 }
 0x238   : > { %v3972_v50 = vunpack.c.l.b16 %v3921_v7  ;;  %v3286_v48 = vor.u32 %v3284_v17, %v3282_v35  ;;  %v3171_v21 = vsel %vm7213_vm11, %v3154_v13, 0  ;;  %v3290_v38 = vrot.slane %v3288_v9, 1  ;;  %v3909_v17 = vld [vmem:[#allocation2 + $0x50] sm:$0xf] }
 0x239   : > { %v4018_v6 = vor.u32 %v4016_v43, %v4014_v49  ;;  %v4026_v1 = vor.u32 %v4024_v39, %v4022_v36  ;;  %v2951_v43 = vadd.f32 %v7617_v25, %v7602_v4  ;;  %v3222_v16 = vunpack.c.l.b16 %v3171_v21 }
 0x23a   : > { %v3291_v3 = vsel %vm8215_vm13, %v3286_v48, %v3290_v38  ;;  %v3926_v21 = vsel %vm8212_vm5, %v3909_v17, 0  ;;  %vm8222_vm13 = vmmov %vm8221_vm12 }
 0x23b   : > { %v4023_v0 = vsel %vm8214_vm0, %v4018_v6, %v4022_v36  ;;  %v3231_v6 = vpack.c.b16 %v3222_v16, %v3222_v16 }
 0x23c   : > { %v2037_v40 = vpop.f32.mrf.mxu1  ;;  %4135 = vmatmul.bf16.gmra.mxu3 %v4023_v0  ;;  %v2952_v0 = vadd.f32 %v7639_v18, %v7619_v44  ;;  %v2953_v44 = vadd.f32 %v7659_v57, %v7634_v20 }
 0x23d   : > { %v2038_v10 = vadd.f32 %v2037_v40, %v7430_v22  ;;  %v3094_v60 = vpop.f32.mrf.mxu3  ;;  %v3905_v22 = vld [vmem:[#allocation2 + $0x40] sm:$0xf]  ;;  %v3296_v7 = vshll.u32 %v3231_v6, 16 }
 0x23e   : > { %v7652_v58 = vadd.f32 %v3094_v60, %v2949_v34  ;;  %v3922_v5 = vsel %vm8200_vm3, %v3905_v22, 0  ;;  %vm8216_vm3 = vmmov %vm8214_vm0  ;;  %v2641_v60 = vpop.f32.mrf.mxu2 }
 0x23f   : > { %3872 = vmatmul.bf16.gmra.mxu0 %v5330_v59  ;;  %v7650_v8 = vadd.f32 %v2634_v31, %v2038_v10  ;;  %3389 = vmatmul.bf16.gmra.mxu1 %v3283_v32  ;;  %v3973_v31 = vunpack.c.l.b16 %v3922_v5  ;;  %v2929_v59 = vpop.f32.mrf.mxu0  ;;  %v3906_v10 = vld [vmem:[#allocation2 + $0x44] sm:$0xf] }
 0x240   : > { %v3923_v34 = vsel %vm8205_vm7, %v3906_v10, 0 }
 0x241   : > { %v3984_v28 = vpack.c.b16 %v3973_v31, %v3972_v50  ;;  %v3974_v4 = vunpack.c.l.b16 %v3923_v34  ;;  %v3298_v31 = vrot.slane %v3296_v7, 1  ;;  %v2954_v41 = vadd.f32 %v2929_v59, %v7650_v8 }
 0x244   : > { %v2039_v62 = vpop.f32.mrf.mxu1 }
 0x245   : > { %v2040_v49 = vadd.f32 %v2039_v62, %v7451_v14  ;;  %v3097_v63 = vpop.f32.mrf.mxu3  ;;  %v4028_v14 = vshll.u32 %v3984_v28, 16 }
 0x246   : > { %v7666_v24 = vadd.f32 %v3097_v63, %v2950_v46  ;;  %v4032_v46 = vshrl.u32 %v3984_v28, 16  ;;  %v2644_v9 = vpop.f32.mrf.mxu2 }
 0x247   : > { %v7664_v56 = vadd.f32 %v2636_v2, %v2040_v49  ;;  %v4030_v45 = vrot.slane %v4028_v14, 1  ;;  %v2931_v55 = vpop.f32.mrf.mxu0  ;;  %v3294_v49 = vor.u32 %v3292_v11, %v3290_v38 }
 0x249   : > { %v4031_v36 = vsel %vm8216_vm3, %v4026_v1, %v4030_v45  ;;  %v4034_v12 = vor.u32 %v4032_v46, %v4030_v45  ;;  %v3299_v48 = vsel %vm8217_vm15, %v3294_v49, %v3298_v31  ;;  %v3977_v1 = vunpack.c.l.b16 %v3926_v21 }
 0x24a   : > { %v2955_v34 = vadd.f32 %v2931_v55, %v7664_v56  ;;  %v3910_v56 = vld [vmem:[#allocation2 + $0x54] sm:$0x1] }
 0x24c   : > { %v2042_v40 = vpop.f32.mrf.mxu1  ;;  %4140 = vmatmul.bf16.gmra.mxu3 %v4031_v36 }
 0x24d   : > { %v2043_v54 = vadd.f32 %v2042_v40, %v7467_v51  ;;  %v3099_v2 = vpop.f32.mrf.mxu3  ;;  %v3924_v51 = vsel %vm8207_vm10, %v3907_v29, 0 }
 0x24e   : > { %v7676_v32 = vadd.f32 %v3099_v2, %v2951_v43  ;;  %v3975_v25 = vunpack.c.l.b16 %v3924_v51  ;;  %v2646_v57 = vpop.f32.mrf.mxu2 }
 0x24f   : > { %v7674_v35 = vadd.f32 %v2639_v42, %v2043_v54  ;;  %3394 = vmatmul.bf16.gmra.mxu1 %v3291_v3  ;;  %v3908_v42 = vld [vmem:[#allocation2 + $0x4c] sm:$0xf]  ;;  %v2934_v38 = vpop.f32.mrf.mxu0 }
 0x250   : > { %v3985_v19 = vpack.c.b16 %v3975_v25, %v3974_v4  ;;  %v3925_v18 = vsel %vm8211_vm6, %v3908_v42, 0 }
 0x251   : > { %v3976_v54 = vunpack.c.l.b16 %v3925_v18  ;;  %v2956_v4 = vadd.f32 %v2934_v38, %v7674_v35 }
 0x252   : > { %v4036_v63 = vshll.u32 %v3985_v19, 16  ;;  %v4040_v16 = vshrl.u32 %v3985_v19, 16  ;;  %v3927_v19 = vsel %vm7213_vm11, %v3910_v56, 0 }
 0x253   : > { %v3986_v47 = vpack.c.b16 %v3977_v1, %v3976_v54  ;;  %v3978_v49 = vunpack.c.l.b16 %v3927_v19  ;;  %v7729_v1 = vld [vmem:[%s7940_s6] ss:$0 sm:$0xff] }
 0x254   : > { %v2044_v22 = vpop.f32.mrf.mxu1  ;;  %v4038_v14 = vrot.slane %v4036_v63, 1 }
 0x255   : > { %v2045_v52 = vadd.f32 %v2044_v22, %v7498_v26  ;;  %v3102_v50 = vpop.f32.mrf.mxu3  ;;  %v4044_v2 = vshll.u32 %v3986_v47, 16  ;;  %v4048_v31 = vshrl.u32 %v3986_v47, 16  ;;  %v3987_v63 = vpack.c.b16 %v3978_v49, %v3978_v49 }
 0x256   : > { %v7686_v62 = vadd.f32 %v3102_v50, %v2952_v0  ;;  %v4042_v51 = vor.u32 %v4040_v16, %v4038_v14  ;;  %v3660_v50 = vpop.f32.mrf.mxu2 }
 0x257   : > { %v2662_v5 = vadd.f32 %v2641_v60, %v2045_v52  ;;  %v2936_v45 = vpop.f32.mrf.mxu0  ;;  %v4046_v36 = vrot.slane %v4044_v2, 1 }
 0x259   : > { %v2957_v22 = vadd.f32 %v2936_v45, %v2662_v5  ;;  %v4050_v5 = vor.u32 %v4048_v31, %v4046_v36 }
 0x25c   : > { %v2047_v13 = vpop.f32.mrf.mxu1 }
 0x25d   : > { %v2048_v26 = vadd.f32 %v2047_v13, %v7519_v61  ;;  %v3104_v39 = vpop.f32.mrf.mxu3  ;;  %v4039_v61 = vsel %vm8218_vm8, %v4034_v12, %v4038_v14 }
 0x25e   : > { %v7696_v40 = vadd.f32 %v3104_v39, %v2953_v44  ;;  %4145 = vmatmul.bf16.gmra.mxu3 %v4039_v61  ;;  %v3662_v44 = vpop.f32.mrf.mxu2  ;;  %v7724_v61 = vld [vmem:[%s7939_s5] ss:$0 sm:$0xff] }
 0x25f   : > { %v2663_v28 = vadd.f32 %v2644_v9, %v2048_v26  ;;  %3399 = vmatmul.bf16.gmra.mxu1 %v3299_v48  ;;  %v2939_v8 = vpop.f32.mrf.mxu0  ;;  %v4052_v9 = vshll.u32 %v3987_v63, 16 }
 0x261   : > { %v2958_v55 = vadd.f32 %v2939_v8, %v2663_v28  ;;  %v4054_v13 = vrot.slane %v4052_v9, 1 }
 0x263   : > { %v4055_v48 = vsel %vm8220_vm2, %v4050_v5, %v4054_v13  ;;  %vm8223_vm2 = vmmov %vm8221_vm12 }
 0x264   : > { %v2049_v10 = vpop.f32.mrf.mxu1 }
 0x265   : > { %v2050_v20 = vadd.f32 %v2049_v10, %v7537_v33  ;;  %v3107_v3 = vpop.f32.mrf.mxu3  ;;  %v4047_v33 = vsel %vm8219_vm9, %v4042_v51, %v4046_v36 }
 0x266   : > { %v7701_v43 = vadd.f32 %v3107_v3, %v2954_v41  ;;  %v3665_v10 = vpop.f32.mrf.mxu2 }
 0x267   : > { %v2664_v29 = vadd.f32 %v2646_v57, %v2050_v20  ;;  %v2941_v11 = vpop.f32.mrf.mxu0 }
 0x269   : > { %v2959_v26 = vadd.f32 %v2941_v11, %v2664_v29 }
 0x26c   : > { %v3365_v52 = vpop.f32.mrf.mxu1 }
 0x26d   : > { %v3109_v60 = vpop.f32.mrf.mxu3  ;;  %v3405_v12 = vadd.f32 %v3365_v52, %v7558_v15 }
 0x26e   : > { %v7704_v6 = vadd.f32 %v3109_v60, %v2955_v34  ;;  %4150 = vmatmul.bf16.gmra.mxu3 %v4047_v33  ;;  %v3667_v36 = vpop.f32.mrf.mxu2 }
 0x26f   : > { %v3838_v17 = vpop.f32.mrf.mxu0  ;;  %v3700_v28 = vadd.f32 %v3660_v50, %v3405_v12 }
 0x271   : > { %v3878_v38 = vadd.f32 %v3838_v17, %v3700_v28 }
 0x274   : > { %v3367_v46 = vpop.f32.mrf.mxu1 }
 0x275   : > { %v3112_v59 = vpop.f32.mrf.mxu3  ;;  %v3406_v14 = vadd.f32 %v3367_v46, %v7590_v23 }
 0x276   : > { %v7708_v25 = vadd.f32 %v3112_v59, %v2956_v4  ;;  %v3670_v19 = vpop.f32.mrf.mxu2 }
 0x277   : > { %v3840_v39 = vpop.f32.mrf.mxu0  ;;  %v3701_v20 = vadd.f32 %v3662_v44, %v3406_v14 }
 0x279   : > { %v3879_v16 = vadd.f32 %v3840_v39, %v3701_v20 }
 0x27c   : > { %v3370_v21 = vpop.f32.mrf.mxu1 }
 0x27d   : > { %v3114_v7 = vpop.f32.mrf.mxu3  ;;  %v3407_v29 = vadd.f32 %v3370_v21, %v7604_v27 }
 0x27e   : > { %v7710_v0 = vadd.f32 %v3114_v7, %v2957_v22  ;;  %4155 = vmatmul.bf16.gmra.mxu3 %v4055_v48 }
 0x27f   : > { %v3843_v41 = vpop.f32.mrf.mxu0  ;;  %v3702_v34 = vadd.f32 %v3665_v10, %v3407_v29 }
 0x281   : > { %v3880_v27 = vadd.f32 %v3843_v41, %v3702_v34 }
 0x284   : > { %v3372_v57 = vpop.f32.mrf.mxu1 }
 0x285   : > { %v3117_v35 = vpop.f32.mrf.mxu3  ;;  %v3408_v8 = vadd.f32 %v3372_v57, %v7624_v30 }
 0x286   : > { %v7714_v42 = vadd.f32 %v3117_v35, %v2958_v55 }
 0x287   : > { %v3845_v22 = vpop.f32.mrf.mxu0  ;;  %v3703_v56 = vadd.f32 %v3667_v36, %v3408_v8 }
 0x289   : > { %v3881_v30 = vadd.f32 %v3845_v22, %v3703_v56 }
 0x28c   : > { %v3375_v33 = vpop.f32.mrf.mxu1 }
 0x28d   : > { %v3119_v37 = vpop.f32.mrf.mxu3  ;;  %v3409_v5 = vadd.f32 %v3375_v33, %v7637_v53 }
 0x28e   : > { %v7718_v18 = vadd.f32 %v3119_v37, %v2959_v26 }
 0x28f   : > { %v3848_v26 = vpop.f32.mrf.mxu0  ;;  %v3704_v21 = vadd.f32 %v3670_v19, %v3409_v5 }
 0x291   : > { %v3882_v29 = vadd.f32 %v3848_v26, %v3704_v21 }
 0x294   : > { %v3377_v35 = vpop.f32.mrf.mxu1 }
 0x295   : > { %v4121_v54 = vpop.f32.mrf.mxu3  ;;  %v3410_v33 = vadd.f32 %v3377_v35, %v7652_v58  ;;  %v4538_v35 = vld [vmem:[%s5736_s19 + $0x8] sm:$0xff] }
 0x296   : > { %v4161_v15 = vadd.f32 %v4121_v54, %v3878_v38 }
 0x297   : > { %v3850_v36 = vpop.f32.mrf.mxu0 }
 0x298   : > { %v4181_v47 = vmul.f32 %v7724_v61, %v4161_v15  ;;  %v3672_v15 = vpop.f32.mrf.mxu2 }
 0x299   : > { %v3705_v56 = vadd.f32 %v3672_v15, %v3410_v33 }
 0x29a   : > { %v7733_v23 = vadd.f32 %v7729_v1, %v4181_v47 }
 0x29c   : > { %v5239_v3 = vmul.f32 -1.442695, %v7733_v23 }
 0x29d   : > { %v4123_v2 = vpop.f32.mrf.mxu3 }
 0x29e   : > { %5536 = vpow2.f32 %v5239_v3  ;;  %v4162_v45 = vadd.f32 %v4123_v2, %v3879_v16  ;;  %v3380_v3 = vpop.f32.mrf.mxu1  ;;  %v4537_v2 = vld [vmem:[%s5736_s19] sm:$0xff] }
 0x29f   : > { %v3853_v21 = vpop.f32.mrf.mxu0 }
 0x2a0   : > { %v4182_v51 = vmul.f32 %v7724_v61, %v4162_v45 }
 0x2a2   : > { %v7739_v60 = vadd.f32 %v7729_v1, %v4182_v51 }
 0x2a4   : > { %v5537_v4 = vpop.eup %5536  ;;  %v5240_v59 = vmul.f32 -1.442695, %v7739_v60 }
 0x2a5   : > { %v4265_v52 = vadd.f32 1.0, %v5537_v4  ;;  %v4126_v11 = vpop.f32.mrf.mxu3 }
 0x2a6   : > { %5538 = vpow2.f32 %v5240_v59  ;;  %v4163_v7 = vadd.f32 %v4126_v11, %v3880_v27 }
 0x2a7   : > { %5540 = vrcp.f32 %v4265_v52  ;;  %v4290_v44 = vand.u32 2147483647, %v4265_v52  ;;  %v4292_v37 = vand.u32 2147483648, %v4265_v52  ;;  %vm4286_vm7 = vweird.f32 %v4265_v52 }
 0x2a8   : > { %v4183_v55 = vmul.f32 %v7724_v61, %v4163_v7 }
 0x2a9   : > { %vm4291_vm10 = vcmp.eq.f32.partialorder %v4290_v44, 8.507059e+37  ;;  %v4293_v10 = vor.u32 1.1754944e-38, %v4292_v37 }
 0x2aa   : > { %v7745_v50 = vadd.f32 %v7729_v1, %v4183_v55 }
 0x2ac   : > { %v5539_v49 = vpop.eup %5538  ;;  %v5241_v31 = vmul.f32 -1.442695, %v7745_v50 }
 0x2ad   : > { %v5541_v46 = vpop.eup %5540  ;;  %v4266_v63 = vadd.f32 1.0, %v5539_v49  ;;  %v4128_v17 = vpop.f32.mrf.mxu3 }
 0x2ae   : > { %v4282_v9 = vmul.f32 %v5541_v46, %v4265_v52  ;;  %5542 = vpow2.f32 %v5241_v31  ;;  %v4164_v13 = vadd.f32 %v4128_v17, %v3881_v30  ;;  %vm4287_vm11 = vweird.f32 %v5541_v46  ;;  %v3675_v30 = vpop.f32.mrf.mxu2 }
 0x2af   : > { %5544 = vrcp.f32 %v4266_v63  ;;  %vm4288_vm1 = vmor %vm4286_vm7, %vm4287_vm11  ;;  %v4305_v4 = vand.u32 2147483647, %v4266_v63  ;;  %v4307_v8 = vand.u32 2147483648, %v4266_v63  ;;  %vm4301_vm6 = vweird.f32 %v4266_v63 }
 0x2b0   : > { %v4283_v12 = vsub.f32 1.0, %v4282_v9  ;;  %v4184_v48 = vmul.f32 %v7724_v61, %v4164_v13  ;;  %v3411_v9 = vadd.f32 %v3380_v3, %v7666_v24  ;;  %v3382_v13 = vpop.f32.mrf.mxu1 }
 0x2b1   : > { %v4308_v58 = vor.u32 1.1754944e-38, %v4307_v8  ;;  %vm4306_vm14 = vcmp.eq.f32.partialorder %v4305_v4, 8.507059e+37 }
 0x2b2   : > { %v4284_v28 = vmul.f32 %v5541_v46, %v4283_v12  ;;  %v7751_v39 = vadd.f32 %v7729_v1, %v4184_v48  ;;  %v3883_v12 = vadd.f32 %v3850_v36, %v3705_v56 }
 0x2b4   : > { %v5543_v14 = vpop.eup %5542  ;;  %v4285_v38 = vadd.f32 %v5541_v46, %v4284_v28  ;;  %v5242_v53 = vmul.f32 -1.442695, %v7751_v39 }
 0x2b5   : > { %v5545_v54 = vpop.eup %5544  ;;  %v7754_v20 = vadd.f32 1.0, %v5543_v14  ;;  %v4131_v47 = vpop.f32.mrf.mxu3 }
 0x2b6   : > { %v4289_v57 = vsel %vm4288_vm1, %v5541_v46, %v4285_v38  ;;  %v4297_v41 = vmul.f32 %v5545_v54, %v4266_v63  ;;  %5546 = vpow2.f32 %v5242_v53  ;;  %v4165_v51 = vadd.f32 %v4131_v47, %v3882_v29 }
 0x2b7   : > { %v4294_v16 = vsel %vm4291_vm10, %v4293_v10, %v4289_v57  ;;  %5548 = vrcp.f32 %v7754_v20  ;;  %vm4302_vm4 = vweird.f32 %v5545_v54  ;;  %v4322_v26 = vand.u32 2147483648, %v7754_v20  ;;  %v4539_v57 = vld [vmem:[%s5736_s19 + $0x10] sm:$0xff]  ;;  %vm8224_vm10 = vmmov %vm8223_vm2 }
 0x2b8   : > { %v4521_v45 = vmul.f32 %v4294_v16, %v7733_v23  ;;  %v4298_v34 = vsub.f32 1.0, %v4297_v41  ;;  %v4185_v22 = vmul.f32 %v7724_v61, %v4165_v51  ;;  %vm4303_vm5 = vmor %vm4301_vm6, %vm4302_vm4  ;;  %v4320_v37 = vand.u32 2147483647, %v7754_v20 }
 0x2b9   : > { %vm4316_vm3 = vweird.f32 %v7754_v20  ;;  %v4323_v24 = vor.u32 1.1754944e-38, %v4322_v26 }
 0x2ba   : > { %v4553_v59 = vadd.f32 %v4537_v2, %v4521_v45  ;;  %v4299_v27 = vmul.f32 %v5545_v54, %v4298_v34  ;;  %v7770_v11 = vadd.f32 %v7729_v1, %v4185_v22  ;;  %vm4321_vm8 = vcmp.eq.f32.partialorder %v4320_v37, 8.507059e+37  ;;  %v3677_v2 = vpop.f32.mrf.mxu2 }
 0x2bc   : > { %v5547_v52 = vpop.eup %5546  ;;  %4569 = vst.msk [vmem:[%s7763_s13] sm:$0xff] %vm8221_vm12, %v4553_v59  ;;  %v4300_v23 = vadd.f32 %v5545_v54, %v4299_v27  ;;  %v5243_v31 = vmul.f32 -1.442695, %v7770_v11  ;;  %v3385_v59 = vpop.f32.mrf.mxu1 }
 0x2bd   : > { %v5549_v7 = vpop.eup %5548  ;;  %v7772_v55 = vadd.f32 1.0, %v5547_v52  ;;  %v4133_v5 = vpop.f32.mrf.mxu3 }
 0x2be   : > { %v4304_v19 = vsel %vm4303_vm5, %v5545_v54, %v4300_v23  ;;  %v4312_v49 = vmul.f32 %v5549_v7, %v7754_v20  ;;  %vm4317_vm0 = vweird.f32 %v5549_v7  ;;  %v4166_v28 = vadd.f32 %v4133_v5, %v3883_v12  ;;  %v3855_v27 = vpop.f32.mrf.mxu0 }
 0x2bf   : > { %v4309_v46 = vsel %vm4306_vm14, %v4308_v58, %v4304_v19  ;;  %5550 = vrcp.f32 %v7772_v55  ;;  %vm4318_vm15 = vmor %vm4316_vm3, %vm4317_vm0  ;;  %v3706_v54 = vadd.f32 %v3675_v30, %v3411_v9  ;;  %v3412_v20 = vadd.f32 %v3382_v13, %v7676_v32  ;;  %v4540_v19 = vld [vmem:[%s5736_s19 + $0x18] sm:$0xff] }
 0x2c0   : > { %v4522_v63 = vmul.f32 %v4309_v46, %v7739_v60  ;;  %v4313_v17 = vsub.f32 1.0, %v4312_v49  ;;  %5552 = vpow2.f32 %v5243_v31  ;;  %v4186_v38 = vmul.f32 %v7724_v61, %v4166_v28  ;;  %vm8225_vm14 = vmmov %vm8223_vm2 }
 0x2c1   : > { %v4335_v45 = vand.u32 2147483647, %v7772_v55  ;;  %v4337_v34 = vand.u32 2147483648, %v7772_v55  ;;  %v3884_v4 = vadd.f32 %v3853_v21, %v3706_v54  ;;  %vm4331_vm11 = vweird.f32 %v7772_v55  ;;  %v4541_v54 = vld [vmem:[%s5736_s19 + $0x20] sm:$0xff] }
 0x2c2   : > { %v4554_v48 = vadd.f32 %v4538_v35, %v4522_v63  ;;  %v4314_v44 = vmul.f32 %v5549_v7, %v4313_v17  ;;  %v7789_v29 = vadd.f32 %v7729_v1, %v4186_v38  ;;  %v3707_v52 = vadd.f32 %v3677_v2, %v3412_v20  ;;  %v3680_v9 = vpop.f32.mrf.mxu2 }
 0x2c3   : > { %v4338_v22 = vor.u32 1.1754944e-38, %v4337_v34  ;;  %vm4336_vm1 = vcmp.eq.f32.partialorder %v4335_v45, 8.507059e+37  ;;  %v3413_v13 = vadd.f32 %v3385_v59, %v7686_v62 }
 0x2c4   : > { %4570 = vst.msk [vmem:[%s7763_s13 + $0x8] sm:$0xff] %vm8222_vm13, %v4554_v48  ;;  %v4315_v60 = vadd.f32 %v5549_v7, %v4314_v44  ;;  %v5244_v33 = vmul.f32 -1.442695, %v7789_v29  ;;  %v3885_v17 = vadd.f32 %v3855_v27, %v3707_v52  ;;  %v3387_v37 = vpop.f32.mrf.mxu1 }
 0x2c5   : > { %v5551_v14 = vpop.eup %5550  ;;  %v4136_v8 = vpop.f32.mrf.mxu3  ;;  %v3708_v62 = vadd.f32 %v3680_v9, %v3413_v13 }
 0x2c6   : > { %v5553_v53 = vpop.eup %5552  ;;  %v4319_v15 = vsel %vm4318_vm15, %v5549_v7, %v4315_v60  ;;  %v4327_v10 = vmul.f32 %v5551_v14, %v7772_v55  ;;  %vm4332_vm9 = vweird.f32 %v5551_v14  ;;  %v3858_v60 = vpop.f32.mrf.mxu0 }
 0x2c7   : > { %v4324_v47 = vsel %vm4321_vm8, %v4323_v24, %v4319_v15  ;;  %v4269_v41 = vadd.f32 1.0, %v5553_v53  ;;  %vm4333_vm7 = vmor %vm4331_vm11, %vm4332_vm9  ;;  %v3886_v2 = vadd.f32 %v3858_v60, %v3708_v62 }
 0x2c8   : > { %v4523_v3 = vmul.f32 %v4324_v47, %v7745_v50  ;;  %v4328_v16 = vsub.f32 1.0, %v4327_v10  ;;  %v4167_v50 = vadd.f32 %v4136_v8, %v3884_v4  ;;  %vm8226_vm9 = vmmov %vm8223_vm2 }
 0x2c9   : > { %5554 = vrcp.f32 %v4269_v41  ;;  %v4350_v26 = vand.u32 2147483647, %v4269_v41  ;;  %v4352_v12 = vand.u32 2147483648, %v4269_v41  ;;  %vm4346_vm12 = vweird.f32 %v4269_v41 }
 0x2ca   : > { %v4555_v51 = vadd.f32 %v4539_v57, %v4523_v3  ;;  %v4329_v36 = vmul.f32 %v5551_v14, %v4328_v16  ;;  %5556 = vpow2.f32 %v5244_v33  ;;  %v4187_v7 = vmul.f32 %v7724_v61, %v4167_v50  ;;  %v3682_v45 = vpop.f32.mrf.mxu2 }
 0x2cb   : > { %vm4351_vm5 = vcmp.eq.f32.partialorder %v4350_v26, 8.507059e+37 }
 0x2cc   : > { %4571 = vst.msk [vmem:[%s7763_s13 + $0x10] sm:$0xff] %vm8223_vm2, %v4555_v51  ;;  %v4330_v32 = vadd.f32 %v5551_v14, %v4329_v36  ;;  %v7804_v55 = vadd.f32 %v7729_v1, %v4187_v7  ;;  %v3414_v36 = vadd.f32 %v3387_v37, %v7696_v40  ;;  %v3390_v33 = vpop.f32.mrf.mxu1 }
 0x2cd   : > { %v4138_v5 = vpop.f32.mrf.mxu3 }
 0x2ce   : > { %v4334_v23 = vsel %vm4333_vm7, %v5551_v14, %v4330_v32  ;;  %v5245_v63 = vmul.f32 -1.442695, %v7804_v55  ;;  %v4168_v44 = vadd.f32 %v4138_v5, %v3885_v17  ;;  %v4353_v14 = vor.u32 1.1754944e-38, %v4352_v12  ;;  %v3860_v32 = vpop.f32.mrf.mxu0 }
 0x2cf   : > { %v5555_v56 = vpop.eup %5554  ;;  %v4339_v58 = vsel %vm4336_vm1, %v4338_v22, %v4334_v23  ;;  %v3709_v23 = vadd.f32 %v3682_v45, %v3414_v36  ;;  %v3415_v17 = vadd.f32 %v3390_v33, %v7701_v43 }
 0x2d0   : > { %v4524_v49 = vmul.f32 %v4339_v58, %v7751_v39  ;;  %v4342_v31 = vmul.f32 %v5555_v56, %v4269_v41  ;;  %v5557_v30 = vpop.eup %5556  ;;  %vm4347_vm4 = vweird.f32 %v5555_v56  ;;  %5558 = vpow2.f32 %v5245_v63 }
 0x2d1   : > { %v4270_v48 = vadd.f32 1.0, %v5557_v30  ;;  %v4188_v28 = vmul.f32 %v7724_v61, %v4168_v44  ;;  %vm4348_vm6 = vmor %vm4346_vm12, %vm4347_vm4  ;;  %v3887_v9 = vadd.f32 %v3860_v32, %v3709_v23 }
 0x2d2   : > { %v4556_v46 = vadd.f32 %v4540_v19, %v4524_v49  ;;  %v4343_v35 = vsub.f32 1.0, %v4342_v31  ;;  %v4542_v31 = vld [vmem:[%s5736_s19 + $0x28] sm:$0xff]  ;;  %v3685_v63 = vpop.f32.mrf.mxu2 }
 0x2d3   : > { %5560 = vrcp.f32 %v4270_v48  ;;  %v7812_v38 = vadd.f32 %v7729_v1, %v4188_v28  ;;  %v4367_v4 = vand.u32 2147483648, %v4270_v48  ;;  %v4365_v8 = vand.u32 2147483647, %v4270_v48 }
 0x2d4   : > { %4572 = vst.msk [vmem:[%s7763_s13 + $0x18] sm:$0xff] %vm8224_vm10, %v4556_v46  ;;  %v4344_v39 = vmul.f32 %v5555_v56, %v4343_v35  ;;  %vm4361_vm13 = vweird.f32 %v4270_v48  ;;  %v3710_v60 = vadd.f32 %v3685_v63, %v3415_v17  ;;  %vm8227_vm10 = vmmov %vm8226_vm9 }
 0x2d5   : > { %v5246_v47 = vmul.f32 -1.442695, %v7812_v38  ;;  %v4141_v20 = vpop.f32.mrf.mxu3  ;;  %v4368_v7 = vor.u32 1.1754944e-38, %v4367_v4  ;;  %vm4366_vm15 = vcmp.eq.f32.partialorder %v4365_v8, 8.507059e+37 }
 0x2d6   : > { %v4345_v21 = vadd.f32 %v5555_v56, %v4344_v39  ;;  %v5559_v15 = vpop.eup %5558  ;;  %v4169_v51 = vadd.f32 %v4141_v20, %v3886_v2  ;;  %v3863_v37 = vpop.f32.mrf.mxu0 }
 0x2d7   : > { %v4271_v41 = vadd.f32 1.0, %v5559_v15  ;;  %5562 = vpow2.f32 %v5246_v47  ;;  %v3888_v45 = vadd.f32 %v3863_v37, %v3710_v60  ;;  %v4545_v37 = vld [vmem:[%s5736_s19 + $0x40] sm:$0xff] }
 0x2d8   : > { %v4349_v24 = vsel %vm4348_vm6, %v5555_v56, %v4345_v21  ;;  %v4189_v59 = vmul.f32 %v7724_v61, %v4169_v51 }
 0x2d9   : > { %v4354_v53 = vsel %vm4351_vm5, %v4353_v14, %v4349_v24  ;;  %v5561_v57 = vpop.eup %5560  ;;  %5564 = vrcp.f32 %v4271_v41  ;;  %v4382_v5 = vand.u32 2147483648, %v4271_v41  ;;  %v4380_v12 = vand.u32 2147483647, %v4271_v41  ;;  %vm8228_vm5 = vmmov %vm8226_vm9 }
 0x2da   : > { %v4525_v10 = vmul.f32 %v4354_v53, %v7770_v11  ;;  %v4357_v16 = vmul.f32 %v5561_v57, %v4270_v48  ;;  %vm4362_vm0 = vweird.f32 %v5561_v57  ;;  %v7822_v22 = vadd.f32 %v7729_v1, %v4189_v59  ;;  %v3392_v48 = vpop.f32.mrf.mxu1  ;;  %v4543_v53 = vld [vmem:[%s5736_s19 + $0x30] sm:$0xff]  ;;  %v3687_v51 = vpop.f32.mrf.mxu2 }
 0x2db   : > { %vm4363_vm3 = vmor %vm4361_vm13, %vm4362_vm0  ;;  %vm4376_vm2 = vweird.f32 %v4271_v41  ;;  %v4383_v21 = vor.u32 1.1754944e-38, %v4382_v5  ;;  %vm4381_vm7 = vcmp.eq.f32.partialorder %v4380_v12, 8.507059e+37 }
 0x2dc   : > { %v4557_v3 = vadd.f32 %v4541_v54, %v4525_v10  ;;  %v4358_v34 = vsub.f32 1.0, %v4357_v16  ;;  %v5247_v19 = vmul.f32 -1.442695, %v7822_v22  ;;  %v3416_v10 = vadd.f32 %v3392_v48, %v7704_v6 }
 0x2dd   : > { %v5563_v50 = vpop.eup %5562  ;;  %v4143_v35 = vpop.f32.mrf.mxu3 }
 0x2de   : > { %4573 = vst.msk [vmem:[%s7763_s13 + $0x20] sm:$0xff] %vm8225_vm14, %v4557_v3  ;;  %v4359_v11 = vmul.f32 %v5561_v57, %v4358_v34  ;;  %v7824_v40 = vadd.f32 1.0, %v5563_v50  ;;  %v4170_v39 = vadd.f32 %v4143_v35, %v3887_v9  ;;  %v3711_v4 = vadd.f32 %v3687_v51, %v3416_v10  ;;  %v3865_v32 = vpop.f32.mrf.mxu0 }
 0x2df   : > { %v5565_v52 = vpop.eup %5564 }
 0x2e0   : > { %v4360_v27 = vadd.f32 %v5561_v57, %v4359_v11  ;;  %v4372_v58 = vmul.f32 %v5565_v52, %v4271_v41  ;;  %5566 = vrcp.f32 %v7824_v40  ;;  %vm4377_vm8 = vweird.f32 %v5565_v52 }
 0x2e1   : > { %5568 = vpow2.f32 %v5247_v19  ;;  %vm4378_vm11 = vmor %vm4376_vm2, %vm4377_vm8  ;;  %v4190_v28 = vmul.f32 %v7724_v61, %v4170_v39  ;;  %v4395_v41 = vand.u32 2147483647, %v7824_v40  ;;  %v4397_v20 = vand.u32 2147483648, %v7824_v40 }
 0x2e2   : > { %v4364_v56 = vsel %vm4363_vm3, %v5561_v57, %v4360_v27  ;;  %v4373_v46 = vsub.f32 1.0, %v4372_v58  ;;  %vm4391_vm4 = vweird.f32 %v7824_v40  ;;  %v3395_v36 = vpop.f32.mrf.mxu1  ;;  %v4544_v27 = vld [vmem:[%s5736_s19 + $0x38] sm:$0xff]  ;;  %v3690_v5 = vpop.f32.mrf.mxu2 }
 0x2e3   : > { %v4369_v49 = vsel %vm4366_vm15, %v4368_v7, %v4364_v56  ;;  %v7837_v15 = vadd.f32 %v7729_v1, %v4190_v28  ;;  %v4398_v33 = vor.u32 1.1754944e-38, %v4397_v20  ;;  %vm4396_vm6 = vcmp.eq.f32.partialorder %v4395_v41, 8.507059e+37  ;;  %vm8229_vm15 = vmmov %vm8228_vm5 }
 0x2e4   : > { %v4526_v30 = vmul.f32 %v4369_v49, %v7789_v29  ;;  %v4374_v26 = vmul.f32 %v5565_v52, %v4373_v46  ;;  %v3889_v49 = vadd.f32 %v3865_v32, %v3711_v4  ;;  %v4546_v32 = vld [vmem:[%s5736_s19 + $0x48] sm:$0xff] }
 0x2e5   : > { %v5248_v2 = vmul.f32 -1.442695, %v7837_v15  ;;  %v4146_v34 = vpop.f32.mrf.mxu3 }
 0x2e6   : > { %v4558_v13 = vadd.f32 %v4542_v31, %v4526_v30  ;;  %v4375_v44 = vadd.f32 %v5565_v52, %v4374_v26  ;;  %v5567_v29 = vpop.eup %5566  ;;  %v3417_v30 = vadd.f32 %v3395_v36, %v7708_v25 }
 0x2e7   : > { %v5569_v43 = vpop.eup %5568  ;;  %v4387_v62 = vmul.f32 %v5567_v29, %v7824_v40  ;;  %vm4392_vm1 = vweird.f32 %v5567_v29 }
 0x2e8   : > { %4574 = vst.msk [vmem:[%s7763_s13 + $0x28] sm:$0xff] %vm8226_vm9, %v4558_v13  ;;  %v4379_v14 = vsel %vm4378_vm11, %v5565_v52, %v4375_v44  ;;  %v4273_v54 = vadd.f32 1.0, %v5569_v43  ;;  %vm4393_vm12 = vmor %vm4391_vm4, %vm4392_vm1  ;;  %v3712_v25 = vadd.f32 %v3690_v5, %v3417_v30  ;;  %v3868_v44 = vpop.f32.mrf.mxu0 }
 0x2e9   : > { %v4384_v24 = vsel %vm4381_vm7, %v4383_v21, %v4379_v14  ;;  %v4388_v57 = vsub.f32 1.0, %v4387_v62  ;;  %vm8230_vm1 = vmmov %vm8228_vm5 }
 0x2ea   : > { %v4527_v47 = vmul.f32 %v4384_v24, %v7804_v55  ;;  %5570 = vrcp.f32 %v4273_v54  ;;  %v4171_v55 = vadd.f32 %v4146_v34, %v3888_v45  ;;  %v4410_v46 = vand.u32 2147483647, %v4273_v54  ;;  %v3397_v26 = vpop.f32.mrf.mxu1 }
 0x2eb   : > { %v4389_v16 = vmul.f32 %v5567_v29, %v4388_v57  ;;  %5572 = vpow2.f32 %v5248_v2  ;;  %v4412_v35 = vand.u32 2147483648, %v4273_v54  ;;  %vm4406_vm0 = vweird.f32 %v4273_v54  ;;  %v3692_v57 = vpop.f32.mrf.mxu2 }
 0x2ec   : > { %v4559_v3 = vadd.f32 %v4543_v53, %v4527_v47  ;;  %v4191_v8 = vmul.f32 %v7724_v61, %v4171_v55  ;;  %vm4411_vm3 = vcmp.eq.f32.partialorder %v4410_v46, 8.507059e+37  ;;  %v3418_v41 = vadd.f32 %v3397_v26, %v7710_v0 }
 0x2ed   : > { %v4390_v6 = vadd.f32 %v5567_v29, %v4389_v16  ;;  %v4148_v31 = vpop.f32.mrf.mxu3  ;;  %v4413_v12 = vor.u32 1.1754944e-38, %v4412_v35 }
 0x2ee   : > { %4575 = vst.msk [vmem:[%s7763_s13 + $0x30] sm:$0xff] %vm8227_vm10, %v4559_v3  ;;  %v7852_v7 = vadd.f32 %v7729_v1, %v4191_v8  ;;  %v3713_v36 = vadd.f32 %v3692_v57, %v3418_v41 }
 0x2ef   : > { %v4394_v11 = vsel %vm4393_vm12, %v5567_v29, %v4390_v6 }
 0x2f0   : > { %v5571_v59 = vpop.eup %5570  ;;  %v4399_v50 = vsel %vm4396_vm6, %v4398_v33, %v4394_v11  ;;  %v5249_v19 = vmul.f32 -1.442695, %v7852_v7  ;;  %v3870_v55 = vpop.f32.mrf.mxu0 }
 0x2f1   : > { %v4528_v52 = vmul.f32 %v4399_v50, %v7812_v38  ;;  %v4402_v23 = vmul.f32 %v5571_v59, %v4273_v54  ;;  %v5573_v40 = vpop.eup %5572  ;;  %vm4407_vm14 = vweird.f32 %v5571_v59  ;;  %v4172_v38 = vadd.f32 %v4148_v31, %v3889_v49 }
 0x2f2   : > { %v4274_v63 = vadd.f32 1.0, %v5573_v40  ;;  %5574 = vpow2.f32 %v5249_v19  ;;  %vm4408_vm13 = vmor %vm4406_vm0, %vm4407_vm14  ;;  %v3890_v54 = vadd.f32 %v3868_v44, %v3712_v25  ;;  %v3400_v2 = vpop.f32.mrf.mxu1 }
 0x2f3   : > { %v4560_v56 = vadd.f32 %v4544_v27, %v4528_v52  ;;  %v4403_v58 = vsub.f32 1.0, %v4402_v23  ;;  %v4192_v13 = vmul.f32 %v7724_v61, %v4172_v38  ;;  %v3419_v23 = vadd.f32 %v3400_v2, %v7714_v42  ;;  %v3695_v31 = vpop.f32.mrf.mxu2 }
 0x2f4   : > { %5576 = vrcp.f32 %v4274_v63  ;;  %v4427_v20 = vand.u32 2147483648, %v4274_v63  ;;  %vm4421_vm9 = vweird.f32 %v4274_v63 }
 0x2f5   : > { %4576 = vst.msk [vmem:[%s7763_s13 + $0x38] sm:$0xff] %vm8228_vm5, %v4560_v56  ;;  %v4404_v17 = vmul.f32 %v5571_v59, %v4403_v58  ;;  %v7860_v39 = vadd.f32 %v7729_v1, %v4192_v13  ;;  %v4151_v62 = vpop.f32.mrf.mxu3  ;;  %v3891_v56 = vadd.f32 %v3870_v55, %v3713_v36  ;;  %v3714_v38 = vadd.f32 %v3695_v31, %v3419_v23  ;;  %vm8231_vm5 = vmmov %vm8230_vm1 }
 0x2f6   : > { %v4173_v47 = vadd.f32 %v4151_v62, %v3890_v54  ;;  %v4428_v33 = vor.u32 1.1754944e-38, %v4427_v20 }
 0x2f7   : > { %v4405_v9 = vadd.f32 %v5571_v59, %v4404_v17  ;;  %v5250_v43 = vmul.f32 -1.442695, %v7860_v39 }
 0x2f8   : > { %v5575_v21 = vpop.eup %5574  ;;  %v4193_v16 = vmul.f32 %v7724_v61, %v4173_v47  ;;  %v3873_v13 = vpop.f32.mrf.mxu0 }
 0x2f9   : > { %v4409_v48 = vsel %vm4408_vm13, %v5571_v59, %v4405_v9  ;;  %v4275_v14 = vadd.f32 1.0, %v5575_v21  ;;  %5578 = vpow2.f32 %v5250_v43  ;;  %v3892_v62 = vadd.f32 %v3873_v13, %v3714_v38 }
 0x2fa   : > { %v4414_v29 = vsel %vm4411_vm3, %v4413_v12, %v4409_v48  ;;  %v5577_v60 = vpop.eup %5576  ;;  %v7870_v51 = vadd.f32 %v7729_v1, %v4193_v16  ;;  %v4547_v12 = vld [vmem:[%s5736_s19 + $0x50] sm:$0xff]  ;;  %vm8232_vm3 = vmmov %vm8230_vm1 }
 0x2fb   : > { %v4529_v28 = vmul.f32 %v4414_v29, %v7822_v22  ;;  %v4417_v53 = vmul.f32 %v5577_v60, %v4274_v63  ;;  %5580 = vrcp.f32 %v4275_v14  ;;  %vm4422_vm8 = vweird.f32 %v5577_v60  ;;  %v3697_v54 = vpop.f32.mrf.mxu2 }
 0x2fc   : > { %v4425_v22 = vand.u32 2147483647, %v4274_v63  ;;  %vm4423_vm2 = vmor %vm4421_vm9, %vm4422_vm8  ;;  %v5251_v8 = vmul.f32 -1.442695, %v7870_v51  ;;  %v4442_v40 = vand.u32 2147483648, %v4275_v14  ;;  %vm4436_vm10 = vweird.f32 %v4275_v14 }
 0x2fd   : > { %v4561_v24 = vadd.f32 %v4545_v37, %v4529_v28  ;;  %v4418_v10 = vsub.f32 1.0, %v4417_v53  ;;  %v4153_v52 = vpop.f32.mrf.mxu3  ;;  %v4440_v49 = vand.u32 2147483647, %v4275_v14 }
 0x2fe   : > { %vm4426_vm11 = vcmp.eq.f32.partialorder %v4425_v22, 8.507059e+37  ;;  %v4174_v30 = vadd.f32 %v4153_v52, %v3891_v56  ;;  %v4443_v63 = vor.u32 1.1754944e-38, %v4442_v40  ;;  %v4549_v56 = vld [vmem:[%s5736_s19 + $0x60] sm:$0xff] }
 0x2ff   : > { %4577 = vst.msk [vmem:[%s7763_s13 + $0x40] sm:$0xff] %vm8229_vm15, %v4561_v24  ;;  %v4419_v3 = vmul.f32 %v5577_v60, %v4418_v10  ;;  %v5579_v45 = vpop.eup %5578  ;;  %vm4441_vm12 = vcmp.eq.f32.partialorder %v4440_v49, 8.507059e+37 }
 0x300   : > { %v4276_v0 = vadd.f32 1.0, %v5579_v45  ;;  %v4194_v17 = vmul.f32 %v7724_v61, %v4174_v30  ;;  %v3875_v45 = vpop.f32.mrf.mxu0 }
 0x301   : > { %v4420_v34 = vadd.f32 %v5577_v60, %v4419_v3  ;;  %v5581_v6 = vpop.eup %5580  ;;  %v4548_v3 = vld [vmem:[%s5736_s19 + $0x58] sm:$0xff] }
 0x302   : > { %v4432_v11 = vmul.f32 %v5581_v6, %v4275_v14  ;;  %5582 = vrcp.f32 %v4276_v0  ;;  %vm4437_vm7 = vweird.f32 %v5581_v6  ;;  %v7881_v48 = vadd.f32 %v7729_v1, %v4194_v17 }
 0x303   : > { %v4424_v4 = vsel %vm4423_vm2, %v5577_v60, %v4420_v34  ;;  %5584 = vpow2.f32 %v5251_v8  ;;  %vm4438_vm4 = vmor %vm4436_vm10, %vm4437_vm7  ;;  %v4455_v21 = vand.u32 2147483647, %v4276_v0  ;;  %v4457_v28 = vand.u32 2147483648, %v4276_v0 }
 0x304   : > { %v4429_v59 = vsel %vm4426_vm11, %v4428_v33, %v4424_v4  ;;  %v4433_v27 = vsub.f32 1.0, %v4432_v11  ;;  %v5252_v14 = vmul.f32 -1.442695, %v7881_v48  ;;  %vm4451_vm14 = vweird.f32 %v4276_v0  ;;  %vm8233_vm11 = vmmov %vm8230_vm1 }
 0x305   : > { %v4530_v50 = vmul.f32 %v4429_v59, %v7837_v15  ;;  %v3402_v15 = vpop.f32.mrf.mxu1  ;;  %v4156_v24 = vpop.f32.mrf.mxu3  ;;  %vm4456_vm13 = vcmp.eq.f32.partialorder %v4455_v21, 8.507059e+37 }
 0x306   : > { %v4434_v19 = vmul.f32 %v5581_v6, %v4433_v27  ;;  %v3420_v44 = vadd.f32 %v3402_v15, %v7718_v18  ;;  %v4175_v18 = vadd.f32 %v4156_v24, %v3892_v62 }
 0x307   : > { %v4562_v58 = vadd.f32 %v4546_v32, %v4530_v50 }
 0x308   : > { %v4435_v46 = vadd.f32 %v5581_v6, %v4434_v19  ;;  %v5583_v35 = vpop.eup %5582  ;;  %v3715_v10 = vadd.f32 %v3697_v54, %v3420_v44  ;;  %v4195_v57 = vmul.f32 %v7724_v61, %v4175_v18 }
 0x309   : > { %4578 = vst.msk [vmem:[%s7763_s13 + $0x48] sm:$0xff] %vm8230_vm1, %v4562_v58  ;;  %v5585_v42 = vpop.eup %5584  ;;  %v4447_v9 = vmul.f32 %v5583_v35, %v4276_v0  ;;  %vm4452_vm6 = vweird.f32 %v5583_v35 }
 0x30a   : > { %v4439_v5 = vsel %vm4438_vm4, %v5581_v6, %v4435_v46  ;;  %v4277_v25 = vadd.f32 1.0, %v5585_v42  ;;  %vm4453_vm0 = vmor %vm4451_vm14, %vm4452_vm6  ;;  %v7893_v2 = vadd.f32 %v7729_v1, %v4195_v57  ;;  %v3893_v33 = vadd.f32 %v3875_v45, %v3715_v10 }
 0x30b   : > { %v4444_v26 = vsel %vm4441_vm12, %v4443_v63, %v4439_v5  ;;  %v4448_v37 = vsub.f32 1.0, %v4447_v9  ;;  %vm8234_vm6 = vmmov %vm8232_vm3 }
 0x30c   : > { %v4531_v29 = vmul.f32 %v4444_v26, %v7852_v7  ;;  %5586 = vrcp.f32 %v4277_v25  ;;  %v4458_v7 = vor.u32 1.1754944e-38, %v4457_v28  ;;  %v5253_v36 = vmul.f32 -1.442695, %v7893_v2 }
 0x30d   : > { %v4449_v60 = vmul.f32 %v5583_v35, %v4448_v37  ;;  %5588 = vpow2.f32 %v5252_v14  ;;  %v4158_v0 = vpop.f32.mrf.mxu3  ;;  %v4470_v4 = vand.u32 2147483647, %v4277_v25  ;;  %v4472_v11 = vand.u32 2147483648, %v4277_v25 }
 0x30e   : > { %v4563_v43 = vadd.f32 %v4547_v12, %v4531_v29  ;;  %5590 = vpow2.f32 %v5253_v36  ;;  %vm4466_vm8 = vweird.f32 %v4277_v25  ;;  %v4550_v12 = vld [vmem:[%s5736_s19 + $0x68] sm:$0xff] }
 0x30f   : > { %v4450_v53 = vadd.f32 %v5583_v35, %v4449_v60  ;;  %v4473_v27 = vor.u32 1.1754944e-38, %v4472_v11  ;;  %vm4471_vm2 = vcmp.eq.f32.partialorder %v4470_v4, 8.507059e+37 }
 0x310   : > { %4579 = vst.msk [vmem:[%s7763_s13 + $0x50] sm:$0xff] %vm8231_vm5, %v4563_v43 }
 0x311   : > { %v4454_v47 = vsel %vm4453_vm0, %v5583_v35, %v4450_v53 }
 0x312   : > { %v5587_v41 = vpop.eup %5586  ;;  %v4459_v20 = vsel %vm4456_vm13, %v4458_v7, %v4454_v47 }
 0x313   : > { %v4532_v22 = vmul.f32 %v4459_v20, %v7860_v39  ;;  %v4462_v16 = vmul.f32 %v5587_v41, %v4277_v25  ;;  %v5589_v34 = vpop.eup %5588  ;;  %vm4467_vm15 = vweird.f32 %v5587_v41  ;;  %v4176_v39 = vadd.f32 %v4158_v0, %v3893_v33 }
 0x314   : > { %v4278_v8 = vadd.f32 1.0, %v5589_v34  ;;  %vm4468_vm9 = vmor %vm4466_vm8, %vm4467_vm15  ;;  %v5591_v58 = vpop.eup %5590 }
 0x315   : > { %v4564_v6 = vadd.f32 %v4548_v3, %v4532_v22  ;;  %v4463_v55 = vsub.f32 1.0, %v4462_v16  ;;  %v4196_v50 = vmul.f32 %v7724_v61, %v4176_v39  ;;  %v4279_v30 = vadd.f32 1.0, %v5591_v58  ;;  %v4552_v16 = vld [vmem:[%s5736_s19 + $0x78] sm:$0xff] }
 0x316   : > { %5592 = vrcp.f32 %v4278_v8  ;;  %v4487_v15 = vand.u32 2147483648, %v4278_v8  ;;  %v4485_v63 = vand.u32 2147483647, %v4278_v8  ;;  %vm4481_vm1 = vweird.f32 %v4278_v8 }
 0x317   : > { %4580 = vst.msk [vmem:[%s7763_s13 + $0x58] sm:$0xff] %vm8232_vm3, %v4564_v6  ;;  %v4464_v59 = vmul.f32 %v5587_v41, %v4463_v55  ;;  %v7900_v23 = vadd.f32 %v7729_v1, %v4196_v50  ;;  %v4502_v29 = vand.u32 2147483648, %v4279_v30  ;;  %v4500_v28 = vand.u32 2147483647, %v4279_v30 }
 0x318   : > { %v4488_v38 = vor.u32 1.1754944e-38, %v4487_v15  ;;  %vm4486_vm4 = vcmp.eq.f32.partialorder %v4485_v63, 8.507059e+37  ;;  %vm4496_vm5 = vweird.f32 %v4279_v30 }
 0x319   : > { %v4465_v32 = vadd.f32 %v5587_v41, %v4464_v59  ;;  %v5254_v49 = vmul.f32 -1.442695, %v7900_v23  ;;  %v4503_v14 = vor.u32 1.1754944e-38, %v4502_v29  ;;  %vm4501_vm0 = vcmp.eq.f32.partialorder %v4500_v28, 8.507059e+37 }
 0x31b   : > { %v4469_v52 = vsel %vm4468_vm9, %v5587_v41, %v4465_v32  ;;  %5594 = vpow2.f32 %v5254_v49 }
 0x31c   : > { %v4474_v40 = vsel %vm4471_vm2, %v4473_v27, %v4469_v52  ;;  %v5593_v31 = vpop.eup %5592  ;;  %5596 = vrcp.f32 %v4279_v30  ;;  %vm8235_vm2 = vmmov %vm8232_vm3 }
 0x31d   : > { %v4533_v19 = vmul.f32 %v4474_v40, %v7870_v51  ;;  %v4477_v35 = vmul.f32 %v5593_v31, %v4278_v8  ;;  %vm4482_vm7 = vweird.f32 %v5593_v31 }
 0x31e   : > { %vm4483_vm10 = vmor %vm4481_vm1, %vm4482_vm7 }
 0x31f   : > { %v4565_v46 = vadd.f32 %v4549_v56, %v4533_v19  ;;  %v4478_v61 = vsub.f32 1.0, %v4477_v35 }
 0x321   : > { %4581 = vst.msk [vmem:[%s7763_s13 + $0x60] sm:$0xff] %vm8233_vm11, %v4565_v46  ;;  %v4479_v1 = vmul.f32 %v5593_v31, %v4478_v61  ;;  %v5595_v17 = vpop.eup %5594 }
 0x322   : > { %v5597_v51 = vpop.eup %5596  ;;  %v4280_v5 = vadd.f32 1.0, %v5595_v17 }
 0x323   : > { %v4480_v42 = vadd.f32 %v5593_v31, %v4479_v1  ;;  %v4492_v13 = vmul.f32 %v5597_v51, %v4279_v30  ;;  %vm4497_vm12 = vweird.f32 %v5597_v51 }
 0x324   : > { %5598 = vrcp.f32 %v4280_v5  ;;  %vm4498_vm14 = vmor %vm4496_vm5, %vm4497_vm12  ;;  %v4517_v7 = vand.u32 2147483648, %v4280_v5  ;;  %v4515_v57 = vand.u32 2147483647, %v4280_v5  ;;  %vm4511_vm15 = vweird.f32 %v4280_v5 }
 0x325   : > { %v4484_v9 = vsel %vm4483_vm10, %v5593_v31, %v4480_v42  ;;  %v4493_v44 = vsub.f32 1.0, %v4492_v13 }
 0x326   : > { %v4489_v26 = vsel %vm4486_vm4, %v4488_v38, %v4484_v9  ;;  %v4518_v20 = vor.u32 1.1754944e-38, %v4517_v7  ;;  %vm4516_vm9 = vcmp.eq.f32.partialorder %v4515_v57, 8.507059e+37 }
 0x327   : > { %v4534_v25 = vmul.f32 %v4489_v26, %v7881_v48  ;;  %v4494_v21 = vmul.f32 %v5597_v51, %v4493_v44  ;;  %v4551_v48 = vld [vmem:[%s5736_s19 + $0x70] sm:$0xff] }
 0x329   : > { %v4566_v37 = vadd.f32 %v4550_v12, %v4534_v25  ;;  %v4495_v43 = vadd.f32 %v5597_v51, %v4494_v21 }
 0x32a   : > { %v5599_v60 = vpop.eup %5598 }
 0x32b   : > { %4582 = vst.msk [vmem:[%s7763_s13 + $0x68] sm:$0xff] %vm8234_vm6, %v4566_v37  ;;  %v4499_v62 = vsel %vm4498_vm14, %v5597_v51, %v4495_v43  ;;  %v4507_v24 = vmul.f32 %v5599_v60, %v4280_v5  ;;  %vm4512_vm13 = vweird.f32 %v5599_v60 }
 0x32c   : > { %v4504_v53 = vsel %vm4501_vm0, %v4503_v14, %v4499_v62  ;;  %vm4513_vm8 = vmor %vm4511_vm15, %vm4512_vm13 }
 0x32d   : > { %v4535_v18 = vmul.f32 %v4504_v53, %v7893_v2  ;;  %v4508_v54 = vsub.f32 1.0, %v4507_v24 }
 0x32f   : > { %v4567_v10 = vadd.f32 %v4551_v48, %v4535_v18  ;;  %v4509_v47 = vmul.f32 %v5599_v60, %v4508_v54 }
 0x331   : > { %4583 = vst.msk [vmem:[%s7763_s13 + $0x70] sm:$0xff] %vm8232_vm3, %v4567_v10  ;;  %v4510_v41 = vadd.f32 %v5599_v60, %v4509_v47 }
 0x333   : > { %v4514_v3 = vsel %vm4513_vm8, %v5599_v60, %v4510_v41 }
 0x334   : > { %v4519_v22 = vsel %vm4516_vm9, %v4518_v20, %v4514_v3 }
 0x335   : > { %v4536_v45 = vmul.f32 %v4519_v22, %v7900_v23 }
 0x337   : > { %v4568_v2 = vadd.f32 %v4552_v16, %v4536_v45 }
 0x339   : > { %4584 = vst.msk [vmem:[%s7763_s13 + $0x78] sm:$0xff] %vm8235_vm2, %v4568_v2 }
 0x33a PF: > { %s17_s28 = sadd.s32 1, %s5640_s28   ;;  %s8236_s24 = smov %s5632_s26 }
 0x33b   : > { %p14_p13 = scmp.ge.s32.totalorder %s17_s28, 6   ;;  %s8237_s25 = smov %s5636_s27 }
 0x33c   : > { %s8238_s26 = smov %s8241_s29  ;;  %s8239_s27 = smov %s8245_s30 }
 0x33d   :  { %16 = sbr.rel (!%p14_p13) target bundleno = 3 (0x3), region = 89 }

// kernel: tpu_custom_call.1
= control target key start
LH: loop header
LB: loop body
LE: loop exit
PB: predicated region body
PF: predicated region fallthrough
CT: control target
= control target key end

     0   :  { %s5684_s24 = smov 0   ;;  %s5686_s25 = smov 0   ;;  %s7934_s0 = inlined_call_operand.vmem [shape: f32[2,16,16,4], index: 0, kind: input, shape index: {}]   ;;  %s7935_s1 = inlined_call_operand.vmem [shape: bf16[4,128], index: 1, kind: input, shape index: {}]   ;;  %s7936_s2 = inlined_call_operand.vmem [shape: f32[1,128], index: 2, kind: input, shape index: {}]   ;;  %s7937_s3 = inlined_call_operand.vmem [shape: f32[1,128], index: 3, kind: input, shape index: {}]   ;;  %s7938_s4 = inlined_call_operand.vmem [shape: bf16[9,128,4], index: 4, kind: input, shape index: {}]   ;;  %s7939_s5 = inlined_call_operand.vmem [shape: f32[1,4], index: 5, kind: input, shape index: {}]   ;;  %s7940_s6 = inlined_call_operand.vmem [shape: f32[1,4], index: 6, kind: input, shape index: {}]   ;;  %s7941_s7 = inlined_call_operand.vmem [shape: f32[2,16,16,4], index: 7, kind: output, shape index: {}]  }
   0x1   :  { %s5688_s26 = smov 0   ;;  %s5690_s27 = smov 0  }
   0x2   :  { %s5692_s28 = smov 0  }
   0x3 LB: > { %s26_s29 = sadd.s32 1, %s5632_s26  ;;  %s29_s30 = sadd.s32 1, %s5636_s27  ;;  %s5640_s28 = sphi %s5692_s28, %s17_s28   ;;  %s5636_s27 = sphi %s5690_s27, %s8239_s27   ;;  %s5632_s26 = sphi %s5688_s26, %s8238_s26   ;;  %s5628_s25 = sphi %s5686_s25, %s8237_s25   ;;  %s5624_s24 = sphi %s5684_s24, %s8236_s24  }
   0x4   : > { %p27_p0 = scmp.ge.s32.totalorder %s26_s29, 2  ;;  %p4685_p1 = scmp.ge.s32.totalorder %s5640_s28, 1 }
   0x5   : > { %p251_p2 = scmp.lt.s32.totalorder %s5640_s28, 5 }
   0x6   : > { %s8241_s29 = smov (%p27_p0, %s26_s29), 0  ;;  %s8243_s30 = smov (!%p27_p0, %s29_s30), %s5636_s27 }
   0x7   : > { %p252_p3 = pnand %p4685_p1, %p251_p2  ;;  %p31_p4 = scmp.ge.s32.totalorder %s8243_s30, 2 }
   0x9   : > { %s8245_s30 = smov (%p31_p4, %s8243_s30), 0  ;;  %255 = sbr.rel (%p252_p3) target bundleno = 826 (0x33a), region = 48 }
   0xe   : > { %v336_v0 = vld [vmem:[%s7935_s1] sm:$0x3]  ;;  %vm362_vm0 = vcmask 1041408   ;;  %p288_p5 = scmp.lt.s32.totalorder %s5628_s25, 1  ;;  %s5258_s12 = sshll.u32 %s5624_s24, 7  ;;  %vm7942_vm1 = vcmask 31744  }
   0xf   : > { %v828_v1 = vld [vmem:[%s7935_s1] sm:$0x3]  ;;  %v364_v2 = vsel %vm362_vm0, %v336_v0, 0  ;;  %s5726_s13 = sshll.u32 %s5624_s24, 3  ;;  %p807_p9 = scmp.gt.s32.totalorder %s5624_s24, 0  ;;  %v5282_v42 = vld [vmem:[%s7938_s4 + $0x78] sm:$0xff] }
  0x10   : > { %v833_v3 = vsel %vm362_vm0, %v828_v1, 0  ;;  %373 = vmatpush.bf16.msra.mxu0 %v364_v2  ;;  %s8247_s25 = smov (!%p288_p5, %s5628_s25), 1  ;;  %p296_p6 = scmp.lt.s32.totalorder %s5726_s13, 15  ;;  %5397 = vmatpush.bf16.msra.mxu2 %v364_v2  ;;  %v937_v10 = vld [vmem:[%s7935_s1] sm:$0x3]  ;;  %v5281_v51 = vld [vmem:[%s7938_s4 + $0x70] sm:$0xff] }
  0x11   : > { %842 = vmatpush.bf16.msra.mxu1 %v833_v3  ;;  %s4718_s14 = sadd.s32 4294967295, %s5726_s13  ;;  %s5257_s15 = sshll.u32 %s8247_s25, 8  ;;  %v942_v11 = vsel %vm362_vm0, %v937_v10, 0  ;;  %v5780_v36 = vld [vmem:[%s7936_s2] ss:$0 sm:$0xff]  ;;  %5398 = vmatpush.bf16.msra.mxu3 %v5282_v42  ;;  %v5280_v58 = vld [vmem:[%s7938_s4 + $0x68] sm:$0xff] }
  0x12   : > { %s5733_s18 = scalar_lea.vmem %s7934_s0, %s5257_s15  ;;  %p821_p7 = scmp.gt.s32.totalorder %s4718_s14, 0  ;;  %v5786_v37 = vld [vmem:[%s7937_s3] ss:$0 sm:$0xff]  ;;  %v7979_v0 = vmov 0  }
  0x13   : > { %s5736_s19 = scalar_lea.vmem %s5733_s18, %s5258_s12  ;;  %s4690_s20 = sshll.u32 %s8247_s25, 5  ;;  %v5450_v40 = vld [vmem:[%s7936_s2] ss:$0 sm:$0xff]  ;;  %308 = vst [vmem:[#allocation2] sm:$0xf] %v7979_v0 }
  0x14   : > { %v312_v4 = vld [vmem:[%s5736_s19] sm:$0xff]  ;;  %v313_v5 = vld [vmem:[%s5736_s19 + $0x8] sm:$0xff]  ;;  %s297_s21 = scalar_select %p296_p6, %s5726_s13, 15  ;;  %951 = vmatpush.bf16.msrb.mxu2 %v942_v11  ;;  %v314_v15 = vld [vmem:[%s5736_s19 + $0x10] sm:$0xff]  ;;  %309 = vst [vmem:[#allocation2 + $0x54] sm:$0xf] %v7979_v0 }
  0x15   : > { %v328_v6 = vpack.c.bf16 %v313_v5, %v312_v4  ;;  %s8249_s14 = smov (!%p821_p7, %s4718_s14), 0  ;;  %v324_v7 = vld [vmem:[%s5736_s19 + $0x60] sm:$0xff]  ;;  %v325_v8 = vld [vmem:[%s5736_s19 + $0x68] sm:$0xff]  ;;  %v315_v16 = vld [vmem:[%s5736_s19 + $0x18] sm:$0xff]  ;;  %s929_s11 = sadd.s32 8, %s5726_s13  ;;  %1774 = vmatpush.bf16.msrb.mxu1 %v5282_v42  ;;  %5399 = vmatpush.bf16.msra.mxu3 %v5281_v51  ;;  %v1025_v4 = vlaneseq }
  0x16   : > { %s4689_s22 = sshll.u32 %s297_s21, 1  ;;  %v334_v9 = vpack.c.bf16 %v325_v8, %v324_v7  ;;  %s4719_s25 = sshll.u32 %s8249_s14, 4  ;;  %v326_v17 = vld [vmem:[%s5736_s19 + $0x70] sm:$0xff]  ;;  %v327_v18 = vld [vmem:[%s5736_s19 + $0x78] sm:$0xff]  ;;  %v329_v19 = vpack.c.bf16 %v315_v16, %v314_v15  ;;  %v316_v21 = vld [vmem:[%s5736_s19 + $0x20] sm:$0xff] }
  0x17   : > { %4694 = vmatmul.msk.bf16.vlgmr.msra.gmra.mxu0 %vm7942_vm1, %v328_v6  ;;  %s5744_s23 = sadd.s32 %s4690_s20, %s4689_s22  ;;  %s824_s10 = scalar_lea.vmem %s5733_s18, %s4719_s25  ;;  %v335_v20 = vpack.c.bf16 %v327_v18, %v326_v17  ;;  %v317_v22 = vld [vmem:[%s5736_s19 + $0x28] sm:$0xff]  ;;  %v318_v27 = vld [vmem:[%s5736_s19 + $0x30] sm:$0xff]  ;;  %v319_v28 = vld [vmem:[%s5736_s19 + $0x38] sm:$0xff]  ;;  %v5854_v15 = vshrl.u32 %v1025_v4, 7 }
  0x18   : > { %4700 = vmatmul.msk.bf16.vlgmr.msra.gmra.mxu2 %vm7942_vm1, %v334_v9  ;;  %v825_v12 = vld [vmem:[%s824_s10] sm:$0xff]  ;;  %v826_v13 = vld [vmem:[%s824_s10 + $0x8] sm:$0xff]  ;;  %p930_p8 = scmp.lt.s32.totalorder %s929_s11, 15  ;;  %v330_v25 = vpack.c.bf16 %v317_v22, %v316_v21  ;;  %v331_v29 = vpack.c.bf16 %v319_v28, %v318_v27  ;;  %v322_v33 = vld [vmem:[%s5736_s19 + $0x50] sm:$0xff]  ;;  %p916_p11 = scmp.lt.s32.totalorder %s5624_s24, 1 }
  0x19   : > { %v827_v14 = vpack.c.bf16 %v826_v13, %v825_v12  ;;  %v320_v30 = vld [vmem:[%s5736_s19 + $0x40] sm:$0xff]  ;;  %v321_v31 = vld [vmem:[%s5736_s19 + $0x48] sm:$0xff]  ;;  %v323_v34 = vld [vmem:[%s5736_s19 + $0x58] sm:$0xff]  ;;  %s808_s13 = scalar_select %p807_p9, 1, 0  ;;  %1775 = vmatpush.bf16.msrb.mxu1 %v5281_v51  ;;  %5400 = vmatpush.bf16.msra.mxu3 %v5280_v58  ;;  %v5864_v22 = vadd.s32 8, %v5854_v15 }
  0x1a   : > { %s8251_s11 = smov (!%p930_p8, %s929_s11), 15  ;;  %v332_v32 = vpack.c.bf16 %v321_v31, %v320_v30  ;;  %v333_v35 = vpack.c.bf16 %v323_v34, %v322_v33  ;;  %v5451_v43 = vld [vmem:[%s7937_s3] ss:$0 sm:$0xff]  ;;  %v5290_v9 = vld [vmem:[%s7938_s4 + $0xb8] sm:$0xff]  ;;  %v5289_v21 = vld [vmem:[%s7938_s4 + $0xb0] sm:$0xff] }
  0x1b   : > { %4720 = vmatmul.msk.bf16.vlgmr.msra.gmra.mxu1 %vm7942_vm1, %v827_v14  ;;  %s4723_s12 = sshll.u32 %s8251_s11, 4  ;;  %s5775_s15 = scvt.s32.f32 %s808_s13  ;;  %v5306_v11 = vld [vmem:[%s7938_s4 + $0xf8] sm:$0xff]  ;;  %v5279_v12 = vld [vmem:[%s7938_s4 + $0x60] sm:$0xff]  ;;  %2600 = vmatpush.bf16.msra.mxu2 %v5290_v9  ;;  %v5277_v51 = vld [vmem:[%s7938_s4 + $0x50] sm:$0xff] }
  0x1c   : > { %s933_s14 = scalar_lea.vmem %s5733_s18, %s4723_s12  ;;  %2895 = vmatpush.bf16.msrb.mxu0 %v5306_v11  ;;  %v5278_v27 = vld [vmem:[%s7938_s4 + $0x58] sm:$0xff]  ;;  %v5287_v4 = vld [vmem:[%s7938_s4 + $0xa0] sm:$0xff]  ;;  %v5276_v9 = vld [vmem:[%s7938_s4 + $0x48] sm:$0xff] }
  0x1d   : > { %v934_v23 = vld [vmem:[%s933_s14] sm:$0xff]  ;;  %v935_v24 = vld [vmem:[%s933_s14 + $0x8] sm:$0xff]  ;;  %s812_s18 = sshrl.u32 %s5775_s15, 16  ;;  %p811_p10 = scmp.ne.f32.partialorder %s5775_s15, %s5775_s15  ;;  %1776 = vmatpush.bf16.msrb.mxu1 %v5280_v58  ;;  %5401 = vmatpush.bf16.msra.mxu3 %v5279_v12 }
  0x1e   : > { %v936_v26 = vpack.c.bf16 %v935_v24, %v934_v23  ;;  %s813_s22 = sand.u32 1, %s812_s18 }
  0x1f   : > { %s814_s11 = sadd.s32 32767, %s813_s22  ;;  %2601 = vmatpush.bf16.msra.mxu2 %v5289_v21 }
  0x20   : > { %s815_s13 = sadd.s32 %s814_s11, %s5775_s15 }
  0x21   : > { %s816_s16 = sand.u32 4294901760, %s815_s13  ;;  %1777 = vmatpush.bf16.msrb.mxu1 %v5279_v12  ;;  %5402 = vmatpush.bf16.msra.mxu3 %v5278_v27  ;;  %v1053_v12 = vand.u32 15, %v5864_v22 }
  0x22   : > { %s8253_s16 = smov (%p811_p10, %s816_s16), 2143289344 }
  0x23   : > { %s819_s21 = sshrl.u32 %s8253_s16, 16 }
  0x24   : > { %s903_s22 = sshll.u32 %s819_s21, 16 }
  0x25   : > { %s5844_s9 = sor.u32 %s903_s22, %s819_s21  ;;  %1778 = vmatpush.bf16.msrb.mxu1 %v5278_v27  ;;  %5403 = vmatpush.bf16.msra.mxu3 %v5277_v51 }
  0x26   : > { %s917_s15 = scalar_select %p916_p11, 1, 0 }
  0x27   : > { %4695 = vmatmul.msk.bf16.gmra.mxu0 %vm7942_vm1, %v329_v19  ;;  %v905_v19 = vstv %s5844_s9 }
  0x28   : > { %4701 = vmatmul.msk.bf16.gmra.mxu2 %vm7942_vm1, %v335_v20  ;;  %v5951_v11 = vunpack.c.l.bf16 %v905_v19  ;;  %s5981_s24 = scvt.s32.f32 %s917_s15 }
  0x29   : > { %1779 = vmatpush.bf16.msrb.mxu1 %v5277_v51  ;;  %5404 = vmatpush.bf16.msra.mxu3 %v5276_v9 }
  0x2a   : > { %s921_s10 = sshrl.u32 %s5981_s24, 16  ;;  %p920_p12 = scmp.ne.f32.partialorder %s5981_s24, %s5981_s24 }
  0x2b   : > { %s6062_s16 = sand.u32 1, %s921_s10 }
  0x2c   : > { %s923_s15 = sadd.s32 32767, %s6062_s16 }
  0x2d   : > { %1780 = vmatpush.bf16.msrb.mxu1 %v5276_v9  ;;  %s6105_s21 = sadd.s32 %s923_s15, %s5981_s24 }
  0x2e   : > { %s925_s11 = sand.u32 4294901760, %s6105_s21 }
  0x2f   : > { %s8255_s11 = smov (%p920_p12, %s925_s11), 2143289344 }
  0x30   : > { %s928_s24 = sshrl.u32 %s8255_s11, 16  ;;  %s4691_s11 = sshll.u32 %s5744_s23, 3 }
  0x31   : > { %s1012_s17 = sshll.u32 %s928_s24, 16  ;;  %s7763_s13 = scalar_lea.vmem %s7941_s7, %s4691_s11 }
  0x32   : > { %s6247_s18 = sor.u32 %s1012_s17, %s928_s24 }
  0x37   : > { %4696 = vmatmul.msk.bf16.gmra.mxu0 %vm7942_vm1, %v330_v25 }
  0x38   : > { %4724 = vmatmul.msk.bf16.vlgmr.msrb.gmra.mxu2 %vm7942_vm1, %v936_v26  ;;  %v5305_v26 = vld [vmem:[%s7938_s4 + $0xf0] sm:$0xff] }
  0x39   : > { %2896 = vmatpush.bf16.msrb.mxu0 %v5305_v26 }
  0x47   : > { %4697 = vmatmul.msk.bf16.gmra.mxu0 %vm7942_vm1, %v331_v29 }
  0x57   : > { %4698 = vmatmul.msk.bf16.gmra.mxu0 %vm7942_vm1, %v332_v32 }
  0x67   : > { %4699 = vmatmul.msk.bf16.gmra.mxu0 %vm7942_vm1, %v333_v35 }
  0x94   : > { %v375_v38 = vpop.f32.mrf.mxu0 }
  0x95   : > { %v419_v39 = vmul.f32 %v5780_v36, %v375_v38 }
  0x97   : > { %v5793_v41 = vadd.f32 %v5786_v37, %v419_v39 }
  0x98   : > { %v844_v45 = vpop.f32.mrf.mxu1 }
  0x99   : > { %v4702_v44 = vmul.f32 -1.442695, %v5793_v41  ;;  %v853_v46 = vmul.f32 %v5450_v40, %v844_v45 }
  0x9b   : > { %5456 = vpow2.f32 %v4702_v44  ;;  %v5803_v47 = vadd.f32 %v5451_v43, %v853_v46  ;;  %v405_v63 = vpop.f32.mrf.mxu2  ;;  %v5288_v44 = vld [vmem:[%s7938_s4 + $0xa8] sm:$0xff] }
  0x9c   : > { %v377_v48 = vpop.f32.mrf.mxu0  ;;  %v431_v20 = vmul.f32 %v5780_v36, %v405_v63  ;;  %2602 = vmatpush.bf16.msra.mxu2 %v5288_v44  ;;  %v6002_v44 = vadd.s32 24, %v5854_v15 }
  0x9d   : > { %v420_v49 = vmul.f32 %v5780_v36, %v377_v48  ;;  %v4721_v50 = vmul.f32 -1.442695, %v5803_v47 }
  0x9e   : > { %v5884_v32 = vadd.f32 %v5786_v37, %v431_v20 }
  0x9f   : > { %v5813_v52 = vadd.f32 %v5786_v37, %v420_v49  ;;  %5458 = vpow2.f32 %v4721_v50  ;;  %v5304_v50 = vld [vmem:[%s7938_s4 + $0xe8] sm:$0xff] }
  0xa0   : > { %v846_v55 = vpop.f32.mrf.mxu1  ;;  %2897 = vmatpush.bf16.msrb.mxu0 %v5304_v50  ;;  %2603 = vmatpush.bf16.msra.mxu2 %v5287_v4 }
  0xa1   : > { %v5457_v53 = vpop.eup %5456  ;;  %v4703_v54 = vmul.f32 -1.442695, %v5813_v52  ;;  %v854_v57 = vmul.f32 %v5450_v40, %v846_v55 }
  0xa2   : > { %v5818_v56 = vadd.f32 1.0, %v5457_v53 }
  0xa3   : > { %5460 = vpow2.f32 %v4703_v54  ;;  %v5825_v60 = vadd.f32 %v5451_v43, %v854_v57  ;;  %v407_v33 = vpop.f32.mrf.mxu2  ;;  %v4714_v43 = vmul.f32 -1.442695, %v5884_v32 }
  0xa4   : > { %5462 = vrcp.f32 %v5818_v56  ;;  %v380_v59 = vpop.f32.mrf.mxu0  ;;  %v528_v13 = vand.u32 2147483647, %v5818_v56  ;;  %v530_v17 = vand.u32 2147483648, %v5818_v56  ;;  %vm524_vm2 = vweird.f32 %v5818_v56 }
  0xa5   : > { %v421_v61 = vmul.f32 %v5780_v36, %v380_v59  ;;  %v5459_v62 = vpop.eup %5458  ;;  %v4722_v2 = vmul.f32 -1.442695, %v5825_v60 }
  0xa6   : > { %v5829_v1 = vadd.f32 1.0, %v5459_v62  ;;  %vm5876_vm4 = vcmp.eq.f32.partialorder %v528_v13, 8.507059e+37  ;;  %v531_v35 = vor.u32 1.1754944e-38, %v530_v17 }
  0xa7   : > { %v5833_v3 = vadd.f32 %v5786_v37, %v421_v61 }
  0xa8   : > { %5464 = vrcp.f32 %v5829_v1  ;;  %v878_v25 = vand.u32 2147483647, %v5829_v1  ;;  %v880_v31 = vand.u32 2147483648, %v5829_v1  ;;  %vm874_vm6 = vweird.f32 %v5829_v1 }
  0xa9   : > { %v5461_v5 = vpop.eup %5460  ;;  %5466 = vpow2.f32 %v4722_v2  ;;  %v4704_v8 = vmul.f32 -1.442695, %v5833_v3 }
  0xaa   : > { %v5463_v6 = vpop.eup %5462  ;;  %v5837_v7 = vadd.f32 1.0, %v5461_v5  ;;  %vm5902_vm8 = vcmp.eq.f32.partialorder %v878_v25, 8.507059e+37  ;;  %v881_v55 = vor.u32 1.1754944e-38, %v880_v31 }
  0xab   : > { %v520_v10 = vmul.f32 %v5463_v6, %v5818_v56  ;;  %vm525_vm3 = vweird.f32 %v5463_v6 }
  0xac   : > { %5468 = vrcp.f32 %v5837_v7  ;;  %v382_v14 = vpop.f32.mrf.mxu0  ;;  %vm526_vm5 = vmor %vm524_vm2, %vm525_vm3  ;;  %v545_v56 = vand.u32 2147483648, %v5837_v7  ;;  %vm539_vm10 = vweird.f32 %v5837_v7 }
  0xad   : > { %v521_v16 = vsub.f32 1.0, %v520_v10  ;;  %5470 = vpow2.f32 %v4704_v8  ;;  %v422_v18 = vmul.f32 %v5780_v36, %v382_v14  ;;  %v5303_v8 = vld [vmem:[%s7938_s4 + $0xe0] sm:$0xff] }
  0xae   : > { %v5866_v23 = vpop.eup %5464  ;;  %2898 = vmatpush.bf16.msrb.mxu0 %v5303_v8 }
  0xaf   : > { %v522_v24 = vmul.f32 %v5463_v6, %v521_v16  ;;  %v5467_v28 = vpop.eup %5466  ;;  %v870_v30 = vmul.f32 %v5866_v23, %v5829_v1  ;;  %v5889_v39 = vadd.f32 %v5786_v37, %v422_v18  ;;  %vm875_vm7 = vweird.f32 %v5866_v23 }
  0xb0   : > { %v5886_v38 = vadd.f32 1.0, %v5467_v28  ;;  %vm5925_vm9 = vmor %vm874_vm6, %vm875_vm7  ;;  %v432_v1 = vmul.f32 %v5780_v36, %v407_v33  ;;  %v5961_v16 = vor.u32 1.1754944e-38, %v545_v56 }
  0xb1   : > { %v523_v34 = vadd.f32 %v5463_v6, %v522_v24  ;;  %v871_v42 = vsub.f32 1.0, %v870_v30  ;;  %v4705_v63 = vmul.f32 -1.442695, %v5889_v39  ;;  %v5286_v30 = vld [vmem:[%s7938_s4 + $0x98] sm:$0xff] }
  0xb2   : > { %v5891_v40 = vpop.eup %5468  ;;  %5472 = vrcp.f32 %v5886_v38  ;;  %v5964_v17 = vadd.f32 %v5786_v37, %v432_v1  ;;  %v893_v21 = vand.u32 2147483647, %v5886_v38  ;;  %v895_v25 = vand.u32 2147483648, %v5886_v38  ;;  %2604 = vmatpush.bf16.msra.mxu2 %v5286_v30 }
  0xb3   : > { %v5471_v45 = vpop.eup %5470  ;;  %v527_v46 = vsel %vm526_vm5, %v5463_v6, %v523_v34  ;;  %v535_v49 = vmul.f32 %v5891_v40, %v5837_v7  ;;  %v872_v54 = vmul.f32 %v5866_v23, %v871_v42  ;;  %5474 = vpow2.f32 %v4714_v43  ;;  %v5302_v42 = vld [vmem:[%s7938_s4 + $0xd8] sm:$0xff]  ;;  %v5275_v43 = vld [vmem:[%s7938_s4 + $0x40] sm:$0xff] }
  0xb4   : > { %v532_v53 = vsel %vm5876_vm4, %v531_v35, %v527_v46  ;;  %v385_v57 = vpop.f32.mrf.mxu0  ;;  %v5929_v62 = vadd.f32 1.0, %v5471_v45  ;;  %vm540_vm11 = vweird.f32 %v5891_v40  ;;  %vm889_vm13 = vweird.f32 %v5886_v38  ;;  %2899 = vmatpush.bf16.msrb.mxu0 %v5302_v42  ;;  %1781 = vmatpush.bf16.msrb.mxu1 %v5275_v43 }
  0xb5   : > { %v759_v58 = vmul.f32 %v532_v53, %v5793_v41  ;;  %v536_v61 = vsub.f32 1.0, %v535_v49  ;;  %v873_v2 = vadd.f32 %v5866_v23, %v872_v54  ;;  %v543_v41 = vand.u32 2147483647, %v5837_v7  ;;  %vm6008_vm15 = vmor %vm539_vm10, %vm540_vm11  ;;  %5405 = vmatpush.bf16.msra.mxu3 %v5275_v43  ;;  %v5299_v53 = vld [vmem:[%s7938_s4 + $0xc0] sm:$0xff] }
  0xb6   : > { %5476 = vrcp.f32 %v5929_v62  ;;  %v423_v26 = vmul.f32 %v5780_v36, %v385_v57  ;;  %vm6013_vm0 = vcmp.eq.f32.partialorder %v893_v21, 8.507059e+37  ;;  %v896_v54 = vor.u32 1.1754944e-38, %v895_v25 }
  0xb7   : > { %v775_v5 = vpack.c.bf16 %v759_v58, %v759_v58  ;;  %v537_v6 = vmul.f32 %v5891_v40, %v536_v61  ;;  %v877_v10 = vsel %vm5925_vm9, %v5866_v23, %v873_v2  ;;  %5478 = vpow2.f32 %v4705_v63  ;;  %v410_v23 = vpop.f32.mrf.mxu2  ;;  %v5301_v2 = vld [vmem:[%s7938_s4 + $0xd0] sm:$0xff] }
  0xb8   : > { %v5957_v13 = vpop.eup %5472  ;;  %v882_v14 = vsel %vm5902_vm8, %v881_v55, %v877_v10  ;;  %vm5968_vm12 = vcmp.eq.f32.partialorder %v543_v41, 8.507059e+37  ;;  %v5991_v34 = vadd.f32 %v5786_v37, %v423_v26  ;;  %v558_v55 = vand.u32 2147483647, %v5929_v62  ;;  %2900 = vmatpush.bf16.msrb.mxu0 %v5301_v2  ;;  %v5300_v26 = vld [vmem:[%s7938_s4 + $0xc8] sm:$0xff] }
  0xb9   : > { %791 = vst [vmem:[#allocation2 + $0xc] sm:$0xf] %v775_v5  ;;  %v899_v18 = vmul.f32 %v882_v14, %v5803_v47  ;;  %v885_v20 = vmul.f32 %v5957_v13, %v5886_v38  ;;  %v538_v24 = vadd.f32 %v5891_v40, %v537_v6  ;;  %v4715_v47 = vmul.f32 -1.442695, %v5964_v17  ;;  %v5475_v27 = vpop.eup %5474  ;;  %v5285_v38 = vld [vmem:[%s7938_s4 + $0x90] sm:$0xff] }
  0xba   : > { %vm890_vm14 = vweird.f32 %v5957_v13  ;;  %v5988_v33 = vadd.f32 1.0, %v5475_v27  ;;  %v560_v59 = vand.u32 2147483648, %v5929_v62  ;;  %v4706_v61 = vmul.f32 -1.442695, %v5991_v34  ;;  %2605 = vmatpush.bf16.msra.mxu2 %v5285_v38 }
  0xbb   : > { %v901_v28 = vpack.c.bf16 %v899_v18, %v899_v18  ;;  %v886_v29 = vsub.f32 1.0, %v885_v20  ;;  %5480 = vpow2.f32 %v4715_v47  ;;  %v542_v7 = vsel %vm6008_vm15, %v5891_v40, %v538_v24  ;;  %vm6026_vm2 = vmor %vm889_vm13, %vm890_vm14 }
  0xbc   : > { %v5986_v31 = vpop.eup %5476  ;;  %v5993_v35 = vpop.f32.mrf.mxu0  ;;  %5482 = vrcp.f32 %v5988_v33  ;;  %v433_v63 = vmul.f32 %v5780_v36, %v410_v23  ;;  %v547_v6 = vsel %vm5968_vm12, %v5961_v16, %v542_v7  ;;  %vm554_vm4 = vweird.f32 %v5929_v62  ;;  %2901 = vmatpush.bf16.msrb.mxu0 %v5300_v26 }
  0xbd   : > { %v907_v45 = vunpack.c.l.bf16 %v901_v28  ;;  %v887_v48 = vmul.f32 %v5957_v13, %v886_v29  ;;  %v550_v50 = vmul.f32 %v5986_v31, %v5929_v62  ;;  %v5479_v51 = vpop.eup %5478  ;;  %vm555_vm3 = vweird.f32 %v5986_v31 }
  0xbe   : > { %v6034_v58 = vadd.f32 1.0, %v5479_v51  ;;  %vm6058_vm5 = vcmp.eq.f32.partialorder %v558_v55, 8.507059e+37  ;;  %vm556_vm6 = vmor %vm554_vm4, %vm555_vm3  ;;  %v561_v62 = vor.u32 1.1754944e-38, %v560_v59  ;;  %v710_v19 = vand.u32 2147483648, %v5988_v33 }
  0xbf   : > { %v910_v56 = vmul.f32 %v5951_v11, %v907_v45  ;;  %v888_v57 = vadd.f32 %v5957_v13, %v887_v48  ;;  %v551_v40 = vsub.f32 1.0, %v550_v50  ;;  %v412_v16 = vpop.f32.mrf.mxu2  ;;  %v6074_v20 = vadd.f32 %v5786_v37, %v433_v63 }
  0xc0   : > { %5484 = vrcp.f32 %v6034_v58  ;;  %v1067_v21 = vand.u32 15, %v6002_v44  ;;  %v760_v23 = vmul.f32 %v547_v6, %v5813_v52  ;;  %vm704_vm7 = vweird.f32 %v5988_v33  ;;  %2902 = vmatpush.bf16.msrb.mxu0 %v5299_v53 }
  0xc1   : > { %v912_v41 = vpack.c.bf16 %v910_v56, %v910_v56  ;;  %v892_v1 = vsel %vm6026_vm2, %v5957_v13, %v888_v57  ;;  %v552_v4 = vmul.f32 %v5986_v31, %v551_v40  ;;  %v5481_v5 = vpop.eup %5480  ;;  %5486 = vpow2.f32 %v4706_v61 }
  0xc2   : > { %v897_v8 = vsel %vm6013_vm0, %v896_v54, %v892_v1  ;;  %v6066_v14 = vadd.f32 1.0, %v5481_v5  ;;  %v6068_v18 = vpop.eup %5482  ;;  %v424_v52 = vmul.f32 %v5780_v36, %v5993_v35  ;;  %v708_v43 = vand.u32 2147483647, %v5988_v33 }
  0xc3   : > { %914 = vst [vmem:[#allocation2 + $0x4] sm:$0xf] %v912_v41  ;;  %v900_v10 = vmul.f32 %v897_v8, %v5825_v60  ;;  %v553_v13 = vadd.f32 %v5986_v31, %v552_v4  ;;  %v5284_v60 = vld [vmem:[%s7938_s4 + $0x88] sm:$0xff]  ;;  %v700_v47 = vmul.f32 %v6068_v18, %v5988_v33  ;;  %v6098_v45 = vor.u32 1.1754944e-38, %v710_v19  ;;  %v6140_v41 = vld [vmem:[%s7936_s2] ss:$0 sm:$0xff] }
  0xc4   : > { %5488 = vrcp.f32 %v6066_v14  ;;  %v390_v28 = vpop.f32.mrf.mxu0  ;;  %2606 = vmatpush.bf16.msra.mxu2 %v5284_v60  ;;  %vm569_vm8 = vweird.f32 %v6034_v58  ;;  %v4716_v35 = vmul.f32 -1.442695, %v6074_v20  ;;  %v573_v51 = vand.u32 2147483647, %v6034_v58 }
  0xc5   : > { %v902_v24 = vpack.c.bf16 %v900_v10, %v900_v10  ;;  %v557_v25 = vsel %vm556_vm6, %v5986_v31, %v553_v13  ;;  %v701_v42 = vsub.f32 1.0, %v700_v47  ;;  %v575_v7 = vand.u32 2147483648, %v6034_v58  ;;  %v6161_v13 = vld [vmem:[%s7937_s3] ss:$0 sm:$0xff] }
  0xc6   : > { %v562_v27 = vsel %vm6058_vm5, %v561_v62, %v557_v25  ;;  %v6094_v29 = vpop.eup %5484  ;;  %5490 = vpow2.f32 %v4716_v35  ;;  %v6119_v56 = vadd.f32 %v5786_v37, %v424_v52  ;;  %vm6124_vm9 = vcmp.eq.f32.partialorder %v708_v43, 8.507059e+37 }
  0xc7   : > { %v908_v30 = vunpack.c.l.bf16 %v902_v24  ;;  %v761_v31 = vmul.f32 %v562_v27, %v5833_v3  ;;  %v565_v46 = vmul.f32 %v6094_v29, %v6034_v58  ;;  %v5283_v3 = vld [vmem:[%s7938_s4 + $0x80] sm:$0xff]  ;;  %v5487_v48 = vpop.eup %5486  ;;  %v702_v57 = vmul.f32 %v6068_v18, %v701_v42  ;;  %v953_v6 = vpop.f32.mrf.mxu2 }
  0xc8   : > { %v6116_v55 = vadd.f32 1.0, %v5487_v48  ;;  %2607 = vmatpush.bf16.msra.mxu2 %v5283_v3  ;;  %v723_v38 = vand.u32 2147483647, %v6066_v14  ;;  %v434_v59 = vmul.f32 %v5780_v36, %v412_v16  ;;  %vm705_vm10 = vweird.f32 %v6068_v18 }
  0xc9   : > { %v911_v49 = vmul.f32 %v5951_v11, %v908_v30  ;;  %v5358_v50 = vpack.c.bf16 %v761_v31, %v760_v23  ;;  %v566_v54 = vsub.f32 1.0, %v565_v46  ;;  %v425_v2 = vmul.f32 %v5780_v36, %v390_v28  ;;  %vm6168_vm14 = vmor %vm704_vm7, %vm705_vm10 }
  0xca   : > { %v6131_v61 = vpop.eup %5488  ;;  %5492 = vrcp.f32 %v6116_v55  ;;  %vm570_vm11 = vweird.f32 %v6094_v29  ;;  %vm6143_vm12 = vcmp.eq.f32.partialorder %v573_v51, 8.507059e+37  ;;  %v576_v4 = vor.u32 1.1754944e-38, %v575_v7 }
  0xcb   : > { %v913_v11 = vpack.c.bf16 %v911_v49, %v911_v49  ;;  %5390 = vst [vmem:[#allocation2 + $0x10] sm:$0xff] %v5358_v50   ;;  %v567_v63 = vmul.f32 %v6094_v29, %v566_v54  ;;  %v715_v5 = vmul.f32 %v6131_v61, %v6066_v14  ;;  %vm719_vm13 = vweird.f32 %v6066_v14  ;;  %vm6183_vm0 = vmor %vm569_vm8, %vm570_vm11 }
  0xcc   : > { %v725_v9 = vand.u32 2147483648, %v6066_v14  ;;  %v4707_v10 = vmul.f32 -1.442695, %v6119_v56  ;;  %v703_v16 = vadd.f32 %v6068_v18, %v702_v57  ;;  %vm6172_vm15 = vcmp.eq.f32.partialorder %v723_v38, 8.507059e+37  ;;  %v5491_v24 = vpop.eup %5490  ;;  %v392_v26 = vpop.f32.mrf.mxu0 }
  0xcd   : > { %915 = vst [vmem:[#allocation2 + $0x8] sm:$0xf] %v913_v11  ;;  %v568_v8 = vadd.f32 %v6094_v29, %v567_v63  ;;  %v716_v19 = vsub.f32 1.0, %v715_v5  ;;  %v6177_v23 = vadd.f32 %v5786_v37, %v434_v59  ;;  %vm720_vm2 = vweird.f32 %v6131_v61 }
  0xce   : > { %5494 = vpow2.f32 %v4707_v10  ;;  %v6189_v25 = vadd.f32 %v5786_v37, %v425_v2  ;;  %v962_v47 = vmul.f32 %v6140_v41, %v953_v6  ;;  %v6196_v58 = vadd.f32 1.0, %v5491_v24  ;;  %vm6213_vm3 = vmor %vm719_vm13, %vm720_vm2 }
  0xcf   : > { %v572_v27 = vsel %vm6183_vm0, %v6094_v29, %v568_v8  ;;  %v717_v52 = vmul.f32 %v6131_v61, %v716_v19  ;;  %v4717_v28 = vmul.f32 -1.442695, %v6177_v23  ;;  %v726_v31 = vor.u32 1.1754944e-38, %v725_v9  ;;  %v955_v40 = vpop.f32.mrf.mxu2 }
  0xd0   : > { %v5493_v30 = vpop.eup %5492  ;;  %v588_v42 = vand.u32 2147483647, %v6116_v55  ;;  %v4708_v43 = vmul.f32 -1.442695, %v6189_v25  ;;  %v6203_v46 = vadd.f32 %v6161_v13, %v962_v47  ;;  %v707_v29 = vsel %vm6168_vm14, %v6068_v18, %v703_v16 }
  0xd1   : > { %v718_v35 = vadd.f32 %v6131_v61, %v717_v52  ;;  %v580_v48 = vmul.f32 %v5493_v30, %v6116_v55  ;;  %5496 = vrcp.f32 %v6196_v58  ;;  %v577_v49 = vsel %vm6143_vm12, %v576_v4, %v572_v27 }
  0xd2   : > { %vm584_vm4 = vweird.f32 %v6116_v55  ;;  %v590_v18 = vand.u32 2147483648, %v6116_v55  ;;  %5498 = vpow2.f32 %v4717_v28  ;;  %v4725_v14 = vmul.f32 -1.442695, %v6203_v46 }
  0xd3   : > { %v581_v51 = vsub.f32 1.0, %v580_v48  ;;  %5500 = vpow2.f32 %v4708_v43  ;;  %v426_v7 = vmul.f32 %v5780_v36, %v392_v26  ;;  %v6230_v54 = vsel %vm6124_vm9, %v6098_v45, %v707_v29 }
  0xd4   : > { %v5259_v50 = vld [vmem:[#allocation2 + $0x4] sm:$0xff]  ;;  %v5495_v53 = vpop.eup %5494  ;;  %v722_v11 = vsel %vm6213_vm3, %v6131_v61, %v718_v35  ;;  %v738_v57 = vand.u32 2147483647, %v6196_v58  ;;  %v740_v38 = vand.u32 2147483648, %v6196_v58  ;;  %vm585_vm5 = vweird.f32 %v5493_v30  ;;  %v395_v62 = vpop.f32.mrf.mxu0 }
  0xd5   : > { %1782 = vmatmul.bf16.vlgmr.msrb.gmra.mxu1 %v5259_v50  ;;  %v582_v59 = vmul.f32 %v5493_v30, %v581_v51  ;;  %vm6237_vm6 = vcmp.eq.f32.partialorder %v588_v42, 8.507059e+37  ;;  %v6241_v2 = vadd.f32 1.0, %v5495_v53  ;;  %v762_v45 = vmul.f32 %v577_v49, %v5889_v39  ;;  %vm586_vm8 = vmor %vm584_vm4, %vm585_vm5 }
  0xd6   : > { %v591_v1 = vor.u32 1.1754944e-38, %v590_v18  ;;  %vm734_vm7 = vweird.f32 %v6196_v58  ;;  %5502 = vpow2.f32 %v4725_v14  ;;  %v727_v4 = vsel %vm6172_vm15, %v726_v31, %v722_v11 }
  0xd7   : > { %v5497_v61 = vpop.eup %5496  ;;  %v583_v5 = vadd.f32 %v5493_v30, %v582_v59  ;;  %5504 = vrcp.f32 %v6241_v2  ;;  %v6253_v6 = vadd.f32 %v5786_v37, %v426_v7  ;;  %vm6259_vm9 = vcmp.eq.f32.partialorder %v738_v57, 8.507059e+37 }
  0xd8   : > { %v5499_v8 = vpop.eup %5498  ;;  %v730_v39 = vmul.f32 %v5497_v61, %v6196_v58  ;;  %v741_v10 = vor.u32 1.1754944e-38, %v740_v38  ;;  %v963_v16 = vmul.f32 %v6140_v41, %v955_v40  ;;  %vm735_vm10 = vweird.f32 %v5497_v61 }
  0xd9   : > { %v5501_v19 = vpop.eup %5500  ;;  %v587_v60 = vsel %vm586_vm8, %v5493_v30, %v583_v5  ;;  %v6264_v24 = vadd.f32 1.0, %v5499_v8  ;;  %v1014_v33 = vstv %s6247_s18  ;;  %v605_v26 = vand.u32 2147483648, %v6241_v2  ;;  %vm6287_vm11 = vmor %vm734_vm7, %vm735_vm10 }
  0xda   : > { %v592_v55 = vsel %vm6237_vm6, %v591_v1, %v587_v60  ;;  %v731_v47 = vsub.f32 1.0, %v730_v39  ;;  %v6270_v27 = vadd.f32 1.0, %v5501_v19  ;;  %v603_v28 = vand.u32 2147483647, %v6241_v2 }
  0xdb   : > { %v763_v52 = vmul.f32 %v592_v55, %v5991_v34  ;;  %5506 = vrcp.f32 %v6264_v24  ;;  %v4709_v41 = vmul.f32 -1.442695, %v6253_v6  ;;  %v753_v42 = vand.u32 2147483647, %v6264_v24 }
  0xdc   : > { %v5503_v30 = vpop.eup %5502  ;;  %v732_v31 = vmul.f32 %v5497_v61, %v731_v47  ;;  %5508 = vrcp.f32 %v6270_v27  ;;  %v6279_v43 = vadd.f32 %v6161_v13, %v963_v16  ;;  %v772_v35 = vmul.f32 %v727_v4, %v5964_v17  ;;  %v397_v5 = vpop.f32.mrf.mxu0 }
  0xdd   : > { %v6281_v29 = vpop.eup %5504  ;;  %v5363_v34 = vpack.c.bf16 %v763_v52, %v762_v45  ;;  %v6291_v48 = vunpack.c.l.bf16 %v1014_v33  ;;  %v427_v49 = vmul.f32 %v5780_v36, %v395_v62  ;;  %vm599_vm12 = vweird.f32 %v6241_v2 }
  0xde   : > { %v733_v18 = vadd.f32 %v5497_v61, %v732_v31  ;;  %v595_v13 = vmul.f32 %v6281_v29, %v6241_v2  ;;  %v606_v50 = vor.u32 1.1754944e-38, %v605_v26  ;;  %vm749_vm13 = vweird.f32 %v6264_v24 }
  0xdf   : > { %5391 = vst [vmem:[#allocation2 + $0x18] sm:$0xff] %v5363_v34   ;;  %v755_v17 = vand.u32 2147483648, %v6264_v24  ;;  %v6299_v58 = vadd.f32 1.0, %v5503_v30  ;;  %5510 = vpow2.f32 %v4709_v41  ;;  %vm6303_vm14 = vcmp.eq.f32.partialorder %v603_v28, 8.507059e+37 }
  0xe0   : > { %v737_v51 = vsel %vm6287_vm11, %v5497_v61, %v733_v18  ;;  %v596_v14 = vsub.f32 1.0, %v595_v13  ;;  %vm6307_vm15 = vcmp.eq.f32.partialorder %v753_v42, 8.507059e+37  ;;  %v618_v11 = vand.u32 2147483647, %v6270_v27 }
  0xe1   : > { %v4726_v57 = vmul.f32 -1.442695, %v6279_v43  ;;  %v5507_v38 = vpop.eup %5506  ;;  %v742_v59 = vsel %vm6259_vm9, %v741_v10, %v737_v51  ;;  %vm614_vm0 = vweird.f32 %v6270_v27  ;;  %v620_v63 = vand.u32 2147483648, %v6270_v27 }
  0xe2   : > { %5512 = vrcp.f32 %v6299_v58  ;;  %v6319_v40 = vadd.f32 %v5786_v37, %v427_v49  ;;  %v5509_v45 = vpop.eup %5508  ;;  %v773_v1 = vmul.f32 %v742_v59, %v6074_v20  ;;  %v597_v61 = vmul.f32 %v6281_v29, %v596_v14 }
  0xe3   : > { %vm600_vm2 = vweird.f32 %v6281_v29  ;;  %v745_v4 = vmul.f32 %v5507_v38, %v6264_v24  ;;  %vm750_vm3 = vweird.f32 %v5507_v38  ;;  %v756_v8 = vor.u32 1.1754944e-38, %v755_v17 }
  0xe4   : > { %v610_v39 = vmul.f32 %v5509_v45, %v6270_v27  ;;  %v987_v9 = vand.u32 2147483647, %v6299_v58  ;;  %v5388_v10 = vpack.c.bf16 %v773_v1, %v772_v35  ;;  %v598_v16 = vadd.f32 %v6281_v29, %v597_v61  ;;  %vm6330_vm4 = vmor %vm599_vm12, %vm600_vm2 }
  0xe5   : > { %v746_v62 = vsub.f32 1.0, %v745_v4  ;;  %5514 = vpow2.f32 %v4726_v57  ;;  %v5511_v19 = vpop.eup %5510  ;;  %vm6334_vm5 = vcmp.eq.f32.partialorder %v618_v11, 8.507059e+37  ;;  %v4710_v55 = vmul.f32 -1.442695, %v6319_v40  ;;  %vm6348_vm6 = vmor %vm749_vm13, %vm750_vm3 }
  0xe6   : > { %v611_v60 = vsub.f32 1.0, %v610_v39  ;;  %v428_v47 = vmul.f32 %v5780_v36, %v397_v5  ;;  %5396 = vst [vmem:[#allocation2 + $0x40] sm:$0xff] %v5388_v10   ;;  %v602_v26 = vsel %vm6330_vm4, %v6281_v29, %v598_v16  ;;  %v621_v2 = vor.u32 1.1754944e-38, %v620_v63 }
  0xe7   : > { %v747_v52 = vmul.f32 %v5507_v38, %v746_v62  ;;  %v6343_v28 = vadd.f32 1.0, %v5511_v19  ;;  %vm615_vm7 = vweird.f32 %v5509_v45  ;;  %5516 = vpow2.f32 %v4710_v55 }
  0xe8   : > { %v5513_v41 = vpop.eup %5512  ;;  %v612_v31 = vmul.f32 %v5509_v45, %v611_v60  ;;  %v6353_v36 = vadd.f32 %v5786_v37, %v428_v47  ;;  %vm983_vm8 = vweird.f32 %v6299_v58  ;;  %vm6357_vm9 = vcmp.eq.f32.partialorder %v987_v9, 8.507059e+37  ;;  %vm616_vm10 = vmor %vm614_vm0, %vm615_vm7 }
  0xe9   : > { %v748_v42 = vadd.f32 %v5507_v38, %v747_v52  ;;  %v979_v29 = vmul.f32 %v5513_v41, %v6299_v58  ;;  %v607_v24 = vsel %vm6303_vm14, %v606_v50, %v602_v26  ;;  %v989_v3 = vand.u32 2147483648, %v6299_v58 }
  0xea   : > { %v613_v34 = vadd.f32 %v5509_v45, %v612_v31  ;;  %5518 = vrcp.f32 %v6343_v28  ;;  %vm984_vm11 = vweird.f32 %v5513_v41  ;;  %v633_v13 = vand.u32 2147483647, %v6343_v28 }
  0xeb   : > { %v5515_v49 = vpop.eup %5514  ;;  %v752_v37 = vsel %vm6348_vm6, %v5507_v38, %v748_v42  ;;  %v980_v18 = vsub.f32 1.0, %v979_v29  ;;  %vm6372_vm12 = vcmp.lt.s32.totalorder %v1053_v12, 15  ;;  %v4711_v7 = vmul.f32 -1.442695, %v6353_v36  ;;  %vm6389_vm13 = vmor %vm983_vm8, %vm984_vm11 }
  0xec   : > { %v757_v17 = vsel %vm6307_vm15, %v756_v8, %v752_v37  ;;  %v617_v51 = vsel %vm616_vm10, %v5509_v45, %v613_v34  ;;  %v6378_v14 = vadd.f32 1.0, %v5515_v49  ;;  %v635_v22 = vand.u32 2147483648, %v6343_v28  ;;  %vm2102_vm8 = vmpackc.low %vm6372_vm12, %vm6372_vm12 }
  0xed   : > { %v774_v27 = vmul.f32 %v757_v17, %v6177_v23  ;;  %v622_v11 = vsel %vm6334_vm5, %v621_v2, %v617_v51  ;;  %v981_v57 = vmul.f32 %v5513_v41, %v980_v18  ;;  %v5517_v12 = vpop.eup %5516  ;;  %v764_v38 = vmul.f32 %v607_v24, %v6119_v56 }
  0xee   : > { %v765_v59 = vmul.f32 %v622_v11, %v6189_v25  ;;  %v990_v63 = vor.u32 1.1754944e-38, %v989_v3  ;;  %5520 = vrcp.f32 %v6378_v14  ;;  %v6394_v1 = vadd.f32 1.0, %v5517_v12 }
  0xef   : > { %v790_v23 = vpack.c.bf16 %v774_v27, %v774_v27  ;;  %v982_v45 = vadd.f32 %v5513_v41, %v981_v57  ;;  %vm6398_vm14 = vcmp.lt.s32.totalorder %v1067_v21, 15  ;;  %vm629_vm15 = vweird.f32 %v6343_v28 }
  0xf0   : > { %v5519_v56 = vpop.eup %5518  ;;  %v5368_v25 = vpack.c.bf16 %v765_v59, %v764_v38  ;;  %5522 = vpow2.f32 %v4711_v7  ;;  %vm6406_vm0 = vcmp.eq.f32.partialorder %v633_v13, 8.507059e+37  ;;  %v636_v44 = vor.u32 1.1754944e-38, %v635_v22  ;;  %vm2104_vm10 = vmpackc.low %vm6398_vm14, %vm6398_vm14  ;;  %v2054_v7 = vld [vmem:[#allocation2 + $0xc] sm:$0xf] }
  0xf1   : > { %806 = vst [vmem:[#allocation2 + $0x48] sm:$0xf] %v790_v23  ;;  %v986_v58 = vsel %vm6389_vm13, %v5513_v41, %v982_v45  ;;  %v625_v4 = vmul.f32 %v5519_v56, %v6343_v28  ;;  %vm5643_vm2 = vmmov 1   ;;  %v1002_v8 = vand.u32 2147483647, %v6378_v14 }
  0xf2   : > { %vm1316_vm3 = vmpackc.low %vm5643_vm2, %vm5643_vm2  ;;  %5392 = vst [vmem:[#allocation2 + $0x20] sm:$0xff] %v5368_v25   ;;  %v991_v21 = vsel %vm6357_vm9, %v990_v63, %v986_v58  ;;  %v1004_v39 = vand.u32 2147483648, %v6378_v14  ;;  %5524 = vrcp.f32 %v6394_v1  ;;  %vm998_vm4 = vweird.f32 %v6378_v14 }
  0xf3   : > { %v1008_v9 = vmul.f32 %v991_v21, %v6203_v46  ;;  %v626_v10 = vsub.f32 1.0, %v625_v4  ;;  %v1332_v16 = vsel %vm1316_vm3, 65537, %v7979_v0  ;;  %vm630_vm5 = vweird.f32 %v5519_v56 }
  0xf4   : > { %v5521_v62 = vpop.eup %5520  ;;  %v650_v19 = vand.u32 2147483648, %v6394_v1  ;;  %v1360_v20 = vshll.u32 %v1332_v16, 16  ;;  %v1364_v60 = vshrl.u32 %v1332_v16, 16  ;;  %v648_v26 = vand.u32 2147483647, %v6394_v1  ;;  %vm631_vm11 = vmor %vm629_vm15, %vm630_vm5 }
  0xf5   : > { %v1010_v33 = vpack.c.bf16 %v1008_v9, %v1008_v9  ;;  %v627_v55 = vmul.f32 %v5519_v56, %v626_v10  ;;  %v994_v47 = vmul.f32 %v5521_v62, %v6378_v14  ;;  %vm999_vm6 = vweird.f32 %v5521_v62 }
  0xf6   : > { %v5523_v52 = vpop.eup %5522  ;;  %vm6421_vm7 = vcmp.eq.f32.partialorder %v1002_v8, 8.507059e+37  ;;  %v1005_v2 = vor.u32 1.1754944e-38, %v1004_v39  ;;  %v1366_v41 = vrot.slane %v1364_v60, 4  ;;  %vm644_vm9 = vweird.f32 %v6394_v1  ;;  %vm6456_vm15 = vmor %vm998_vm4, %vm999_vm6 }
  0xf7   : > { %v1016_v30 = vunpack.c.l.bf16 %v1010_v33  ;;  %v628_v31 = vadd.f32 %v5519_v56, %v627_v55  ;;  %v995_v42 = vsub.f32 1.0, %v994_v47  ;;  %v6429_v29 = vadd.f32 1.0, %v5523_v52  ;;  %v5601_v47 = vld [vmem:[%s7937_s3] ss:$0 sm:$0xff] }
  0xf8   : > { %v5525_v35 = vpop.eup %5524  ;;  %v651_v24 = vor.u32 1.1754944e-38, %v650_v19  ;;  %v6437_v34 = vrot.slane %v1360_v20, 5  ;;  %v6440_v3 = vunpack.c.l.b16 %v7979_v0  ;;  %v6443_v49 = vunpack.c.h.b16 %v7979_v0 }
  0xf9   : > { %v1019_v37 = vmul.f32 %v6291_v48, %v1016_v30  ;;  %v632_v18 = vsel %vm631_vm11, %v5519_v56, %v628_v31  ;;  %v996_v13 = vmul.f32 %v5521_v62, %v995_v42  ;;  %v640_v17 = vmul.f32 %v5525_v35, %v6394_v1  ;;  %v2052_v42 = vld [vmem:[#allocation2 + $0x4] sm:$0xf] }
  0xfa   : > { %vm6447_vm13 = vcmp.eq.f32.partialorder %v648_v26, 8.507059e+37  ;;  %v637_v28 = vsel %vm6406_vm0, %v636_v44, %v632_v18  ;;  %5526 = vrcp.f32 %v6429_v29  ;;  %v1367_v27 = vor.u32 %v1366_v41, %v6437_v34 }
  0xfb   : > { %v2118_v11 = vsel %vm2102_vm8, 65537, %v7979_v0  ;;  %v1021_v57 = vpack.c.bf16 %v1019_v37, %v1019_v37  ;;  %v997_v22 = vadd.f32 %v5521_v62, %v996_v13  ;;  %v641_v12 = vsub.f32 1.0, %v640_v17  ;;  %v2053_v17 = vld [vmem:[#allocation2 + $0x8] sm:$0xf] }
  0xfc   : > { %v2120_v14 = vsel %vm2104_vm10, 65537, %v7979_v0  ;;  %v766_v38 = vmul.f32 %v637_v28, %v6253_v6  ;;  %vm645_vm0 = vweird.f32 %v5525_v35  ;;  %v663_v59 = vand.u32 2147483647, %v6429_v29 }
  0xfd   : > { %vm2133_vm2 = vsmask.f32 256  ;;  %1023 = vst [vmem:[#allocation2 + $0x4c] sm:$0xf] %v1021_v57  ;;  %v1001_v50 = vsel %vm6456_vm15, %v5521_v62, %v997_v22  ;;  %v642_v53 = vmul.f32 %v5525_v35, %v641_v12  ;;  %v2139_v63 = vrot.slane %v1364_v60, 7  ;;  %vm646_vm3 = vmor %vm644_vm9, %vm645_vm0 }
  0xfe   : > { %v2145_v23 = vshrl.u32 %v2118_v11, 16  ;;  %v1006_v45 = vsel %vm6421_vm7, %v1005_v2, %v1001_v50  ;;  %vm659_vm12 = vweird.f32 %v6429_v29  ;;  %v665_v61 = vand.u32 2147483648, %v6429_v29  ;;  %v2055_v22 = vld [vmem:[#allocation2 + $0x10] sm:$0xf] }
  0xff   : > { %vm2134_vm14 = vsmask.f32 4368  ;;  %v2148_v6 = vshll.u32 %v2118_v11, 16  ;;  %v1009_v56 = vmul.f32 %v1006_v45, %v6279_v43  ;;  %v643_v25 = vadd.f32 %v5525_v35, %v642_v53 }
 0x100   : > { %v6483_v58 = vrot.slane %v1367_v27, 4  ;;  %v6485_v4 = vor.u32 %v2139_v63, %v1360_v20  ;;  %v6487_v5 = vpop.eup %5526  ;;  %v6492_v44 = vrot.slane %v2139_v63, 4  ;;  %v2147_v21 = vrot.slane %v2145_v23, 7  ;;  %vm6499_vm5 = vmor %vm2133_vm2, %vm2134_vm14 }
 0x101   : > { %v2163_v8 = vshrl.u32 %v2120_v14, 16  ;;  %v2166_v39 = vshll.u32 %v2120_v14, 16  ;;  %v1011_v9 = vpack.c.bf16 %v1009_v56, %v1009_v56  ;;  %v647_v10 = vsel %vm646_vm3, %v5525_v35, %v643_v25 }
 0x102   : > { %v655_v43 = vmul.f32 %v6487_v5, %v6429_v29  ;;  %vm660_vm4 = vweird.f32 %v6487_v5  ;;  %v652_v1 = vsel %vm6447_vm13, %v651_v24, %v647_v10  ;;  %v2150_v62 = vor.u32 %v2148_v6, %v2147_v21 }
 0x103   : > { %v2152_v19 = vrot.slane %v2147_v21, 4  ;;  %v6505_v20 = vrot.slane %v2163_v8, 7  ;;  %v1017_v60 = vunpack.c.l.bf16 %v1011_v9  ;;  %v767_v33 = vmul.f32 %v652_v1, %v6319_v40  ;;  %vm6533_vm9 = vmor %vm659_vm12, %vm660_vm4  ;;  %v400_v9 = vpop.f32.mrf.mxu0 }
 0x104   : > { %v656_v55 = vsub.f32 1.0, %v655_v43  ;;  %vm6508_vm6 = vcmp.eq.f32.partialorder %v663_v59, 8.507059e+37  ;;  %v2279_v26 = vunpack.c.l.b16 %v6485_v4  ;;  %v2151_v52 = vsel %vm6499_vm5, %v6492_v44, %v2150_v62  ;;  %v5600_v43 = vld [vmem:[%s7936_s2] ss:$0 sm:$0xff] }
 0x105   : > { %v2160_v46 = vsel %vm6499_vm5, %v2152_v19, %v6485_v4  ;;  %v2168_v2 = vor.u32 %v2166_v39, %v6505_v20  ;;  %v2280_v41 = vunpack.c.h.b16 %v6485_v4  ;;  %v1020_v40 = vmul.f32 %v6291_v48, %v1017_v60  ;;  %v5260_v39 = vld [vmem:[#allocation2 + $0xc] sm:$0xff] }
 0x106   : > { %v5373_v30 = vpack.c.bf16 %v767_v33, %v766_v38  ;;  %v657_v31 = vmul.f32 %v6487_v5, %v656_v55  ;;  %vm2283_vm7 = vcmp.ne.s32.totalorder %v2279_v26, %v6440_v3  ;;  %v2286_v24 = vunpack.c.l.b16 %v2151_v52  ;;  %1787 = vmatmul.bf16.gmra.mxu1 %v5260_v39 }
 0x107   : > { %v2169_v35 = vsel %vm6499_vm5, %v6492_v44, %v2168_v2  ;;  %vm2284_vm8 = vcmp.ne.s32.totalorder %v2280_v41, %v6443_v49  ;;  %v2287_v37 = vunpack.c.h.b16 %v2151_v52  ;;  %v1022_v18 = vpack.c.bf16 %v1020_v40, %v1020_v40 }
 0x108   : > { %5393 = vst [vmem:[#allocation2 + $0x28] sm:$0xff] %v5373_v30   ;;  %v658_v13 = vadd.f32 %v6487_v5, %v657_v31  ;;  %v2293_v51 = vunpack.c.l.b16 %v2160_v46  ;;  %v2294_v28 = vunpack.c.h.b16 %v2160_v46  ;;  %vm6537_vm10 = vmpackc.low %vm2284_vm8, %vm2283_vm7  ;;  %v8054_v27 = vmov 0 }
 0x109   : > { %v8055_v27 = vsel %vm6537_vm10, 4294967295, %v8054_v27  ;;  %vm2290_vm11 = vcmp.ne.s32.totalorder %v2286_v24, %v6440_v3  ;;  %vm2291_vm13 = vcmp.ne.s32.totalorder %v2287_v37, %v6443_v49  ;;  %v2300_v11 = vunpack.c.l.b16 %v2169_v35  ;;  %1024 = vst [vmem:[#allocation2 + $0x50] sm:$0xf] %v1022_v18 }
 0x10a   : > { %v2301_v57 = vunpack.c.h.b16 %v2169_v35  ;;  %v662_v29 = vsel %vm6533_vm9, %v6487_v5, %v658_v13  ;;  %vm6546_vm15 = vmpackc.low %vm2291_vm13, %vm2290_vm11  ;;  %v8056_v12 = vmov 0  ;;  %vm2297_vm0 = vcmp.ne.s32.totalorder %v2293_v51, %v6440_v3 }
 0x10b   : > { %v8057_v12 = vsel %vm6546_vm15, 4294967295, %v8056_v12  ;;  %vm2298_vm2 = vcmp.ne.s32.totalorder %v2294_v28, %v6443_v49  ;;  %v2398_v14 = vsel %vm6537_vm10, %v2052_v42, 0  ;;  %v666_v38 = vor.u32 1.1754944e-38, %v665_v61 }
 0x10c   : > { %vm6554_vm12 = vmpackc.low %vm2298_vm2, %vm2297_vm0  ;;  %v8058_v59 = vmov 0  ;;  %vm2304_vm14 = vcmp.ne.s32.totalorder %v2300_v11, %v6440_v3  ;;  %vm2305_vm3 = vcmp.ne.s32.totalorder %v2301_v57, %v6443_v49  ;;  %v2399_v50 = vsel %vm6546_vm15, %v2053_v17, 0  ;;  %v402_v11 = vpop.f32.mrf.mxu0  ;;  %v5342_v57 = vld [vmem:[%s7938_s4 + $0x1d8] sm:$0xff] }
 0x10d   : > { %v8059_v59 = vsel %vm6554_vm12, 4294967295, %v8058_v59  ;;  %vm6562_vm4 = vmpackc.low %vm2305_vm3, %vm2304_vm14  ;;  %v8060_v53 = vmov 0  ;;  %v2400_v63 = vsel %vm6554_vm12, %v2054_v7, 0  ;;  %v2449_v23 = vunpack.c.l.b16 %v2398_v14  ;;  %v2665_v14 = vld [vmem:[#allocation2 + $0x8] sm:$0x8] }
 0x10e   : > { %v8061_v53 = vsel %vm6562_vm4, 4294967295, %v8060_v53  ;;  %v2450_v45 = vunpack.c.l.b16 %v2399_v50  ;;  %vm7943_vm7 = vsmask.f32 7424  ;;  %v6570_v61 = vsel %vm6508_vm6, %v666_v38, %v662_v29 }
 0x10f   : > { %v2401_v6 = vsel %vm6562_vm4, %v2055_v22, 0  ;;  %v1028_v56 = vadd.s32 16, %v5854_v15  ;;  %v1046_v25 = vand.u32 15, %v5854_v15  ;;  %v2451_v5 = vunpack.c.l.b16 %v2400_v63 }
 0x110   : > { %v2452_v21 = vunpack.c.l.b16 %v2401_v6  ;;  %v2466_v8 = vpack.c.b16 %v2450_v45, %v2449_v23  ;;  %vm1347_vm8 = vsmask.f32 3328  ;;  %vm1348_vm11 = vsmask.f32 7440 }
 0x111   : > { %v1060_v10 = vand.u32 15, %v1028_v56  ;;  %vm1234_vm9 = vcmp.ge.s32.totalorder %v1046_v25, 1  ;;  %v429_v1 = vmul.f32 %v5600_v43, %v400_v9  ;;  %v1031_v33 = vadd.s32 40, %v5854_v15  ;;  %vm6603_vm3 = vmor %vm1347_vm8, %vm1348_vm11 }
 0x112   : > { %v6579_v62 = vpack.c.b16 %v2452_v21, %v2451_v5  ;;  %v2477_v19 = vshrl.u32 %v2466_v8, 16  ;;  %v2479_v60 = vshll.u32 %v2466_v8, 16  ;;  %vm1315_vm6 = vmpackc.low %vm1234_vm9, %vm1234_vm9  ;;  %v2170_v52 = vrot.slane %v6505_v20, 4 }
 0x113   : > { %vm1236_vm13 = vcmp.ge.s32.totalorder %v1060_v10, 1  ;;  %v1331_v55 = vsel %vm1315_vm6, 65537, %v7979_v0  ;;  %v6586_v26 = vadd.f32 %v5601_v47, %v429_v1  ;;  %v1081_v42 = vand.u32 15, %v1031_v33 }
 0x114   : > { %v2481_v46 = vrot.slane %v2479_v60, 1  ;;  %v2484_v2 = vshll.u32 %v6579_v62, 16  ;;  %vm1317_vm0 = vmpackc.low %vm1236_vm13, %vm1236_vm13  ;;  %v1351_v41 = vshll.u32 %v1331_v55, 16  ;;  %v1354_v40 = vshrl.u32 %v1331_v55, 16  ;;  %v2667_v60 = vld [vmem:[#allocation2 + $0x10] sm:$0xf] }
 0x115   : > { %v1333_v30 = vsel %vm1317_vm0, 65537, %v7979_v0  ;;  %v4712_v31 = vmul.f32 -1.442695, %v6586_v26  ;;  %v6595_v35 = vsel %vm6499_vm5, %v2170_v52, %v6485_v4  ;;  %vm1255_vm2 = vcmp.lt.s32.totalorder %v1081_v42, 15  ;;  %v2666_v55 = vld [vmem:[#allocation2 + $0xc] sm:$0xf] }
 0x116   : > { %v2482_v24 = vor.u32 %v2481_v46, %v2477_v19  ;;  %v6597_v37 = vrot.slane %v2484_v2, 1  ;;  %v1353_v20 = vrot.slane %v1351_v41, 5  ;;  %v1356_v18 = vrot.slane %v1354_v40, 4  ;;  %vm2106_vm14 = vmpackc.low %vm1255_vm2, %vm1255_vm2 }
 0x117   : > { %v1370_v13 = vshll.u32 %v1333_v30, 16  ;;  %v1374_v48 = vshrl.u32 %v1333_v30, 16  ;;  %5528 = vpow2.f32 %v4712_v31  ;;  %v430_v38 = vmul.f32 %v5600_v43, %v402_v11 }
 0x118   : > { %v2487_v17 = vsel %vm7943_vm7, %v2482_v24, %v6597_v37  ;;  %v1357_v51 = vor.u32 %v1356_v18, %v1353_v20  ;;  %v1509_v28 = vunpack.c.l.b16 %v1353_v20  ;;  %v1510_v7 = vunpack.c.h.b16 %v1353_v20  ;;  %v2668_v18 = vld [vmem:[#allocation2 + $0x14] sm:$0xf] }
 0x119   : > { %2608 = vmatmul.bf16.vlgmr.msra.gmra.mxu2 %v2487_v17  ;;  %v1372_v29 = vrot.slane %v1370_v13, 5  ;;  %v1376_v22 = vrot.slane %v1374_v48, 4  ;;  %v2122_v50 = vsel %vm2106_vm14, 65537, %v7979_v0  ;;  %v6617_v25 = vadd.f32 %v5601_v47, %v430_v38 }
 0x11a   : > { %v1358_v63 = vrot.slane %v1357_v51, 4  ;;  %vm1513_vm9 = vcmp.ne.s32.totalorder %v1509_v28, %v6440_v3  ;;  %vm1514_vm6 = vcmp.ne.s32.totalorder %v1510_v7, %v6443_v49  ;;  %v2181_v23 = vshrl.u32 %v2122_v50, 16  ;;  %v5293_v51 = vld [vmem:[#allocation2 + $0x1c] sm:$0xff] }
 0x11b   : > { %v1373_v45 = vsel %vm6603_vm3, %v6483_v58, %v1372_v29  ;;  %v1377_v6 = vor.u32 %v1376_v22, %v1372_v29  ;;  %vm6613_vm8 = vmpackc.low %vm1514_vm6, %vm1513_vm9  ;;  %v2184_v5 = vshll.u32 %v2122_v50, 16  ;;  %v4713_v52 = vmul.f32 -1.442695, %v6617_v25  ;;  %v2056_v22 = vld [vmem:[#allocation2 + $0x14] sm:$0xf] }
 0x11c   : > { %v1363_v21 = vsel %vm6603_vm3, %v1358_v63, %v6437_v34  ;;  %v1523_v8 = vunpack.c.l.b16 %v1373_v45  ;;  %v1524_v39 = vunpack.c.h.b16 %v1373_v45  ;;  %v2682_v9 = vsel %vm6613_vm8, %v2665_v14, 0 }
 0x11d   : > { %v5529_v10 = vpop.eup %5528  ;;  %v1378_v43 = vrot.slane %v1377_v6, 4  ;;  %v1516_v1 = vunpack.c.l.b16 %v1363_v21  ;;  %v1517_v19 = vunpack.c.h.b16 %v1363_v21  ;;  %v2733_v33 = vunpack.c.l.b16 %v2682_v9  ;;  %v2057_v9 = vld [vmem:[#allocation2 + $0x18] sm:$0xf] }
 0x11e   : > { %vm1527_vm11 = vcmp.ne.s32.totalorder %v1523_v8, %v6440_v3  ;;  %vm1528_vm13 = vcmp.ne.s32.totalorder %v1524_v39, %v6443_v49  ;;  %v6626_v47 = vadd.f32 1.0, %v5529_v10  ;;  %v6638_v41 = vrot.slane %v2181_v23, 7 }
 0x11f   : > { %v1383_v46 = vsel %vm6603_vm3, %v1378_v43, %v6437_v34  ;;  %vm1520_vm0 = vcmp.ne.s32.totalorder %v1516_v1, %v6440_v3  ;;  %vm1521_vm2 = vcmp.ne.s32.totalorder %v1517_v19, %v6443_v49  ;;  %vm6634_vm14 = vmpackc.low %vm1528_vm13, %vm1527_vm11  ;;  %v8068_v40 = vmov 0 }
 0x120   : > { %vm6640_vm9 = vmpackc.low %vm1521_vm2, %vm1520_vm0  ;;  %v1530_v30 = vunpack.c.l.b16 %v1383_v46  ;;  %v1531_v31 = vunpack.c.h.b16 %v1383_v46  ;;  %v2684_v42 = vsel %vm6634_vm14, %v2667_v60, 0  ;;  %5530 = vrcp.f32 %v6626_v47 }
 0x121   : > { %v8069_v40 = vsel %vm6640_vm9, 4294967295, %v8068_v40  ;;  %v6649_v24 = vmul.f32 %v6230_v54, %v5884_v32  ;;  %v6653_v20 = vmul.f32 %v6570_v61, %v6353_v36  ;;  %v2683_v13 = vsel %vm6640_vm9, %v2666_v55, 0 }
 0x122   : > { %vm1534_vm6 = vcmp.ne.s32.totalorder %v1530_v30, %v6440_v3  ;;  %vm1535_vm11 = vcmp.ne.s32.totalorder %v1531_v31, %v6443_v49  ;;  %v2734_v48 = vunpack.c.l.b16 %v2683_v13  ;;  %v2735_v17 = vunpack.c.l.b16 %v2684_v42 }
 0x123   : > { %vm6659_vm13 = vmpackc.low %vm1535_vm11, %vm1534_vm6  ;;  %v678_v32 = vand.u32 2147483647, %v6626_v47  ;;  %5532 = vpow2.f32 %v4713_v52  ;;  %v2186_v54 = vor.u32 %v2184_v5, %v6638_v41  ;;  %v2307_v36 = vunpack.c.l.b16 %v6595_v35 }
 0x124   : > { %v2685_v61 = vsel %vm6659_vm13, %v2668_v18, 0  ;;  %v2750_v28 = vpack.c.b16 %v2734_v48, %v2733_v33  ;;  %v2308_v7 = vunpack.c.h.b16 %v6595_v35  ;;  %v680_v29 = vand.u32 2147483648, %v6626_v47 }
 0x125   : > { %v2736_v11 = vunpack.c.l.b16 %v2685_v61  ;;  %v2187_v14 = vsel %vm6499_vm5, %v6492_v44, %v2186_v54  ;;  %vm2311_vm6 = vcmp.ne.s32.totalorder %v2307_v36, %v6440_v3  ;;  %vm6677_vm1 = vcmp.eq.f32.partialorder %v678_v32, 8.507059e+37 }
 0x126   : > { %v5531_v38 = vpop.eup %5530  ;;  %v2760_v50 = vshrl.u32 %v2750_v28, 16  ;;  %v2763_v63 = vshll.u32 %v2750_v28, 16  ;;  %vm2312_vm11 = vcmp.ne.s32.totalorder %v2308_v7, %v6443_v49  ;;  %v2314_v23 = vunpack.c.l.b16 %v2187_v14 }
 0x127   : > { %v2751_v45 = vpack.c.b16 %v2736_v11, %v2735_v17  ;;  %v670_v35 = vmul.f32 %v5531_v38, %v6626_v47  ;;  %vm6681_vm7 = vmpackc.low %vm2312_vm11, %vm2311_vm6  ;;  %v8074_v5 = vmov 0  ;;  %v2315_v21 = vunpack.c.h.b16 %v2187_v14 }
 0x128   : > { %v8075_v5 = vsel %vm6681_vm7, 4294967295, %v8074_v5  ;;  %v2762_v8 = vrot.slane %v2760_v50, 3  ;;  %v2765_v39 = vrot.slane %v2763_v63, 4  ;;  %vm2318_vm0 = vcmp.ne.s32.totalorder %v2314_v23, %v6440_v3 }
 0x129   : > { %v2402_v10 = vsel %vm6681_vm7, %v2056_v22, 0  ;;  %v5533_v43 = vpop.eup %5532  ;;  %v2768_v1 = vshrl.u32 %v2751_v45, 16  ;;  %v2771_v19 = vshll.u32 %v2751_v45, 16  ;;  %v671_v60 = vsub.f32 1.0, %v670_v35 }
 0x12a   : > { %vm2319_vm2 = vcmp.ne.s32.totalorder %v2315_v21, %v6443_v49  ;;  %v2766_v33 = vor.u32 %v2765_v39, %v2762_v8  ;;  %vm675_vm6 = vweird.f32 %v5531_v38  ;;  %v681_v55 = vor.u32 1.1754944e-38, %v680_v29  ;;  %v5261_v29 = vld [vmem:[#allocation2 + $0x14] sm:$0xff] }
 0x12b   : > { %v6689_v52 = vadd.f32 1.0, %v5533_v43  ;;  %vm6691_vm11 = vmpackc.low %vm2319_vm2, %vm2318_vm0  ;;  %v8076_v46 = vmov 0  ;;  %v2770_v30 = vrot.slane %v2768_v1, 3  ;;  %v2773_v31 = vrot.slane %v2771_v19, 4  ;;  %1792 = vmatmul.bf16.gmra.mxu1 %v5261_v29 }
 0x12c   : > { %v8077_v46 = vsel %vm6691_vm11, 4294967295, %v8076_v46  ;;  %v672_v42 = vmul.f32 %v5531_v38, %v671_v60  ;;  %v2403_v18 = vsel %vm6691_vm11, %v2057_v9, 0  ;;  %v2453_v48 = vunpack.c.l.b16 %v2402_v10 }
 0x12d   : > { %5534 = vrcp.f32 %v6689_v52  ;;  %v695_v13 = vand.u32 2147483648, %v6689_v52  ;;  %v2488_v17 = vshrl.u32 %v6579_v62, 16  ;;  %v6700_v32 = vor.u32 %v2773_v31, %v2770_v30  ;;  %v5274_v62 = vld [vmem:[%s7938_s4 + $0x38] sm:$0xff] }
 0x12e   : > { %v673_v54 = vadd.f32 %v5531_v38, %v672_v42  ;;  %v2454_v36 = vunpack.c.l.b16 %v2403_v18  ;;  %v1030_v61 = vadd.s32 32, %v5854_v15  ;;  %vm8078_vm0 = vweird.f32 %v6626_v47  ;;  %2003 = vmatpush.bf16.msra.mxu1 %v5274_v62 }
 0x12f   : > { %vm676_vm2 = vmor %vm8078_vm0, %vm675_vm6  ;;  %v693_v28 = vand.u32 2147483647, %v6689_v52  ;;  %v6707_v7 = vor.u32 1.1754944e-38, %v695_v13  ;;  %v2490_v11 = vor.u32 %v2488_v17, %v6597_v37  ;;  %v1033_v22 = vadd.s32 56, %v5854_v15  ;;  %v2058_v17 = vld [vmem:[#allocation2 + $0x1c] sm:$0xf] }
 0x130   : > { %vm8079_vm7 = vsmask.f32 4352  ;;  %v677_v50 = vsel %vm676_vm2, %v5531_v38, %v673_v54  ;;  %v2468_v63 = vpack.c.b16 %v2454_v36, %v2453_v48  ;;  %v1074_v47 = vand.u32 15, %v1030_v61  ;;  %v5273_v38 = vld [vmem:[%s7938_s4 + $0x30] sm:$0xff] }
 0x131   : > { %v2775_v14 = vsel %vm8079_vm7, %v2766_v33, %v6700_v32  ;;  %v682_v23 = vsel %vm6677_vm1, %v681_v55, %v677_v50  ;;  %v1095_v45 = vand.u32 15, %v1033_v22  ;;  %v2188_v37 = vrot.slane %v6638_v41, 4  ;;  %v5272_v55 = vld [vmem:[%s7938_s4 + $0x28] sm:$0xff] }
 0x132   : > { %2903 = vmatmul.bf16.vlgmr.msrb.gmra.mxu0 %v2775_v14  ;;  %v1032_v35 = vadd.s32 48, %v5854_v15  ;;  %v769_v21 = vmul.f32 %v682_v23, %v6586_v26  ;;  %v2492_v8 = vshll.u32 %v2468_v63, 16  ;;  %vm6722_vm0 = vcmp.ge.s32.totalorder %v1074_v47, 1  ;;  %2004 = vmatpush.bf16.msra.mxu1 %v5273_v38 }
 0x133   : > { %v2496_v6 = vshrl.u32 %v2468_v63, 16  ;;  %v5535_v9 = vpop.eup %5534  ;;  %vm1319_vm1 = vmpackc.low %vm6722_vm0, %vm6722_vm0  ;;  %vm1257_vm7 = vcmp.lt.s32.totalorder %v1095_v45, 15  ;;  %v2196_v26 = vsel %vm6499_vm5, %v2188_v37, %v6485_v4  ;;  %v6736_v10 = vadd.s32 64, %v5854_v15 }
 0x134   : > { %v1088_v41 = vand.u32 15, %v1032_v35  ;;  %v5378_v43 = vpack.c.bf16 %v769_v21, %v6653_v20  ;;  %v685_v1 = vmul.f32 %v5535_v9, %v6689_v52  ;;  %vm690_vm2 = vweird.f32 %v5535_v9  ;;  %vm2108_vm0 = vmpackc.low %vm1257_vm7, %vm1257_vm7 }
 0x135   : > { %vm6740_vm6 = vcmp.eq.f32.partialorder %v693_v28, 8.507059e+37  ;;  %v2494_v60 = vrot.slane %v2492_v8, 1  ;;  %v1335_v33 = vsel %vm1319_vm1, 65537, %v7979_v0  ;;  %v2124_v30 = vsel %vm2108_vm0, 65537, %v7979_v0 }
 0x136   : > { %v2321_v31 = vunpack.c.l.b16 %v2196_v26  ;;  %v2322_v42 = vunpack.c.h.b16 %v2196_v26  ;;  %5394 = vst [vmem:[#allocation2 + $0x30] sm:$0xff] %v5378_v43   ;;  %v686_v20 = vsub.f32 1.0, %v685_v1  ;;  %vm8084_vm11 = vsmask.f32 7424  ;;  %2005 = vmatpush.bf16.msra.mxu1 %v5272_v55 }
 0x137   : > { %v2495_v18 = vsel %vm8084_vm11, %v2490_v11, %v2494_v60  ;;  %v1390_v13 = vshll.u32 %v1335_v33, 16  ;;  %v1394_v48 = vshrl.u32 %v1335_v33, 16  ;;  %v2199_v54 = vshrl.u32 %v2124_v30, 16 }
 0x138   : > { %2613 = vmatmul.bf16.gmra.mxu2 %v2495_v18  ;;  %v2202_v36 = vshll.u32 %v2124_v30, 16  ;;  %vm2325_vm1 = vcmp.ne.s32.totalorder %v2321_v31, %v6440_v3  ;;  %vm2326_vm7 = vcmp.ne.s32.totalorder %v2322_v42, %v6443_v49  ;;  %v687_v61 = vmul.f32 %v5535_v9, %v686_v20  ;;  %v2059_v31 = vld [vmem:[#allocation2 + $0x20] sm:$0xf]  ;;  %v5263_v20 = vld [vmem:[#allocation2 + $0x24] sm:$0xff] }
 0x139   : > { %v1392_v28 = vrot.slane %v1390_v13, 5  ;;  %v1396_v29 = vrot.slane %v1394_v48, 4  ;;  %vm6752_vm0 = vmpackc.low %vm2326_vm7, %vm2325_vm1  ;;  %v8085_v62 = vmov 0  ;;  %v6756_v22 = vor.u32 %v2496_v6, %v2494_v60  ;;  %v2669_v6 = vld [vmem:[#allocation2 + $0x18] sm:$0xf]  ;;  %1802 = vmatmul.bf16.vlgmr.msra.gmra.mxu3 %v5263_v20 }
 0x13a   : > { %v8086_v62 = vsel %vm6752_vm0, 4294967295, %v8085_v62  ;;  %v6758_v11 = vrot.slane %v2199_v54, 7  ;;  %v2404_v14 = vsel %vm6752_vm0, %v2058_v17, 0  ;;  %vm1240_vm11 = vcmp.ge.s32.totalorder %v1088_v41, 1  ;;  %v2670_v13 = vld [vmem:[#allocation2 + $0x1c] sm:$0xf] }
 0x13b   : > { %v1102_v50 = vand.u32 15, %v6736_v10  ;;  %v688_v63 = vadd.f32 %v5535_v9, %v687_v61  ;;  %v1393_v47 = vsel %vm6603_vm3, %v6483_v58, %v1392_v28  ;;  %v1397_v23 = vor.u32 %v1396_v29, %v1392_v28  ;;  %vm1321_vm1 = vmpackc.low %vm1240_vm11, %vm1240_vm11  ;;  %v5262_v17 = vld [vmem:[#allocation2 + $0x1c] sm:$0xff] }
 0x13c   : > { %v2455_v45 = vunpack.c.l.b16 %v2404_v14  ;;  %vm8087_vm7 = vweird.f32 %v6689_v52  ;;  %v1537_v37 = vunpack.c.l.b16 %v1393_v47  ;;  %v1538_v35 = vunpack.c.h.b16 %v1393_v47  ;;  %v5314_v54 = vld [vmem:[%s7938_s4 + $0x138] sm:$0xff]  ;;  %1797 = vmatmul.bf16.gmra.mxu1 %v5262_v17  ;;  %v5268_v17 = vld [vmem:[%s7938_s4 + $0x8] sm:$0xff] }
 0x13d   : > { %vm691_vm12 = vmor %vm8087_vm7, %vm690_vm2  ;;  %v2204_v21 = vor.u32 %v2202_v36, %v6758_v11  ;;  %v1337_v8 = vsel %vm1321_vm1, 65537, %v7979_v0  ;;  %v1398_v38 = vrot.slane %v1397_v23, 4  ;;  %v8088_v60 = vmov 0  ;;  %v5270_v28 = vld [vmem:[%s7938_s4 + $0x18] sm:$0xff]  ;;  %3073 = vmatpush.bf16.msrb.mxu3 %v5314_v54  ;;  %v5313_v23 = vld [vmem:[%s7938_s4 + $0x130] sm:$0xff] }
 0x13e   : > { %v692_v39 = vsel %vm691_vm12, %v5535_v9, %v688_v63  ;;  %v1410_v26 = vshll.u32 %v1337_v8, 16  ;;  %v1414_v41 = vshrl.u32 %v1337_v8, 16  ;;  %vm1541_vm11 = vcmp.ne.s32.totalorder %v1537_v37, %v6440_v3 }
 0x13f   : > { %v697_v43 = vsel %vm6740_vm6, %v6707_v7, %v692_v39  ;;  %vm1542_vm0 = vcmp.ne.s32.totalorder %v1538_v35, %v6443_v49  ;;  %v2205_v52 = vsel %vm6499_vm5, %v6492_v44, %v2204_v21  ;;  %v1403_v9 = vsel %vm6603_vm3, %v1398_v38, %v6437_v34  ;;  %v2671_v39 = vld [vmem:[#allocation2 + $0x20] sm:$0xf] }
 0x140   : > { %v770_v1 = vmul.f32 %v697_v43, %v6617_v25  ;;  %vm6783_vm12 = vmpackc.low %vm1542_vm0, %vm1541_vm11  ;;  %v2328_v19 = vunpack.c.l.b16 %v2205_v52  ;;  %v2329_v7 = vunpack.c.h.b16 %v2205_v52  ;;  %v1544_v33 = vunpack.c.l.b16 %v1403_v9  ;;  %v5271_v25 = vld [vmem:[%s7938_s4 + $0x20] sm:$0xff] }
 0x141   : > { %v8089_v60 = vsel %vm6783_vm12, 4294967295, %v8088_v60  ;;  %v1545_v55 = vunpack.c.h.b16 %v1403_v9  ;;  %v2686_v30 = vsel %vm6783_vm12, %v2669_v6, 0  ;;  %v1412_v42 = vrot.slane %v1410_v26, 5  ;;  %2006 = vmatpush.bf16.msra.mxu1 %v5271_v25  ;;  %3074 = vmatpush.bf16.msrb.mxu3 %v5313_v23  ;;  %v5267_v9 = vld [vmem:[%s7938_s4] sm:$0xff] }
 0x142   : > { %v5383_v18 = vpack.c.bf16 %v6649_v24, %v770_v1  ;;  %v2737_v48 = vunpack.c.l.b16 %v2686_v30  ;;  %vm2332_vm6 = vcmp.ne.s32.totalorder %v2328_v19, %v6440_v3  ;;  %vm2333_vm2 = vcmp.ne.s32.totalorder %v2329_v7, %v6443_v49  ;;  %v5269_v1 = vld [vmem:[%s7938_s4 + $0x10] sm:$0xff] }
 0x143   : > { %vm1548_vm0 = vcmp.ne.s32.totalorder %v1544_v33, %v6440_v3  ;;  %vm1549_vm1 = vcmp.ne.s32.totalorder %v1545_v55, %v6443_v49  ;;  %vm6800_vm7 = vmpackc.low %vm2333_vm2, %vm2332_vm6  ;;  %v8090_v36 = vmov 0  ;;  %v1413_v24 = vsel %vm6603_vm3, %v6483_v58, %v1412_v42 }
 0x144   : > { %v8091_v36 = vsel %vm6800_vm7, 4294967295, %v8090_v36  ;;  %v1416_v61 = vrot.slane %v1414_v41, 4  ;;  %5395 = vst [vmem:[#allocation2 + $0x38] sm:$0xff] %v5383_v18   ;;  %vm6810_vm11 = vmpackc.low %vm1549_vm1, %vm1548_vm0  ;;  %v8092_v29 = vmov 0  ;;  %v2405_v14 = vsel %vm6800_vm7, %v2059_v31, 0 }
 0x145   : > { %v8093_v29 = vsel %vm6810_vm11, 4294967295, %v8092_v29  ;;  %v1551_v63 = vunpack.c.l.b16 %v1413_v24  ;;  %v1552_v47 = vunpack.c.h.b16 %v1413_v24  ;;  %v1035_v37 = vadd.s32 72, %v5854_v15  ;;  %2007 = vmatpush.bf16.msra.mxu1 %v5270_v28  ;;  %v2060_v18 = vld [vmem:[#allocation2 + $0x24] sm:$0xf] }
 0x146   : > { %v2687_v35 = vsel %vm6810_vm11, %v2670_v13, 0  ;;  %v2456_v21 = vunpack.c.l.b16 %v2405_v14  ;;  %v1417_v8 = vor.u32 %v1416_v61, %v1412_v42  ;;  %v2206_v38 = vrot.slane %v6758_v11, 4  ;;  %v1266_v14 = vld [vmem:[#allocation2] sm:$0x8] }
 0x147   : > { %v2738_v6 = vunpack.c.l.b16 %v2687_v35  ;;  %vm1555_vm6 = vcmp.ne.s32.totalorder %v1551_v63, %v6440_v3  ;;  %vm1556_vm2 = vcmp.ne.s32.totalorder %v1552_v47, %v6443_v49  ;;  %v1109_v26 = vand.u32 15, %v1035_v37 }
 0x148   : > { %v2469_v41 = vpack.c.b16 %v2456_v21, %v2455_v45  ;;  %v1418_v43 = vrot.slane %v1417_v8, 4  ;;  %vm6825_vm0 = vmpackc.low %vm1556_vm2, %vm1555_vm6  ;;  %v8094_v52 = vmov 0  ;;  %v2214_v11 = vsel %vm6499_vm5, %v2206_v38, %v6485_v4 }
 0x149   : > { %v8095_v52 = vsel %vm6825_vm0, 4294967295, %v8094_v52  ;;  %vm6837_vm1 = vcmp.ge.s32.totalorder %v1102_v50, 1  ;;  %v2752_v45 = vpack.c.b16 %v2738_v6, %v2737_v48  ;;  %v2688_v19 = vsel %vm6825_vm0, %v2671_v39, 0  ;;  %v2672_v48 = vld [vmem:[#allocation2 + $0x24] sm:$0xf]  ;;  %2008 = vmatpush.bf16.msra.mxu1 %v5269_v1 }
 0x14a   : > { %vm6843_vm6 = vcmp.lt.s32.totalorder %v1109_v26, 15  ;;  %v2335_v33 = vunpack.c.l.b16 %v2214_v11  ;;  %v2500_v55 = vshll.u32 %v2469_v41, 16  ;;  %v1423_v30 = vsel %vm6603_vm3, %v1418_v43, %v6437_v34  ;;  %v1267_v6 = vld [vmem:[#allocation2 + $0x4] sm:$0xf]  ;;  %v1268_v26 = vld [vmem:[#allocation2 + $0x8] sm:$0xf] }
 0x14b   : > { %v2739_v10 = vunpack.c.l.b16 %v2688_v19  ;;  %vm2110_vm2 = vmpackc.low %vm6843_vm6, %vm6843_vm6  ;;  %v2336_v50 = vunpack.c.h.b16 %v2214_v11  ;;  %v2777_v31 = vshrl.u32 %v2752_v45, 16  ;;  %v2780_v42 = vshll.u32 %v2752_v45, 16  ;;  %v1269_v11 = vld [vmem:[#allocation2 + $0xc] sm:$0xf] }
 0x14c   : > { %v1558_v25 = vunpack.c.l.b16 %v1423_v30  ;;  %v1559_v20 = vunpack.c.h.b16 %v1423_v30  ;;  %v2502_v13 = vrot.slane %v2500_v55, 1  ;;  %v2126_v54 = vsel %vm2110_vm2, 65537, %v7979_v0  ;;  %vm1323_vm6 = vmpackc.low %vm6837_vm1, %vm6837_vm1 }
 0x14d   : > { %vm2339_vm7 = vcmp.ne.s32.totalorder %v2335_v33, %v6440_v3  ;;  %vm2340_vm4 = vcmp.ne.s32.totalorder %v2336_v50, %v6443_v49  ;;  %v2779_v24 = vrot.slane %v2777_v31, 3  ;;  %v2782_v61 = vrot.slane %v2780_v42, 4  ;;  %2009 = vmatpush.bf16.msra.mxu1 %v5268_v17  ;;  %v5264_v42 = vld [vmem:[#allocation2 + $0x2c] sm:$0xff] }
 0x14e   : > { %vm1562_vm10 = vcmp.ne.s32.totalorder %v1558_v25, %v6440_v3  ;;  %vm1563_vm15 = vcmp.ne.s32.totalorder %v1559_v20, %v6443_v49  ;;  %vm6864_vm0 = vmpackc.low %vm2340_vm4, %vm2339_vm7  ;;  %v8100_v28 = vmov 0  ;;  %vm8102_vm2 = vsmask.f32 7424  ;;  %1807 = vmatmul.bf16.gmra.mxu3 %v5264_v42 }
 0x14f   : > { %v8101_v28 = vsel %vm6864_vm0, 4294967295, %v8100_v28  ;;  %v2503_v63 = vsel %vm8102_vm2, %v6756_v22, %v2502_v13  ;;  %vm6870_vm11 = vmpackc.low %vm1563_vm15, %vm1562_vm10  ;;  %v8103_v47 = vmov 0  ;;  %v2217_v23 = vshrl.u32 %v2126_v54, 16 }
 0x150   : > { %v8104_v47 = vsel %vm6870_vm11, 4294967295, %v8103_v47  ;;  %v2220_v37 = vshll.u32 %v2126_v54, 16  ;;  %v2406_v35 = vsel %vm6864_vm0, %v2060_v18, 0  ;;  %v2783_v21 = vor.u32 %v2782_v61, %v2779_v24  ;;  %2618 = vmatmul.bf16.gmra.mxu2 %v2503_v63 }
 0x151   : > { %v2689_v8 = vsel %vm6870_vm11, %v2672_v48, 0  ;;  %v6878_v39 = vunpack.c.l.b16 %v2406_v35  ;;  %v2504_v38 = vshrl.u32 %v2469_v41, 16  ;;  %v6880_v43 = vrot.slane %v2217_v23, 7  ;;  %2010 = vmatpush.bf16.msra.mxu1 %v5267_v9  ;;  %v5311_v23 = vld [vmem:[%s7938_s4 + $0x120] sm:$0xff] }
 0x152   : > { %v2740_v22 = vunpack.c.l.b16 %v2689_v8  ;;  %v1339_v1 = vsel %vm1323_vm6, 65537, %v7979_v0  ;;  %v1628_v45 = vsel %vm6613_vm8, %v1266_v14, 0  ;;  %vm8105_vm10 = vsmask.f32 4352  ;;  %v2061_v8 = vld [vmem:[#allocation2 + $0x28] sm:$0xf] }
 0x153   : > { %v2784_v41 = vsel %vm8105_vm10, %v6700_v32, %v2783_v21  ;;  %v6892_v19 = vor.u32 %v2504_v38, %v2502_v13  ;;  %v1430_v7 = vshll.u32 %v1339_v1, 16  ;;  %v1434_v33 = vshrl.u32 %v1339_v1, 16  ;;  %v5312_v32 = vld [vmem:[%s7938_s4 + $0x128] sm:$0xff]  ;;  %vm8108_vm2 = vmmov %vm8105_vm10 }
 0x154   : > { %2908 = vmatmul.bf16.gmra.mxu0 %v2784_v41  ;;  %v2753_v55 = vpack.c.b16 %v2740_v22, %v2739_v10  ;;  %v2222_v30 = vor.u32 %v2220_v37, %v6880_v43  ;;  %v1629_v50 = vsel %vm6640_vm9, %v1267_v6, 0  ;;  %v1630_v31 = vsel %vm6634_vm14, %v1268_v26, 0  ;;  %3075 = vmatpush.bf16.msrb.mxu3 %v5312_v32 }
 0x155   : > { %v1432_v25 = vrot.slane %v1430_v7, 5  ;;  %v1436_v20 = vrot.slane %v1434_v33, 4  ;;  %v1631_v10 = vsel %vm6659_vm13, %v1269_v11, 0  ;;  %v1840_v18 = vunpack.c.l.b16 %v1628_v45  ;;  %v2673_v45 = vld [vmem:[#allocation2 + $0x28] sm:$0xf] }
 0x156   : > { %v2786_v13 = vshrl.u32 %v2753_v55, 16  ;;  %v2789_v48 = vshll.u32 %v2753_v55, 16  ;;  %v2223_v17 = vsel %vm6499_vm5, %v6492_v44, %v2222_v30  ;;  %v1841_v54 = vunpack.c.l.b16 %v1629_v50 }
 0x157   : > { %v2342_v24 = vunpack.c.l.b16 %v2223_v17  ;;  %v2343_v61 = vunpack.c.h.b16 %v2223_v17  ;;  %v1433_v14 = vsel %vm6603_vm3, %v6483_v58, %v1432_v25  ;;  %v1437_v63 = vor.u32 %v1436_v20, %v1432_v25  ;;  %v2674_v25 = vld [vmem:[#allocation2 + $0x2c] sm:$0xf] }
 0x158   : > { %v2788_v37 = vrot.slane %v2786_v13, 3  ;;  %v2791_v35 = vrot.slane %v2789_v48, 4  ;;  %v1565_v38 = vunpack.c.l.b16 %v1433_v14  ;;  %v1566_v6 = vunpack.c.h.b16 %v1433_v14  ;;  %3076 = vmatpush.bf16.msrb.mxu3 %v5311_v23 }
 0x159   : > { %vm2346_vm15 = vcmp.ne.s32.totalorder %v2342_v24, %v6440_v3  ;;  %vm2347_vm4 = vcmp.ne.s32.totalorder %v2343_v61, %v6443_v49  ;;  %v1438_v26 = vrot.slane %v1437_v63, 4  ;;  %v1842_v22 = vunpack.c.l.b16 %v1630_v31 }
 0x15a   : > { %v6918_v1 = vor.u32 %v2791_v35, %v2788_v37  ;;  %vm6920_vm7 = vmpackc.low %vm2347_vm4, %vm2346_vm15  ;;  %v8106_v11 = vmov 0  ;;  %vm1569_vm1 = vcmp.ne.s32.totalorder %v1565_v38, %v6440_v3  ;;  %vm1570_vm6 = vcmp.ne.s32.totalorder %v1566_v6, %v6443_v49 }
 0x15b   : > { %v8107_v11 = vsel %vm6920_vm7, 4294967295, %v8106_v11  ;;  %v1843_v41 = vunpack.c.l.b16 %v1631_v10  ;;  %v2407_v7 = vsel %vm6920_vm7, %v2061_v8, 0  ;;  %v1443_v33 = vsel %vm6603_vm3, %v1438_v26, %v6437_v34  ;;  %vm6934_vm10 = vmpackc.low %vm1570_vm6, %vm1569_vm1 }
 0x15c   : > { %v1857_v55 = vpack.c.b16 %v1841_v54, %v1840_v18  ;;  %v1037_v30 = vadd.s32 88, %v5854_v15  ;;  %v2793_v9 = vsel %vm8108_vm2, %v2783_v21, %v6918_v1  ;;  %v2458_v50 = vunpack.c.l.b16 %v2407_v7 }
 0x15d   : > { %v8109_v31 = vmov 0  ;;  %v1572_v42 = vunpack.c.l.b16 %v1443_v33  ;;  %v1573_v32 = vunpack.c.h.b16 %v1443_v33  ;;  %v2690_v20 = vsel %vm6934_vm10, %v2673_v45, 0 }
 0x15e   : > { %v8110_v31 = vsel %vm6934_vm10, 4294967295, %v8109_v31  ;;  %v1858_v10 = vpack.c.b16 %v1843_v41, %v1842_v22  ;;  %v1868_v13 = vshrl.u32 %v1857_v55, 16  ;;  %v1871_v18 = vshll.u32 %v1857_v55, 16 }
 0x15f   : > { %v2470_v48 = vpack.c.b16 %v2458_v50, %v6878_v39  ;;  %vm1576_vm15 = vcmp.ne.s32.totalorder %v1572_v42, %v6440_v3  ;;  %vm1577_vm4 = vcmp.ne.s32.totalorder %v1573_v32, %v6443_v49  ;;  %v2741_v21 = vunpack.c.l.b16 %v2690_v20  ;;  %v5265_v20 = vld [vmem:[#allocation2 + $0x34] sm:$0xff] }
 0x160   : > { %vm6943_vm1 = vmpackc.low %vm1577_vm4, %vm1576_vm15  ;;  %v8111_v17 = vmov 0  ;;  %v1870_v54 = vrot.slane %v1868_v13, 3  ;;  %v1873_v24 = vrot.slane %v1871_v18, 4  ;;  %v1876_v61 = vshrl.u32 %v1858_v10, 16  ;;  %1812 = vmatmul.bf16.gmra.mxu3 %v5265_v20 }
 0x161   : > { %v8112_v17 = vsel %vm6943_vm1, 4294967295, %v8111_v17  ;;  %v1879_v14 = vshll.u32 %v1858_v10, 16  ;;  %v2508_v63 = vshll.u32 %v2470_v48, 16  ;;  %v2691_v23 = vsel %vm6943_vm1, %v2674_v25, 0  ;;  %v1271_v25 = vld [vmem:[#allocation2 + $0x14] sm:$0xf] }
 0x162   : > { %v1123_v37 = vand.u32 15, %v1037_v30  ;;  %v2224_v39 = vrot.slane %v6880_v43, 4  ;;  %v2742_v35 = vunpack.c.l.b16 %v2691_v23  ;;  %v1874_v8 = vor.u32 %v1873_v24, %v1870_v54  ;;  %v1270_v30 = vld [vmem:[#allocation2 + $0x10] sm:$0xf]  ;;  %v5310_v10 = vld [vmem:[%s7938_s4 + $0x118] sm:$0xff] }
 0x163   : > { %v1878_v38 = vrot.slane %v1876_v61, 3  ;;  %v1881_v6 = vrot.slane %v1879_v14, 4  ;;  %v2510_v26 = vrot.slane %v2508_v63, 1  ;;  %v2512_v45 = vshrl.u32 %v2470_v48, 16  ;;  %v2062_v48 = vld [vmem:[#allocation2 + $0x2c] sm:$0xf]  ;;  %3077 = vmatpush.bf16.msrb.mxu3 %v5310_v10 }
 0x164   : > { %vm1261_vm6 = vcmp.lt.s32.totalorder %v1123_v37, 15  ;;  %v2232_v22 = vsel %vm6499_vm5, %v2224_v39, %v6485_v4  ;;  %v2754_v41 = vpack.c.b16 %v2742_v35, %v2741_v21  ;;  %2913 = vmatmul.bf16.gmra.mxu0 %v2793_v9  ;;  %vm8113_vm15 = vsmask.f32 7424  ;;  %v5309_v37 = vld [vmem:[%s7938_s4 + $0x110] sm:$0xff] }
 0x165   : > { %v6953_v7 = vor.u32 %v1881_v6, %v1878_v38  ;;  %vm2112_vm2 = vmpackc.low %vm1261_vm6, %vm1261_vm6  ;;  %v2349_v33 = vunpack.c.l.b16 %v2232_v22  ;;  %v2350_v55 = vunpack.c.h.b16 %v2232_v22  ;;  %v2511_v43 = vsel %vm8113_vm15, %v6892_v19, %v2510_v26 }
 0x166   : > { %v2128_v50 = vsel %vm2112_vm2, 65537, %v7979_v0  ;;  %v6958_v42 = vor.u32 %v2512_v45, %v2510_v26  ;;  %v1036_v32 = vadd.s32 80, %v5854_v15  ;;  %2623 = vmatmul.bf16.gmra.mxu2 %v2511_v43  ;;  %v2795_v13 = vshrl.u32 %v2754_v41, 16 }
 0x167   : > { %v2798_v18 = vshll.u32 %v2754_v41, 16  ;;  %vm8114_vm4 = vsmask.f32 4352  ;;  %v2235_v19 = vshrl.u32 %v2128_v50, 16  ;;  %v2238_v21 = vshll.u32 %v2128_v50, 16  ;;  %3078 = vmatpush.bf16.msrb.mxu3 %v5309_v37 }
 0x168   : > { %v1883_v9 = vsel %vm8114_vm4, %v1874_v8, %v6953_v7  ;;  %vm2353_vm6 = vcmp.ne.s32.totalorder %v2349_v33, %v6440_v3  ;;  %vm2354_vm2 = vcmp.ne.s32.totalorder %v2350_v55, %v6443_v49  ;;  %v1116_v54 = vand.u32 15, %v1036_v32 }
 0x169   : > { %2011 = vmatmul.bf16.vlgmr.msra.gmra.mxu1 %v1883_v9  ;;  %v2797_v24 = vrot.slane %v2795_v13, 3  ;;  %v2800_v61 = vrot.slane %v2798_v18, 4  ;;  %v2237_v14 = vrot.slane %v2235_v19, 7  ;;  %vm6968_vm15 = vmpackc.low %vm2354_vm2, %vm2353_vm6  ;;  %v8115_v63 = vmov 0  ;;  %v2063_v18 = vld [vmem:[#allocation2 + $0x30] sm:$0xf] }
 0x16a   : > { %v8116_v63 = vsel %vm6968_vm15, 4294967295, %v8115_v63  ;;  %v1632_v23 = vsel %vm6783_vm12, %v1270_v30, 0  ;;  %v2408_v39 = vsel %vm6968_vm15, %v2062_v48, 0  ;;  %vm1244_vm4 = vcmp.ge.s32.totalorder %v1116_v54, 1 }
 0x16b   : > { %vm8117_vm0 = vnez %v8093_v29  ;;  %v1844_v8 = vunpack.c.l.b16 %v1632_v23  ;;  %v6981_v38 = vor.u32 %v2800_v61, %v2797_v24  ;;  %v2240_v6 = vor.u32 %v2238_v21, %v2237_v14  ;;  %vm1325_vm6 = vmpackc.low %vm1244_vm4, %vm1244_vm4 }
 0x16c   : > { %v1633_v35 = vsel %vm8117_vm0, %v1271_v25, 0  ;;  %v2459_v26 = vunpack.c.l.b16 %v2408_v39  ;;  %v1341_v45 = vsel %vm1325_vm6, 65537, %v7979_v0  ;;  %v1039_v41 = vadd.s32 104, %v5854_v15 }
 0x16d   : > { %v1845_v22 = vunpack.c.l.b16 %v1633_v35  ;;  %v2242_v33 = vrot.slane %v2237_v14, 4  ;;  %v6986_v55 = vadd.s32 96, %v5854_v15  ;;  %vm8118_vm2 = vsmask.f32 4352 }
 0x16e   : > { %v2802_v30 = vsel %vm8118_vm2, %v6918_v1, %v6981_v38  ;;  %v2241_v43 = vsel %vm6499_vm5, %v6492_v44, %v2240_v6  ;;  %v1450_v50 = vshll.u32 %v1341_v45, 16  ;;  %v1454_v32 = vshrl.u32 %v1341_v45, 16  ;;  %v2675_v45 = vld [vmem:[#allocation2 + $0x30] sm:$0xf] }
 0x16f   : > { %v2356_v25 = vunpack.c.l.b16 %v2241_v43  ;;  %v2357_v20 = vunpack.c.h.b16 %v2241_v43  ;;  %v1859_v10 = vpack.c.b16 %v1845_v22, %v1844_v8  ;;  %v1137_v13 = vand.u32 15, %v1039_v41 }
 0x170   : > { %v1452_v9 = vrot.slane %v1450_v50, 5  ;;  %v1456_v48 = vrot.slane %v1454_v32, 4  ;;  %v2250_v19 = vsel %vm6499_vm5, %v2242_v33, %v6485_v4  ;;  %v1130_v1 = vand.u32 15, %v6986_v55 }
 0x171   : > { %vm2360_vm4 = vcmp.ne.s32.totalorder %v2356_v25, %v6440_v3  ;;  %vm2361_vm6 = vcmp.ne.s32.totalorder %v2357_v20, %v6443_v49  ;;  %v1885_v21 = vshrl.u32 %v1859_v10, 16  ;;  %v1888_v54 = vshll.u32 %v1859_v10, 16 }
 0x172   : > { %vm7000_vm2 = vmpackc.low %vm2361_vm6, %vm2360_vm4  ;;  %v8119_v24 = vmov 0  ;;  %v1453_v61 = vsel %vm6603_vm3, %v6483_v58, %v1452_v9  ;;  %v1457_v14 = vor.u32 %v1456_v48, %v1452_v9  ;;  %vm1263_vm15 = vcmp.lt.s32.totalorder %v1137_v13, 15 }
 0x173   : > { %v8120_v24 = vsel %vm7000_vm2, 4294967295, %v8119_v24  ;;  %v2363_v23 = vunpack.c.l.b16 %v2250_v19  ;;  %v2409_v37 = vsel %vm7000_vm2, %v2063_v18, 0  ;;  %v1579_v39 = vunpack.c.l.b16 %v1453_v61  ;;  %vm2114_vm7 = vmpackc.low %vm1263_vm15, %vm1263_vm15 }
 0x174   : > { %v1580_v35 = vunpack.c.h.b16 %v1453_v61  ;;  %v1887_v8 = vrot.slane %v1885_v21, 3  ;;  %v2460_v6 = vunpack.c.l.b16 %v2409_v37  ;;  %v1458_v22 = vrot.slane %v1457_v14, 4  ;;  %2918 = vmatmul.bf16.gmra.mxu0 %v2802_v30  ;;  %v1273_v21 = vld [vmem:[#allocation2 + $0x1c] sm:$0xf]  ;;  %v2676_v61 = vld [vmem:[#allocation2 + $0x34] sm:$0xf] }
 0x175   : > { %v1890_v41 = vrot.slane %v1888_v54, 4  ;;  %v2130_v33 = vsel %vm2114_vm7, 65537, %v7979_v0  ;;  %vm1583_vm4 = vcmp.ne.s32.totalorder %v1579_v39, %v6440_v3  ;;  %v2364_v10 = vunpack.c.h.b16 %v2250_v19  ;;  %v5266_v30 = vld [vmem:[#allocation2 + $0x3c] sm:$0xff]  ;;  %v5308_v39 = vld [vmem:[%s7938_s4 + $0x108] sm:$0xff] }
 0x176   : > { %vm1584_vm6 = vcmp.ne.s32.totalorder %v1580_v35, %v6443_v49  ;;  %v2253_v55 = vshrl.u32 %v2130_v33, 16  ;;  %v2256_v43 = vshll.u32 %v2130_v33, 16  ;;  %v2471_v50 = vpack.c.b16 %v2460_v6, %v2459_v26  ;;  %v1272_v26 = vld [vmem:[#allocation2 + $0x18] sm:$0xf]  ;;  %1817 = vmatmul.bf16.gmra.mxu3 %v5266_v30 }
 0x177   : > { %v1463_v32 = vsel %vm6603_vm3, %v1458_v22, %v6437_v34  ;;  %vm7015_vm2 = vmpackc.low %vm1584_vm6, %vm1583_vm4  ;;  %v7019_v20 = vor.u32 %v1890_v41, %v1887_v8  ;;  %vm8123_vm7 = vsmask.f32 4352  ;;  %vm7029_vm15 = vcmp.ne.s32.totalorder %v2363_v23, %v6440_v3  ;;  %v2064_v8 = vld [vmem:[#allocation2 + $0x34] sm:$0xf]  ;;  %3079 = vmatpush.bf16.msrb.mxu3 %v5308_v39 }
 0x178   : > { %v1586_v13 = vunpack.c.l.b16 %v1463_v32  ;;  %v1587_v18 = vunpack.c.h.b16 %v1463_v32  ;;  %v2692_v9 = vsel %vm7015_vm2, %v2675_v45, 0  ;;  %v7023_v48 = vrot.slane %v2253_v55, 7 }
 0x179   : > { %v2516_v54 = vshll.u32 %v2471_v50, 16  ;;  %v2743_v14 = vunpack.c.l.b16 %v2692_v9  ;;  %v1892_v37 = vsel %vm8123_vm7, %v6953_v7, %v7019_v20  ;;  %vm2368_vm0 = vcmp.ne.s32.totalorder %v2364_v10, %v6443_v49  ;;  %v2065_v9 = vld [vmem:[#allocation2 + $0x38] sm:$0xf] }
 0x17a   : > { %vm1590_vm4 = vcmp.ne.s32.totalorder %v1586_v13, %v6440_v3  ;;  %vm1591_vm6 = vcmp.ne.s32.totalorder %v1587_v18, %v6443_v49  ;;  %2016 = vmatmul.bf16.gmra.mxu1 %v1892_v37  ;;  %v2258_v35 = vor.u32 %v2256_v43, %v7023_v48  ;;  %v2520_v6 = vshrl.u32 %v2471_v50, 16  ;;  %v5307_v50 = vld [vmem:[%s7938_s4 + $0x100] sm:$0xff] }
 0x17b   : > { %v2518_v7 = vrot.slane %v2516_v54, 1  ;;  %vm7040_vm7 = vmpackc.low %vm1591_vm6, %vm1590_vm4  ;;  %vm7044_vm12 = vcmp.ge.s32.totalorder %v1130_v1, 1  ;;  %vm8130_vm9 = vnez %v8095_v52  ;;  %v8131_v55 = vmov 0  ;;  %3080 = vmatpush.bf16.msrb.mxu3 %v5307_v50 }
 0x17c   : > { %v1634_v45 = vsel %vm8130_vm9, %v1272_v26, 0  ;;  %v2693_v41 = vsel %vm7040_vm7, %v2676_v61, 0  ;;  %v2259_v33 = vsel %vm6499_vm5, %v6492_v44, %v2258_v35  ;;  %vm7057_vm4 = vmpackc.low %vm2368_vm0, %vm7029_vm15  ;;  %v1635_v1 = vsel %vm6870_vm11, %v1273_v21, 0 }
 0x17d   : > { %v8132_v55 = vsel %vm7057_vm4, 4294967295, %v8131_v55  ;;  %v1846_v43 = vunpack.c.l.b16 %v1634_v45  ;;  %vm8133_vm6 = vsmask.f32 7424  ;;  %v2744_v10 = vunpack.c.l.b16 %v2693_v41  ;;  %vm1327_vm0 = vmpackc.low %vm7044_vm12, %vm7044_vm12 }
 0x17e   : > { %v2519_v32 = vsel %vm8133_vm6, %v6958_v42, %v2518_v7  ;;  %v2370_v13 = vunpack.c.l.b16 %v2259_v33  ;;  %v2371_v18 = vunpack.c.h.b16 %v2259_v33  ;;  %v2410_v26 = vsel %vm7057_vm4, %v2064_v8, 0 }
 0x17f   : > { %2628 = vmatmul.bf16.gmra.mxu2 %v2519_v32  ;;  %v2522_v21 = vor.u32 %v2520_v6, %v2518_v7  ;;  %v1343_v54 = vsel %vm1327_vm0, 65537, %v7979_v0  ;;  %v1847_v61 = vunpack.c.l.b16 %v1635_v1  ;;  %v2755_v37 = vpack.c.b16 %v2744_v10, %v2743_v14 }
 0x180   : > { %vm2374_vm15 = vcmp.ne.s32.totalorder %v2370_v13, %v6440_v3  ;;  %vm2375_vm6 = vcmp.ne.s32.totalorder %v2371_v18, %v6443_v49  ;;  %v2461_v42 = vunpack.c.l.b16 %v2410_v26  ;;  %v8134_v19 = vmov 0 }
 0x181   : > { %vm7076_vm11 = vmpackc.low %vm2375_vm6, %vm2374_vm15  ;;  %v1470_v30 = vshll.u32 %v1343_v54, 16  ;;  %v1474_v39 = vshrl.u32 %v1343_v54, 16  ;;  %v1860_v35 = vpack.c.b16 %v1847_v61, %v1846_v43  ;;  %v1041_v8 = vadd.s32 120, %v5854_v15 }
 0x182   : > { %v8135_v19 = vsel %vm7076_vm11, 4294967295, %v8134_v19  ;;  %v2804_v7 = vshrl.u32 %v2755_v37, 16  ;;  %v2807_v6 = vshll.u32 %v2755_v37, 16  ;;  %v2411_v14 = vsel %vm7076_vm11, %v2065_v9, 0 }
 0x183   : > { %v2260_v22 = vrot.slane %v7023_v48, 4  ;;  %v2462_v45 = vunpack.c.l.b16 %v2411_v14  ;;  %v1472_v41 = vrot.slane %v1470_v30, 5  ;;  %v1476_v33 = vrot.slane %v1474_v39, 4 }
 0x184   : > { %v1894_v1 = vshrl.u32 %v1860_v35, 16  ;;  %v2806_v32 = vrot.slane %v2804_v7, 3  ;;  %v2809_v10 = vrot.slane %v2807_v6, 4  ;;  %v1897_v13 = vshll.u32 %v1860_v35, 16  ;;  %v2677_v7 = vld [vmem:[#allocation2 + $0x38] sm:$0xf] }
 0x185   : > { %v1151_v18 = vand.u32 15, %v1041_v8  ;;  %v7084_v26 = vpack.c.b16 %v2462_v45, %v2461_v42  ;;  %v1473_v43 = vsel %vm6603_vm3, %v6483_v58, %v1472_v41  ;;  %v1477_v50 = vor.u32 %v1476_v33, %v1472_v41 }
 0x186   : > { %v1896_v54 = vrot.slane %v1894_v1, 3  ;;  %v7089_v61 = vor.u32 %v2809_v10, %v2806_v32  ;;  %v1593_v9 = vunpack.c.l.b16 %v1473_v43  ;;  %v1594_v48 = vunpack.c.h.b16 %v1473_v43  ;;  %v1274_v32 = vld [vmem:[#allocation2 + $0x20] sm:$0xf]  ;;  %v5291_v10 = vld [vmem:[#allocation2 + $0xc] sm:$0xff] }
 0x187   : > { %v1899_v37 = vrot.slane %v1897_v13, 4  ;;  %v2524_v30 = vshll.u32 %v7084_v26, 16  ;;  %v1478_v39 = vrot.slane %v1477_v50, 4  ;;  %vm1265_vm12 = vcmp.lt.s32.totalorder %v1151_v18, 15  ;;  %v2678_v18 = vld [vmem:[#allocation2 + $0x3c] sm:$0xf]  ;;  %3081 = vmatmul.bf16.vlgmr.msrb.gmra.mxu3 %v5291_v10 }
 0x188   : > { %v2268_v42 = vsel %vm6499_vm5, %v2260_v22, %v6485_v4  ;;  %vm8136_vm0 = vsmask.f32 4352  ;;  %vm1597_vm15 = vcmp.ne.s32.totalorder %v1593_v9, %v6440_v3  ;;  %vm1598_vm6 = vcmp.ne.s32.totalorder %v1594_v48, %v6443_v49  ;;  %vm2116_vm11 = vmpackc.low %vm1265_vm12, %vm1265_vm12  ;;  %v2066_v9 = vld [vmem:[#allocation2 + $0x3c] sm:$0xf] }
 0x189   : > { %v2811_v35 = vsel %vm8136_vm0, %v6981_v38, %v7089_v61  ;;  %v7100_v8 = vor.u32 %v1899_v37, %v1896_v54  ;;  %v7102_v6 = vrot.slane %v2524_v30, 1  ;;  %v1483_v14 = vsel %vm6603_vm3, %v1478_v39, %v6437_v34  ;;  %vm7107_vm4 = vmpackc.low %vm1598_vm6, %vm1597_vm15  ;;  %v1275_v54 = vld [vmem:[#allocation2 + $0x24] sm:$0xf]  ;;  %v5354_v10 = vld [vmem:[%s7938_s4 + $0x238] sm:$0xff] }
 0x18a   : > { %2923 = vmatmul.bf16.gmra.mxu0 %v2811_v35  ;;  %v2132_v38 = vsel %vm2116_vm11, 65537, %v7979_v0  ;;  %v2377_v22 = vunpack.c.l.b16 %v2268_v42  ;;  %v1600_v45 = vunpack.c.l.b16 %v1483_v14  ;;  %v1601_v41 = vunpack.c.h.b16 %v1483_v14  ;;  %vm8139_vm12 = vmmov %vm8136_vm0  ;;  %4112 = vmatpush.bf16.msra.mxu3 %v5354_v10  ;;  %v2067_v0 = vld [vmem:[#allocation2 + $0x40] sm:$0xf] }
 0x18b   : > { %v2694_v33 = vsel %vm7107_vm4, %v2677_v7, 0  ;;  %v1901_v1 = vsel %vm8139_vm12, %v7019_v20, %v7100_v8  ;;  %vm8140_vm0 = vsmask.f32 7424  ;;  %v2271_v43 = vshrl.u32 %v2132_v38, 16  ;;  %v5338_v7 = vld [vmem:[%s7938_s4 + $0x1b8] sm:$0xff] }
 0x18c   : > { %v2527_v13 = vsel %vm8140_vm0, %v2522_v21, %v7102_v6  ;;  %2021 = vmatmul.bf16.gmra.mxu1 %v1901_v1  ;;  %v2274_v50 = vshll.u32 %v2132_v38, 16  ;;  %vm1604_vm11 = vcmp.ne.s32.totalorder %v1600_v45, %v6440_v3  ;;  %vm1605_vm15 = vcmp.ne.s32.totalorder %v1601_v41, %v6443_v49  ;;  %3651 = vmatpush.bf16.msrb.mxu2 %v5338_v7 }
 0x18d   : > { %v2378_v48 = vunpack.c.h.b16 %v2268_v42  ;;  %vm7122_vm6 = vcmp.ne.s32.totalorder %v2377_v22, %v6440_v3  ;;  %vm7126_vm12 = vmpackc.low %vm1605_vm15, %vm1604_vm11  ;;  %v2745_v21 = vunpack.c.l.b16 %v2694_v33  ;;  %v2273_v30 = vrot.slane %v2271_v43, 7  ;;  %v5346_v42 = vld [vmem:[%s7938_s4 + $0x1f8] sm:$0xff] }
 0x18e   : > { %v1040_v39 = vadd.s32 112, %v5854_v15  ;;  %v1636_v35 = vsel %vm6934_vm10, %v1274_v32, 0  ;;  %v2695_v14 = vsel %vm7126_vm12, %v2678_v18, 0  ;;  %v1637_v38 = vsel %vm6943_vm1, %v1275_v54, 0  ;;  %v5322_v22 = vld [vmem:[%s7938_s4 + $0x178] sm:$0xff]  ;;  %3829 = vmatpush.bf16.msra.mxu0 %v5346_v42  ;;  %v5345_v32 = vld [vmem:[%s7938_s4 + $0x1f0] sm:$0xff] }
 0x18f   : > { %vm2382_vm0 = vcmp.ne.s32.totalorder %v2378_v48, %v6443_v49  ;;  %v1848_v15 = vunpack.c.l.b16 %v1636_v35  ;;  %2633 = vmatmul.bf16.gmra.mxu2 %v2527_v13  ;;  %v2746_v45 = vunpack.c.l.b16 %v2695_v14  ;;  %v2276_v41 = vor.u32 %v2274_v50, %v2273_v30  ;;  %v5337_v18 = vld [vmem:[%s7938_s4 + $0x1b0] sm:$0xff]  ;;  %3356 = vmatpush.bf16.msrb.mxu1 %v5322_v22 }
 0x190   : > { %vm7149_vm11 = vmpackc.low %vm2382_vm0, %vm7122_vm6  ;;  %v8145_v33 = vmov 0  ;;  %v1144_v1 = vand.u32 15, %v1040_v39  ;;  %v1849_v43 = vunpack.c.l.b16 %v1637_v38  ;;  %v2278_v50 = vrot.slane %v2273_v30, 4  ;;  %3652 = vmatpush.bf16.msrb.mxu2 %v5337_v18 }
 0x191   : > { %v8146_v33 = vsel %vm7149_vm11, 4294967295, %v8145_v33  ;;  %v2412_v13 = vsel %vm7149_vm11, %v2066_v9, 0  ;;  %v2756_v54 = vpack.c.b16 %v2746_v45, %v2745_v21  ;;  %v2277_v48 = vsel %vm6499_vm5, %v6492_v44, %v2276_v41  ;;  %v5344_v21 = vld [vmem:[%s7938_s4 + $0x1e8] sm:$0xff] }
 0x192   : > { %8147 = vst [vmem:[#allocation3_spill] sm:$0xff] %v8146_v33  ;;  %v2463_v37 = vunpack.c.l.b16 %v2412_v13  ;;  %vm1248_vm15 = vcmp.ge.s32.totalorder %v1144_v1, 1  ;;  %v2384_v39 = vunpack.c.l.b16 %v2277_v48  ;;  %v2385_v42 = vunpack.c.h.b16 %v2277_v48  ;;  %3830 = vmatpush.bf16.msra.mxu0 %v5345_v32 }
 0x193   : > { %vm1329_vm6 = vmpackc.low %vm1248_vm15, %vm1248_vm15  ;;  %v1861_v9 = vpack.c.b16 %v1849_v43, %v1848_v15  ;;  %v2391_v7 = vunpack.c.l.b16 %v2278_v50  ;;  %v2813_v35 = vshrl.u32 %v2756_v54, 16  ;;  %v2816_v14 = vshll.u32 %v2756_v54, 16  ;;  %v5336_v15 = vld [vmem:[%s7938_s4 + $0x1a8] sm:$0xff] }
 0x194   : > { %v8148_v33 = vmov 0   ;;  %v2392_v16 = vunpack.c.h.b16 %v2278_v50  ;;  %vm2388_vm5 = vcmp.ne.s32.totalorder %v2384_v39, %v6440_v3  ;;  %vm2389_vm0 = vcmp.ne.s32.totalorder %v2385_v42, %v6443_v49  ;;  %v5343_v39 = vld [vmem:[%s7938_s4 + $0x1e0] sm:$0xff]  ;;  %3653 = vmatpush.bf16.msrb.mxu2 %v5336_v15 }
 0x195   : > { %v1345_v38 = vsel %vm1329_vm6, 65537, %v8148_v33  ;;  %v2815_v22 = vrot.slane %v2813_v35, 3  ;;  %v2818_v45 = vrot.slane %v2816_v14, 4  ;;  %vm7176_vm15 = vmpackc.low %vm2389_vm0, %vm2388_vm5  ;;  %v8149_v41 = vmov 0 }
 0x196   : > { %v1490_v44 = vshll.u32 %v1345_v38, 16  ;;  %v1494_v30 = vshrl.u32 %v1345_v38, 16  ;;  %v8150_v41 = vsel %vm7176_vm15, 4294967295, %v8149_v41  ;;  %v1903_v33 = vshrl.u32 %v1861_v9, 16  ;;  %3831 = vmatpush.bf16.msra.mxu0 %v5344_v21 }
 0x197   : > { %v1906_v1 = vshll.u32 %v1861_v9, 16  ;;  %v2413_v32 = vsel %vm7176_vm15, %v2067_v0, 0  ;;  %v2528_v10 = vshrl.u32 %v7084_v26, 16  ;;  %v7183_v18 = vor.u32 %v2818_v45, %v2815_v22  ;;  %v5335_v0 = vld [vmem:[%s7938_s4 + $0x1a0] sm:$0xff]  ;;  %v5292_v45 = vld [vmem:[#allocation2 + $0x14] sm:$0xff] }
 0x198   : > { %v1492_v13 = vrot.slane %v1490_v44, 5  ;;  %v1496_v43 = vrot.slane %v1494_v30, 4  ;;  %v2464_v50 = vunpack.c.l.b16 %v2413_v32  ;;  %v1905_v54 = vrot.slane %v1903_v33, 3  ;;  %v2679_v44 = vld [vmem:[#allocation2 + $0x40] sm:$0xf]  ;;  %3654 = vmatpush.bf16.msrb.mxu2 %v5335_v0  ;;  %3086 = vmatmul.bf16.gmra.mxu3 %v5292_v45  ;;  %v5321_v0 = vld [vmem:[%s7938_s4 + $0x170] sm:$0xff] }
 0x199   : > { %v1908_v48 = vrot.slane %v1906_v1, 4  ;;  %vm2395_vm6 = vcmp.ne.s32.totalorder %v2391_v7, %v6440_v3  ;;  %vm8151_vm0 = vsmask.f32 4352  ;;  %v1621_v15 = vunpack.c.l.b16 %v6483_v58  ;;  %3357 = vmatpush.bf16.msrb.mxu1 %v5321_v0  ;;  %v3421_v0 = vld [vmem:[#allocation2 + $0x10] sm:$0x8] }
 0x19a   : > { %v1493_v42 = vsel %vm6603_vm3, %v6483_v58, %v1492_v13  ;;  %v1497_v9 = vor.u32 %v1496_v43, %v1492_v13  ;;  %v2820_v26 = vsel %vm8151_vm0, %v7089_v61, %v7183_v18  ;;  %v7199_v35 = vpack.c.b16 %v2464_v50, %v2463_v37  ;;  %3832 = vmatpush.bf16.msra.mxu0 %v5343_v39  ;;  %v2068_v61 = vld [vmem:[#allocation2 + $0x44] sm:$0x1]  ;;  %v7237_v50 = vpop.f32.mrf.mxu1  ;;  %v3424_v39 = vld [vmem:[#allocation2 + $0x1c] sm:$0xf] }
 0x19b   : > { %v1607_v14 = vunpack.c.l.b16 %v1493_v42  ;;  %v1608_v38 = vunpack.c.h.b16 %v1493_v42  ;;  %2928 = vmatmul.bf16.gmra.mxu0 %v2820_v26  ;;  %v7201_v30 = vor.u32 %v1908_v48, %v1905_v54  ;;  %v1622_v22 = vunpack.c.h.b16 %v6483_v58  ;;  %v1276_v58 = vld [vmem:[#allocation2 + $0x28] sm:$0xf]  ;;  %v2680_v54 = vld [vmem:[#allocation2 + $0x44] sm:$0xf] }
 0x19c   : > { %v1498_v21 = vrot.slane %v1497_v9, 4  ;;  %v2530_v33 = vor.u32 %v2528_v10, %v7102_v6  ;;  %v2532_v1 = vshll.u32 %v7199_v35, 16  ;;  %vm8152_vm15 = vcmp.ne.s32.totalorder %v2392_v16, %v6443_v49  ;;  %v7371_v52 = vpop.f32.mrf.mxu2 }
 0x19d   : > { %vm1611_vm0 = vcmp.ne.s32.totalorder %v1607_v14, %v6440_v3  ;;  %vm1612_vm5 = vcmp.ne.s32.totalorder %v1608_v38, %v6443_v49  ;;  %vm7213_vm11 = vmpackc.low %vm8152_vm15, %vm2395_vm6  ;;  %vm8157_vm10 = vsmask.f32 4352  ;;  %v1638_v9 = vsel %vm7015_vm2, %v1276_v58, 0  ;;  %v5341_v14 = vld [vmem:[%s7938_s4 + $0x1d0] sm:$0xff] }
 0x19e   : > { %v1503_v6 = vsel %vm6603_vm3, %v1498_v21, %v6437_v34  ;;  %vm7220_vm1 = vmpackc.low %vm1612_vm5, %vm1611_vm0  ;;  %v1910_v10 = vsel %vm8157_vm10, %v7100_v8, %v7201_v30  ;;  %v7227_v7 = vrot.slane %v2532_v1, 1  ;;  %v5334_v34 = vld [vmem:[%s7938_s4 + $0x198] sm:$0xff]  ;;  %v1277_v8 = vld [vmem:[#allocation2 + $0x2c] sm:$0xf]  ;;  %v2414_v48 = vsel %vm7213_vm11, %v2068_v61, 0  ;;  %3833 = vmatpush.bf16.msra.mxu0 %v5342_v57 }
 0x19f   : > { %v1614_v16 = vunpack.c.l.b16 %v1503_v6  ;;  %v1615_v13 = vunpack.c.h.b16 %v1503_v6  ;;  %v2696_v43 = vsel %vm7220_vm1, %v2679_v44, 0  ;;  %2026 = vmatmul.bf16.gmra.mxu1 %v1910_v10  ;;  %vm7242_vm3 = vcmp.ne.s32.totalorder %v1621_v15, %v6440_v3  ;;  %v5353_v38 = vld [vmem:[%s7938_s4 + $0x230] sm:$0xff]  ;;  %3655 = vmatpush.bf16.msrb.mxu2 %v5334_v34  ;;  %v5340_v10 = vld [vmem:[%s7938_s4 + $0x1c8] sm:$0xff] }
 0x1a0   : > { %vm7247_vm10 = vcmp.ne.s32.totalorder %v1622_v22, %v6443_v49  ;;  %vm8162_vm15 = vsmask.f32 7424  ;;  %v2747_v44 = vunpack.c.l.b16 %v2696_v43  ;;  %v1850_v15 = vunpack.c.l.b16 %v1638_v9  ;;  %v5333_v1 = vld [vmem:[%s7938_s4 + $0x190] sm:$0xff]  ;;  %4113 = vmatpush.bf16.msra.mxu3 %v5353_v38  ;;  %v3423_v43 = vld [vmem:[#allocation2 + $0x18] sm:$0xf] }
 0x1a1   : > { %v2535_v26 = vsel %vm8162_vm15, %v2530_v33, %v7227_v7  ;;  %vm1618_vm6 = vcmp.ne.s32.totalorder %v1614_v16, %v6440_v3  ;;  %vm1619_vm5 = vcmp.ne.s32.totalorder %v1615_v13, %v6443_v49  ;;  %v1639_v3 = vsel %vm7040_vm7, %v1277_v8, 0  ;;  %vm7278_vm15 = vmpackc.low %vm7247_vm10, %vm7242_vm3  ;;  %v2681_v33 = vld [vmem:[#allocation2 + $0x48] sm:$0xf] }
 0x1a2   : > { %2638 = vmatmul.bf16.gmra.mxu2 %v2535_v26  ;;  %vm7266_vm0 = vmpackc.low %vm1619_vm5, %vm1618_vm6  ;;  %v2465_v22 = vunpack.c.l.b16 %v2414_v48  ;;  %v1851_v61 = vunpack.c.l.b16 %v1639_v3  ;;  %3834 = vmatpush.bf16.msra.mxu0 %v5341_v14  ;;  %v2698_v13 = vsel %vm7278_vm15, %v2681_v33, 0  ;;  %v7293_v48 = vpop.f32.mrf.mxu1  ;;  %v3422_v3 = vld [vmem:[#allocation2 + $0x14] sm:$0xf]  ;;  %v3441_v33 = vsel %vm6659_vm13, %v3424_v39, 0 }
 0x1a3   : > { %v2697_v49 = vsel %vm7266_vm0, %v2680_v54, 0  ;;  %3656 = vmatpush.bf16.msrb.mxu2 %v5333_v1  ;;  %v5332_v54 = vld [vmem:[%s7938_s4 + $0x188] sm:$0xff]  ;;  %v2749_v26 = vunpack.c.l.b16 %v2698_v13  ;;  %v2536_v1 = vshrl.u32 %v7199_v35, 16  ;;  %vm8168_vm13 = vsmask.f32 4352 }
 0x1a4   : > { %v2748_v58 = vunpack.c.l.b16 %v2697_v49  ;;  %v1862_v6 = vpack.c.b16 %v1851_v61, %v1850_v15  ;;  %v2474_v57 = vpack.c.b16 %v2465_v22, %v2465_v22  ;;  %v3440_v22 = vsel %vm6634_vm14, %v3423_v43, 0  ;;  %vm8169_vm3 = vmmov %vm8168_vm13 }
 0x1a5   : > { %vm8167_vm14 = vnez %v8069_v40  ;;  %v2538_v13 = vor.u32 %v2536_v1, %v7227_v7  ;;  %v3491_v35 = vunpack.c.l.b16 %v3440_v22  ;;  %v3492_v43 = vunpack.c.l.b16 %v3441_v33  ;;  %v1278_v7 = vld [vmem:[#allocation2 + $0x30] sm:$0xf]  ;;  %vm8173_vm5 = vmmov %vm8169_vm3 }
 0x1a6   : > { %v2757_v16 = vpack.c.b16 %v2748_v58, %v2747_v44  ;;  %v1912_v34 = vshrl.u32 %v1862_v6, 16  ;;  %v1915_v8 = vshll.u32 %v1862_v6, 16  ;;  %3835 = vmatpush.bf16.msra.mxu0 %v5340_v10  ;;  %v5339_v44 = vld [vmem:[%s7938_s4 + $0x1c0] sm:$0xff]  ;;  %v2540_v61 = vshll.u32 %v2474_v57, 16 }
 0x1a7   : > { %3657 = vmatpush.bf16.msrb.mxu2 %v5332_v54  ;;  %v5331_v10 = vld [vmem:[%s7938_s4 + $0x180] sm:$0xff]  ;;  %v3439_v2 = vsel %vm8167_vm14, %v3422_v3, 0  ;;  %vm8171_vm10 = vnez %v8089_v60  ;;  %vm8172_vm6 = vnez %v8093_v29  ;;  %vm8174_vm14 = vmmov %vm8169_vm3  ;;  %v1280_v60 = vld [vmem:[#allocation2 + $0x38] sm:$0xf] }
 0x1a8   : > { %v2822_v42 = vshrl.u32 %v2757_v16, 16  ;;  %v2825_v9 = vshll.u32 %v2757_v16, 16  ;;  %v1914_v14 = vrot.slane %v1912_v34, 3  ;;  %v1917_v38 = vrot.slane %v1915_v8, 4  ;;  %3091 = vmatmul.bf16.gmra.mxu3 %v5293_v51  ;;  %v3425_v51 = vld [vmem:[#allocation2 + $0x20] sm:$0xf] }
 0x1a9   : > { %v3438_v16 = vsel %vm6613_vm8, %v3421_v0, 0  ;;  %v2758_v34 = vpack.c.b16 %v2749_v26, %v2749_v26  ;;  %v2542_v56 = vrot.slane %v2540_v61, 1  ;;  %v3490_v54 = vunpack.c.l.b16 %v3439_v2  ;;  %v5352_v0 = vld [vmem:[%s7938_s4 + $0x228] sm:$0xff] }
 0x1aa   : > { %v2824_v15 = vrot.slane %v2822_v42, 3  ;;  %v2827_v49 = vrot.slane %v2825_v9, 4  ;;  %v7303_v58 = vor.u32 %v1917_v38, %v1914_v14  ;;  %3836 = vmatpush.bf16.msra.mxu0 %v5339_v44  ;;  %v3489_v40 = vunpack.c.l.b16 %v3438_v16  ;;  %v7321_v39 = vpop.f32.mrf.mxu1  ;;  %v1279_v42 = vld [vmem:[#allocation2 + $0x34] sm:$0xf]  ;;  %v5320_v9 = vld [vmem:[%s7938_s4 + $0x168] sm:$0xff]  ;;  %4114 = vmatpush.bf16.msra.mxu3 %v5352_v0 }
 0x1ab   : > { %3658 = vmatpush.bf16.msrb.mxu2 %v5331_v10  ;;  %vm8170_vm8 = vsmask.f32 7424  ;;  %v3507_v14 = vpack.c.b16 %v3492_v43, %v3491_v35  ;;  %3358 = vmatpush.bf16.msrb.mxu1 %v5320_v9  ;;  %v2831_v3 = vshrl.u32 %v2758_v34, 16  ;;  %v3426_v43 = vld [vmem:[#allocation2 + $0x24] sm:$0xf]  ;;  %v1642_v29 = vsel %vm7220_vm1, %v1280_v60, 0 }
 0x1ac   : > { %v7305_v6 = vor.u32 %v2827_v49, %v2824_v15  ;;  %v1919_v8 = vsel %vm8169_vm3, %v7201_v30, %v7303_v58  ;;  %v1641_v30 = vsel %vm7126_vm12, %v1279_v42, 0  ;;  %v2543_v26 = vsel %vm8170_vm8, %v2538_v13, %v2542_v56  ;;  %v5294_v0 = vld [vmem:[#allocation2 + $0x24] sm:$0xff]  ;;  %vm8177_vm8 = vmmov %vm8173_vm5 }
 0x1ad   : > { %v1853_v44 = vunpack.c.l.b16 %v1641_v30  ;;  %v2834_v15 = vshll.u32 %v2758_v34, 16  ;;  %v3506_v49 = vpack.c.b16 %v3490_v54, %v3489_v40  ;;  %v3524_v33 = vshrl.u32 %v3507_v14, 16 }
 0x1ae   : > { %v2829_v57 = vsel %vm8168_vm13, %v7183_v18, %v7305_v6  ;;  %v1640_v18 = vsel %vm7107_vm4, %v1278_v7, 0  ;;  %v3527_v1 = vshll.u32 %v3507_v14, 16  ;;  %v2833_v16 = vrot.slane %v2831_v3, 3  ;;  %vm8175_vm13 = vmmov %vm8169_vm3 }
 0x1af   : > { %2933 = vmatmul.bf16.gmra.mxu0 %v2829_v57  ;;  %2031 = vmatmul.bf16.gmra.mxu1 %v1919_v8  ;;  %v1852_v38 = vunpack.c.l.b16 %v1640_v18  ;;  %v2836_v2 = vrot.slane %v2834_v15, 4  ;;  %v3516_v57 = vshrl.u32 %v3506_v49, 16  ;;  %v3519_v8 = vshll.u32 %v3506_v49, 16  ;;  %v1281_v49 = vld [vmem:[#allocation2 + $0x3c] sm:$0xf] }
 0x1b0   : > { %v3526_v7 = vrot.slane %v3524_v33, 3  ;;  %v3529_v42 = vrot.slane %v3527_v1, 4  ;;  %v3442_v40 = vsel %vm8171_vm10, %v3425_v51, 0  ;;  %v3443_v54 = vsel %vm8172_vm6, %v3426_v43, 0  ;;  %v5319_v33 = vld [vmem:[%s7938_s4 + $0x160] sm:$0xff] }
 0x1b1   : > { %v1863_v22 = vpack.c.b16 %v1853_v44, %v1852_v38  ;;  %v2837_v34 = vor.u32 %v2836_v2, %v2833_v16  ;;  %v3518_v18 = vrot.slane %v3516_v57, 3  ;;  %v3521_v30 = vrot.slane %v3519_v8, 4  ;;  %3359 = vmatpush.bf16.msrb.mxu1 %v5319_v33 }
 0x1b2   : > { %2643 = vmatmul.bf16.gmra.mxu2 %v2543_v26  ;;  %v7334_v56 = vpop.f32.mrf.mxu1  ;;  %v3530_v26 = vor.u32 %v3529_v42, %v3526_v7  ;;  %v3493_v14 = vunpack.c.l.b16 %v3442_v40  ;;  %v3494_v38 = vunpack.c.l.b16 %v3443_v54  ;;  %v3427_v42 = vld [vmem:[#allocation2 + $0x28] sm:$0xf]  ;;  %vm8176_vm3 = vnez %v8104_v47  ;;  %v5318_v47 = vld [vmem:[%s7938_s4 + $0x158] sm:$0xff] }
 0x1b3   : > { %v1921_v61 = vshrl.u32 %v1863_v22, 16  ;;  %v1924_v10 = vshll.u32 %v1863_v22, 16  ;;  %v2838_v44 = vsel %vm8173_vm5, %v7305_v6, %v2837_v34  ;;  %v3522_v15 = vor.u32 %v3521_v30, %v3518_v18  ;;  %v3428_v34 = vld [vmem:[#allocation2 + $0x2c] sm:$0xf] }
 0x1b4   : > { %v1643_v22 = vsel %vm7266_vm0, %v1281_v49, 0  ;;  %v3508_v1 = vpack.c.b16 %v3494_v38, %v3493_v14  ;;  %v3445_v14 = vsel %vm8176_vm3, %v3428_v34, 0  ;;  %vm8179_vm10 = vnez %v8057_v12  ;;  %vm8186_vm3 = vmmov %vm8177_vm8  ;;  %v5326_v12 = vld [vmem:[#allocation2 + $0x2c] sm:$0xff] }
 0x1b5   : > { %v1923_v13 = vrot.slane %v1921_v61, 3  ;;  %v1926_v35 = vrot.slane %v1924_v10, 4  ;;  %v3531_v6 = vsel %vm8175_vm13, %v3522_v15, %v3530_v26  ;;  %v1854_v61 = vunpack.c.l.b16 %v1642_v29  ;;  %v5323_v15 = vld [vmem:[#allocation2 + $0x14] sm:$0xff]  ;;  %3360 = vmatpush.bf16.msrb.mxu1 %v5318_v47  ;;  %vm8185_vm13 = vmmov %vm8177_vm8 }
 0x1b6   : > { %v1855_v10 = vunpack.c.l.b16 %v1643_v22  ;;  %v3533_v51 = vshrl.u32 %v3508_v1, 16  ;;  %v3536_v57 = vshll.u32 %v3508_v1, 16  ;;  %v3496_v29 = vunpack.c.l.b16 %v3445_v14  ;;  %v3141_v14 = vld [vmem:[#allocation2 + $0x18] sm:$0xf] }
 0x1b7   : > { %v1927_v9 = vor.u32 %v1926_v35, %v1923_v13  ;;  %v1282_v35 = vld [vmem:[#allocation2 + $0x40] sm:$0xf]  ;;  %vm8181_vm6 = vnez %v8112_v17 }
 0x1b8   : > { %3096 = vmatmul.bf16.gmra.mxu3 %v5294_v0  ;;  %v1864_v2 = vpack.c.b16 %v1855_v10, %v1854_v61  ;;  %v3535_v40 = vrot.slane %v3533_v51, 3  ;;  %v3538_v54 = vrot.slane %v3536_v57, 4  ;;  %v1644_v18 = vsel %vm7278_vm15, %v1282_v35, 0  ;;  %v3138_v35 = vld [vmem:[#allocation2 + $0xc] sm:$0xf] }
 0x1b9   : > { %v1928_v3 = vsel %vm8174_vm14, %v7303_v58, %v1927_v9  ;;  %v5351_v58 = vld [vmem:[%s7938_s4 + $0x220] sm:$0xff]  ;;  %v3444_v0 = vsel %vm8130_vm9, %v3427_v42, 0  ;;  %vm8178_vm9 = vmmov %vm8173_vm5  ;;  %v3430_v42 = vld [vmem:[#allocation2 + $0x34] sm:$0xf]  ;;  %vm8182_vm5 = vnez %v8055_v27  ;;  %vm8183_vm14 = vnez %v8061_v53 }
 0x1ba   : > { %v7355_v16 = vpop.f32.mrf.mxu1  ;;  %4115 = vmatpush.bf16.msra.mxu3 %v5351_v58  ;;  %v1930_v8 = vshrl.u32 %v1864_v2, 16  ;;  %v1933_v13 = vshll.u32 %v1864_v2, 16  ;;  %v7367_v60 = vor.u32 %v3538_v54, %v3535_v40  ;;  %v3495_v49 = vunpack.c.l.b16 %v3444_v0  ;;  %v5350_v58 = vld [vmem:[%s7938_s4 + $0x218] sm:$0xff]  ;;  %v3139_v2 = vld [vmem:[#allocation2 + $0x10] sm:$0xf]  ;;  %v5316_v0 = vld [vmem:[%s7938_s4 + $0x148] sm:$0xff] }
 0x1bb   : > { %v3156_v34 = vsel %vm8179_vm10, %v3139_v2, 0  ;;  %v3447_v47 = vsel %vm8181_vm6, %v3430_v42, 0  ;;  %v3158_v21 = vsel %vm8183_vm14, %v3141_v14, 0  ;;  %v5347_v53 = vld [vmem:[%s7938_s4 + $0x200] sm:$0xff]  ;;  %vm8195_vm6 = vnez %v8107_v11 }
 0x1bc   : > { %v1932_v43 = vrot.slane %v1930_v8, 3  ;;  %v1935_v7 = vrot.slane %v1933_v13, 4  ;;  %v3509_v1 = vpack.c.b16 %v3496_v29, %v3495_v49  ;;  %v7384_v8 = vpop.f32.mrf.mxu3  ;;  %v3140_v29 = vld [vmem:[#allocation2 + $0x14] sm:$0xf] }
 0x1be   : > { %v7359_v30 = vor.u32 %v1935_v7, %v1932_v43  ;;  %4116 = vmatpush.bf16.msra.mxu3 %v5350_v58  ;;  %v3542_v51 = vshrl.u32 %v3509_v1, 16  ;;  %v3545_v57 = vshll.u32 %v3509_v1, 16  ;;  %v3436_v43 = vld [vmem:[#allocation2 + $0x4c] sm:$0xf]  ;;  %v3429_v7 = vld [vmem:[#allocation2 + $0x30] sm:$0xf] }
 0x1bf   : > { %2938 = vmatmul.bf16.gmra.mxu0 %v2838_v44  ;;  %2036 = vmatmul.bf16.gmra.mxu1 %v1928_v3  ;;  %v1856_v44 = vunpack.c.l.b16 %v1644_v18  ;;  %v5295_v3 = vld [vmem:[#allocation2 + $0x2c] sm:$0xff]  ;;  %v3155_v58 = vsel %vm8182_vm5, %v3138_v35, 0 }
 0x1c0   : > { %v1937_v22 = vsel %vm8177_vm8, %v1927_v9, %v7359_v30  ;;  %v5317_v9 = vld [vmem:[%s7938_s4 + $0x150] sm:$0xff]  ;;  %v3547_v49 = vrot.slane %v3545_v57, 4  ;;  %v3206_v57 = vunpack.c.l.b16 %v3155_v58  ;;  %v7432_v58 = vpop.f32.mrf.mxu0  ;;  %vm8187_vm8 = vnez %v8077_v46 }
 0x1c1   : > { %v1865_v33 = vpack.c.b16 %v1856_v44, %v1856_v44  ;;  %3361 = vmatpush.bf16.msrb.mxu1 %v5317_v9  ;;  %v3453_v44 = vsel %vm7266_vm0, %v3436_v43, 0  ;;  %vm8184_vm0 = vnez %v8059_v59  ;;  %v5315_v43 = vld [vmem:[%s7938_s4 + $0x140] sm:$0xff] }
 0x1c2   : > { %3659 = vmatmul.bf16.vlgmr.msrb.gmra.mxu2 %v3531_v6  ;;  %v7365_v38 = vpop.f32.mrf.mxu1  ;;  %v3540_v6 = vsel %vm8178_vm9, %v3530_v26, %v7367_v60  ;;  %v3435_v26 = vld [vmem:[#allocation2 + $0x48] sm:$0xf]  ;;  %vm8188_vm9 = vnez %v8075_v5 }
 0x1c3   : > { %v1939_v61 = vshrl.u32 %v1865_v33, 16  ;;  %v1942_v10 = vshll.u32 %v1865_v33, 16  ;;  %v3452_v40 = vsel %vm7220_vm1, %v3435_v26, 0  ;;  %v7397_v33 = vpop.f32.mrf.mxu2  ;;  %vm8180_vm1 = vnez %v8110_v31 }
 0x1c4   : > { %v3446_v32 = vsel %vm8180_vm1, %v3429_v7, 0  ;;  %v3209_v26 = vunpack.c.l.b16 %v3158_v21  ;;  %v7413_v35 = vpop.f32.mrf.mxu3  ;;  %vm8191_vm1 = vnez %v8091_v36 }
 0x1c5   : > { %v1941_v54 = vrot.slane %v1939_v61, 3  ;;  %v1944_v18 = vrot.slane %v1942_v10, 4  ;;  %3362 = vmatpush.bf16.msrb.mxu1 %v5316_v0  ;;  %v3157_v61 = vsel %vm8184_vm0, %v3140_v29, 0  ;;  %v5324_v10 = vld [vmem:[#allocation2 + $0x1c] sm:$0xff]  ;;  %v3497_v31 = vunpack.c.l.b16 %v3446_v32  ;;  %v3431_v32 = vld [vmem:[#allocation2 + $0x38] sm:$0xf] }
 0x1c7   : > { %v1945_v9 = vor.u32 %v1944_v18, %v1941_v54  ;;  %v5349_v54 = vld [vmem:[%s7938_s4 + $0x210] sm:$0xff] }
 0x1c8   : > { %3101 = vmatmul.bf16.gmra.mxu3 %v5295_v3  ;;  %v3503_v3 = vunpack.c.l.b16 %v3452_v40  ;;  %v5296_v40 = vld [vmem:[#allocation2 + $0x34] sm:$0xff] }
 0x1c9   : > { %v1946_v17 = vsel %vm8185_vm13, %v7359_v30, %v1945_v9  ;;  %3363 = vmatpush.bf16.msrb.mxu1 %v5315_v43  ;;  %4117 = vmatpush.bf16.msra.mxu3 %v5349_v54  ;;  %v3142_v9 = vld [vmem:[#allocation2 + $0x1c] sm:$0xf] }
 0x1ca   : > { %v7386_v13 = vpop.f32.mrf.mxu1 }
 0x1cf   : > { %3837 = vmatmul.bf16.vlgmr.msra.gmra.mxu0 %v5323_v15  ;;  %2041 = vmatmul.bf16.gmra.mxu1 %v1937_v22  ;;  %v3544_v15 = vrot.slane %v3542_v51, 3  ;;  %v3504_v22 = vunpack.c.l.b16 %v3453_v44  ;;  %v3498_v51 = vunpack.c.l.b16 %v3447_v47  ;;  %v7427_v44 = vpop.f32.mrf.mxu2  ;;  %v3432_v47 = vld [vmem:[#allocation2 + $0x3c] sm:$0xf] }
 0x1d1   : > { %v7407_v1 = vpack.c.b16 %v3504_v22, %v3503_v3  ;;  %v3548_v2 = vor.u32 %v3547_v49, %v3544_v15  ;;  %v3510_v18 = vpack.c.b16 %v3498_v51, %v3497_v31  ;;  %v7430_v22 = vpop.f32.mrf.mxu3  ;;  %v3448_v51 = vsel %vm7015_vm2, %v3431_v32, 0 }
 0x1d2   : > { %3664 = vmatmul.bf16.gmra.mxu2 %v3540_v6  ;;  %v3207_v6 = vunpack.c.l.b16 %v3156_v34  ;;  %v7418_v42 = vpop.f32.mrf.mxu1  ;;  %v3208_v34 = vunpack.c.l.b16 %v3157_v61  ;;  %v3499_v25 = vunpack.c.l.b16 %v3448_v51  ;;  %vm8189_vm2 = vsmask.f32 7424 }
 0x1d3   : > { %v3549_v30 = vsel %vm8186_vm3, %v7367_v60, %v3548_v2  ;;  %v3551_v3 = vshrl.u32 %v3510_v18, 16  ;;  %v3554_v15 = vshll.u32 %v3510_v18, 16  ;;  %v3143_v60 = vld [vmem:[#allocation2 + $0x20] sm:$0xf]  ;;  %vm8199_vm13 = vmmov %vm8189_vm2 }
 0x1d4   : > { %v3223_v7 = vpack.c.b16 %v3207_v6, %v3206_v57  ;;  %v7425_v0 = vpack.c.b16 %v3209_v26, %v3208_v34  ;;  %v3449_v57 = vsel %vm7040_vm7, %v3432_v47, 0  ;;  %v3160_v26 = vsel %vm8187_vm8, %v3143_v60, 0  ;;  %vm8190_vm7 = vmmov %vm8186_vm3  ;;  %v7460_v60 = vpop.f32.mrf.mxu0 }
 0x1d5   : > { %v3553_v21 = vrot.slane %v3551_v3, 3  ;;  %v3556_v6 = vrot.slane %v3554_v15, 4  ;;  %v3159_v34 = vsel %vm8188_vm9, %v3142_v9, 0  ;;  %v5297_v15 = vld [vmem:[#allocation2 + $0x3c] sm:$0xff] }
 0x1d6   : > { %v3235_v14 = vshll.u32 %v3223_v7, 16  ;;  %v3240_v49 = vshll.u32 %v7425_v0, 16  ;;  %v3210_v3 = vunpack.c.l.b16 %v3159_v34 }
 0x1d7   : > { %v7443_v54 = vor.u32 %v3556_v6, %v3553_v21  ;;  %v7448_v18 = vpop.f32.mrf.mxu2 }
 0x1d8   : > { %3106 = vmatmul.bf16.gmra.mxu3 %v5296_v40  ;;  %v3237_v29 = vrot.slane %v3235_v14, 1  ;;  %v3242_v31 = vrot.slane %v3240_v49, 1  ;;  %v5325_v40 = vld [vmem:[#allocation2 + $0x24] sm:$0xff] }
 0x1d9   : > { %v7451_v14 = vpop.f32.mrf.mxu3  ;;  %v5348_v49 = vld [vmem:[%s7938_s4 + $0x208] sm:$0xff] }
 0x1da   : > { %4118 = vmatpush.bf16.msra.mxu3 %v5348_v49  ;;  %v3897_v49 = vld [vmem:[#allocation2 + $0x20] sm:$0xf] }
 0x1db   : > { %v3914_v27 = vsel %vm8183_vm14, %v3897_v49, 0  ;;  %vm8197_vm14 = vmmov %vm8189_vm2 }
 0x1de   : > { %4119 = vmatpush.bf16.msra.mxu3 %v5347_v53 }
 0x1df   : > { %3842 = vmatmul.bf16.gmra.mxu0 %v5324_v10  ;;  %2046 = vmatmul.bf16.gmra.mxu1 %v1946_v17  ;;  %v3233_v10 = vshrl.u32 %v3223_v7, 16 }
 0x1e1   : > { %v3238_v43 = vor.u32 %v3237_v29, %v3233_v10 }
 0x1e2   : > { %3669 = vmatmul.bf16.gmra.mxu2 %v3549_v30  ;;  %v3500_v30 = vunpack.c.l.b16 %v3449_v57  ;;  %v7469_v57 = vpop.f32.mrf.mxu2 }
 0x1e3   : > { %v3243_v23 = vsel %vm8189_vm2, %v3238_v43, %v3242_v31  ;;  %v7467_v51 = vpop.f32.mrf.mxu3 }
 0x1e4   : > { %v3511_v29 = vpack.c.b16 %v3500_v30, %v3499_v25  ;;  %v3434_v25 = vld [vmem:[#allocation2 + $0x44] sm:$0xf]  ;;  %v3244_v30 = vshrl.u32 %v7425_v0, 16 }
 0x1e6   : > { %v2012_v61 = vpop.f32.mrf.mxu1  ;;  %v3560_v9 = vshrl.u32 %v3511_v29, 16 }
 0x1e7   : > { %v2013_v17 = vadd.f32 %v2012_v61, %v7237_v50  ;;  %v3211_v50 = vunpack.c.l.b16 %v3160_v26  ;;  %v3563_v61 = vshll.u32 %v3511_v29, 16  ;;  %v3894_v26 = vld [vmem:[#allocation2 + $0x14] sm:$0xf] }
 0x1e8   : > { %3111 = vmatmul.bf16.gmra.mxu3 %v5297_v15  ;;  %v3562_v43 = vrot.slane %v3560_v9, 3  ;;  %v3911_v0 = vsel %vm8182_vm5, %v3894_v26, 0  ;;  %vm8196_vm5 = vnez %v8101_v28 }
 0x1e9   : > { %v7446_v7 = vadd.f32 %v7371_v52, %v2013_v17  ;;  %v3558_v52 = vsel %vm8190_vm7, %v3548_v2, %v7443_v54  ;;  %v7458_v47 = vpack.c.b16 %v3211_v50, %v3210_v3  ;;  %v3895_v2 = vld [vmem:[#allocation2 + $0x18] sm:$0xf]  ;;  %v3145_v17 = vld [vmem:[#allocation2 + $0x28] sm:$0xf]  ;;  %v3565_v34 = vrot.slane %v3563_v61, 4 }
 0x1ea   : > { %v3912_v50 = vsel %vm8179_vm10, %v3895_v2, 0  ;;  %v3162_v15 = vsel %vm8191_vm1, %v3145_v17, 0  ;;  %vm8192_vm10 = vnez %v8086_v62  ;;  %v3896_v61 = vld [vmem:[#allocation2 + $0x1c] sm:$0xf]  ;;  %vm8205_vm7 = vnez %v8132_v55 }
 0x1eb   : > { %v3248_v10 = vshll.u32 %v7458_v47, 16  ;;  %v7487_v9 = vor.u32 %v3565_v34, %v3562_v43  ;;  %v3963_v4 = vunpack.c.l.b16 %v3912_v50  ;;  %v7498_v26 = vpop.f32.mrf.mxu3  ;;  %v5298_v34 = vld [vmem:[#allocation2 + $0x44] sm:$0xff] }
 0x1ee   : > { %v2014_v32 = vpop.f32.mrf.mxu1 }
 0x1ef   : > { %3847 = vmatmul.bf16.gmra.mxu0 %v5325_v40  ;;  %3364 = vmatmul.bf16.vlgmr.msrb.gmra.mxu1 %v3243_v23  ;;  %v2015_v21 = vadd.f32 %v2014_v32, %v7293_v48  ;;  %v3433_v40 = vld [vmem:[#allocation2 + $0x40] sm:$0xf]  ;;  %v3144_v23 = vld [vmem:[#allocation2 + $0x24] sm:$0xf]  ;;  %v3451_v32 = vsel %vm7126_vm12, %v3434_v25, 0  ;;  %vm8194_vm12 = vmmov %vm8186_vm3 }
 0x1f0   : > { %v3450_v29 = vsel %vm7107_vm4, %v3433_v40, 0  ;;  %vm8193_vm4 = vmmov %vm8189_vm2  ;;  %v3502_v17 = vunpack.c.l.b16 %v3451_v32  ;;  %v3913_v40 = vsel %vm8184_vm0, %v3896_v61, 0  ;;  %v3567_v25 = vsel %vm8194_vm12, %v7443_v54, %v7487_v9 }
 0x1f1   : > { %v7464_v6 = vadd.f32 %v7397_v33, %v2015_v21  ;;  %v7472_v33 = vrot.slane %v3248_v10, 1  ;;  %v7485_v21 = vpop.f32.mrf.mxu0  ;;  %v3213_v10 = vunpack.c.l.b16 %v3162_v15  ;;  %v3501_v2 = vunpack.c.l.b16 %v3450_v29  ;;  %vm8198_vm0 = vmmov %vm8186_vm3 }
 0x1f2   : > { %3674 = vmatmul.bf16.gmra.mxu2 %v3558_v52  ;;  %v3246_v52 = vor.u32 %v3244_v30, %v3242_v31  ;;  %v3161_v31 = vsel %vm8192_vm10, %v3144_v23, 0  ;;  %v2621_v23 = vpop.f32.mrf.mxu2  ;;  %v3964_v49 = vunpack.c.l.b16 %v3913_v40  ;;  %vm8200_vm3 = vnez %v8120_v24 }
 0x1f3   : > { %v3212_v43 = vunpack.c.l.b16 %v3161_v31  ;;  %v3512_v59 = vpack.c.b16 %v3502_v17, %v3501_v2  ;;  %v3146_v2 = vld [vmem:[#allocation2 + $0x2c] sm:$0xf]  ;;  %v3899_v17 = vld [vmem:[#allocation2 + $0x28] sm:$0xf] }
 0x1f4   : > { %v3251_v20 = vsel %vm8193_vm4, %v3246_v52, %v7472_v33 }
 0x1f5   : > { %v3572_v31 = vshll.u32 %v3512_v59, 16 }
 0x1f7   : > { %v2017_v48 = vpop.f32.mrf.mxu1 }
 0x1f8   : > { %v2018_v3 = vadd.f32 %v2017_v48, %v7321_v39  ;;  %v3965_v48 = vunpack.c.l.b16 %v3914_v27  ;;  %3116 = vmatmul.bf16.gmra.mxu3 %v5298_v34  ;;  %v3252_v27 = vshrl.u32 %v7458_v47, 16  ;;  %v3163_v47 = vsel %vm8196_vm5, %v3146_v2, 0 }
 0x1f9   : > { %v7519_v61 = vpop.f32.mrf.mxu3 }
 0x1fa   : > { %v7490_v39 = vadd.f32 %v7427_v44, %v2018_v3  ;;  %v3962_v44 = vunpack.c.l.b16 %v3911_v0  ;;  %v7508_v3 = vpack.c.b16 %v3213_v10, %v3212_v43  ;;  %v7514_v54 = vpack.c.b16 %v3965_v48, %v3964_v49  ;;  %v7517_v0 = vpop.f32.mrf.mxu0 }
 0x1fb   : > { %v3574_v43 = vrot.slane %v3572_v31, 4  ;;  %v3254_v53 = vor.u32 %v3252_v27, %v7472_v33  ;;  %v3214_v31 = vunpack.c.l.b16 %v3163_v47  ;;  %v3149_v47 = vld [vmem:[#allocation2 + $0x38] sm:$0xf] }
 0x1fc   : > { %v3979_v30 = vpack.c.b16 %v3963_v4, %v3962_v44  ;;  %v3256_v32 = vshll.u32 %v7508_v3, 16  ;;  %v3147_v4 = vld [vmem:[#allocation2 + $0x30] sm:$0xf] }
 0x1fd   : > { %v3164_v40 = vsel %vm8195_vm6, %v3147_v4, 0 }
 0x1fe   : > { %v3991_v29 = vshll.u32 %v3979_v30, 16  ;;  %v3989_v48 = vshrl.u32 %v3979_v30, 16 }
 0x1ff   : > { %3852 = vmatmul.bf16.gmra.mxu0 %v5326_v12  ;;  %3369 = vmatmul.bf16.gmra.mxu1 %v3251_v20  ;;  %v2019_v50 = vpop.f32.mrf.mxu1  ;;  %v3569_v12 = vshrl.u32 %v3512_v59, 16 }
 0x200   : > { %v2020_v15 = vadd.f32 %v2019_v50, %v7334_v56  ;;  %v3993_v20 = vrot.slane %v3991_v29, 1  ;;  %v3996_v56 = vshll.u32 %v7514_v54, 16  ;;  %v3898_v50 = vld [vmem:[#allocation2 + $0x24] sm:$0xf] }
 0x201   : > { %v3571_v44 = vrot.slane %v3569_v12, 3  ;;  %v7537_v33 = vpop.f32.mrf.mxu3 }
 0x202   : > { %3679 = vmatmul.bf16.gmra.mxu2 %v3567_v25  ;;  %v7512_v52 = vadd.f32 %v7448_v18, %v2020_v15  ;;  %v3258_v18 = vrot.slane %v3256_v32, 1  ;;  %v7526_v25 = vpop.f32.mrf.mxu2  ;;  %v5327_v15 = vld [vmem:[#allocation2 + $0x34] sm:$0xff]  ;;  %v3998_v49 = vrot.slane %v3996_v56, 1  ;;  %v3215_v32 = vunpack.c.l.b16 %v3164_v40 }
 0x203   : > { %v3575_v12 = vor.u32 %v3574_v43, %v3571_v44  ;;  %v3994_v30 = vor.u32 %v3993_v20, %v3989_v48  ;;  %v3578_v43 = vshrl.u32 %v7407_v1, 16 }
 0x204   : > { %v3259_v29 = vsel %vm8197_vm14, %v3254_v53, %v3258_v18  ;;  %v7546_v2 = vpack.c.b16 %v3215_v32, %v3214_v31  ;;  %v2944_v53 = vadd.f32 %v7432_v58, %v7446_v7  ;;  %v3166_v58 = vsel %vm8200_vm3, %v3149_v47, 0  ;;  %v3901_v7 = vld [vmem:[#allocation2 + $0x30] sm:$0xf] }
 0x205   : > { %v3576_v46 = vsel %vm8198_vm0, %v7487_v9, %v3575_v12  ;;  %v3999_v56 = vsel %vm8199_vm13, %v3994_v30, %v3998_v49  ;;  %v3148_v30 = vld [vmem:[#allocation2 + $0x34] sm:$0xf] }
 0x206   : > { %v3264_v9 = vshll.u32 %v7546_v2, 16 }
 0x208   : > { %4120 = vmatmul.bf16.vlgmr.msra.gmra.mxu3 %v3999_v56  ;;  %v3266_v32 = vrot.slane %v3264_v9, 1  ;;  %v3217_v9 = vunpack.c.l.b16 %v3166_v58 }
 0x209   : > { %v2022_v10 = vpop.f32.mrf.mxu1 }
 0x20a   : > { %v2023_v34 = vadd.f32 %v2022_v10, %v7355_v16  ;;  %v3916_v16 = vsel %vm8187_vm8, %v3899_v17, 0  ;;  %v7541_v10 = vpop.f32.mrf.mxu0  ;;  %v2626_v40 = vpop.f32.mrf.mxu2  ;;  %vm8202_vm8 = vmmov %vm8189_vm2 }
 0x20b   : > { %v3967_v4 = vunpack.c.l.b16 %v3916_v16  ;;  %v3082_v48 = vpop.f32.mrf.mxu3  ;;  %v3580_v16 = vrot.slane %v3578_v43, 3  ;;  %v3900_v43 = vld [vmem:[#allocation2 + $0x2c] sm:$0xf] }
 0x20c   : > { %v7530_v59 = vadd.f32 %v7469_v57, %v2023_v34  ;;  %v3915_v57 = vsel %vm8188_vm9, %v3898_v50, 0  ;;  %v3581_v34 = vshll.u32 %v7407_v1, 16  ;;  %v3437_v50 = vld [vmem:[#allocation2 + $0x50] sm:$0xf]  ;;  %vm8203_vm9 = vmmov %vm8189_vm2 }
 0x20d   : > { %v3966_v17 = vunpack.c.l.b16 %v3915_v57  ;;  %v3454_v1 = vsel %vm7278_vm15, %v3437_v50, 0  ;;  %vm8201_vm15 = vnez %v8116_v63  ;;  %vm8204_vm2 = vmmov %vm8198_vm0 }
 0x20e   : > { %v3505_v45 = vunpack.c.l.b16 %v3454_v1  ;;  %v2948_v28 = vadd.f32 %v7541_v10, %v7530_v59  ;;  %v5330_v59 = vld [vmem:[#allocation2 + $0x4c] sm:$0xff] }
 0x20f   : > { %3857 = vmatmul.bf16.gmra.mxu0 %v5327_v15  ;;  %3374 = vmatmul.bf16.gmra.mxu1 %v3259_v29  ;;  %v7549_v44 = vpack.c.b16 %v3967_v4, %v3966_v17  ;;  %v7558_v15 = vadd.f32 %v3082_v48, %v2944_v53  ;;  %v3260_v29 = vshrl.u32 %v7508_v3, 16 }
 0x211   : > { %v2024_v27 = vpop.f32.mrf.mxu1  ;;  %v3262_v4 = vor.u32 %v3260_v29, %v3258_v18  ;;  %v3918_v18 = vsel %vm8191_vm1, %v3901_v7, 0  ;;  %vm8206_vm1 = vmmov %vm8193_vm4 }
 0x212   : > { %3684 = vmatmul.bf16.gmra.mxu2 %v3576_v46  ;;  %v2025_v20 = vadd.f32 %v2024_v27, %v7365_v38  ;;  %v4004_v38 = vshll.u32 %v7549_v44, 16  ;;  %v7564_v57 = vpop.f32.mrf.mxu0  ;;  %v4000_v46 = vshrl.u32 %v7514_v54, 16  ;;  %v5328_v27 = vld [vmem:[#allocation2 + $0x3c] sm:$0xff]  ;;  %v2629_v50 = vpop.f32.mrf.mxu2  ;;  %vm8208_vm4 = vmmov %vm8198_vm0 }
 0x213   : > { %v3084_v48 = vpop.f32.mrf.mxu3  ;;  %vm8209_vm12 = vmmov %vm8206_vm1 }
 0x214   : > { %v7551_v5 = vadd.f32 %v2621_v23, %v2025_v20  ;;  %v3583_v23 = vrot.slane %v3581_v34, 4  ;;  %v7569_v56 = vrot.slane %v4004_v38, 1  ;;  %v3165_v20 = vsel %vm8201_vm15, %v3148_v30, 0  ;;  %vm8213_vm14 = vmmov %vm8206_vm1 }
 0x215   : > { %v3267_v34 = vsel %vm8202_vm8, %v3262_v4, %v3266_v32  ;;  %v4002_v53 = vor.u32 %v4000_v46, %v3998_v49  ;;  %v3216_v47 = vunpack.c.l.b16 %v3165_v20  ;;  %v3917_v49 = vsel %vm8192_vm10, %v3900_v43, 0  ;;  %vm8214_vm0 = vmmov %vm8206_vm1 }
 0x216   : > { %v7571_v17 = vor.u32 %v3583_v23, %v3580_v16  ;;  %v3514_v16 = vpack.c.b16 %v3505_v45, %v3505_v45  ;;  %vm8207_vm10 = vnez %v8135_v19  ;;  %vm8215_vm13 = vmmov %vm8214_vm0 }
 0x217   : > { %v4007_v38 = vsel %vm8203_vm9, %v4002_v53, %v7569_v56  ;;  %v7592_v29 = vpack.c.b16 %v3217_v9, %v3216_v47  ;;  %v3150_v9 = vld [vmem:[#allocation2 + $0x3c] sm:$0xf]  ;;  %v3903_v53 = vld [vmem:[#allocation2 + $0x38] sm:$0xf]  ;;  %vm8218_vm8 = vmmov %vm8214_vm0 }
 0x218   : > { %v3585_v36 = vsel %vm8204_vm2, %v3575_v12, %v7571_v17  ;;  %4125 = vmatmul.bf16.gmra.mxu3 %v4007_v38  ;;  %v3587_v58 = vshrl.u32 %v3514_v16, 16  ;;  %v3590_v62 = vshll.u32 %v3514_v16, 16  ;;  %v3167_v38 = vsel %vm8205_vm7, %v3150_v9, 0  ;;  %vm8219_vm9 = vmmov %vm8214_vm0 }
 0x219   : > { %v3272_v12 = vshll.u32 %v7592_v29, 16  ;;  %vm8220_vm2 = vmmov %vm8214_vm0 }
 0x21a   : > { %v7594_v1 = vpop.f32.mrf.mxu0  ;;  %v3592_v45 = vrot.slane %v3590_v62, 4  ;;  %v2631_v43 = vpop.f32.mrf.mxu2 }
 0x21b   : > { %v3087_v46 = vpop.f32.mrf.mxu3 }
 0x21c   : > { %v2027_v31 = vpop.f32.mrf.mxu1 }
 0x21d   : > { %v2028_v3 = vadd.f32 %v2027_v31, %v7386_v13  ;;  %v2945_v13 = vadd.f32 %v7460_v60, %v7464_v6  ;;  %v3968_v60 = vunpack.c.l.b16 %v3917_v49  ;;  %v2946_v31 = vadd.f32 %v7485_v21, %v7490_v39  ;;  %v5329_v39 = vld [vmem:[#allocation2 + $0x44] sm:$0xff] }
 0x21e   : > { %v4008_v21 = vshrl.u32 %v7549_v44, 16 }
 0x21f   : > { %3862 = vmatmul.bf16.gmra.mxu0 %v5328_v27  ;;  %v7580_v54 = vadd.f32 %v7526_v25, %v2028_v3  ;;  %3379 = vmatmul.bf16.gmra.mxu1 %v3267_v34  ;;  %v7590_v23 = vadd.f32 %v3084_v48, %v2945_v13  ;;  %v3969_v25 = vunpack.c.l.b16 %v3918_v18  ;;  %v7604_v27 = vadd.f32 %v3087_v46, %v2946_v31  ;;  %v3151_v48 = vld [vmem:[#allocation2 + $0x40] sm:$0xf] }
 0x220   : > { %v3589_v3 = vrot.slane %v3587_v58, 3  ;;  %v3274_v34 = vrot.slane %v3272_v12, 1  ;;  %v3218_v58 = vunpack.c.l.b16 %v3167_v38 }
 0x221   : > { %v7597_v7 = vpack.c.b16 %v3969_v25, %v3968_v60  ;;  %v3168_v60 = vsel %vm8207_vm10, %v3151_v48, 0 }
 0x222   : > { %3689 = vmatmul.bf16.gmra.mxu2 %v3585_v36  ;;  %v3902_v36 = vld [vmem:[#allocation2 + $0x34] sm:$0xf]  ;;  %v7617_v25 = vpop.f32.mrf.mxu0  ;;  %v3219_v62 = vunpack.c.l.b16 %v3168_v60  ;;  %v2634_v31 = vpop.f32.mrf.mxu2 }
 0x223   : > { %v4012_v20 = vshll.u32 %v7597_v7, 16 }
 0x224   : > { %v2029_v6 = vpop.f32.mrf.mxu1 }
 0x225   : > { %v2030_v30 = vadd.f32 %v2029_v6, %v7418_v42  ;;  %v3268_v42 = vshrl.u32 %v7546_v2, 16  ;;  %v4014_v49 = vrot.slane %v4012_v20, 1  ;;  %v2947_v2 = vadd.f32 %v7517_v0, %v7512_v52 }
 0x226   : > { %v4010_v6 = vor.u32 %v4008_v21, %v7569_v56  ;;  %v3919_v52 = vsel %vm8196_vm5, %v3902_v36, 0  ;;  %vm8212_vm5 = vnez %v8150_v41 }
 0x227   : > { %v7602_v4 = vadd.f32 %v2626_v40, %v2030_v30  ;;  %v3270_v13 = vor.u32 %v3268_v42, %v3266_v32  ;;  %v3593_v40 = vor.u32 %v3592_v45, %v3589_v3  ;;  %v3920_v32 = vsel %vm8195_vm6, %v3903_v53, 0 }
 0x228   : > { %v4015_v0 = vsel %vm8209_vm12, %v4010_v6, %v4014_v49  ;;  %v3970_v12 = vunpack.c.l.b16 %v3919_v52  ;;  %v3229_v3 = vpack.c.b16 %v3219_v62, %v3218_v58  ;;  %vm8221_vm12 = vcmask 31744  }
 0x229   : > { %v3275_v16 = vsel %vm8206_vm1, %v3270_v13, %v3274_v34  ;;  %v3594_v11 = vsel %vm8208_vm4, %v7571_v17, %v3593_v40  ;;  %4130 = vmatmul.bf16.gmra.mxu3 %v4015_v0  ;;  %v3276_v17 = vshrl.u32 %v7592_v29, 16  ;;  %v3152_v13 = vld [vmem:[#allocation2 + $0x44] sm:$0xf] }
 0x22a   : > { %v3280_v9 = vshll.u32 %v3229_v3, 16 }
 0x22b   : > { %v3278_v21 = vor.u32 %v3276_v17, %v3274_v34  ;;  %v2949_v34 = vadd.f32 %v7564_v57, %v7551_v5  ;;  %v3284_v17 = vshrl.u32 %v3229_v3, 16 }
 0x22c   : > { %v2032_v18 = vpop.f32.mrf.mxu1 }
 0x22d   : > { %v2033_v47 = vadd.f32 %v2032_v18, %v7384_v8  ;;  %v3089_v8 = vpop.f32.mrf.mxu3  ;;  %v7639_v18 = vpop.f32.mrf.mxu0 }
 0x22e   : > { %v7624_v30 = vadd.f32 %v3089_v8, %v2947_v2  ;;  %v2636_v2 = vpop.f32.mrf.mxu2 }
 0x22f   : > { %3867 = vmatmul.bf16.gmra.mxu0 %v5329_v39  ;;  %v7619_v44 = vadd.f32 %v2629_v50, %v2033_v47  ;;  %3384 = vmatmul.bf16.gmra.mxu1 %v3275_v16  ;;  %v3971_v50 = vunpack.c.l.b16 %v3920_v32  ;;  %v3153_v39 = vld [vmem:[#allocation2 + $0x48] sm:$0xf]  ;;  %v8210_v47 = vld [vmem:[#allocation3_spill] sm:$0xff] }
 0x230   : > { %vm8211_vm6 = vnez %v8210_v47  ;;  %v3170_v29 = vsel %vm8212_vm5, %v3153_v39, 0  ;;  %v3904_v16 = vld [vmem:[#allocation2 + $0x3c] sm:$0xf] }
 0x231   : > { %v3983_v45 = vpack.c.b16 %v3971_v50, %v3970_v12  ;;  %v3169_v38 = vsel %vm8211_vm6, %v3152_v13, 0  ;;  %v3154_v13 = vld [vmem:[#allocation2 + $0x4c] sm:$0x1] }
 0x232   : > { %3694 = vmatmul.bf16.gmra.mxu2 %v3594_v11  ;;  %v3220_v52 = vunpack.c.l.b16 %v3169_v38  ;;  %v3221_v11 = vunpack.c.l.b16 %v3170_v29  ;;  %v3907_v29 = vld [vmem:[#allocation2 + $0x48] sm:$0xf] }
 0x233   : > { %v4020_v48 = vshll.u32 %v3983_v45, 16  ;;  %v4024_v39 = vshrl.u32 %v3983_v45, 16 }
 0x234   : > { %v2034_v46 = vpop.f32.mrf.mxu1  ;;  %v3230_v12 = vpack.c.b16 %v3221_v11, %v3220_v52 }
 0x235   : > { %v2035_v56 = vadd.f32 %v2034_v46, %v7413_v35  ;;  %v3092_v42 = vpop.f32.mrf.mxu3  ;;  %v3282_v35 = vrot.slane %v3280_v9, 1  ;;  %v4022_v36 = vrot.slane %v4020_v48, 1  ;;  %v7659_v57 = vpop.f32.mrf.mxu0  ;;  %v2950_v46 = vadd.f32 %v7594_v1, %v7580_v54 }
 0x236   : > { %v7637_v53 = vadd.f32 %v3092_v42, %v2948_v28  ;;  %v2639_v42 = vpop.f32.mrf.mxu2  ;;  %v3288_v9 = vshll.u32 %v3230_v12, 16  ;;  %v3292_v11 = vshrl.u32 %v3230_v12, 16 }
 0x237   : > { %v7634_v20 = vadd.f32 %v2631_v43, %v2035_v56  ;;  %v4016_v43 = vshrl.u32 %v7597_v7, 16  ;;  %v3283_v32 = vsel %vm8213_vm14, %v3278_v21, %v3282_v35  ;;  %v3921_v7 = vsel %vm8201_vm15, %v3904_v16, 0  ;;  %vm8217_vm15 = vmmov %vm8214_vm0 }
 0x238   : > { %v3972_v50 = vunpack.c.l.b16 %v3921_v7  ;;  %v3286_v48 = vor.u32 %v3284_v17, %v3282_v35  ;;  %v3171_v21 = vsel %vm7213_vm11, %v3154_v13, 0  ;;  %v3290_v38 = vrot.slane %v3288_v9, 1  ;;  %v3909_v17 = vld [vmem:[#allocation2 + $0x50] sm:$0xf] }
 0x239   : > { %v4018_v6 = vor.u32 %v4016_v43, %v4014_v49  ;;  %v4026_v1 = vor.u32 %v4024_v39, %v4022_v36  ;;  %v2951_v43 = vadd.f32 %v7617_v25, %v7602_v4  ;;  %v3222_v16 = vunpack.c.l.b16 %v3171_v21 }
 0x23a   : > { %v3291_v3 = vsel %vm8215_vm13, %v3286_v48, %v3290_v38  ;;  %v3926_v21 = vsel %vm8212_vm5, %v3909_v17, 0  ;;  %vm8222_vm13 = vmmov %vm8221_vm12 }
 0x23b   : > { %v4023_v0 = vsel %vm8214_vm0, %v4018_v6, %v4022_v36  ;;  %v3231_v6 = vpack.c.b16 %v3222_v16, %v3222_v16 }
 0x23c   : > { %v2037_v40 = vpop.f32.mrf.mxu1  ;;  %4135 = vmatmul.bf16.gmra.mxu3 %v4023_v0  ;;  %v2952_v0 = vadd.f32 %v7639_v18, %v7619_v44  ;;  %v2953_v44 = vadd.f32 %v7659_v57, %v7634_v20 }
 0x23d   : > { %v2038_v10 = vadd.f32 %v2037_v40, %v7430_v22  ;;  %v3094_v60 = vpop.f32.mrf.mxu3  ;;  %v3905_v22 = vld [vmem:[#allocation2 + $0x40] sm:$0xf]  ;;  %v3296_v7 = vshll.u32 %v3231_v6, 16 }
 0x23e   : > { %v7652_v58 = vadd.f32 %v3094_v60, %v2949_v34  ;;  %v3922_v5 = vsel %vm8200_vm3, %v3905_v22, 0  ;;  %vm8216_vm3 = vmmov %vm8214_vm0  ;;  %v2641_v60 = vpop.f32.mrf.mxu2 }
 0x23f   : > { %3872 = vmatmul.bf16.gmra.mxu0 %v5330_v59  ;;  %v7650_v8 = vadd.f32 %v2634_v31, %v2038_v10  ;;  %3389 = vmatmul.bf16.gmra.mxu1 %v3283_v32  ;;  %v3973_v31 = vunpack.c.l.b16 %v3922_v5  ;;  %v2929_v59 = vpop.f32.mrf.mxu0  ;;  %v3906_v10 = vld [vmem:[#allocation2 + $0x44] sm:$0xf] }
 0x240   : > { %v3923_v34 = vsel %vm8205_vm7, %v3906_v10, 0 }
 0x241   : > { %v3984_v28 = vpack.c.b16 %v3973_v31, %v3972_v50  ;;  %v3974_v4 = vunpack.c.l.b16 %v3923_v34  ;;  %v3298_v31 = vrot.slane %v3296_v7, 1  ;;  %v2954_v41 = vadd.f32 %v2929_v59, %v7650_v8 }
 0x244   : > { %v2039_v62 = vpop.f32.mrf.mxu1 }
 0x245   : > { %v2040_v49 = vadd.f32 %v2039_v62, %v7451_v14  ;;  %v3097_v63 = vpop.f32.mrf.mxu3  ;;  %v4028_v14 = vshll.u32 %v3984_v28, 16 }
 0x246   : > { %v7666_v24 = vadd.f32 %v3097_v63, %v2950_v46  ;;  %v4032_v46 = vshrl.u32 %v3984_v28, 16  ;;  %v2644_v9 = vpop.f32.mrf.mxu2 }
 0x247   : > { %v7664_v56 = vadd.f32 %v2636_v2, %v2040_v49  ;;  %v4030_v45 = vrot.slane %v4028_v14, 1  ;;  %v2931_v55 = vpop.f32.mrf.mxu0  ;;  %v3294_v49 = vor.u32 %v3292_v11, %v3290_v38 }
 0x249   : > { %v4031_v36 = vsel %vm8216_vm3, %v4026_v1, %v4030_v45  ;;  %v4034_v12 = vor.u32 %v4032_v46, %v4030_v45  ;;  %v3299_v48 = vsel %vm8217_vm15, %v3294_v49, %v3298_v31  ;;  %v3977_v1 = vunpack.c.l.b16 %v3926_v21 }
 0x24a   : > { %v2955_v34 = vadd.f32 %v2931_v55, %v7664_v56  ;;  %v3910_v56 = vld [vmem:[#allocation2 + $0x54] sm:$0x1] }
 0x24c   : > { %v2042_v40 = vpop.f32.mrf.mxu1  ;;  %4140 = vmatmul.bf16.gmra.mxu3 %v4031_v36 }
 0x24d   : > { %v2043_v54 = vadd.f32 %v2042_v40, %v7467_v51  ;;  %v3099_v2 = vpop.f32.mrf.mxu3  ;;  %v3924_v51 = vsel %vm8207_vm10, %v3907_v29, 0 }
 0x24e   : > { %v7676_v32 = vadd.f32 %v3099_v2, %v2951_v43  ;;  %v3975_v25 = vunpack.c.l.b16 %v3924_v51  ;;  %v2646_v57 = vpop.f32.mrf.mxu2 }
 0x24f   : > { %v7674_v35 = vadd.f32 %v2639_v42, %v2043_v54  ;;  %3394 = vmatmul.bf16.gmra.mxu1 %v3291_v3  ;;  %v3908_v42 = vld [vmem:[#allocation2 + $0x4c] sm:$0xf]  ;;  %v2934_v38 = vpop.f32.mrf.mxu0 }
 0x250   : > { %v3985_v19 = vpack.c.b16 %v3975_v25, %v3974_v4  ;;  %v3925_v18 = vsel %vm8211_vm6, %v3908_v42, 0 }
 0x251   : > { %v3976_v54 = vunpack.c.l.b16 %v3925_v18  ;;  %v2956_v4 = vadd.f32 %v2934_v38, %v7674_v35 }
 0x252   : > { %v4036_v63 = vshll.u32 %v3985_v19, 16  ;;  %v4040_v16 = vshrl.u32 %v3985_v19, 16  ;;  %v3927_v19 = vsel %vm7213_vm11, %v3910_v56, 0 }
 0x253   : > { %v3986_v47 = vpack.c.b16 %v3977_v1, %v3976_v54  ;;  %v3978_v49 = vunpack.c.l.b16 %v3927_v19  ;;  %v7729_v1 = vld [vmem:[%s7940_s6] ss:$0 sm:$0xff] }
 0x254   : > { %v2044_v22 = vpop.f32.mrf.mxu1  ;;  %v4038_v14 = vrot.slane %v4036_v63, 1 }
 0x255   : > { %v2045_v52 = vadd.f32 %v2044_v22, %v7498_v26  ;;  %v3102_v50 = vpop.f32.mrf.mxu3  ;;  %v4044_v2 = vshll.u32 %v3986_v47, 16  ;;  %v4048_v31 = vshrl.u32 %v3986_v47, 16  ;;  %v3987_v63 = vpack.c.b16 %v3978_v49, %v3978_v49 }
 0x256   : > { %v7686_v62 = vadd.f32 %v3102_v50, %v2952_v0  ;;  %v4042_v51 = vor.u32 %v4040_v16, %v4038_v14  ;;  %v3660_v50 = vpop.f32.mrf.mxu2 }
 0x257   : > { %v2662_v5 = vadd.f32 %v2641_v60, %v2045_v52  ;;  %v2936_v45 = vpop.f32.mrf.mxu0  ;;  %v4046_v36 = vrot.slane %v4044_v2, 1 }
 0x259   : > { %v2957_v22 = vadd.f32 %v2936_v45, %v2662_v5  ;;  %v4050_v5 = vor.u32 %v4048_v31, %v4046_v36 }
 0x25c   : > { %v2047_v13 = vpop.f32.mrf.mxu1 }
 0x25d   : > { %v2048_v26 = vadd.f32 %v2047_v13, %v7519_v61  ;;  %v3104_v39 = vpop.f32.mrf.mxu3  ;;  %v4039_v61 = vsel %vm8218_vm8, %v4034_v12, %v4038_v14 }
 0x25e   : > { %v7696_v40 = vadd.f32 %v3104_v39, %v2953_v44  ;;  %4145 = vmatmul.bf16.gmra.mxu3 %v4039_v61  ;;  %v3662_v44 = vpop.f32.mrf.mxu2  ;;  %v7724_v61 = vld [vmem:[%s7939_s5] ss:$0 sm:$0xff] }
 0x25f   : > { %v2663_v28 = vadd.f32 %v2644_v9, %v2048_v26  ;;  %3399 = vmatmul.bf16.gmra.mxu1 %v3299_v48  ;;  %v2939_v8 = vpop.f32.mrf.mxu0  ;;  %v4052_v9 = vshll.u32 %v3987_v63, 16 }
 0x261   : > { %v2958_v55 = vadd.f32 %v2939_v8, %v2663_v28  ;;  %v4054_v13 = vrot.slane %v4052_v9, 1 }
 0x263   : > { %v4055_v48 = vsel %vm8220_vm2, %v4050_v5, %v4054_v13  ;;  %vm8223_vm2 = vmmov %vm8221_vm12 }
 0x264   : > { %v2049_v10 = vpop.f32.mrf.mxu1 }
 0x265   : > { %v2050_v20 = vadd.f32 %v2049_v10, %v7537_v33  ;;  %v3107_v3 = vpop.f32.mrf.mxu3  ;;  %v4047_v33 = vsel %vm8219_vm9, %v4042_v51, %v4046_v36 }
 0x266   : > { %v7701_v43 = vadd.f32 %v3107_v3, %v2954_v41  ;;  %v3665_v10 = vpop.f32.mrf.mxu2 }
 0x267   : > { %v2664_v29 = vadd.f32 %v2646_v57, %v2050_v20  ;;  %v2941_v11 = vpop.f32.mrf.mxu0 }
 0x269   : > { %v2959_v26 = vadd.f32 %v2941_v11, %v2664_v29 }
 0x26c   : > { %v3365_v52 = vpop.f32.mrf.mxu1 }
 0x26d   : > { %v3109_v60 = vpop.f32.mrf.mxu3  ;;  %v3405_v12 = vadd.f32 %v3365_v52, %v7558_v15 }
 0x26e   : > { %v7704_v6 = vadd.f32 %v3109_v60, %v2955_v34  ;;  %4150 = vmatmul.bf16.gmra.mxu3 %v4047_v33  ;;  %v3667_v36 = vpop.f32.mrf.mxu2 }
 0x26f   : > { %v3838_v17 = vpop.f32.mrf.mxu0  ;;  %v3700_v28 = vadd.f32 %v3660_v50, %v3405_v12 }
 0x271   : > { %v3878_v38 = vadd.f32 %v3838_v17, %v3700_v28 }
 0x274   : > { %v3367_v46 = vpop.f32.mrf.mxu1 }
 0x275   : > { %v3112_v59 = vpop.f32.mrf.mxu3  ;;  %v3406_v14 = vadd.f32 %v3367_v46, %v7590_v23 }
 0x276   : > { %v7708_v25 = vadd.f32 %v3112_v59, %v2956_v4  ;;  %v3670_v19 = vpop.f32.mrf.mxu2 }
 0x277   : > { %v3840_v39 = vpop.f32.mrf.mxu0  ;;  %v3701_v20 = vadd.f32 %v3662_v44, %v3406_v14 }
 0x279   : > { %v3879_v16 = vadd.f32 %v3840_v39, %v3701_v20 }
 0x27c   : > { %v3370_v21 = vpop.f32.mrf.mxu1 }
 0x27d   : > { %v3114_v7 = vpop.f32.mrf.mxu3  ;;  %v3407_v29 = vadd.f32 %v3370_v21, %v7604_v27 }
 0x27e   : > { %v7710_v0 = vadd.f32 %v3114_v7, %v2957_v22  ;;  %4155 = vmatmul.bf16.gmra.mxu3 %v4055_v48 }
 0x27f   : > { %v3843_v41 = vpop.f32.mrf.mxu0  ;;  %v3702_v34 = vadd.f32 %v3665_v10, %v3407_v29 }
 0x281   : > { %v3880_v27 = vadd.f32 %v3843_v41, %v3702_v34 }
 0x284   : > { %v3372_v57 = vpop.f32.mrf.mxu1 }
 0x285   : > { %v3117_v35 = vpop.f32.mrf.mxu3  ;;  %v3408_v8 = vadd.f32 %v3372_v57, %v7624_v30 }
 0x286   : > { %v7714_v42 = vadd.f32 %v3117_v35, %v2958_v55 }
 0x287   : > { %v3845_v22 = vpop.f32.mrf.mxu0  ;;  %v3703_v56 = vadd.f32 %v3667_v36, %v3408_v8 }
 0x289   : > { %v3881_v30 = vadd.f32 %v3845_v22, %v3703_v56 }
 0x28c   : > { %v3375_v33 = vpop.f32.mrf.mxu1 }
 0x28d   : > { %v3119_v37 = vpop.f32.mrf.mxu3  ;;  %v3409_v5 = vadd.f32 %v3375_v33, %v7637_v53 }
 0x28e   : > { %v7718_v18 = vadd.f32 %v3119_v37, %v2959_v26 }
 0x28f   : > { %v3848_v26 = vpop.f32.mrf.mxu0  ;;  %v3704_v21 = vadd.f32 %v3670_v19, %v3409_v5 }
 0x291   : > { %v3882_v29 = vadd.f32 %v3848_v26, %v3704_v21 }
 0x294   : > { %v3377_v35 = vpop.f32.mrf.mxu1 }
 0x295   : > { %v4121_v54 = vpop.f32.mrf.mxu3  ;;  %v3410_v33 = vadd.f32 %v3377_v35, %v7652_v58  ;;  %v4538_v35 = vld [vmem:[%s5736_s19 + $0x8] sm:$0xff] }
 0x296   : > { %v4161_v15 = vadd.f32 %v4121_v54, %v3878_v38 }
 0x297   : > { %v3850_v36 = vpop.f32.mrf.mxu0 }
 0x298   : > { %v4181_v47 = vmul.f32 %v7724_v61, %v4161_v15  ;;  %v3672_v15 = vpop.f32.mrf.mxu2 }
 0x299   : > { %v3705_v56 = vadd.f32 %v3672_v15, %v3410_v33 }
 0x29a   : > { %v7733_v23 = vadd.f32 %v7729_v1, %v4181_v47 }
 0x29c   : > { %v5239_v3 = vmul.f32 -1.442695, %v7733_v23 }
 0x29d   : > { %v4123_v2 = vpop.f32.mrf.mxu3 }
 0x29e   : > { %5536 = vpow2.f32 %v5239_v3  ;;  %v4162_v45 = vadd.f32 %v4123_v2, %v3879_v16  ;;  %v3380_v3 = vpop.f32.mrf.mxu1  ;;  %v4537_v2 = vld [vmem:[%s5736_s19] sm:$0xff] }
 0x29f   : > { %v3853_v21 = vpop.f32.mrf.mxu0 }
 0x2a0   : > { %v4182_v51 = vmul.f32 %v7724_v61, %v4162_v45 }
 0x2a2   : > { %v7739_v60 = vadd.f32 %v7729_v1, %v4182_v51 }
 0x2a4   : > { %v5537_v4 = vpop.eup %5536  ;;  %v5240_v59 = vmul.f32 -1.442695, %v7739_v60 }
 0x2a5   : > { %v4265_v52 = vadd.f32 1.0, %v5537_v4  ;;  %v4126_v11 = vpop.f32.mrf.mxu3 }
 0x2a6   : > { %5538 = vpow2.f32 %v5240_v59  ;;  %v4163_v7 = vadd.f32 %v4126_v11, %v3880_v27 }
 0x2a7   : > { %5540 = vrcp.f32 %v4265_v52  ;;  %v4290_v44 = vand.u32 2147483647, %v4265_v52  ;;  %v4292_v37 = vand.u32 2147483648, %v4265_v52  ;;  %vm4286_vm7 = vweird.f32 %v4265_v52 }
 0x2a8   : > { %v4183_v55 = vmul.f32 %v7724_v61, %v4163_v7 }
 0x2a9   : > { %vm4291_vm10 = vcmp.eq.f32.partialorder %v4290_v44, 8.507059e+37  ;;  %v4293_v10 = vor.u32 1.1754944e-38, %v4292_v37 }
 0x2aa   : > { %v7745_v50 = vadd.f32 %v7729_v1, %v4183_v55 }
 0x2ac   : > { %v5539_v49 = vpop.eup %5538  ;;  %v5241_v31 = vmul.f32 -1.442695, %v7745_v50 }
 0x2ad   : > { %v5541_v46 = vpop.eup %5540  ;;  %v4266_v63 = vadd.f32 1.0, %v5539_v49  ;;  %v4128_v17 = vpop.f32.mrf.mxu3 }
 0x2ae   : > { %v4282_v9 = vmul.f32 %v5541_v46, %v4265_v52  ;;  %5542 = vpow2.f32 %v5241_v31  ;;  %v4164_v13 = vadd.f32 %v4128_v17, %v3881_v30  ;;  %vm4287_vm11 = vweird.f32 %v5541_v46  ;;  %v3675_v30 = vpop.f32.mrf.mxu2 }
 0x2af   : > { %5544 = vrcp.f32 %v4266_v63  ;;  %vm4288_vm1 = vmor %vm4286_vm7, %vm4287_vm11  ;;  %v4305_v4 = vand.u32 2147483647, %v4266_v63  ;;  %v4307_v8 = vand.u32 2147483648, %v4266_v63  ;;  %vm4301_vm6 = vweird.f32 %v4266_v63 }
 0x2b0   : > { %v4283_v12 = vsub.f32 1.0, %v4282_v9  ;;  %v4184_v48 = vmul.f32 %v7724_v61, %v4164_v13  ;;  %v3411_v9 = vadd.f32 %v3380_v3, %v7666_v24  ;;  %v3382_v13 = vpop.f32.mrf.mxu1 }
 0x2b1   : > { %v4308_v58 = vor.u32 1.1754944e-38, %v4307_v8  ;;  %vm4306_vm14 = vcmp.eq.f32.partialorder %v4305_v4, 8.507059e+37 }
 0x2b2   : > { %v4284_v28 = vmul.f32 %v5541_v46, %v4283_v12  ;;  %v7751_v39 = vadd.f32 %v7729_v1, %v4184_v48  ;;  %v3883_v12 = vadd.f32 %v3850_v36, %v3705_v56 }
 0x2b4   : > { %v5543_v14 = vpop.eup %5542  ;;  %v4285_v38 = vadd.f32 %v5541_v46, %v4284_v28  ;;  %v5242_v53 = vmul.f32 -1.442695, %v7751_v39 }
 0x2b5   : > { %v5545_v54 = vpop.eup %5544  ;;  %v7754_v20 = vadd.f32 1.0, %v5543_v14  ;;  %v4131_v47 = vpop.f32.mrf.mxu3 }
 0x2b6   : > { %v4289_v57 = vsel %vm4288_vm1, %v5541_v46, %v4285_v38  ;;  %v4297_v41 = vmul.f32 %v5545_v54, %v4266_v63  ;;  %5546 = vpow2.f32 %v5242_v53  ;;  %v4165_v51 = vadd.f32 %v4131_v47, %v3882_v29 }
 0x2b7   : > { %v4294_v16 = vsel %vm4291_vm10, %v4293_v10, %v4289_v57  ;;  %5548 = vrcp.f32 %v7754_v20  ;;  %vm4302_vm4 = vweird.f32 %v5545_v54  ;;  %v4322_v26 = vand.u32 2147483648, %v7754_v20  ;;  %v4539_v57 = vld [vmem:[%s5736_s19 + $0x10] sm:$0xff]  ;;  %vm8224_vm10 = vmmov %vm8223_vm2 }
 0x2b8   : > { %v4521_v45 = vmul.f32 %v4294_v16, %v7733_v23  ;;  %v4298_v34 = vsub.f32 1.0, %v4297_v41  ;;  %v4185_v22 = vmul.f32 %v7724_v61, %v4165_v51  ;;  %vm4303_vm5 = vmor %vm4301_vm6, %vm4302_vm4  ;;  %v4320_v37 = vand.u32 2147483647, %v7754_v20 }
 0x2b9   : > { %vm4316_vm3 = vweird.f32 %v7754_v20  ;;  %v4323_v24 = vor.u32 1.1754944e-38, %v4322_v26 }
 0x2ba   : > { %v4553_v59 = vadd.f32 %v4537_v2, %v4521_v45  ;;  %v4299_v27 = vmul.f32 %v5545_v54, %v4298_v34  ;;  %v7770_v11 = vadd.f32 %v7729_v1, %v4185_v22  ;;  %vm4321_vm8 = vcmp.eq.f32.partialorder %v4320_v37, 8.507059e+37  ;;  %v3677_v2 = vpop.f32.mrf.mxu2 }
 0x2bc   : > { %v5547_v52 = vpop.eup %5546  ;;  %4569 = vst.msk [vmem:[%s7763_s13] sm:$0xff] %vm8221_vm12, %v4553_v59  ;;  %v4300_v23 = vadd.f32 %v5545_v54, %v4299_v27  ;;  %v5243_v31 = vmul.f32 -1.442695, %v7770_v11  ;;  %v3385_v59 = vpop.f32.mrf.mxu1 }
 0x2bd   : > { %v5549_v7 = vpop.eup %5548  ;;  %v7772_v55 = vadd.f32 1.0, %v5547_v52  ;;  %v4133_v5 = vpop.f32.mrf.mxu3 }
 0x2be   : > { %v4304_v19 = vsel %vm4303_vm5, %v5545_v54, %v4300_v23  ;;  %v4312_v49 = vmul.f32 %v5549_v7, %v7754_v20  ;;  %vm4317_vm0 = vweird.f32 %v5549_v7  ;;  %v4166_v28 = vadd.f32 %v4133_v5, %v3883_v12  ;;  %v3855_v27 = vpop.f32.mrf.mxu0 }
 0x2bf   : > { %v4309_v46 = vsel %vm4306_vm14, %v4308_v58, %v4304_v19  ;;  %5550 = vrcp.f32 %v7772_v55  ;;  %vm4318_vm15 = vmor %vm4316_vm3, %vm4317_vm0  ;;  %v3706_v54 = vadd.f32 %v3675_v30, %v3411_v9  ;;  %v3412_v20 = vadd.f32 %v3382_v13, %v7676_v32  ;;  %v4540_v19 = vld [vmem:[%s5736_s19 + $0x18] sm:$0xff] }
 0x2c0   : > { %v4522_v63 = vmul.f32 %v4309_v46, %v7739_v60  ;;  %v4313_v17 = vsub.f32 1.0, %v4312_v49  ;;  %5552 = vpow2.f32 %v5243_v31  ;;  %v4186_v38 = vmul.f32 %v7724_v61, %v4166_v28  ;;  %vm8225_vm14 = vmmov %vm8223_vm2 }
 0x2c1   : > { %v4335_v45 = vand.u32 2147483647, %v7772_v55  ;;  %v4337_v34 = vand.u32 2147483648, %v7772_v55  ;;  %v3884_v4 = vadd.f32 %v3853_v21, %v3706_v54  ;;  %vm4331_vm11 = vweird.f32 %v7772_v55  ;;  %v4541_v54 = vld [vmem:[%s5736_s19 + $0x20] sm:$0xff] }
 0x2c2   : > { %v4554_v48 = vadd.f32 %v4538_v35, %v4522_v63  ;;  %v4314_v44 = vmul.f32 %v5549_v7, %v4313_v17  ;;  %v7789_v29 = vadd.f32 %v7729_v1, %v4186_v38  ;;  %v3707_v52 = vadd.f32 %v3677_v2, %v3412_v20  ;;  %v3680_v9 = vpop.f32.mrf.mxu2 }
 0x2c3   : > { %v4338_v22 = vor.u32 1.1754944e-38, %v4337_v34  ;;  %vm4336_vm1 = vcmp.eq.f32.partialorder %v4335_v45, 8.507059e+37  ;;  %v3413_v13 = vadd.f32 %v3385_v59, %v7686_v62 }
 0x2c4   : > { %4570 = vst.msk [vmem:[%s7763_s13 + $0x8] sm:$0xff] %vm8222_vm13, %v4554_v48  ;;  %v4315_v60 = vadd.f32 %v5549_v7, %v4314_v44  ;;  %v5244_v33 = vmul.f32 -1.442695, %v7789_v29  ;;  %v3885_v17 = vadd.f32 %v3855_v27, %v3707_v52  ;;  %v3387_v37 = vpop.f32.mrf.mxu1 }
 0x2c5   : > { %v5551_v14 = vpop.eup %5550  ;;  %v4136_v8 = vpop.f32.mrf.mxu3  ;;  %v3708_v62 = vadd.f32 %v3680_v9, %v3413_v13 }
 0x2c6   : > { %v5553_v53 = vpop.eup %5552  ;;  %v4319_v15 = vsel %vm4318_vm15, %v5549_v7, %v4315_v60  ;;  %v4327_v10 = vmul.f32 %v5551_v14, %v7772_v55  ;;  %vm4332_vm9 = vweird.f32 %v5551_v14  ;;  %v3858_v60 = vpop.f32.mrf.mxu0 }
 0x2c7   : > { %v4324_v47 = vsel %vm4321_vm8, %v4323_v24, %v4319_v15  ;;  %v4269_v41 = vadd.f32 1.0, %v5553_v53  ;;  %vm4333_vm7 = vmor %vm4331_vm11, %vm4332_vm9  ;;  %v3886_v2 = vadd.f32 %v3858_v60, %v3708_v62 }
 0x2c8   : > { %v4523_v3 = vmul.f32 %v4324_v47, %v7745_v50  ;;  %v4328_v16 = vsub.f32 1.0, %v4327_v10  ;;  %v4167_v50 = vadd.f32 %v4136_v8, %v3884_v4  ;;  %vm8226_vm9 = vmmov %vm8223_vm2 }
 0x2c9   : > { %5554 = vrcp.f32 %v4269_v41  ;;  %v4350_v26 = vand.u32 2147483647, %v4269_v41  ;;  %v4352_v12 = vand.u32 2147483648, %v4269_v41  ;;  %vm4346_vm12 = vweird.f32 %v4269_v41 }
 0x2ca   : > { %v4555_v51 = vadd.f32 %v4539_v57, %v4523_v3  ;;  %v4329_v36 = vmul.f32 %v5551_v14, %v4328_v16  ;;  %5556 = vpow2.f32 %v5244_v33  ;;  %v4187_v7 = vmul.f32 %v7724_v61, %v4167_v50  ;;  %v3682_v45 = vpop.f32.mrf.mxu2 }
 0x2cb   : > { %vm4351_vm5 = vcmp.eq.f32.partialorder %v4350_v26, 8.507059e+37 }
 0x2cc   : > { %4571 = vst.msk [vmem:[%s7763_s13 + $0x10] sm:$0xff] %vm8223_vm2, %v4555_v51  ;;  %v4330_v32 = vadd.f32 %v5551_v14, %v4329_v36  ;;  %v7804_v55 = vadd.f32 %v7729_v1, %v4187_v7  ;;  %v3414_v36 = vadd.f32 %v3387_v37, %v7696_v40  ;;  %v3390_v33 = vpop.f32.mrf.mxu1 }
 0x2cd   : > { %v4138_v5 = vpop.f32.mrf.mxu3 }
 0x2ce   : > { %v4334_v23 = vsel %vm4333_vm7, %v5551_v14, %v4330_v32  ;;  %v5245_v63 = vmul.f32 -1.442695, %v7804_v55  ;;  %v4168_v44 = vadd.f32 %v4138_v5, %v3885_v17  ;;  %v4353_v14 = vor.u32 1.1754944e-38, %v4352_v12  ;;  %v3860_v32 = vpop.f32.mrf.mxu0 }
 0x2cf   : > { %v5555_v56 = vpop.eup %5554  ;;  %v4339_v58 = vsel %vm4336_vm1, %v4338_v22, %v4334_v23  ;;  %v3709_v23 = vadd.f32 %v3682_v45, %v3414_v36  ;;  %v3415_v17 = vadd.f32 %v3390_v33, %v7701_v43 }
 0x2d0   : > { %v4524_v49 = vmul.f32 %v4339_v58, %v7751_v39  ;;  %v4342_v31 = vmul.f32 %v5555_v56, %v4269_v41  ;;  %v5557_v30 = vpop.eup %5556  ;;  %vm4347_vm4 = vweird.f32 %v5555_v56  ;;  %5558 = vpow2.f32 %v5245_v63 }
 0x2d1   : > { %v4270_v48 = vadd.f32 1.0, %v5557_v30  ;;  %v4188_v28 = vmul.f32 %v7724_v61, %v4168_v44  ;;  %vm4348_vm6 = vmor %vm4346_vm12, %vm4347_vm4  ;;  %v3887_v9 = vadd.f32 %v3860_v32, %v3709_v23 }
 0x2d2   : > { %v4556_v46 = vadd.f32 %v4540_v19, %v4524_v49  ;;  %v4343_v35 = vsub.f32 1.0, %v4342_v31  ;;  %v4542_v31 = vld [vmem:[%s5736_s19 + $0x28] sm:$0xff]  ;;  %v3685_v63 = vpop.f32.mrf.mxu2 }
 0x2d3   : > { %5560 = vrcp.f32 %v4270_v48  ;;  %v7812_v38 = vadd.f32 %v7729_v1, %v4188_v28  ;;  %v4367_v4 = vand.u32 2147483648, %v4270_v48  ;;  %v4365_v8 = vand.u32 2147483647, %v4270_v48 }
 0x2d4   : > { %4572 = vst.msk [vmem:[%s7763_s13 + $0x18] sm:$0xff] %vm8224_vm10, %v4556_v46  ;;  %v4344_v39 = vmul.f32 %v5555_v56, %v4343_v35  ;;  %vm4361_vm13 = vweird.f32 %v4270_v48  ;;  %v3710_v60 = vadd.f32 %v3685_v63, %v3415_v17  ;;  %vm8227_vm10 = vmmov %vm8226_vm9 }
 0x2d5   : > { %v5246_v47 = vmul.f32 -1.442695, %v7812_v38  ;;  %v4141_v20 = vpop.f32.mrf.mxu3  ;;  %v4368_v7 = vor.u32 1.1754944e-38, %v4367_v4  ;;  %vm4366_vm15 = vcmp.eq.f32.partialorder %v4365_v8, 8.507059e+37 }
 0x2d6   : > { %v4345_v21 = vadd.f32 %v5555_v56, %v4344_v39  ;;  %v5559_v15 = vpop.eup %5558  ;;  %v4169_v51 = vadd.f32 %v4141_v20, %v3886_v2  ;;  %v3863_v37 = vpop.f32.mrf.mxu0 }
 0x2d7   : > { %v4271_v41 = vadd.f32 1.0, %v5559_v15  ;;  %5562 = vpow2.f32 %v5246_v47  ;;  %v3888_v45 = vadd.f32 %v3863_v37, %v3710_v60  ;;  %v4545_v37 = vld [vmem:[%s5736_s19 + $0x40] sm:$0xff] }
 0x2d8   : > { %v4349_v24 = vsel %vm4348_vm6, %v5555_v56, %v4345_v21  ;;  %v4189_v59 = vmul.f32 %v7724_v61, %v4169_v51 }
 0x2d9   : > { %v4354_v53 = vsel %vm4351_vm5, %v4353_v14, %v4349_v24  ;;  %v5561_v57 = vpop.eup %5560  ;;  %5564 = vrcp.f32 %v4271_v41  ;;  %v4382_v5 = vand.u32 2147483648, %v4271_v41  ;;  %v4380_v12 = vand.u32 2147483647, %v4271_v41  ;;  %vm8228_vm5 = vmmov %vm8226_vm9 }
 0x2da   : > { %v4525_v10 = vmul.f32 %v4354_v53, %v7770_v11  ;;  %v4357_v16 = vmul.f32 %v5561_v57, %v4270_v48  ;;  %vm4362_vm0 = vweird.f32 %v5561_v57  ;;  %v7822_v22 = vadd.f32 %v7729_v1, %v4189_v59  ;;  %v3392_v48 = vpop.f32.mrf.mxu1  ;;  %v4543_v53 = vld [vmem:[%s5736_s19 + $0x30] sm:$0xff]  ;;  %v3687_v51 = vpop.f32.mrf.mxu2 }
 0x2db   : > { %vm4363_vm3 = vmor %vm4361_vm13, %vm4362_vm0  ;;  %vm4376_vm2 = vweird.f32 %v4271_v41  ;;  %v4383_v21 = vor.u32 1.1754944e-38, %v4382_v5  ;;  %vm4381_vm7 = vcmp.eq.f32.partialorder %v4380_v12, 8.507059e+37 }
 0x2dc   : > { %v4557_v3 = vadd.f32 %v4541_v54, %v4525_v10  ;;  %v4358_v34 = vsub.f32 1.0, %v4357_v16  ;;  %v5247_v19 = vmul.f32 -1.442695, %v7822_v22  ;;  %v3416_v10 = vadd.f32 %v3392_v48, %v7704_v6 }
 0x2dd   : > { %v5563_v50 = vpop.eup %5562  ;;  %v4143_v35 = vpop.f32.mrf.mxu3 }
 0x2de   : > { %4573 = vst.msk [vmem:[%s7763_s13 + $0x20] sm:$0xff] %vm8225_vm14, %v4557_v3  ;;  %v4359_v11 = vmul.f32 %v5561_v57, %v4358_v34  ;;  %v7824_v40 = vadd.f32 1.0, %v5563_v50  ;;  %v4170_v39 = vadd.f32 %v4143_v35, %v3887_v9  ;;  %v3711_v4 = vadd.f32 %v3687_v51, %v3416_v10  ;;  %v3865_v32 = vpop.f32.mrf.mxu0 }
 0x2df   : > { %v5565_v52 = vpop.eup %5564 }
 0x2e0   : > { %v4360_v27 = vadd.f32 %v5561_v57, %v4359_v11  ;;  %v4372_v58 = vmul.f32 %v5565_v52, %v4271_v41  ;;  %5566 = vrcp.f32 %v7824_v40  ;;  %vm4377_vm8 = vweird.f32 %v5565_v52 }
 0x2e1   : > { %5568 = vpow2.f32 %v5247_v19  ;;  %vm4378_vm11 = vmor %vm4376_vm2, %vm4377_vm8  ;;  %v4190_v28 = vmul.f32 %v7724_v61, %v4170_v39  ;;  %v4395_v41 = vand.u32 2147483647, %v7824_v40  ;;  %v4397_v20 = vand.u32 2147483648, %v7824_v40 }
 0x2e2   : > { %v4364_v56 = vsel %vm4363_vm3, %v5561_v57, %v4360_v27  ;;  %v4373_v46 = vsub.f32 1.0, %v4372_v58  ;;  %vm4391_vm4 = vweird.f32 %v7824_v40  ;;  %v3395_v36 = vpop.f32.mrf.mxu1  ;;  %v4544_v27 = vld [vmem:[%s5736_s19 + $0x38] sm:$0xff]  ;;  %v3690_v5 = vpop.f32.mrf.mxu2 }
 0x2e3   : > { %v4369_v49 = vsel %vm4366_vm15, %v4368_v7, %v4364_v56  ;;  %v7837_v15 = vadd.f32 %v7729_v1, %v4190_v28  ;;  %v4398_v33 = vor.u32 1.1754944e-38, %v4397_v20  ;;  %vm4396_vm6 = vcmp.eq.f32.partialorder %v4395_v41, 8.507059e+37  ;;  %vm8229_vm15 = vmmov %vm8228_vm5 }
 0x2e4   : > { %v4526_v30 = vmul.f32 %v4369_v49, %v7789_v29  ;;  %v4374_v26 = vmul.f32 %v5565_v52, %v4373_v46  ;;  %v3889_v49 = vadd.f32 %v3865_v32, %v3711_v4  ;;  %v4546_v32 = vld [vmem:[%s5736_s19 + $0x48] sm:$0xff] }
 0x2e5   : > { %v5248_v2 = vmul.f32 -1.442695, %v7837_v15  ;;  %v4146_v34 = vpop.f32.mrf.mxu3 }
 0x2e6   : > { %v4558_v13 = vadd.f32 %v4542_v31, %v4526_v30  ;;  %v4375_v44 = vadd.f32 %v5565_v52, %v4374_v26  ;;  %v5567_v29 = vpop.eup %5566  ;;  %v3417_v30 = vadd.f32 %v3395_v36, %v7708_v25 }
 0x2e7   : > { %v5569_v43 = vpop.eup %5568  ;;  %v4387_v62 = vmul.f32 %v5567_v29, %v7824_v40  ;;  %vm4392_vm1 = vweird.f32 %v5567_v29 }
 0x2e8   : > { %4574 = vst.msk [vmem:[%s7763_s13 + $0x28] sm:$0xff] %vm8226_vm9, %v4558_v13  ;;  %v4379_v14 = vsel %vm4378_vm11, %v5565_v52, %v4375_v44  ;;  %v4273_v54 = vadd.f32 1.0, %v5569_v43  ;;  %vm4393_vm12 = vmor %vm4391_vm4, %vm4392_vm1  ;;  %v3712_v25 = vadd.f32 %v3690_v5, %v3417_v30  ;;  %v3868_v44 = vpop.f32.mrf.mxu0 }
 0x2e9   : > { %v4384_v24 = vsel %vm4381_vm7, %v4383_v21, %v4379_v14  ;;  %v4388_v57 = vsub.f32 1.0, %v4387_v62  ;;  %vm8230_vm1 = vmmov %vm8228_vm5 }
 0x2ea   : > { %v4527_v47 = vmul.f32 %v4384_v24, %v7804_v55  ;;  %5570 = vrcp.f32 %v4273_v54  ;;  %v4171_v55 = vadd.f32 %v4146_v34, %v3888_v45  ;;  %v4410_v46 = vand.u32 2147483647, %v4273_v54  ;;  %v3397_v26 = vpop.f32.mrf.mxu1 }
 0x2eb   : > { %v4389_v16 = vmul.f32 %v5567_v29, %v4388_v57  ;;  %5572 = vpow2.f32 %v5248_v2  ;;  %v4412_v35 = vand.u32 2147483648, %v4273_v54  ;;  %vm4406_vm0 = vweird.f32 %v4273_v54  ;;  %v3692_v57 = vpop.f32.mrf.mxu2 }
 0x2ec   : > { %v4559_v3 = vadd.f32 %v4543_v53, %v4527_v47  ;;  %v4191_v8 = vmul.f32 %v7724_v61, %v4171_v55  ;;  %vm4411_vm3 = vcmp.eq.f32.partialorder %v4410_v46, 8.507059e+37  ;;  %v3418_v41 = vadd.f32 %v3397_v26, %v7710_v0 }
 0x2ed   : > { %v4390_v6 = vadd.f32 %v5567_v29, %v4389_v16  ;;  %v4148_v31 = vpop.f32.mrf.mxu3  ;;  %v4413_v12 = vor.u32 1.1754944e-38, %v4412_v35 }
 0x2ee   : > { %4575 = vst.msk [vmem:[%s7763_s13 + $0x30] sm:$0xff] %vm8227_vm10, %v4559_v3  ;;  %v7852_v7 = vadd.f32 %v7729_v1, %v4191_v8  ;;  %v3713_v36 = vadd.f32 %v3692_v57, %v3418_v41 }
 0x2ef   : > { %v4394_v11 = vsel %vm4393_vm12, %v5567_v29, %v4390_v6 }
 0x2f0   : > { %v5571_v59 = vpop.eup %5570  ;;  %v4399_v50 = vsel %vm4396_vm6, %v4398_v33, %v4394_v11  ;;  %v5249_v19 = vmul.f32 -1.442695, %v7852_v7  ;;  %v3870_v55 = vpop.f32.mrf.mxu0 }
 0x2f1   : > { %v4528_v52 = vmul.f32 %v4399_v50, %v7812_v38  ;;  %v4402_v23 = vmul.f32 %v5571_v59, %v4273_v54  ;;  %v5573_v40 = vpop.eup %5572  ;;  %vm4407_vm14 = vweird.f32 %v5571_v59  ;;  %v4172_v38 = vadd.f32 %v4148_v31, %v3889_v49 }
 0x2f2   : > { %v4274_v63 = vadd.f32 1.0, %v5573_v40  ;;  %5574 = vpow2.f32 %v5249_v19  ;;  %vm4408_vm13 = vmor %vm4406_vm0, %vm4407_vm14  ;;  %v3890_v54 = vadd.f32 %v3868_v44, %v3712_v25  ;;  %v3400_v2 = vpop.f32.mrf.mxu1 }
 0x2f3   : > { %v4560_v56 = vadd.f32 %v4544_v27, %v4528_v52  ;;  %v4403_v58 = vsub.f32 1.0, %v4402_v23  ;;  %v4192_v13 = vmul.f32 %v7724_v61, %v4172_v38  ;;  %v3419_v23 = vadd.f32 %v3400_v2, %v7714_v42  ;;  %v3695_v31 = vpop.f32.mrf.mxu2 }
 0x2f4   : > { %5576 = vrcp.f32 %v4274_v63  ;;  %v4427_v20 = vand.u32 2147483648, %v4274_v63  ;;  %vm4421_vm9 = vweird.f32 %v4274_v63 }
 0x2f5   : > { %4576 = vst.msk [vmem:[%s7763_s13 + $0x38] sm:$0xff] %vm8228_vm5, %v4560_v56  ;;  %v4404_v17 = vmul.f32 %v5571_v59, %v4403_v58  ;;  %v7860_v39 = vadd.f32 %v7729_v1, %v4192_v13  ;;  %v4151_v62 = vpop.f32.mrf.mxu3  ;;  %v3891_v56 = vadd.f32 %v3870_v55, %v3713_v36  ;;  %v3714_v38 = vadd.f32 %v3695_v31, %v3419_v23  ;;  %vm8231_vm5 = vmmov %vm8230_vm1 }
 0x2f6   : > { %v4173_v47 = vadd.f32 %v4151_v62, %v3890_v54  ;;  %v4428_v33 = vor.u32 1.1754944e-38, %v4427_v20 }
 0x2f7   : > { %v4405_v9 = vadd.f32 %v5571_v59, %v4404_v17  ;;  %v5250_v43 = vmul.f32 -1.442695, %v7860_v39 }
 0x2f8   : > { %v5575_v21 = vpop.eup %5574  ;;  %v4193_v16 = vmul.f32 %v7724_v61, %v4173_v47  ;;  %v3873_v13 = vpop.f32.mrf.mxu0 }
 0x2f9   : > { %v4409_v48 = vsel %vm4408_vm13, %v5571_v59, %v4405_v9  ;;  %v4275_v14 = vadd.f32 1.0, %v5575_v21  ;;  %5578 = vpow2.f32 %v5250_v43  ;;  %v3892_v62 = vadd.f32 %v3873_v13, %v3714_v38 }
 0x2fa   : > { %v4414_v29 = vsel %vm4411_vm3, %v4413_v12, %v4409_v48  ;;  %v5577_v60 = vpop.eup %5576  ;;  %v7870_v51 = vadd.f32 %v7729_v1, %v4193_v16  ;;  %v4547_v12 = vld [vmem:[%s5736_s19 + $0x50] sm:$0xff]  ;;  %vm8232_vm3 = vmmov %vm8230_vm1 }
 0x2fb   : > { %v4529_v28 = vmul.f32 %v4414_v29, %v7822_v22  ;;  %v4417_v53 = vmul.f32 %v5577_v60, %v4274_v63  ;;  %5580 = vrcp.f32 %v4275_v14  ;;  %vm4422_vm8 = vweird.f32 %v5577_v60  ;;  %v3697_v54 = vpop.f32.mrf.mxu2 }
 0x2fc   : > { %v4425_v22 = vand.u32 2147483647, %v4274_v63  ;;  %vm4423_vm2 = vmor %vm4421_vm9, %vm4422_vm8  ;;  %v5251_v8 = vmul.f32 -1.442695, %v7870_v51  ;;  %v4442_v40 = vand.u32 2147483648, %v4275_v14  ;;  %vm4436_vm10 = vweird.f32 %v4275_v14 }
 0x2fd   : > { %v4561_v24 = vadd.f32 %v4545_v37, %v4529_v28  ;;  %v4418_v10 = vsub.f32 1.0, %v4417_v53  ;;  %v4153_v52 = vpop.f32.mrf.mxu3  ;;  %v4440_v49 = vand.u32 2147483647, %v4275_v14 }
 0x2fe   : > { %vm4426_vm11 = vcmp.eq.f32.partialorder %v4425_v22, 8.507059e+37  ;;  %v4174_v30 = vadd.f32 %v4153_v52, %v3891_v56  ;;  %v4443_v63 = vor.u32 1.1754944e-38, %v4442_v40  ;;  %v4549_v56 = vld [vmem:[%s5736_s19 + $0x60] sm:$0xff] }
 0x2ff   : > { %4577 = vst.msk [vmem:[%s7763_s13 + $0x40] sm:$0xff] %vm8229_vm15, %v4561_v24  ;;  %v4419_v3 = vmul.f32 %v5577_v60, %v4418_v10  ;;  %v5579_v45 = vpop.eup %5578  ;;  %vm4441_vm12 = vcmp.eq.f32.partialorder %v4440_v49, 8.507059e+37 }
 0x300   : > { %v4276_v0 = vadd.f32 1.0, %v5579_v45  ;;  %v4194_v17 = vmul.f32 %v7724_v61, %v4174_v30  ;;  %v3875_v45 = vpop.f32.mrf.mxu0 }
 0x301   : > { %v4420_v34 = vadd.f32 %v5577_v60, %v4419_v3  ;;  %v5581_v6 = vpop.eup %5580  ;;  %v4548_v3 = vld [vmem:[%s5736_s19 + $0x58] sm:$0xff] }
 0x302   : > { %v4432_v11 = vmul.f32 %v5581_v6, %v4275_v14  ;;  %5582 = vrcp.f32 %v4276_v0  ;;  %vm4437_vm7 = vweird.f32 %v5581_v6  ;;  %v7881_v48 = vadd.f32 %v7729_v1, %v4194_v17 }
 0x303   : > { %v4424_v4 = vsel %vm4423_vm2, %v5577_v60, %v4420_v34  ;;  %5584 = vpow2.f32 %v5251_v8  ;;  %vm4438_vm4 = vmor %vm4436_vm10, %vm4437_vm7  ;;  %v4455_v21 = vand.u32 2147483647, %v4276_v0  ;;  %v4457_v28 = vand.u32 2147483648, %v4276_v0 }
 0x304   : > { %v4429_v59 = vsel %vm4426_vm11, %v4428_v33, %v4424_v4  ;;  %v4433_v27 = vsub.f32 1.0, %v4432_v11  ;;  %v5252_v14 = vmul.f32 -1.442695, %v7881_v48  ;;  %vm4451_vm14 = vweird.f32 %v4276_v0  ;;  %vm8233_vm11 = vmmov %vm8230_vm1 }
 0x305   : > { %v4530_v50 = vmul.f32 %v4429_v59, %v7837_v15  ;;  %v3402_v15 = vpop.f32.mrf.mxu1  ;;  %v4156_v24 = vpop.f32.mrf.mxu3  ;;  %vm4456_vm13 = vcmp.eq.f32.partialorder %v4455_v21, 8.507059e+37 }
 0x306   : > { %v4434_v19 = vmul.f32 %v5581_v6, %v4433_v27  ;;  %v3420_v44 = vadd.f32 %v3402_v15, %v7718_v18  ;;  %v4175_v18 = vadd.f32 %v4156_v24, %v3892_v62 }
 0x307   : > { %v4562_v58 = vadd.f32 %v4546_v32, %v4530_v50 }
 0x308   : > { %v4435_v46 = vadd.f32 %v5581_v6, %v4434_v19  ;;  %v5583_v35 = vpop.eup %5582  ;;  %v3715_v10 = vadd.f32 %v3697_v54, %v3420_v44  ;;  %v4195_v57 = vmul.f32 %v7724_v61, %v4175_v18 }
 0x309   : > { %4578 = vst.msk [vmem:[%s7763_s13 + $0x48] sm:$0xff] %vm8230_vm1, %v4562_v58  ;;  %v5585_v42 = vpop.eup %5584  ;;  %v4447_v9 = vmul.f32 %v5583_v35, %v4276_v0  ;;  %vm4452_vm6 = vweird.f32 %v5583_v35 }
 0x30a   : > { %v4439_v5 = vsel %vm4438_vm4, %v5581_v6, %v4435_v46  ;;  %v4277_v25 = vadd.f32 1.0, %v5585_v42  ;;  %vm4453_vm0 = vmor %vm4451_vm14, %vm4452_vm6  ;;  %v7893_v2 = vadd.f32 %v7729_v1, %v4195_v57  ;;  %v3893_v33 = vadd.f32 %v3875_v45, %v3715_v10 }
 0x30b   : > { %v4444_v26 = vsel %vm4441_vm12, %v4443_v63, %v4439_v5  ;;  %v4448_v37 = vsub.f32 1.0, %v4447_v9  ;;  %vm8234_vm6 = vmmov %vm8232_vm3 }
 0x30c   : > { %v4531_v29 = vmul.f32 %v4444_v26, %v7852_v7  ;;  %5586 = vrcp.f32 %v4277_v25  ;;  %v4458_v7 = vor.u32 1.1754944e-38, %v4457_v28  ;;  %v5253_v36 = vmul.f32 -1.442695, %v7893_v2 }
 0x30d   : > { %v4449_v60 = vmul.f32 %v5583_v35, %v4448_v37  ;;  %5588 = vpow2.f32 %v5252_v14  ;;  %v4158_v0 = vpop.f32.mrf.mxu3  ;;  %v4470_v4 = vand.u32 2147483647, %v4277_v25  ;;  %v4472_v11 = vand.u32 2147483648, %v4277_v25 }
 0x30e   : > { %v4563_v43 = vadd.f32 %v4547_v12, %v4531_v29  ;;  %5590 = vpow2.f32 %v5253_v36  ;;  %vm4466_vm8 = vweird.f32 %v4277_v25  ;;  %v4550_v12 = vld [vmem:[%s5736_s19 + $0x68] sm:$0xff] }
 0x30f   : > { %v4450_v53 = vadd.f32 %v5583_v35, %v4449_v60  ;;  %v4473_v27 = vor.u32 1.1754944e-38, %v4472_v11  ;;  %vm4471_vm2 = vcmp.eq.f32.partialorder %v4470_v4, 8.507059e+37 }
 0x310   : > { %4579 = vst.msk [vmem:[%s7763_s13 + $0x50] sm:$0xff] %vm8231_vm5, %v4563_v43 }
 0x311   : > { %v4454_v47 = vsel %vm4453_vm0, %v5583_v35, %v4450_v53 }
 0x312   : > { %v5587_v41 = vpop.eup %5586  ;;  %v4459_v20 = vsel %vm4456_vm13, %v4458_v7, %v4454_v47 }
 0x313   : > { %v4532_v22 = vmul.f32 %v4459_v20, %v7860_v39  ;;  %v4462_v16 = vmul.f32 %v5587_v41, %v4277_v25  ;;  %v5589_v34 = vpop.eup %5588  ;;  %vm4467_vm15 = vweird.f32 %v5587_v41  ;;  %v4176_v39 = vadd.f32 %v4158_v0, %v3893_v33 }
 0x314   : > { %v4278_v8 = vadd.f32 1.0, %v5589_v34  ;;  %vm4468_vm9 = vmor %vm4466_vm8, %vm4467_vm15  ;;  %v5591_v58 = vpop.eup %5590 }
 0x315   : > { %v4564_v6 = vadd.f32 %v4548_v3, %v4532_v22  ;;  %v4463_v55 = vsub.f32 1.0, %v4462_v16  ;;  %v4196_v50 = vmul.f32 %v7724_v61, %v4176_v39  ;;  %v4279_v30 = vadd.f32 1.0, %v5591_v58  ;;  %v4552_v16 = vld [vmem:[%s5736_s19 + $0x78] sm:$0xff] }
 0x316   : > { %5592 = vrcp.f32 %v4278_v8  ;;  %v4487_v15 = vand.u32 2147483648, %v4278_v8  ;;  %v4485_v63 = vand.u32 2147483647, %v4278_v8  ;;  %vm4481_vm1 = vweird.f32 %v4278_v8 }
 0x317   : > { %4580 = vst.msk [vmem:[%s7763_s13 + $0x58] sm:$0xff] %vm8232_vm3, %v4564_v6  ;;  %v4464_v59 = vmul.f32 %v5587_v41, %v4463_v55  ;;  %v7900_v23 = vadd.f32 %v7729_v1, %v4196_v50  ;;  %v4502_v29 = vand.u32 2147483648, %v4279_v30  ;;  %v4500_v28 = vand.u32 2147483647, %v4279_v30 }
 0x318   : > { %v4488_v38 = vor.u32 1.1754944e-38, %v4487_v15  ;;  %vm4486_vm4 = vcmp.eq.f32.partialorder %v4485_v63, 8.507059e+37  ;;  %vm4496_vm5 = vweird.f32 %v4279_v30 }
 0x319   : > { %v4465_v32 = vadd.f32 %v5587_v41, %v4464_v59  ;;  %v5254_v49 = vmul.f32 -1.442695, %v7900_v23  ;;  %v4503_v14 = vor.u32 1.1754944e-38, %v4502_v29  ;;  %vm4501_vm0 = vcmp.eq.f32.partialorder %v4500_v28, 8.507059e+37 }
 0x31b   : > { %v4469_v52 = vsel %vm4468_vm9, %v5587_v41, %v4465_v32  ;;  %5594 = vpow2.f32 %v5254_v49 }
 0x31c   : > { %v4474_v40 = vsel %vm4471_vm2, %v4473_v27, %v4469_v52  ;;  %v5593_v31 = vpop.eup %5592  ;;  %5596 = vrcp.f32 %v4279_v30  ;;  %vm8235_vm2 = vmmov %vm8232_vm3 }
 0x31d   : > { %v4533_v19 = vmul.f32 %v4474_v40, %v7870_v51  ;;  %v4477_v35 = vmul.f32 %v5593_v31, %v4278_v8  ;;  %vm4482_vm7 = vweird.f32 %v5593_v31 }
 0x31e   : > { %vm4483_vm10 = vmor %vm4481_vm1, %vm4482_vm7 }
 0x31f   : > { %v4565_v46 = vadd.f32 %v4549_v56, %v4533_v19  ;;  %v4478_v61 = vsub.f32 1.0, %v4477_v35 }
 0x321   : > { %4581 = vst.msk [vmem:[%s7763_s13 + $0x60] sm:$0xff] %vm8233_vm11, %v4565_v46  ;;  %v4479_v1 = vmul.f32 %v5593_v31, %v4478_v61  ;;  %v5595_v17 = vpop.eup %5594 }
 0x322   : > { %v5597_v51 = vpop.eup %5596  ;;  %v4280_v5 = vadd.f32 1.0, %v5595_v17 }
 0x323   : > { %v4480_v42 = vadd.f32 %v5593_v31, %v4479_v1  ;;  %v4492_v13 = vmul.f32 %v5597_v51, %v4279_v30  ;;  %vm4497_vm12 = vweird.f32 %v5597_v51 }
 0x324   : > { %5598 = vrcp.f32 %v4280_v5  ;;  %vm4498_vm14 = vmor %vm4496_vm5, %vm4497_vm12  ;;  %v4517_v7 = vand.u32 2147483648, %v4280_v5  ;;  %v4515_v57 = vand.u32 2147483647, %v4280_v5  ;;  %vm4511_vm15 = vweird.f32 %v4280_v5 }
 0x325   : > { %v4484_v9 = vsel %vm4483_vm10, %v5593_v31, %v4480_v42  ;;  %v4493_v44 = vsub.f32 1.0, %v4492_v13 }
 0x326   : > { %v4489_v26 = vsel %vm4486_vm4, %v4488_v38, %v4484_v9  ;;  %v4518_v20 = vor.u32 1.1754944e-38, %v4517_v7  ;;  %vm4516_vm9 = vcmp.eq.f32.partialorder %v4515_v57, 8.507059e+37 }
 0x327   : > { %v4534_v25 = vmul.f32 %v4489_v26, %v7881_v48  ;;  %v4494_v21 = vmul.f32 %v5597_v51, %v4493_v44  ;;  %v4551_v48 = vld [vmem:[%s5736_s19 + $0x70] sm:$0xff] }
 0x329   : > { %v4566_v37 = vadd.f32 %v4550_v12, %v4534_v25  ;;  %v4495_v43 = vadd.f32 %v5597_v51, %v4494_v21 }
 0x32a   : > { %v5599_v60 = vpop.eup %5598 }
 0x32b   : > { %4582 = vst.msk [vmem:[%s7763_s13 + $0x68] sm:$0xff] %vm8234_vm6, %v4566_v37  ;;  %v4499_v62 = vsel %vm4498_vm14, %v5597_v51, %v4495_v43  ;;  %v4507_v24 = vmul.f32 %v5599_v60, %v4280_v5  ;;  %vm4512_vm13 = vweird.f32 %v5599_v60 }
 0x32c   : > { %v4504_v53 = vsel %vm4501_vm0, %v4503_v14, %v4499_v62  ;;  %vm4513_vm8 = vmor %vm4511_vm15, %vm4512_vm13 }
 0x32d   : > { %v4535_v18 = vmul.f32 %v4504_v53, %v7893_v2  ;;  %v4508_v54 = vsub.f32 1.0, %v4507_v24 }
 0x32f   : > { %v4567_v10 = vadd.f32 %v4551_v48, %v4535_v18  ;;  %v4509_v47 = vmul.f32 %v5599_v60, %v4508_v54 }
 0x331   : > { %4583 = vst.msk [vmem:[%s7763_s13 + $0x70] sm:$0xff] %vm8232_vm3, %v4567_v10  ;;  %v4510_v41 = vadd.f32 %v5599_v60, %v4509_v47 }
 0x333   : > { %v4514_v3 = vsel %vm4513_vm8, %v5599_v60, %v4510_v41 }
 0x334   : > { %v4519_v22 = vsel %vm4516_vm9, %v4518_v20, %v4514_v3 }
 0x335   : > { %v4536_v45 = vmul.f32 %v4519_v22, %v7900_v23 }
 0x337   : > { %v4568_v2 = vadd.f32 %v4552_v16, %v4536_v45 }
 0x339   : > { %4584 = vst.msk [vmem:[%s7763_s13 + $0x78] sm:$0xff] %vm8235_vm2, %v4568_v2 }
 0x33a PF: > { %s17_s28 = sadd.s32 1, %s5640_s28   ;;  %s8236_s24 = smov %s5632_s26 }
 0x33b   : > { %p14_p13 = scmp.ge.s32.totalorder %s17_s28, 6   ;;  %s8237_s25 = smov %s5636_s27 }
 0x33c   : > { %s8238_s26 = smov %s8241_s29  ;;  %s8239_s27 = smov %s8245_s30 }
 0x33d   :  { %16 = sbr.rel (!%p14_p13) target bundleno = 3 (0x3), region = 89 }

</bundles_post_ra>
